<compile_context>
chip_gen: v7x
topology: tpu7x:2x2x1
jax: 0.10.0
libtpu: 0.0.40
codegen_flags: <defaults>
</compile_context>

<pallas_src>
import functools
import math

import jax
import jax.numpy as jnp
from jax import lax
from jax.experimental import pallas as pl
from jax.experimental.pallas import tpu as pltpu


# ---------------------------------------------------------------------------
# Generic tiled matmul + bias (+ optional fused residual) kernel
# ---------------------------------------------------------------------------

def _round_up(x, m):
    return ((x + m - 1) // m) * m


def _pad2d(a, rows, cols):
    pr, pc = rows - a.shape[0], cols - a.shape[1]
    if pr == 0 and pc == 0:
        return a
    return jnp.pad(a, ((0, pr), (0, pc)))


def _matmul_bias_kernel(x_ref, w_ref, b_ref, *rest, has_residual):
    if has_residual:
        r_ref, o_ref, acc_ref = rest
    else:
        o_ref, acc_ref = rest

    k = pl.program_id(2)

    @pl.when(k == 0)
    def _init():
        acc_ref[...] = jnp.zeros_like(acc_ref)

    acc_ref[...] += jnp.dot(x_ref[...], w_ref[...],
                            preferred_element_type=jnp.float32)

    @pl.when(k == pl.num_programs(2) - 1)
    def _finalize():
        y = acc_ref[...] + b_ref[...]          # bias added exactly once
        if has_residual:
            y = y + r_ref[...]                  # fused residual add
        o_ref[...] = y.astype(o_ref.dtype)


def _pick_tiles(M, K, N, tm_max=256, tk_max=512, tn_max=256):
    # v7x-safe budget: 2*(tm*tk + tk*tn)*2B + tm*tn*4B << 64 MiB.
    tm = min(tm_max, _round_up(M, 8))
    tk = min(tk_max, _round_up(K, 128))
    tn = min(tn_max, _round_up(N, 128))
    return tm, tk, tn


def matmul_bias(x, w, b, residual=None, out_dtype=jnp.float32,
                mxu_dtype=jnp.bfloat16):
    """(M, K) @ (K, N) + b [+ residual], tiled Pallas matmul on the MXU."""
    M, K = x.shape
    K2, N = w.shape
    assert K == K2
    tm, tk, tn = _pick_tiles(M, K, N)
    Mp, Kp, Np = _round_up(M, tm), _round_up(K, tk), _round_up(N, tn)

    xp = _pad2d(x.astype(mxu_dtype), Mp, Kp)
    wp = _pad2d(w.astype(mxu_dtype), Kp, Np)
    bp = _pad2d(b.astype(jnp.float32).reshape(1, N), 1, Np)

    args = [xp, wp, bp]
    in_specs = [
        pl.BlockSpec((tm, tk), lambda i, j, k: (i, k)),
        pl.BlockSpec((tk, tn), lambda i, j, k: (k, j)),
        pl.BlockSpec((1, tn), lambda i, j, k: (0, j)),
    ]
    has_res = residual is not None
    if has_res:
        rp = _pad2d(residual.astype(jnp.float32), Mp, Np)
        args.append(rp)
        in_specs.append(pl.BlockSpec((tm, tn), lambda i, j, k: (i, j)))

    grid = (Mp // tm, Np // tn, Kp // tk)
    out_itemsize = jnp.dtype(out_dtype).itemsize
    bytes_accessed = (xp.size * xp.dtype.itemsize + wp.size * wp.dtype.itemsize
                      + bp.size * 4 + Mp * Np * out_itemsize
                      + (Mp * Np * 4 if has_res else 0))

    out = pl.pallas_call(
        functools.partial(_matmul_bias_kernel, has_residual=has_res),
        out_shape=jax.ShapeDtypeStruct((Mp, Np), out_dtype),
        grid=grid,
        in_specs=in_specs,
        out_specs=pl.BlockSpec((tm, tn), lambda i, j, k: (i, j)),
        scratch_shapes=[pltpu.VMEM((tm, tn), jnp.float32)],
        compiler_params=pltpu.CompilerParams(
            dimension_semantics=("parallel", "parallel", "arbitrary"),
            vmem_limit_bytes=32 * 1024 * 1024),
        cost_estimate=pl.CostEstimate(
            flops=2 * Mp * Kp * Np, transcendentals=0,
            bytes_accessed=bytes_accessed),
    )(*args)
    return out[:M, :N]


# ---------------------------------------------------------------------------
# Convolution (NHWC) = im2col (JAX glue) + tiled Pallas matmul
# ---------------------------------------------------------------------------

def conv2d_nhwc(x, w_hwio, b, *, stride=1, padding=((0, 0), (0, 0)),
                residual=None, mxu_dtype=jnp.bfloat16):
    B, H, W, Cin = x.shape
    kh, kw, _, Cout = w_hwio.shape
    xp = jnp.pad(x, ((0, 0), padding[0], padding[1], (0, 0)))
    Hp = H + padding[0][0] + padding[0][1]
    Wp = W + padding[1][0] + padding[1][1]
    Ho = (Hp - kh) // stride + 1
    Wo = (Wp - kw) // stride + 1

    if kh == 1 and kw == 1 and stride == 1:
        pat = xp.reshape(B * Ho * Wo, Cin)
    else:
        cols = []
        for ih in range(kh):
            for iw in range(kw):
                cols.append(xp[:,
                               ih:ih + stride * (Ho - 1) + 1:stride,
                               iw:iw + stride * (Wo - 1) + 1:stride, :])
        pat = jnp.concatenate(cols, axis=-1).reshape(B * Ho * Wo, kh * kw * Cin)

    w_mat = w_hwio.reshape(kh * kw * Cin, Cout)
    res_mat = None if residual is None else residual.reshape(B * Ho * Wo, Cout)
    out = matmul_bias(pat, w_mat, b, residual=res_mat,
                      out_dtype=x.dtype, mxu_dtype=mxu_dtype)
    return out.reshape(B, Ho, Wo, Cout)


# ---------------------------------------------------------------------------
# GroupNorm (+ optional fused SiLU) kernel, grid over batch
# ---------------------------------------------------------------------------

def _groupnorm_kernel(x_ref, gamma_ref, beta_ref, gmat_ref, o_ref, *,
                      eps, inv_n, fuse_silu):
    x = x_ref[...].astype(jnp.float32)                      # (1, HW, C)
    s1 = jnp.sum(x, axis=1)                                 # (1, C)
    s2 = jnp.sum(x * x, axis=1)                             # (1, C)
    gm = gmat_ref[...]                                      # (C, C) group mask
    mean = jnp.dot(s1, gm, preferred_element_type=jnp.float32) * inv_n
    ms = jnp.dot(s2, gm, preferred_element_type=jnp.float32) * inv_n
    inv = lax.rsqrt(ms - mean * mean + eps)
    y = (x - mean) * inv * gamma_ref[...] + beta_ref[...]
    if fuse_silu:
        y = y * jax.nn.sigmoid(y)
    o_ref[...] = y.astype(o_ref.dtype)


def group_norm_nhwc(x, gamma, beta, *, num_groups=32, eps=1e-6, fuse_silu=False):
    B, H, W, C = x.shape
    HW = H * W
    cg = C // num_groups
    xr = x.reshape(B, HW, C)
    gidx = jnp.arange(C) // cg
    gmat = (gidx[:, None] == gidx[None, :]).astype(jnp.float32)
    out = pl.pallas_call(
        functools.partial(_groupnorm_kernel, eps=eps,
                          inv_n=1.0 / (HW * cg), fuse_silu=fuse_silu),
        out_shape=jax.ShapeDtypeStruct((B, HW, C), x.dtype),
        grid=(B,),
        in_specs=[pl.BlockSpec((1, HW, C), lambda b: (b, 0, 0)),
                  pl.BlockSpec((1, C), lambda b: (0, 0)),
                  pl.BlockSpec((1, C), lambda b: (0, 0)),
                  pl.BlockSpec((C, C), lambda b: (0, 0))],
        out_specs=pl.BlockSpec((1, HW, C), lambda b: (b, 0, 0)),
        compiler_params=pltpu.CompilerParams(
            dimension_semantics=("parallel",)),
    )(xr, gamma.reshape(1, C), beta.reshape(1, C), gmat)
    return out.reshape(B, H, W, C)


# ---------------------------------------------------------------------------
# Single-head spatial attention kernel (AttnBlock core), grid over batch
# ---------------------------------------------------------------------------

def _attention_kernel(q_ref, k_ref, v_ref, o_ref, *, scale):
    q, k, v = q_ref[...], k_ref[...], v_ref[...]            # (1, HW, C)
    s = jnp.einsum("bqc,bkc->bqk", q, k,
                   preferred_element_type=jnp.float32) * scale
    m = jnp.max(s, axis=-1, keepdims=True)
    p = jnp.exp(s - m)
    l = jnp.sum(p, axis=-1, keepdims=True)
    o = jnp.einsum("bqk,bkc->bqc", p.astype(v.dtype), v,
                   preferred_element_type=jnp.float32) / l
    o_ref[...] = o.astype(o_ref.dtype)


def attention_nhwc(q, k, v):
    B, H, W, C = q.shape
    HW = H * W
    qr, kr, vr = (t.reshape(B, HW, C) for t in (q, k, v))
    out = pl.pallas_call(
        functools.partial(_attention_kernel, scale=1.0 / math.sqrt(C)),
        out_shape=jax.ShapeDtypeStruct((B, HW, C), q.dtype),
        grid=(B,),
        in_specs=[pl.BlockSpec((1, HW, C), lambda b: (b, 0, 0))] * 3,
        out_specs=pl.BlockSpec((1, HW, C), lambda b: (b, 0, 0)),
        compiler_params=pltpu.CompilerParams(
            dimension_semantics=("parallel",)),
    )(qr, kr, vr)
    return out.reshape(B, H, W, C)


# ---------------------------------------------------------------------------
# VAEEncoder forward (shared skeleton, swappable primitive backend)
# ---------------------------------------------------------------------------

def _encoder_forward(params, x_nchw, *, ch_mult, num_res_blocks,
                     conv, groupnorm, attention):
    x = jnp.transpose(x_nchw, (0, 2, 3, 1))                 # NCHW -> NHWC once

    def resblock(p, h):
        t = groupnorm(h, p["norm1"]["gamma"], p["norm1"]["beta"], fuse_silu=True)
        t = conv(t, p["conv1"]["w"], p["conv1"]["b"],
                 stride=1, padding=((1, 1), (1, 1)))
        t = groupnorm(t, p["norm2"]["gamma"], p["norm2"]["beta"], fuse_silu=True)
        shortcut = h
        if "nin_shortcut" in p:
            shortcut = conv(h, p["nin_shortcut"]["w"], p["nin_shortcut"]["b"],
                            stride=1, padding=((0, 0), (0, 0)))
        return conv(t, p["conv2"]["w"], p["conv2"]["b"], stride=1,
                    padding=((1, 1), (1, 1)), residual=shortcut)

    def attnblock(p, h):
        t = groupnorm(h, p["norm"]["gamma"], p["norm"]["beta"], fuse_silu=False)
        q = conv(t, p["q"]["w"], p["q"]["b"], stride=1, padding=((0, 0), (0, 0)))
        k = conv(t, p["k"]["w"], p["k"]["b"], stride=1, padding=((0, 0), (0, 0)))
        v = conv(t, p["v"]["w"], p["v"]["b"], stride=1, padding=((0, 0), (0, 0)))
        a = attention(q, k, v)
        return conv(a, p["proj_out"]["w"], p["proj_out"]["b"], stride=1,
                    padding=((0, 0), (0, 0)), residual=h)

    h = conv(x, params["conv_in"]["w"], params["conv_in"]["b"],
             stride=1, padding=((1, 1), (1, 1)))
    num_resolutions = len(ch_mult)
    for i_level in range(num_resolutions):
        for i_block in range(num_res_blocks):
            h = resblock(params["down"][i_level]["blocks"][i_block], h)
        if i_level != num_resolutions - 1:
            d = params["down"][i_level]["downsample"]
            h = conv(h, d["w"], d["b"], stride=2, padding=((0, 1), (0, 1)))

    h = resblock(params["mid"]["block_1"], h)
    h = attnblock(params["mid"]["attn_1"], h)
    h = resblock(params["mid"]["block_2"], h)
    h = groupnorm(h, params["norm_out"]["gamma"], params["norm_out"]["beta"],
                  fuse_silu=True)
    h = conv(h, params["conv_out"]["w"], params["conv_out"]["b"],
             stride=1, padding=((1, 1), (1, 1)))
    return jnp.transpose(h, (0, 3, 1, 2))                   # NHWC -> NCHW


def vae_encoder_forward(params, x, *, ch_mult, num_res_blocks,
                        mxu_dtype=jnp.bfloat16):
    return _encoder_forward(
        params, x, ch_mult=ch_mult, num_res_blocks=num_res_blocks,
        conv=functools.partial(conv2d_nhwc, mxu_dtype=mxu_dtype),
        groupnorm=group_norm_nhwc, attention=attention_nhwc)


# ---------------------------------------------------------------------------
# Plain-JAX (XLA) reference — mirrors the same math (incl. bf16 conv inputs)
# ---------------------------------------------------------------------------

def _ref_conv(x, w, b, *, stride=1, padding=((0, 0), (0, 0)), residual=None,
              mxu_dtype=jnp.bfloat16):
    out = lax.conv_general_dilated(
        x.astype(mxu_dtype), w.astype(mxu_dtype),
        window_strides=(stride, stride), padding=padding,
        dimension_numbers=("NHWC", "HWIO", "NHWC"),
        preferred_element_type=jnp.float32) + b.astype(jnp.float32)
    if residual is not None:
        out = out + residual
    return out.astype(x.dtype)


def _ref_groupnorm(x, gamma, beta, *, num_groups=32, eps=1e-6, fuse_silu=False):
    B, H, W, C = x.shape
    cg = C // num_groups
    xg = x.reshape(B, H * W, num_groups, cg).astype(jnp.float32)
    mean = jnp.mean(xg, axis=(1, 3), keepdims=True)
    ms = jnp.mean(xg * xg, axis=(1, 3), keepdims=True)
    inv = lax.rsqrt(ms - mean * mean + eps)
    y = ((xg - mean) * inv).reshape(B, H, W, C) * gamma + beta
    if fuse_silu:
        y = y * jax.nn.sigmoid(y)
    return y.astype(x.dtype)


def _ref_attention(q, k, v):
    B, H, W, C = q.shape
    scale = 1.0 / math.sqrt(C)
    qr = q.reshape(B, H * W, C).astype(jnp.float32)
    kr = k.reshape(B, H * W, C).astype(jnp.float32)
    vr = v.reshape(B, H * W, C).astype(jnp.float32)
    s = jnp.einsum("bqc,bkc->bqk", qr, kr) * scale
    p = jax.nn.softmax(s, axis=-1)
    o = jnp.einsum("bqk,bkc->bqc", p, vr)
    return o.reshape(B, H, W, C).astype(q.dtype)


def vae_encoder_reference(params, x, *, ch_mult, num_res_blocks,
                          mxu_dtype=jnp.bfloat16):
    return _encoder_forward(
        params, x, ch_mult=ch_mult, num_res_blocks=num_res_blocks,
        conv=functools.partial(_ref_conv, mxu_dtype=mxu_dtype),
        groupnorm=_ref_groupnorm, attention=_ref_attention)


# ---------------------------------------------------------------------------
# Parameter construction (torch-like uniform +/- 1/sqrt(fan_in) conv init)
# ---------------------------------------------------------------------------

def init_vae_encoder_params(key, *, ch, ch_mult, num_res_blocks,
                            in_channels, z_channels):
    keys = iter(jax.random.split(key, 256))

    def conv_p(kh, kw, cin, cout):
        k1, k2 = jax.random.split(next(keys))
        bound = 1.0 / math.sqrt(cin * kh * kw)
        return {"w": jax.random.uniform(k1, (kh, kw, cin, cout),
                                        jnp.float32, -bound, bound),
                "b": jax.random.uniform(k2, (cout,), jnp.float32, -bound, bound)}

    def norm_p(c):
        return {"gamma": jnp.ones((c,), jnp.float32),
                "beta": jnp.zeros((c,), jnp.float32)}

    def resnet_p(cin, cout):
        p = {"norm1": norm_p(cin), "conv1": conv_p(3, 3, cin, cout),
             "norm2": norm_p(cout), "conv2": conv_p(3, 3, cout, cout)}
        if cin != cout:
            p["nin_shortcut"] = conv_p(1, 1, cin, cout)
        return p

    def attn_p(c):
        return {"norm": norm_p(c), "q": conv_p(1, 1, c, c),
                "k": conv_p(1, 1, c, c), "v": conv_p(1, 1, c, c),
                "proj_out": conv_p(1, 1, c, c)}

    params = {"conv_in": conv_p(3, 3, in_channels, ch)}
    in_ch_mult = (1,) + tuple(ch_mult)
    down = []
    block_in = ch
    for i_level in range(len(ch_mult)):
        block_in = ch * in_ch_mult[i_level]
        block_out = ch * ch_mult[i_level]
        blocks = []
        for _ in range(num_res_blocks):
            blocks.append(resnet_p(block_in, block_out))
            block_in = block_out
        lvl = {"blocks": blocks}
        if i_level != len(ch_mult) - 1:
            lvl["downsample"] = conv_p(3, 3, block_in, block_in)
        down.append(lvl)
    params["down"] = down
    params["mid"] = {"block_1": resnet_p(block_in, block_in),
                     "attn_1": attn_p(block_in),
                     "block_2": resnet_p(block_in, block_in)}
    params["norm_out"] = norm_p(block_in)
    params["conv_out"] = conv_p(3, 3, block_in, 2 * z_channels)
    return params


# ---------------------------------------------------------------------------
# Test
# ---------------------------------------------------------------------------

if __name__ == "__main__":
    # Small config consistent with the module (channels kept multiples of 32
    # so GroupNorm(num_groups=32) is valid).
    B, H, W = 2, 16, 16
    in_channels = 3
    ch = 32
    ch_mult = (1, 2)
    num_res_blocks = 1
    z_channels = 4

    key = jax.random.PRNGKey(0)
    kp, kx = jax.random.split(key)
    params = init_vae_encoder_params(kp, ch=ch, ch_mult=ch_mult,
                                     num_res_blocks=num_res_blocks,
                                     in_channels=in_channels,
                                     z_channels=z_channels)
    x = jax.random.normal(kx, (B, in_channels, H, W), jnp.float32)

    pallas_fwd = jax.jit(functools.partial(
        vae_encoder_forward, ch_mult=ch_mult, num_res_blocks=num_res_blocks))
    out = jax.block_until_ready(pallas_fwd(params, x))

    ref_fwd = jax.jit(functools.partial(
        vae_encoder_reference, ch_mult=ch_mult, num_res_blocks=num_res_blocks))
    ref = jax.block_until_ready(ref_fwd(params, x))

    n_down = len(ch_mult) - 1
    expected = (B, 2 * z_channels, H // (2 ** n_down), W // (2 ** n_down))
    assert out.shape == expected, (out.shape, expected)
    assert bool(jnp.all(jnp.isfinite(out))), "non-finite output"
    err = float(jnp.max(jnp.abs(out - ref)))
    assert err < 2e-2, f"max abs diff vs reference: {err}"
    print("KERNEL_OK")
</pallas_src>

<mosaic_0001>
module attributes {stable_mosaic.version = 11 : i64} {
  func.func @_matmul_bias_kernel(%arg0: i32, %arg1: i32, %arg2: i32, %arg3: memref<256x128xbf16, #tpu.memory_space<vmem>>, %arg4: memref<128x128xbf16, #tpu.memory_space<vmem>>, %arg5: memref<1x128xf32, #tpu.memory_space<vmem>>, %arg6: memref<256x128xf32, #tpu.memory_space<vmem>>, %arg7: memref<256x128xf32, #tpu.memory_space<vmem>>) attributes {dimension_semantics = [#tpu.dimension_semantics<parallel>, #tpu.dimension_semantics<parallel>, #tpu.dimension_semantics<arbitrary>], iteration_bounds = array<i64: 2, 1, 1>, scalar_prefetch = 0 : i64, scratch_operands = 1 : i64, tpu.core_type = #tpu.core_type<tc>, window_params = [{transform_indices = @transform_0, window_bounds = array<i64: 256, 128>}, {transform_indices = @transform_1, window_bounds = array<i64: 128, 128>}, {transform_indices = @transform_2, window_bounds = array<i64: 1, 128>}, {transform_indices = @transform_3, window_bounds = array<i64: 256, 128>}]} {
    %c0_i32 = arith.constant 0 : i32
    %0 = arith.cmpi eq, %arg2, %c0_i32 : i32
    %1 = arith.extui %0 : i1 to i32
    %c0_i32_0 = arith.constant 0 : i32
    %2 = arith.cmpi ne, %1, %c0_i32_0 : i32
    scf.if %2 {
      %cst_10 = arith.constant 0.000000e+00 : f32
      %12 = vector.broadcast %cst_10 : f32 to vector<256x128xf32>
      %c0_11 = arith.constant 0 : index
      %c0_12 = arith.constant 0 : index
      %13 = vector.load %arg7[%c0_11, %c0_12] : memref<256x128xf32, #tpu.memory_space<vmem>>, vector<256x128xf32>
      tpu.vector_store %arg7[%c0_11, %c0_12], %12 {strides = array<i32>} : memref<256x128xf32, #tpu.memory_space<vmem>>, vector<256x128xf32>,
    } else {
    }
    %c0 = arith.constant 0 : index
    %c0_1 = arith.constant 0 : index
    %3 = vector.load %arg7[%c0, %c0_1] : memref<256x128xf32, #tpu.memory_space<vmem>>, vector<256x128xf32>
    %c0_2 = arith.constant 0 : index
    %c0_3 = arith.constant 0 : index
    %4 = vector.load %arg3[%c0_2, %c0_3] : memref<256x128xbf16, #tpu.memory_space<vmem>>, vector<256x128xbf16>
    %c0_4 = arith.constant 0 : index
    %c0_5 = arith.constant 0 : index
    %5 = vector.load %arg4[%c0_4, %c0_5] : memref<128x128xbf16, #tpu.memory_space<vmem>>, vector<128x128xbf16>
    %cst = arith.constant dense<0.000000e+00> : vector<256x128xf32>
    %6 = tpu.matmul %4, %5, %cst {dimension_numbers = #tpu.dot_dimension_numbers<[1], [0], [0], [1], [0, 0, 1, 1], [], []>} : vector<256x128xbf16>, vector<128x128xbf16>, vector<256x128xf32> -> vector<256x128xf32>
    %7 = arith.addf %3, %6 : vector<256x128xf32>
    %c0_6 = arith.constant 0 : index
    %c0_7 = arith.constant 0 : index
    %8 = vector.load %arg7[%c0_6, %c0_7] : memref<256x128xf32, #tpu.memory_space<vmem>>, vector<256x128xf32>
    tpu.vector_store %arg7[%c0_6, %c0_7], %7 {strides = array<i32>} : memref<256x128xf32, #tpu.memory_space<vmem>>, vector<256x128xf32>,
    %c0_i32_8 = arith.constant 0 : i32
    %9 = arith.cmpi eq, %arg2, %c0_i32_8 : i32
    %10 = arith.extui %9 : i1 to i32
    %c0_i32_9 = arith.constant 0 : i32
    %11 = arith.cmpi ne, %10, %c0_i32_9 : i32
    scf.if %11 {
      %c0_10 = arith.constant 0 : index
      %c0_11 = arith.constant 0 : index
      %12 = vector.load %arg7[%c0_10, %c0_11] : memref<256x128xf32, #tpu.memory_space<vmem>>, vector<256x128xf32>
      %c0_12 = arith.constant 0 : index
      %c0_13 = arith.constant 0 : index
      %13 = vector.load %arg5[%c0_12, %c0_13] : memref<1x128xf32, #tpu.memory_space<vmem>>, vector<1x128xf32>
      %14 = vector.broadcast %13 : vector<1x128xf32> to vector<256x128xf32>
      %15 = arith.addf %12, %14 : vector<256x128xf32>
      %c0_14 = arith.constant 0 : index
      %c0_15 = arith.constant 0 : index
      %16 = vector.load %arg6[%c0_14, %c0_15] : memref<256x128xf32, #tpu.memory_space<vmem>>, vector<256x128xf32>
      tpu.vector_store %arg6[%c0_14, %c0_15], %15 {strides = array<i32>} : memref<256x128xf32, #tpu.memory_space<vmem>>, vector<256x128xf32>,
    } else {
    }
    return
  }
  func.func @transform_0(%arg0: i32, %arg1: i32, %arg2: i32) -> (i32, i32) {
    %c0_i32 = arith.constant 0 : i32
    return %arg0, %arg2 : i32, i32
  }
  func.func @transform_1(%arg0: i32, %arg1: i32, %arg2: i32) -> (i32, i32) {
    %c0_i32 = arith.constant 0 : i32
    return %arg2, %arg1 : i32, i32
  }
  func.func @transform_2(%arg0: i32, %arg1: i32, %arg2: i32) -> (i32, i32) {
    %c0_i32 = arith.constant 0 : i32
    %c0_i32_0 = arith.constant 0 : i32
    return %c0_i32, %arg1 : i32, i32
  }
  func.func @transform_3(%arg0: i32, %arg1: i32, %arg2: i32) -> (i32, i32) {
    %c0_i32 = arith.constant 0 : i32
    return %arg0, %arg1 : i32, i32
  }
}

module attributes {stable_mosaic.version = 11 : i64} {
  func.func @_groupnorm_kernel(%arg0: i32, %arg1: memref<1x256x32xf32, #tpu.memory_space<vmem>>, %arg2: memref<1x32xf32, #tpu.memory_space<vmem>>, %arg3: memref<1x32xf32, #tpu.memory_space<vmem>>, %arg4: memref<32x32xf32, #tpu.memory_space<vmem>>, %arg5: memref<1x256x32xf32, #tpu.memory_space<vmem>>) attributes {dimension_semantics = [#tpu.dimension_semantics<parallel>], iteration_bounds = array<i64: 2>, scalar_prefetch = 0 : i64, scratch_operands = 0 : i64, tpu.core_type = #tpu.core_type<tc>, window_params = [{transform_indices = @transform_0, window_bounds = array<i64: 1, 256, 32>}, {pipeline_mode = #tpu.pipeline_mode<synchronous>, transform_indices = @transform_1, window_bounds = array<i64: 1, 32>}, {pipeline_mode = #tpu.pipeline_mode<synchronous>, transform_indices = @transform_2, window_bounds = array<i64: 1, 32>}, {pipeline_mode = #tpu.pipeline_mode<synchronous>, transform_indices = @transform_3, window_bounds = array<i64: 32, 32>}, {transform_indices = @transform_4, window_bounds = array<i64: 1, 256, 32>}]} {
    %c0 = arith.constant 0 : index
    %c0_0 = arith.constant 0 : index
    %c0_1 = arith.constant 0 : index
    %0 = vector.load %arg1[%c0, %c0_0, %c0_1] : memref<1x256x32xf32, #tpu.memory_space<vmem>>, vector<1x256x32xf32>
    %cst = arith.constant dense<0.000000e+00> : vector<1x32xf32>
    %1 = vector.multi_reduction <add>, %0, %cst [1] : vector<1x256x32xf32> to vector<1x32xf32>
    %2 = arith.mulf %0, %0 : vector<1x256x32xf32>
    %cst_2 = arith.constant dense<0.000000e+00> : vector<1x32xf32>
    %3 = vector.multi_reduction <add>, %2, %cst_2 [1] : vector<1x256x32xf32> to vector<1x32xf32>
    %c0_3 = arith.constant 0 : index
    %c0_4 = arith.constant 0 : index
    %4 = vector.load %arg4[%c0_3, %c0_4] : memref<32x32xf32, #tpu.memory_space<vmem>>, vector<32x32xf32>
    %cst_5 = arith.constant dense<0.000000e+00> : vector<1x32xf32>
    %5 = tpu.matmul %1, %4, %cst_5 {dimension_numbers = #tpu.dot_dimension_numbers<[1], [0], [0], [1], [0, 0, 1, 1], [], []>} : vector<1x32xf32>, vector<32x32xf32>, vector<1x32xf32> -> vector<1x32xf32>
    %cst_6 = arith.constant 3.906250e-03 : f32
    %6 = vector.broadcast %cst_6 : f32 to vector<1x32xf32>
    %7 = arith.mulf %5, %6 : vector<1x32xf32>
    %cst_7 = arith.constant dense<0.000000e+00> : vector<1x32xf32>
    %8 = tpu.matmul %3, %4, %cst_7 {dimension_numbers = #tpu.dot_dimension_numbers<[1], [0], [0], [1], [0, 0, 1, 1], [], []>} : vector<1x32xf32>, vector<32x32xf32>, vector<1x32xf32> -> vector<1x32xf32>
    %cst_8 = arith.constant 3.906250e-03 : f32
    %9 = vector.broadcast %cst_8 : f32 to vector<1x32xf32>
    %10 = arith.mulf %8, %9 : vector<1x32xf32>
    %11 = arith.mulf %7, %7 : vector<1x32xf32>
    %12 = arith.subf %10, %11 : vector<1x32xf32>
    %cst_9 = arith.constant 9.99999997E-7 : f32
    %13 = vector.broadcast %cst_9 : f32 to vector<1x32xf32>
    %14 = arith.addf %12, %13 : vector<1x32xf32>
    %15 = math.rsqrt %14 : vector<1x32xf32>
    %16 = vector.shape_cast %7 : vector<1x32xf32> to vector<1x1x32xf32>
    %17 = vector.broadcast %16 : vector<1x1x32xf32> to vector<1x256x32xf32>
    %18 = arith.subf %0, %17 : vector<1x256x32xf32>
    %19 = vector.shape_cast %15 : vector<1x32xf32> to vector<1x1x32xf32>
    %20 = vector.broadcast %19 : vector<1x1x32xf32> to vector<1x256x32xf32>
    %21 = arith.mulf %18, %20 : vector<1x256x32xf32>
    %c0_10 = arith.constant 0 : index
    %c0_11 = arith.constant 0 : index
    %22 = vector.load %arg2[%c0_10, %c0_11] : memref<1x32xf32, #tpu.memory_space<vmem>>, vector<1x32xf32>
    %23 = vector.shape_cast %22 : vector<1x32xf32> to vector<1x1x32xf32>
    %24 = vector.broadcast %23 : vector<1x1x32xf32> to vector<1x256x32xf32>
    %25 = arith.mulf %21, %24 : vector<1x256x32xf32>
    %c0_12 = arith.constant 0 : index
    %c0_13 = arith.constant 0 : index
    %26 = vector.load %arg3[%c0_12, %c0_13] : memref<1x32xf32, #tpu.memory_space<vmem>>, vector<1x32xf32>
    %27 = vector.shape_cast %26 : vector<1x32xf32> to vector<1x1x32xf32>
    %28 = vector.broadcast %27 : vector<1x1x32xf32> to vector<1x256x32xf32>
    %29 = arith.addf %25, %28 : vector<1x256x32xf32>
    %30 = arith.negf %29 : vector<1x256x32xf32>
    %31 = math.exp %30 : vector<1x256x32xf32>
    %cst_14 = arith.constant 1.000000e+00 : f32
    %32 = vector.broadcast %cst_14 : f32 to vector<1x256x32xf32>
    %33 = arith.addf %32, %31 : vector<1x256x32xf32>
    %34 = arith.divf %32, %33 : vector<1x256x32xf32>
    %35 = arith.mulf %29, %34 : vector<1x256x32xf32>
    %c0_15 = arith.constant 0 : index
    %c0_16 = arith.constant 0 : index
    %c0_17 = arith.constant 0 : index
    %36 = vector.load %arg5[%c0_15, %c0_16, %c0_17] : memref<1x256x32xf32, #tpu.memory_space<vmem>>, vector<1x256x32xf32>
    tpu.vector_store %arg5[%c0_15, %c0_16, %c0_17], %35 {strides = array<i32>} : memref<1x256x32xf32, #tpu.memory_space<vmem>>, vector<1x256x32xf32>,
    return
  }
  func.func @transform_0(%arg0: i32) -> (i32, i32, i32) {
    %c0_i32 = arith.constant 0 : i32
    %c0_i32_0 = arith.constant 0 : i32
    %c0_i32_1 = arith.constant 0 : i32
    return %arg0, %c0_i32, %c0_i32_0 : i32, i32, i32
  }
  func.func @transform_1(%arg0: i32) -> (i32, i32) {
    %c0_i32 = arith.constant 0 : i32
    %c0_i32_0 = arith.constant 0 : i32
    %c0_i32_1 = arith.constant 0 : i32
    return %c0_i32, %c0_i32_0 : i32, i32
  }
  func.func @transform_2(%arg0: i32) -> (i32, i32) {
    %c0_i32 = arith.constant 0 : i32
    %c0_i32_0 = arith.constant 0 : i32
    %c0_i32_1 = arith.constant 0 : i32
    return %c0_i32, %c0_i32_0 : i32, i32
  }
  func.func @transform_3(%arg0: i32) -> (i32, i32) {
    %c0_i32 = arith.constant 0 : i32
    %c0_i32_0 = arith.constant 0 : i32
    %c0_i32_1 = arith.constant 0 : i32
    return %c0_i32, %c0_i32_0 : i32, i32
  }
  func.func @transform_4(%arg0: i32) -> (i32, i32, i32) {
    %c0_i32 = arith.constant 0 : i32
    %c0_i32_0 = arith.constant 0 : i32
    %c0_i32_1 = arith.constant 0 : i32
    return %arg0, %c0_i32, %c0_i32_0 : i32, i32, i32
  }
}

module attributes {stable_mosaic.version = 11 : i64} {
  func.func @_matmul_bias_kernel(%arg0: i32, %arg1: i32, %arg2: i32, %arg3: memref<256x384xbf16, #tpu.memory_space<vmem>>, %arg4: memref<384x128xbf16, #tpu.memory_space<vmem>>, %arg5: memref<1x128xf32, #tpu.memory_space<vmem>>, %arg6: memref<256x128xf32, #tpu.memory_space<vmem>>, %arg7: memref<256x128xf32, #tpu.memory_space<vmem>>) attributes {dimension_semantics = [#tpu.dimension_semantics<parallel>, #tpu.dimension_semantics<parallel>, #tpu.dimension_semantics<arbitrary>], iteration_bounds = array<i64: 2, 1, 1>, scalar_prefetch = 0 : i64, scratch_operands = 1 : i64, tpu.core_type = #tpu.core_type<tc>, window_params = [{transform_indices = @transform_0, window_bounds = array<i64: 256, 384>}, {transform_indices = @transform_1, window_bounds = array<i64: 384, 128>}, {transform_indices = @transform_2, window_bounds = array<i64: 1, 128>}, {transform_indices = @transform_3, window_bounds = array<i64: 256, 128>}]} {
    %c0_i32 = arith.constant 0 : i32
    %0 = arith.cmpi eq, %arg2, %c0_i32 : i32
    %1 = arith.extui %0 : i1 to i32
    %c0_i32_0 = arith.constant 0 : i32
    %2 = arith.cmpi ne, %1, %c0_i32_0 : i32
    scf.if %2 {
      %cst_10 = arith.constant 0.000000e+00 : f32
      %12 = vector.broadcast %cst_10 : f32 to vector<256x128xf32>
      %c0_11 = arith.constant 0 : index
      %c0_12 = arith.constant 0 : index
      %13 = vector.load %arg7[%c0_11, %c0_12] : memref<256x128xf32, #tpu.memory_space<vmem>>, vector<256x128xf32>
      tpu.vector_store %arg7[%c0_11, %c0_12], %12 {strides = array<i32>} : memref<256x128xf32, #tpu.memory_space<vmem>>, vector<256x128xf32>,
    } else {
    }
    %c0 = arith.constant 0 : index
    %c0_1 = arith.constant 0 : index
    %3 = vector.load %arg7[%c0, %c0_1] : memref<256x128xf32, #tpu.memory_space<vmem>>, vector<256x128xf32>
    %c0_2 = arith.constant 0 : index
    %c0_3 = arith.constant 0 : index
    %4 = vector.load %arg3[%c0_2, %c0_3] : memref<256x384xbf16, #tpu.memory_space<vmem>>, vector<256x384xbf16>
    %c0_4 = arith.constant 0 : index
    %c0_5 = arith.constant 0 : index
    %5 = vector.load %arg4[%c0_4, %c0_5] : memref<384x128xbf16, #tpu.memory_space<vmem>>, vector<384x128xbf16>
    %cst = arith.constant dense<0.000000e+00> : vector<256x128xf32>
    %6 = tpu.matmul %4, %5, %cst {dimension_numbers = #tpu.dot_dimension_numbers<[1], [0], [0], [1], [0, 0, 1, 1], [], []>} : vector<256x384xbf16>, vector<384x128xbf16>, vector<256x128xf32> -> vector<256x128xf32>
    %7 = arith.addf %3, %6 : vector<256x128xf32>
    %c0_6 = arith.constant 0 : index
    %c0_7 = arith.constant 0 : index
    %8 = vector.load %arg7[%c0_6, %c0_7] : memref<256x128xf32, #tpu.memory_space<vmem>>, vector<256x128xf32>
    tpu.vector_store %arg7[%c0_6, %c0_7], %7 {strides = array<i32>} : memref<256x128xf32, #tpu.memory_space<vmem>>, vector<256x128xf32>,
    %c0_i32_8 = arith.constant 0 : i32
    %9 = arith.cmpi eq, %arg2, %c0_i32_8 : i32
    %10 = arith.extui %9 : i1 to i32
    %c0_i32_9 = arith.constant 0 : i32
    %11 = arith.cmpi ne, %10, %c0_i32_9 : i32
    scf.if %11 {
      %c0_10 = arith.constant 0 : index
      %c0_11 = arith.constant 0 : index
      %12 = vector.load %arg7[%c0_10, %c0_11] : memref<256x128xf32, #tpu.memory_space<vmem>>, vector<256x128xf32>
      %c0_12 = arith.constant 0 : index
      %c0_13 = arith.constant 0 : index
      %13 = vector.load %arg5[%c0_12, %c0_13] : memref<1x128xf32, #tpu.memory_space<vmem>>, vector<1x128xf32>
      %14 = vector.broadcast %13 : vector<1x128xf32> to vector<256x128xf32>
      %15 = arith.addf %12, %14 : vector<256x128xf32>
      %c0_14 = arith.constant 0 : index
      %c0_15 = arith.constant 0 : index
      %16 = vector.load %arg6[%c0_14, %c0_15] : memref<256x128xf32, #tpu.memory_space<vmem>>, vector<256x128xf32>
      tpu.vector_store %arg6[%c0_14, %c0_15], %15 {strides = array<i32>} : memref<256x128xf32, #tpu.memory_space<vmem>>, vector<256x128xf32>,
    } else {
    }
    return
  }
  func.func @transform_0(%arg0: i32, %arg1: i32, %arg2: i32) -> (i32, i32) {
    %c0_i32 = arith.constant 0 : i32
    return %arg0, %arg2 : i32, i32
  }
  func.func @transform_1(%arg0: i32, %arg1: i32, %arg2: i32) -> (i32, i32) {
    %c0_i32 = arith.constant 0 : i32
    return %arg2, %arg1 : i32, i32
  }
  func.func @transform_2(%arg0: i32, %arg1: i32, %arg2: i32) -> (i32, i32) {
    %c0_i32 = arith.constant 0 : i32
    %c0_i32_0 = arith.constant 0 : i32
    return %c0_i32, %arg1 : i32, i32
  }
  func.func @transform_3(%arg0: i32, %arg1: i32, %arg2: i32) -> (i32, i32) {
    %c0_i32 = arith.constant 0 : i32
    return %arg0, %arg1 : i32, i32
  }
}

module attributes {stable_mosaic.version = 11 : i64} {
  func.func @_matmul_bias_kernel(%arg0: i32, %arg1: i32, %arg2: i32, %arg3: memref<256x384xbf16, #tpu.memory_space<vmem>>, %arg4: memref<384x128xbf16, #tpu.memory_space<vmem>>, %arg5: memref<1x128xf32, #tpu.memory_space<vmem>>, %arg6: memref<256x128xf32, #tpu.memory_space<vmem>>, %arg7: memref<256x128xf32, #tpu.memory_space<vmem>>, %arg8: memref<256x128xf32, #tpu.memory_space<vmem>>) attributes {dimension_semantics = [#tpu.dimension_semantics<parallel>, #tpu.dimension_semantics<parallel>, #tpu.dimension_semantics<arbitrary>], iteration_bounds = array<i64: 2, 1, 1>, scalar_prefetch = 0 : i64, scratch_operands = 1 : i64, tpu.core_type = #tpu.core_type<tc>, window_params = [{transform_indices = @transform_0, window_bounds = array<i64: 256, 384>}, {transform_indices = @transform_1, window_bounds = array<i64: 384, 128>}, {transform_indices = @transform_2, window_bounds = array<i64: 1, 128>}, {transform_indices = @transform_3, window_bounds = array<i64: 256, 128>}, {transform_indices = @transform_4, window_bounds = array<i64: 256, 128>}]} {
    %c0_i32 = arith.constant 0 : i32
    %0 = arith.cmpi eq, %arg2, %c0_i32 : i32
    %1 = arith.extui %0 : i1 to i32
    %c0_i32_0 = arith.constant 0 : i32
    %2 = arith.cmpi ne, %1, %c0_i32_0 : i32
    scf.if %2 {
      %cst_10 = arith.constant 0.000000e+00 : f32
      %12 = vector.broadcast %cst_10 : f32 to vector<256x128xf32>
      %c0_11 = arith.constant 0 : index
      %c0_12 = arith.constant 0 : index
      %13 = vector.load %arg8[%c0_11, %c0_12] : memref<256x128xf32, #tpu.memory_space<vmem>>, vector<256x128xf32>
      tpu.vector_store %arg8[%c0_11, %c0_12], %12 {strides = array<i32>} : memref<256x128xf32, #tpu.memory_space<vmem>>, vector<256x128xf32>,
    } else {
    }
    %c0 = arith.constant 0 : index
    %c0_1 = arith.constant 0 : index
    %3 = vector.load %arg8[%c0, %c0_1] : memref<256x128xf32, #tpu.memory_space<vmem>>, vector<256x128xf32>
    %c0_2 = arith.constant 0 : index
    %c0_3 = arith.constant 0 : index
    %4 = vector.load %arg3[%c0_2, %c0_3] : memref<256x384xbf16, #tpu.memory_space<vmem>>, vector<256x384xbf16>
    %c0_4 = arith.constant 0 : index
    %c0_5 = arith.constant 0 : index
    %5 = vector.load %arg4[%c0_4, %c0_5] : memref<384x128xbf16, #tpu.memory_space<vmem>>, vector<384x128xbf16>
    %cst = arith.constant dense<0.000000e+00> : vector<256x128xf32>
    %6 = tpu.matmul %4, %5, %cst {dimension_numbers = #tpu.dot_dimension_numbers<[1], [0], [0], [1], [0, 0, 1, 1], [], []>} : vector<256x384xbf16>, vector<384x128xbf16>, vector<256x128xf32> -> vector<256x128xf32>
    %7 = arith.addf %3, %6 : vector<256x128xf32>
    %c0_6 = arith.constant 0 : index
    %c0_7 = arith.constant 0 : index
    %8 = vector.load %arg8[%c0_6, %c0_7] : memref<256x128xf32, #tpu.memory_space<vmem>>, vector<256x128xf32>
    tpu.vector_store %arg8[%c0_6, %c0_7], %7 {strides = array<i32>} : memref<256x128xf32, #tpu.memory_space<vmem>>, vector<256x128xf32>,
    %c0_i32_8 = arith.constant 0 : i32
    %9 = arith.cmpi eq, %arg2, %c0_i32_8 : i32
    %10 = arith.extui %9 : i1 to i32
    %c0_i32_9 = arith.constant 0 : i32
    %11 = arith.cmpi ne, %10, %c0_i32_9 : i32
    scf.if %11 {
      %c0_10 = arith.constant 0 : index
      %c0_11 = arith.constant 0 : index
      %12 = vector.load %arg8[%c0_10, %c0_11] : memref<256x128xf32, #tpu.memory_space<vmem>>, vector<256x128xf32>
      %c0_12 = arith.constant 0 : index
      %c0_13 = arith.constant 0 : index
      %13 = vector.load %arg5[%c0_12, %c0_13] : memref<1x128xf32, #tpu.memory_space<vmem>>, vector<1x128xf32>
      %14 = vector.broadcast %13 : vector<1x128xf32> to vector<256x128xf32>
      %15 = arith.addf %12, %14 : vector<256x128xf32>
      %c0_14 = arith.constant 0 : index
      %c0_15 = arith.constant 0 : index
      %16 = vector.load %arg6[%c0_14, %c0_15] : memref<256x128xf32, #tpu.memory_space<vmem>>, vector<256x128xf32>
      %17 = arith.addf %15, %16 : vector<256x128xf32>
      %c0_16 = arith.constant 0 : index
      %c0_17 = arith.constant 0 : index
      %18 = vector.load %arg7[%c0_16, %c0_17] : memref<256x128xf32, #tpu.memory_space<vmem>>, vector<256x128xf32>
      tpu.vector_store %arg7[%c0_16, %c0_17], %17 {strides = array<i32>} : memref<256x128xf32, #tpu.memory_space<vmem>>, vector<256x128xf32>,
    } else {
    }
    return
  }
  func.func @transform_0(%arg0: i32, %arg1: i32, %arg2: i32) -> (i32, i32) {
    %c0_i32 = arith.constant 0 : i32
    return %arg0, %arg2 : i32, i32
  }
  func.func @transform_1(%arg0: i32, %arg1: i32, %arg2: i32) -> (i32, i32) {
    %c0_i32 = arith.constant 0 : i32
    return %arg2, %arg1 : i32, i32
  }
  func.func @transform_2(%arg0: i32, %arg1: i32, %arg2: i32) -> (i32, i32) {
    %c0_i32 = arith.constant 0 : i32
    %c0_i32_0 = arith.constant 0 : i32
    return %c0_i32, %arg1 : i32, i32
  }
  func.func @transform_3(%arg0: i32, %arg1: i32, %arg2: i32) -> (i32, i32) {
    %c0_i32 = arith.constant 0 : i32
    return %arg0, %arg1 : i32, i32
  }
  func.func @transform_4(%arg0: i32, %arg1: i32, %arg2: i32) -> (i32, i32) {
    %c0_i32 = arith.constant 0 : i32
    return %arg0, %arg1 : i32, i32
  }
}

module attributes {stable_mosaic.version = 11 : i64} {
  func.func @_groupnorm_kernel(%arg0: i32, %arg1: memref<1x64x32xf32, #tpu.memory_space<vmem>>, %arg2: memref<1x32xf32, #tpu.memory_space<vmem>>, %arg3: memref<1x32xf32, #tpu.memory_space<vmem>>, %arg4: memref<32x32xf32, #tpu.memory_space<vmem>>, %arg5: memref<1x64x32xf32, #tpu.memory_space<vmem>>) attributes {dimension_semantics = [#tpu.dimension_semantics<parallel>], iteration_bounds = array<i64: 2>, scalar_prefetch = 0 : i64, scratch_operands = 0 : i64, tpu.core_type = #tpu.core_type<tc>, window_params = [{transform_indices = @transform_0, window_bounds = array<i64: 1, 64, 32>}, {pipeline_mode = #tpu.pipeline_mode<synchronous>, transform_indices = @transform_1, window_bounds = array<i64: 1, 32>}, {pipeline_mode = #tpu.pipeline_mode<synchronous>, transform_indices = @transform_2, window_bounds = array<i64: 1, 32>}, {pipeline_mode = #tpu.pipeline_mode<synchronous>, transform_indices = @transform_3, window_bounds = array<i64: 32, 32>}, {transform_indices = @transform_4, window_bounds = array<i64: 1, 64, 32>}]} {
    %c0 = arith.constant 0 : index
    %c0_0 = arith.constant 0 : index
    %c0_1 = arith.constant 0 : index
    %0 = vector.load %arg1[%c0, %c0_0, %c0_1] : memref<1x64x32xf32, #tpu.memory_space<vmem>>, vector<1x64x32xf32>
    %cst = arith.constant dense<0.000000e+00> : vector<1x32xf32>
    %1 = vector.multi_reduction <add>, %0, %cst [1] : vector<1x64x32xf32> to vector<1x32xf32>
    %2 = arith.mulf %0, %0 : vector<1x64x32xf32>
    %cst_2 = arith.constant dense<0.000000e+00> : vector<1x32xf32>
    %3 = vector.multi_reduction <add>, %2, %cst_2 [1] : vector<1x64x32xf32> to vector<1x32xf32>
    %c0_3 = arith.constant 0 : index
    %c0_4 = arith.constant 0 : index
    %4 = vector.load %arg4[%c0_3, %c0_4] : memref<32x32xf32, #tpu.memory_space<vmem>>, vector<32x32xf32>
    %cst_5 = arith.constant dense<0.000000e+00> : vector<1x32xf32>
    %5 = tpu.matmul %1, %4, %cst_5 {dimension_numbers = #tpu.dot_dimension_numbers<[1], [0], [0], [1], [0, 0, 1, 1], [], []>} : vector<1x32xf32>, vector<32x32xf32>, vector<1x32xf32> -> vector<1x32xf32>
    %cst_6 = arith.constant 1.562500e-02 : f32
    %6 = vector.broadcast %cst_6 : f32 to vector<1x32xf32>
    %7 = arith.mulf %5, %6 : vector<1x32xf32>
    %cst_7 = arith.constant dense<0.000000e+00> : vector<1x32xf32>
    %8 = tpu.matmul %3, %4, %cst_7 {dimension_numbers = #tpu.dot_dimension_numbers<[1], [0], [0], [1], [0, 0, 1, 1], [], []>} : vector<1x32xf32>, vector<32x32xf32>, vector<1x32xf32> -> vector<1x32xf32>
    %cst_8 = arith.constant 1.562500e-02 : f32
    %9 = vector.broadcast %cst_8 : f32 to vector<1x32xf32>
    %10 = arith.mulf %8, %9 : vector<1x32xf32>
    %11 = arith.mulf %7, %7 : vector<1x32xf32>
    %12 = arith.subf %10, %11 : vector<1x32xf32>
    %cst_9 = arith.constant 9.99999997E-7 : f32
    %13 = vector.broadcast %cst_9 : f32 to vector<1x32xf32>
    %14 = arith.addf %12, %13 : vector<1x32xf32>
    %15 = math.rsqrt %14 : vector<1x32xf32>
    %16 = vector.shape_cast %7 : vector<1x32xf32> to vector<1x1x32xf32>
    %17 = vector.broadcast %16 : vector<1x1x32xf32> to vector<1x64x32xf32>
    %18 = arith.subf %0, %17 : vector<1x64x32xf32>
    %19 = vector.shape_cast %15 : vector<1x32xf32> to vector<1x1x32xf32>
    %20 = vector.broadcast %19 : vector<1x1x32xf32> to vector<1x64x32xf32>
    %21 = arith.mulf %18, %20 : vector<1x64x32xf32>
    %c0_10 = arith.constant 0 : index
    %c0_11 = arith.constant 0 : index
    %22 = vector.load %arg2[%c0_10, %c0_11] : memref<1x32xf32, #tpu.memory_space<vmem>>, vector<1x32xf32>
    %23 = vector.shape_cast %22 : vector<1x32xf32> to vector<1x1x32xf32>
    %24 = vector.broadcast %23 : vector<1x1x32xf32> to vector<1x64x32xf32>
    %25 = arith.mulf %21, %24 : vector<1x64x32xf32>
    %c0_12 = arith.constant 0 : index
    %c0_13 = arith.constant 0 : index
    %26 = vector.load %arg3[%c0_12, %c0_13] : memref<1x32xf32, #tpu.memory_space<vmem>>, vector<1x32xf32>
    %27 = vector.shape_cast %26 : vector<1x32xf32> to vector<1x1x32xf32>
    %28 = vector.broadcast %27 : vector<1x1x32xf32> to vector<1x64x32xf32>
    %29 = arith.addf %25, %28 : vector<1x64x32xf32>
    %30 = arith.negf %29 : vector<1x64x32xf32>
    %31 = math.exp %30 : vector<1x64x32xf32>
    %cst_14 = arith.constant 1.000000e+00 : f32
    %32 = vector.broadcast %cst_14 : f32 to vector<1x64x32xf32>
    %33 = arith.addf %32, %31 : vector<1x64x32xf32>
    %34 = arith.divf %32, %33 : vector<1x64x32xf32>
    %35 = arith.mulf %29, %34 : vector<1x64x32xf32>
    %c0_15 = arith.constant 0 : index
    %c0_16 = arith.constant 0 : index
    %c0_17 = arith.constant 0 : index
    %36 = vector.load %arg5[%c0_15, %c0_16, %c0_17] : memref<1x64x32xf32, #tpu.memory_space<vmem>>, vector<1x64x32xf32>
    tpu.vector_store %arg5[%c0_15, %c0_16, %c0_17], %35 {strides = array<i32>} : memref<1x64x32xf32, #tpu.memory_space<vmem>>, vector<1x64x32xf32>,
    return
  }
  func.func @transform_0(%arg0: i32) -> (i32, i32, i32) {
    %c0_i32 = arith.constant 0 : i32
    %c0_i32_0 = arith.constant 0 : i32
    %c0_i32_1 = arith.constant 0 : i32
    return %arg0, %c0_i32, %c0_i32_0 : i32, i32, i32
  }
  func.func @transform_1(%arg0: i32) -> (i32, i32) {
    %c0_i32 = arith.constant 0 : i32
    %c0_i32_0 = arith.constant 0 : i32
    %c0_i32_1 = arith.constant 0 : i32
    return %c0_i32, %c0_i32_0 : i32, i32
  }
  func.func @transform_2(%arg0: i32) -> (i32, i32) {
    %c0_i32 = arith.constant 0 : i32
    %c0_i32_0 = arith.constant 0 : i32
    %c0_i32_1 = arith.constant 0 : i32
    return %c0_i32, %c0_i32_0 : i32, i32
  }
  func.func @transform_3(%arg0: i32) -> (i32, i32) {
    %c0_i32 = arith.constant 0 : i32
    %c0_i32_0 = arith.constant 0 : i32
    %c0_i32_1 = arith.constant 0 : i32
    return %c0_i32, %c0_i32_0 : i32, i32
  }
  func.func @transform_4(%arg0: i32) -> (i32, i32, i32) {
    %c0_i32 = arith.constant 0 : i32
    %c0_i32_0 = arith.constant 0 : i32
    %c0_i32_1 = arith.constant 0 : i32
    return %arg0, %c0_i32, %c0_i32_0 : i32, i32, i32
  }
}

module attributes {stable_mosaic.version = 11 : i64} {
  func.func @_matmul_bias_kernel(%arg0: i32, %arg1: i32, %arg2: i32, %arg3: memref<128x384xbf16, #tpu.memory_space<vmem>>, %arg4: memref<384x128xbf16, #tpu.memory_space<vmem>>, %arg5: memref<1x128xf32, #tpu.memory_space<vmem>>, %arg6: memref<128x128xf32, #tpu.memory_space<vmem>>, %arg7: memref<128x128xf32, #tpu.memory_space<vmem>>) attributes {dimension_semantics = [#tpu.dimension_semantics<parallel>, #tpu.dimension_semantics<parallel>, #tpu.dimension_semantics<arbitrary>], iteration_bounds = array<i64: 1, 1, 1>, scalar_prefetch = 0 : i64, scratch_operands = 1 : i64, tpu.core_type = #tpu.core_type<tc>, window_params = [{transform_indices = @transform_0, window_bounds = array<i64: 128, 384>}, {transform_indices = @transform_1, window_bounds = array<i64: 384, 128>}, {transform_indices = @transform_2, window_bounds = array<i64: 1, 128>}, {transform_indices = @transform_3, window_bounds = array<i64: 128, 128>}]} {
    %c0_i32 = arith.constant 0 : i32
    %0 = arith.cmpi eq, %arg2, %c0_i32 : i32
    %1 = arith.extui %0 : i1 to i32
    %c0_i32_0 = arith.constant 0 : i32
    %2 = arith.cmpi ne, %1, %c0_i32_0 : i32
    scf.if %2 {
      %cst_10 = arith.constant 0.000000e+00 : f32
      %12 = vector.broadcast %cst_10 : f32 to vector<128x128xf32>
      %c0_11 = arith.constant 0 : index
      %c0_12 = arith.constant 0 : index
      %13 = vector.load %arg7[%c0_11, %c0_12] : memref<128x128xf32, #tpu.memory_space<vmem>>, vector<128x128xf32>
      tpu.vector_store %arg7[%c0_11, %c0_12], %12 {strides = array<i32>} : memref<128x128xf32, #tpu.memory_space<vmem>>, vector<128x128xf32>,
    } else {
    }
    %c0 = arith.constant 0 : index
    %c0_1 = arith.constant 0 : index
    %3 = vector.load %arg7[%c0, %c0_1] : memref<128x128xf32, #tpu.memory_space<vmem>>, vector<128x128xf32>
    %c0_2 = arith.constant 0 : index
    %c0_3 = arith.constant 0 : index
    %4 = vector.load %arg3[%c0_2, %c0_3] : memref<128x384xbf16, #tpu.memory_space<vmem>>, vector<128x384xbf16>
    %c0_4 = arith.constant 0 : index
    %c0_5 = arith.constant 0 : index
    %5 = vector.load %arg4[%c0_4, %c0_5] : memref<384x128xbf16, #tpu.memory_space<vmem>>, vector<384x128xbf16>
    %cst = arith.constant dense<0.000000e+00> : vector<128x128xf32>
    %6 = tpu.matmul %4, %5, %cst {dimension_numbers = #tpu.dot_dimension_numbers<[1], [0], [0], [1], [0, 0, 1, 1], [], []>} : vector<128x384xbf16>, vector<384x128xbf16>, vector<128x128xf32> -> vector<128x128xf32>
    %7 = arith.addf %3, %6 : vector<128x128xf32>
    %c0_6 = arith.constant 0 : index
    %c0_7 = arith.constant 0 : index
    %8 = vector.load %arg7[%c0_6, %c0_7] : memref<128x128xf32, #tpu.memory_space<vmem>>, vector<128x128xf32>
    tpu.vector_store %arg7[%c0_6, %c0_7], %7 {strides = array<i32>} : memref<128x128xf32, #tpu.memory_space<vmem>>, vector<128x128xf32>,
    %c0_i32_8 = arith.constant 0 : i32
    %9 = arith.cmpi eq, %arg2, %c0_i32_8 : i32
    %10 = arith.extui %9 : i1 to i32
    %c0_i32_9 = arith.constant 0 : i32
    %11 = arith.cmpi ne, %10, %c0_i32_9 : i32
    scf.if %11 {
      %c0_10 = arith.constant 0 : index
      %c0_11 = arith.constant 0 : index
      %12 = vector.load %arg7[%c0_10, %c0_11] : memref<128x128xf32, #tpu.memory_space<vmem>>, vector<128x128xf32>
      %c0_12 = arith.constant 0 : index
      %c0_13 = arith.constant 0 : index
      %13 = vector.load %arg5[%c0_12, %c0_13] : memref<1x128xf32, #tpu.memory_space<vmem>>, vector<1x128xf32>
      %14 = vector.broadcast %13 : vector<1x128xf32> to vector<128x128xf32>
      %15 = arith.addf %12, %14 : vector<128x128xf32>
      %c0_14 = arith.constant 0 : index
      %c0_15 = arith.constant 0 : index
      %16 = vector.load %arg6[%c0_14, %c0_15] : memref<128x128xf32, #tpu.memory_space<vmem>>, vector<128x128xf32>
      tpu.vector_store %arg6[%c0_14, %c0_15], %15 {strides = array<i32>} : memref<128x128xf32, #tpu.memory_space<vmem>>, vector<128x128xf32>,
    } else {
    }
    return
  }
  func.func @transform_0(%arg0: i32, %arg1: i32, %arg2: i32) -> (i32, i32) {
    %c0_i32 = arith.constant 0 : i32
    return %arg0, %arg2 : i32, i32
  }
  func.func @transform_1(%arg0: i32, %arg1: i32, %arg2: i32) -> (i32, i32) {
    %c0_i32 = arith.constant 0 : i32
    return %arg2, %arg1 : i32, i32
  }
  func.func @transform_2(%arg0: i32, %arg1: i32, %arg2: i32) -> (i32, i32) {
    %c0_i32 = arith.constant 0 : i32
    %c0_i32_0 = arith.constant 0 : i32
    return %c0_i32, %arg1 : i32, i32
  }
  func.func @transform_3(%arg0: i32, %arg1: i32, %arg2: i32) -> (i32, i32) {
    %c0_i32 = arith.constant 0 : i32
    return %arg0, %arg1 : i32, i32
  }
}

module attributes {stable_mosaic.version = 11 : i64} {
  func.func @_groupnorm_kernel(%arg0: i32, %arg1: memref<1x64x64xf32, #tpu.memory_space<vmem>>, %arg2: memref<1x64xf32, #tpu.memory_space<vmem>>, %arg3: memref<1x64xf32, #tpu.memory_space<vmem>>, %arg4: memref<64x64xf32, #tpu.memory_space<vmem>>, %arg5: memref<1x64x64xf32, #tpu.memory_space<vmem>>) attributes {dimension_semantics = [#tpu.dimension_semantics<parallel>], iteration_bounds = array<i64: 2>, scalar_prefetch = 0 : i64, scratch_operands = 0 : i64, tpu.core_type = #tpu.core_type<tc>, window_params = [{transform_indices = @transform_0, window_bounds = array<i64: 1, 64, 64>}, {pipeline_mode = #tpu.pipeline_mode<synchronous>, transform_indices = @transform_1, window_bounds = array<i64: 1, 64>}, {pipeline_mode = #tpu.pipeline_mode<synchronous>, transform_indices = @transform_2, window_bounds = array<i64: 1, 64>}, {pipeline_mode = #tpu.pipeline_mode<synchronous>, transform_indices = @transform_3, window_bounds = array<i64: 64, 64>}, {transform_indices = @transform_4, window_bounds = array<i64: 1, 64, 64>}]} {
    %c0 = arith.constant 0 : index
    %c0_0 = arith.constant 0 : index
    %c0_1 = arith.constant 0 : index
    %0 = vector.load %arg1[%c0, %c0_0, %c0_1] : memref<1x64x64xf32, #tpu.memory_space<vmem>>, vector<1x64x64xf32>
    %cst = arith.constant dense<0.000000e+00> : vector<1x64xf32>
    %1 = vector.multi_reduction <add>, %0, %cst [1] : vector<1x64x64xf32> to vector<1x64xf32>
    %2 = arith.mulf %0, %0 : vector<1x64x64xf32>
    %cst_2 = arith.constant dense<0.000000e+00> : vector<1x64xf32>
    %3 = vector.multi_reduction <add>, %2, %cst_2 [1] : vector<1x64x64xf32> to vector<1x64xf32>
    %c0_3 = arith.constant 0 : index
    %c0_4 = arith.constant 0 : index
    %4 = vector.load %arg4[%c0_3, %c0_4] : memref<64x64xf32, #tpu.memory_space<vmem>>, vector<64x64xf32>
    %cst_5 = arith.constant dense<0.000000e+00> : vector<1x64xf32>
    %5 = tpu.matmul %1, %4, %cst_5 {dimension_numbers = #tpu.dot_dimension_numbers<[1], [0], [0], [1], [0, 0, 1, 1], [], []>} : vector<1x64xf32>, vector<64x64xf32>, vector<1x64xf32> -> vector<1x64xf32>
    %cst_6 = arith.constant 7.812500e-03 : f32
    %6 = vector.broadcast %cst_6 : f32 to vector<1x64xf32>
    %7 = arith.mulf %5, %6 : vector<1x64xf32>
    %cst_7 = arith.constant dense<0.000000e+00> : vector<1x64xf32>
    %8 = tpu.matmul %3, %4, %cst_7 {dimension_numbers = #tpu.dot_dimension_numbers<[1], [0], [0], [1], [0, 0, 1, 1], [], []>} : vector<1x64xf32>, vector<64x64xf32>, vector<1x64xf32> -> vector<1x64xf32>
    %cst_8 = arith.constant 7.812500e-03 : f32
    %9 = vector.broadcast %cst_8 : f32 to vector<1x64xf32>
    %10 = arith.mulf %8, %9 : vector<1x64xf32>
    %11 = arith.mulf %7, %7 : vector<1x64xf32>
    %12 = arith.subf %10, %11 : vector<1x64xf32>
    %cst_9 = arith.constant 9.99999997E-7 : f32
    %13 = vector.broadcast %cst_9 : f32 to vector<1x64xf32>
    %14 = arith.addf %12, %13 : vector<1x64xf32>
    %15 = math.rsqrt %14 : vector<1x64xf32>
    %16 = vector.shape_cast %7 : vector<1x64xf32> to vector<1x1x64xf32>
    %17 = vector.broadcast %16 : vector<1x1x64xf32> to vector<1x64x64xf32>
    %18 = arith.subf %0, %17 : vector<1x64x64xf32>
    %19 = vector.shape_cast %15 : vector<1x64xf32> to vector<1x1x64xf32>
    %20 = vector.broadcast %19 : vector<1x1x64xf32> to vector<1x64x64xf32>
    %21 = arith.mulf %18, %20 : vector<1x64x64xf32>
    %c0_10 = arith.constant 0 : index
    %c0_11 = arith.constant 0 : index
    %22 = vector.load %arg2[%c0_10, %c0_11] : memref<1x64xf32, #tpu.memory_space<vmem>>, vector<1x64xf32>
    %23 = vector.shape_cast %22 : vector<1x64xf32> to vector<1x1x64xf32>
    %24 = vector.broadcast %23 : vector<1x1x64xf32> to vector<1x64x64xf32>
    %25 = arith.mulf %21, %24 : vector<1x64x64xf32>
    %c0_12 = arith.constant 0 : index
    %c0_13 = arith.constant 0 : index
    %26 = vector.load %arg3[%c0_12, %c0_13] : memref<1x64xf32, #tpu.memory_space<vmem>>, vector<1x64xf32>
    %27 = vector.shape_cast %26 : vector<1x64xf32> to vector<1x1x64xf32>
    %28 = vector.broadcast %27 : vector<1x1x64xf32> to vector<1x64x64xf32>
    %29 = arith.addf %25, %28 : vector<1x64x64xf32>
    %30 = arith.negf %29 : vector<1x64x64xf32>
    %31 = math.exp %30 : vector<1x64x64xf32>
    %cst_14 = arith.constant 1.000000e+00 : f32
    %32 = vector.broadcast %cst_14 : f32 to vector<1x64x64xf32>
    %33 = arith.addf %32, %31 : vector<1x64x64xf32>
    %34 = arith.divf %32, %33 : vector<1x64x64xf32>
    %35 = arith.mulf %29, %34 : vector<1x64x64xf32>
    %c0_15 = arith.constant 0 : index
    %c0_16 = arith.constant 0 : index
    %c0_17 = arith.constant 0 : index
    %36 = vector.load %arg5[%c0_15, %c0_16, %c0_17] : memref<1x64x64xf32, #tpu.memory_space<vmem>>, vector<1x64x64xf32>
    tpu.vector_store %arg5[%c0_15, %c0_16, %c0_17], %35 {strides = array<i32>} : memref<1x64x64xf32, #tpu.memory_space<vmem>>, vector<1x64x64xf32>,
    return
  }
  func.func @transform_0(%arg0: i32) -> (i32, i32, i32) {
    %c0_i32 = arith.constant 0 : i32
    %c0_i32_0 = arith.constant 0 : i32
    %c0_i32_1 = arith.constant 0 : i32
    return %arg0, %c0_i32, %c0_i32_0 : i32, i32, i32
  }
  func.func @transform_1(%arg0: i32) -> (i32, i32) {
    %c0_i32 = arith.constant 0 : i32
    %c0_i32_0 = arith.constant 0 : i32
    %c0_i32_1 = arith.constant 0 : i32
    return %c0_i32, %c0_i32_0 : i32, i32
  }
  func.func @transform_2(%arg0: i32) -> (i32, i32) {
    %c0_i32 = arith.constant 0 : i32
    %c0_i32_0 = arith.constant 0 : i32
    %c0_i32_1 = arith.constant 0 : i32
    return %c0_i32, %c0_i32_0 : i32, i32
  }
  func.func @transform_3(%arg0: i32) -> (i32, i32) {
    %c0_i32 = arith.constant 0 : i32
    %c0_i32_0 = arith.constant 0 : i32
    %c0_i32_1 = arith.constant 0 : i32
    return %c0_i32, %c0_i32_0 : i32, i32
  }
  func.func @transform_4(%arg0: i32) -> (i32, i32, i32) {
    %c0_i32 = arith.constant 0 : i32
    %c0_i32_0 = arith.constant 0 : i32
    %c0_i32_1 = arith.constant 0 : i32
    return %arg0, %c0_i32, %c0_i32_0 : i32, i32, i32
  }
}

module attributes {stable_mosaic.version = 11 : i64} {
  func.func @_matmul_bias_kernel(%arg0: i32, %arg1: i32, %arg2: i32, %arg3: memref<128x128xbf16, #tpu.memory_space<vmem>>, %arg4: memref<128x128xbf16, #tpu.memory_space<vmem>>, %arg5: memref<1x128xf32, #tpu.memory_space<vmem>>, %arg6: memref<128x128xf32, #tpu.memory_space<vmem>>, %arg7: memref<128x128xf32, #tpu.memory_space<vmem>>) attributes {dimension_semantics = [#tpu.dimension_semantics<parallel>, #tpu.dimension_semantics<parallel>, #tpu.dimension_semantics<arbitrary>], iteration_bounds = array<i64: 1, 1, 1>, scalar_prefetch = 0 : i64, scratch_operands = 1 : i64, tpu.core_type = #tpu.core_type<tc>, window_params = [{transform_indices = @transform_0, window_bounds = array<i64: 128, 128>}, {transform_indices = @transform_1, window_bounds = array<i64: 128, 128>}, {transform_indices = @transform_2, window_bounds = array<i64: 1, 128>}, {transform_indices = @transform_3, window_bounds = array<i64: 128, 128>}]} {
    %c0_i32 = arith.constant 0 : i32
    %0 = arith.cmpi eq, %arg2, %c0_i32 : i32
    %1 = arith.extui %0 : i1 to i32
    %c0_i32_0 = arith.constant 0 : i32
    %2 = arith.cmpi ne, %1, %c0_i32_0 : i32
    scf.if %2 {
      %cst_10 = arith.constant 0.000000e+00 : f32
      %12 = vector.broadcast %cst_10 : f32 to vector<128x128xf32>
      %c0_11 = arith.constant 0 : index
      %c0_12 = arith.constant 0 : index
      %13 = vector.load %arg7[%c0_11, %c0_12] : memref<128x128xf32, #tpu.memory_space<vmem>>, vector<128x128xf32>
      tpu.vector_store %arg7[%c0_11, %c0_12], %12 {strides = array<i32>} : memref<128x128xf32, #tpu.memory_space<vmem>>, vector<128x128xf32>,
    } else {
    }
    %c0 = arith.constant 0 : index
    %c0_1 = arith.constant 0 : index
    %3 = vector.load %arg7[%c0, %c0_1] : memref<128x128xf32, #tpu.memory_space<vmem>>, vector<128x128xf32>
    %c0_2 = arith.constant 0 : index
    %c0_3 = arith.constant 0 : index
    %4 = vector.load %arg3[%c0_2, %c0_3] : memref<128x128xbf16, #tpu.memory_space<vmem>>, vector<128x128xbf16>
    %c0_4 = arith.constant 0 : index
    %c0_5 = arith.constant 0 : index
    %5 = vector.load %arg4[%c0_4, %c0_5] : memref<128x128xbf16, #tpu.memory_space<vmem>>, vector<128x128xbf16>
    %cst = arith.constant dense<0.000000e+00> : vector<128x128xf32>
    %6 = tpu.matmul %4, %5, %cst {dimension_numbers = #tpu.dot_dimension_numbers<[1], [0], [0], [1], [0, 0, 1, 1], [], []>} : vector<128x128xbf16>, vector<128x128xbf16>, vector<128x128xf32> -> vector<128x128xf32>
    %7 = arith.addf %3, %6 : vector<128x128xf32>
    %c0_6 = arith.constant 0 : index
    %c0_7 = arith.constant 0 : index
    %8 = vector.load %arg7[%c0_6, %c0_7] : memref<128x128xf32, #tpu.memory_space<vmem>>, vector<128x128xf32>
    tpu.vector_store %arg7[%c0_6, %c0_7], %7 {strides = array<i32>} : memref<128x128xf32, #tpu.memory_space<vmem>>, vector<128x128xf32>,
    %c0_i32_8 = arith.constant 0 : i32
    %9 = arith.cmpi eq, %arg2, %c0_i32_8 : i32
    %10 = arith.extui %9 : i1 to i32
    %c0_i32_9 = arith.constant 0 : i32
    %11 = arith.cmpi ne, %10, %c0_i32_9 : i32
    scf.if %11 {
      %c0_10 = arith.constant 0 : index
      %c0_11 = arith.constant 0 : index
      %12 = vector.load %arg7[%c0_10, %c0_11] : memref<128x128xf32, #tpu.memory_space<vmem>>, vector<128x128xf32>
      %c0_12 = arith.constant 0 : index
      %c0_13 = arith.constant 0 : index
      %13 = vector.load %arg5[%c0_12, %c0_13] : memref<1x128xf32, #tpu.memory_space<vmem>>, vector<1x128xf32>
      %14 = vector.broadcast %13 : vector<1x128xf32> to vector<128x128xf32>
      %15 = arith.addf %12, %14 : vector<128x128xf32>
      %c0_14 = arith.constant 0 : index
      %c0_15 = arith.constant 0 : index
      %16 = vector.load %arg6[%c0_14, %c0_15] : memref<128x128xf32, #tpu.memory_space<vmem>>, vector<128x128xf32>
      tpu.vector_store %arg6[%c0_14, %c0_15], %15 {strides = array<i32>} : memref<128x128xf32, #tpu.memory_space<vmem>>, vector<128x128xf32>,
    } else {
    }
    return
  }
  func.func @transform_0(%arg0: i32, %arg1: i32, %arg2: i32) -> (i32, i32) {
    %c0_i32 = arith.constant 0 : i32
    return %arg0, %arg2 : i32, i32
  }
  func.func @transform_1(%arg0: i32, %arg1: i32, %arg2: i32) -> (i32, i32) {
    %c0_i32 = arith.constant 0 : i32
    return %arg2, %arg1 : i32, i32
  }
  func.func @transform_2(%arg0: i32, %arg1: i32, %arg2: i32) -> (i32, i32) {
    %c0_i32 = arith.constant 0 : i32
    %c0_i32_0 = arith.constant 0 : i32
    return %c0_i32, %arg1 : i32, i32
  }
  func.func @transform_3(%arg0: i32, %arg1: i32, %arg2: i32) -> (i32, i32) {
    %c0_i32 = arith.constant 0 : i32
    return %arg0, %arg1 : i32, i32
  }
}

module attributes {stable_mosaic.version = 11 : i64} {
  func.func @_matmul_bias_kernel(%arg0: i32, %arg1: i32, %arg2: i32, %arg3: memref<128x512xbf16, #tpu.memory_space<vmem>>, %arg4: memref<512x128xbf16, #tpu.memory_space<vmem>>, %arg5: memref<1x128xf32, #tpu.memory_space<vmem>>, %arg6: memref<128x128xf32, #tpu.memory_space<vmem>>, %arg7: memref<128x128xf32, #tpu.memory_space<vmem>>, %arg8: memref<128x128xf32, #tpu.memory_space<vmem>>) attributes {dimension_semantics = [#tpu.dimension_semantics<parallel>, #tpu.dimension_semantics<parallel>, #tpu.dimension_semantics<arbitrary>], iteration_bounds = array<i64: 1, 1, 2>, scalar_prefetch = 0 : i64, scratch_operands = 1 : i64, tpu.core_type = #tpu.core_type<tc>, window_params = [{transform_indices = @transform_0, window_bounds = array<i64: 128, 512>}, {transform_indices = @transform_1, window_bounds = array<i64: 512, 128>}, {transform_indices = @transform_2, window_bounds = array<i64: 1, 128>}, {transform_indices = @transform_3, window_bounds = array<i64: 128, 128>}, {transform_indices = @transform_4, window_bounds = array<i64: 128, 128>}]} {
    %c0_i32 = arith.constant 0 : i32
    %0 = arith.cmpi eq, %arg2, %c0_i32 : i32
    %1 = arith.extui %0 : i1 to i32
    %c0_i32_0 = arith.constant 0 : i32
    %2 = arith.cmpi ne, %1, %c0_i32_0 : i32
    scf.if %2 {
      %cst_9 = arith.constant 0.000000e+00 : f32
      %12 = vector.broadcast %cst_9 : f32 to vector<128x128xf32>
      %c0_10 = arith.constant 0 : index
      %c0_11 = arith.constant 0 : index
      %13 = vector.load %arg8[%c0_10, %c0_11] : memref<128x128xf32, #tpu.memory_space<vmem>>, vector<128x128xf32>
      tpu.vector_store %arg8[%c0_10, %c0_11], %12 {strides = array<i32>} : memref<128x128xf32, #tpu.memory_space<vmem>>, vector<128x128xf32>,
    } else {
    }
    %c0 = arith.constant 0 : index
    %c0_1 = arith.constant 0 : index
    %3 = vector.load %arg8[%c0, %c0_1] : memref<128x128xf32, #tpu.memory_space<vmem>>, vector<128x128xf32>
    %c0_2 = arith.constant 0 : index
    %c0_3 = arith.constant 0 : index
    %4 = vector.load %arg3[%c0_2, %c0_3] : memref<128x512xbf16, #tpu.memory_space<vmem>>, vector<128x512xbf16>
    %c0_4 = arith.constant 0 : index
    %c0_5 = arith.constant 0 : index
    %5 = vector.load %arg4[%c0_4, %c0_5] : memref<512x128xbf16, #tpu.memory_space<vmem>>, vector<512x128xbf16>
    %cst = arith.constant dense<0.000000e+00> : vector<128x128xf32>
    %6 = tpu.matmul %4, %5, %cst {dimension_numbers = #tpu.dot_dimension_numbers<[1], [0], [0], [1], [0, 0, 1, 1], [], []>} : vector<128x512xbf16>, vector<512x128xbf16>, vector<128x128xf32> -> vector<128x128xf32>
    %7 = arith.addf %3, %6 : vector<128x128xf32>
    %c0_6 = arith.constant 0 : index
    %c0_7 = arith.constant 0 : index
    %8 = vector.load %arg8[%c0_6, %c0_7] : memref<128x128xf32, #tpu.memory_space<vmem>>, vector<128x128xf32>
    tpu.vector_store %arg8[%c0_6, %c0_7], %7 {strides = array<i32>} : memref<128x128xf32, #tpu.memory_space<vmem>>, vector<128x128xf32>,
    %c1_i32 = arith.constant 1 : i32
    %9 = arith.cmpi eq, %arg2, %c1_i32 : i32
    %10 = arith.extui %9 : i1 to i32
    %c0_i32_8 = arith.constant 0 : i32
    %11 = arith.cmpi ne, %10, %c0_i32_8 : i32
    scf.if %11 {
      %c0_9 = arith.constant 0 : index
      %c0_10 = arith.constant 0 : index
      %12 = vector.load %arg8[%c0_9, %c0_10] : memref<128x128xf32, #tpu.memory_space<vmem>>, vector<128x128xf32>
      %c0_11 = arith.constant 0 : index
      %c0_12 = arith.constant 0 : index
      %13 = vector.load %arg5[%c0_11, %c0_12] : memref<1x128xf32, #tpu.memory_space<vmem>>, vector<1x128xf32>
      %14 = vector.broadcast %13 : vector<1x128xf32> to vector<128x128xf32>
      %15 = arith.addf %12, %14 : vector<128x128xf32>
      %c0_13 = arith.constant 0 : index
      %c0_14 = arith.constant 0 : index
      %16 = vector.load %arg6[%c0_13, %c0_14] : memref<128x128xf32, #tpu.memory_space<vmem>>, vector<128x128xf32>
      %17 = arith.addf %15, %16 : vector<128x128xf32>
      %c0_15 = arith.constant 0 : index
      %c0_16 = arith.constant 0 : index
      %18 = vector.load %arg7[%c0_15, %c0_16] : memref<128x128xf32, #tpu.memory_space<vmem>>, vector<128x128xf32>
      tpu.vector_store %arg7[%c0_15, %c0_16], %17 {strides = array<i32>} : memref<128x128xf32, #tpu.memory_space<vmem>>, vector<128x128xf32>,
    } else {
    }
    return
  }
  func.func @transform_0(%arg0: i32, %arg1: i32, %arg2: i32) -> (i32, i32) {
    %c0_i32 = arith.constant 0 : i32
    return %arg0, %arg2 : i32, i32
  }
  func.func @transform_1(%arg0: i32, %arg1: i32, %arg2: i32) -> (i32, i32) {
    %c0_i32 = arith.constant 0 : i32
    return %arg2, %arg1 : i32, i32
  }
  func.func @transform_2(%arg0: i32, %arg1: i32, %arg2: i32) -> (i32, i32) {
    %c0_i32 = arith.constant 0 : i32
    %c0_i32_0 = arith.constant 0 : i32
    return %c0_i32, %arg1 : i32, i32
  }
  func.func @transform_3(%arg0: i32, %arg1: i32, %arg2: i32) -> (i32, i32) {
    %c0_i32 = arith.constant 0 : i32
    return %arg0, %arg1 : i32, i32
  }
  func.func @transform_4(%arg0: i32, %arg1: i32, %arg2: i32) -> (i32, i32) {
    %c0_i32 = arith.constant 0 : i32
    return %arg0, %arg1 : i32, i32
  }
}

module attributes {stable_mosaic.version = 11 : i64} {
  func.func @_matmul_bias_kernel(%arg0: i32, %arg1: i32, %arg2: i32, %arg3: memref<128x512xbf16, #tpu.memory_space<vmem>>, %arg4: memref<512x128xbf16, #tpu.memory_space<vmem>>, %arg5: memref<1x128xf32, #tpu.memory_space<vmem>>, %arg6: memref<128x128xf32, #tpu.memory_space<vmem>>, %arg7: memref<128x128xf32, #tpu.memory_space<vmem>>) attributes {dimension_semantics = [#tpu.dimension_semantics<parallel>, #tpu.dimension_semantics<parallel>, #tpu.dimension_semantics<arbitrary>], iteration_bounds = array<i64: 1, 1, 2>, scalar_prefetch = 0 : i64, scratch_operands = 1 : i64, tpu.core_type = #tpu.core_type<tc>, window_params = [{transform_indices = @transform_0, window_bounds = array<i64: 128, 512>}, {transform_indices = @transform_1, window_bounds = array<i64: 512, 128>}, {transform_indices = @transform_2, window_bounds = array<i64: 1, 128>}, {transform_indices = @transform_3, window_bounds = array<i64: 128, 128>}]} {
    %c0_i32 = arith.constant 0 : i32
    %0 = arith.cmpi eq, %arg2, %c0_i32 : i32
    %1 = arith.extui %0 : i1 to i32
    %c0_i32_0 = arith.constant 0 : i32
    %2 = arith.cmpi ne, %1, %c0_i32_0 : i32
    scf.if %2 {
      %cst_9 = arith.constant 0.000000e+00 : f32
      %12 = vector.broadcast %cst_9 : f32 to vector<128x128xf32>
      %c0_10 = arith.constant 0 : index
      %c0_11 = arith.constant 0 : index
      %13 = vector.load %arg7[%c0_10, %c0_11] : memref<128x128xf32, #tpu.memory_space<vmem>>, vector<128x128xf32>
      tpu.vector_store %arg7[%c0_10, %c0_11], %12 {strides = array<i32>} : memref<128x128xf32, #tpu.memory_space<vmem>>, vector<128x128xf32>,
    } else {
    }
    %c0 = arith.constant 0 : index
    %c0_1 = arith.constant 0 : index
    %3 = vector.load %arg7[%c0, %c0_1] : memref<128x128xf32, #tpu.memory_space<vmem>>, vector<128x128xf32>
    %c0_2 = arith.constant 0 : index
    %c0_3 = arith.constant 0 : index
    %4 = vector.load %arg3[%c0_2, %c0_3] : memref<128x512xbf16, #tpu.memory_space<vmem>>, vector<128x512xbf16>
    %c0_4 = arith.constant 0 : index
    %c0_5 = arith.constant 0 : index
    %5 = vector.load %arg4[%c0_4, %c0_5] : memref<512x128xbf16, #tpu.memory_space<vmem>>, vector<512x128xbf16>
    %cst = arith.constant dense<0.000000e+00> : vector<128x128xf32>
    %6 = tpu.matmul %4, %5, %cst {dimension_numbers = #tpu.dot_dimension_numbers<[1], [0], [0], [1], [0, 0, 1, 1], [], []>} : vector<128x512xbf16>, vector<512x128xbf16>, vector<128x128xf32> -> vector<128x128xf32>
    %7 = arith.addf %3, %6 : vector<128x128xf32>
    %c0_6 = arith.constant 0 : index
    %c0_7 = arith.constant 0 : index
    %8 = vector.load %arg7[%c0_6, %c0_7] : memref<128x128xf32, #tpu.memory_space<vmem>>, vector<128x128xf32>
    tpu.vector_store %arg7[%c0_6, %c0_7], %7 {strides = array<i32>} : memref<128x128xf32, #tpu.memory_space<vmem>>, vector<128x128xf32>,
    %c1_i32 = arith.constant 1 : i32
    %9 = arith.cmpi eq, %arg2, %c1_i32 : i32
    %10 = arith.extui %9 : i1 to i32
    %c0_i32_8 = arith.constant 0 : i32
    %11 = arith.cmpi ne, %10, %c0_i32_8 : i32
    scf.if %11 {
      %c0_9 = arith.constant 0 : index
      %c0_10 = arith.constant 0 : index
      %12 = vector.load %arg7[%c0_9, %c0_10] : memref<128x128xf32, #tpu.memory_space<vmem>>, vector<128x128xf32>
      %c0_11 = arith.constant 0 : index
      %c0_12 = arith.constant 0 : index
      %13 = vector.load %arg5[%c0_11, %c0_12] : memref<1x128xf32, #tpu.memory_space<vmem>>, vector<1x128xf32>
      %14 = vector.broadcast %13 : vector<1x128xf32> to vector<128x128xf32>
      %15 = arith.addf %12, %14 : vector<128x128xf32>
      %c0_13 = arith.constant 0 : index
      %c0_14 = arith.constant 0 : index
      %16 = vector.load %arg6[%c0_13, %c0_14] : memref<128x128xf32, #tpu.memory_space<vmem>>, vector<128x128xf32>
      tpu.vector_store %arg6[%c0_13, %c0_14], %15 {strides = array<i32>} : memref<128x128xf32, #tpu.memory_space<vmem>>, vector<128x128xf32>,
    } else {
    }
    return
  }
  func.func @transform_0(%arg0: i32, %arg1: i32, %arg2: i32) -> (i32, i32) {
    %c0_i32 = arith.constant 0 : i32
    return %arg0, %arg2 : i32, i32
  }
  func.func @transform_1(%arg0: i32, %arg1: i32, %arg2: i32) -> (i32, i32) {
    %c0_i32 = arith.constant 0 : i32
    return %arg2, %arg1 : i32, i32
  }
  func.func @transform_2(%arg0: i32, %arg1: i32, %arg2: i32) -> (i32, i32) {
    %c0_i32 = arith.constant 0 : i32
    %c0_i32_0 = arith.constant 0 : i32
    return %c0_i32, %arg1 : i32, i32
  }
  func.func @transform_3(%arg0: i32, %arg1: i32, %arg2: i32) -> (i32, i32) {
    %c0_i32 = arith.constant 0 : i32
    return %arg0, %arg1 : i32, i32
  }
}

module attributes {stable_mosaic.version = 11 : i64} {
  func.func @_groupnorm_kernel(%arg0: i32, %arg1: memref<1x64x64xf32, #tpu.memory_space<vmem>>, %arg2: memref<1x64xf32, #tpu.memory_space<vmem>>, %arg3: memref<1x64xf32, #tpu.memory_space<vmem>>, %arg4: memref<64x64xf32, #tpu.memory_space<vmem>>, %arg5: memref<1x64x64xf32, #tpu.memory_space<vmem>>) attributes {dimension_semantics = [#tpu.dimension_semantics<parallel>], iteration_bounds = array<i64: 2>, scalar_prefetch = 0 : i64, scratch_operands = 0 : i64, tpu.core_type = #tpu.core_type<tc>, window_params = [{transform_indices = @transform_0, window_bounds = array<i64: 1, 64, 64>}, {pipeline_mode = #tpu.pipeline_mode<synchronous>, transform_indices = @transform_1, window_bounds = array<i64: 1, 64>}, {pipeline_mode = #tpu.pipeline_mode<synchronous>, transform_indices = @transform_2, window_bounds = array<i64: 1, 64>}, {pipeline_mode = #tpu.pipeline_mode<synchronous>, transform_indices = @transform_3, window_bounds = array<i64: 64, 64>}, {transform_indices = @transform_4, window_bounds = array<i64: 1, 64, 64>}]} {
    %c0 = arith.constant 0 : index
    %c0_0 = arith.constant 0 : index
    %c0_1 = arith.constant 0 : index
    %0 = vector.load %arg1[%c0, %c0_0, %c0_1] : memref<1x64x64xf32, #tpu.memory_space<vmem>>, vector<1x64x64xf32>
    %cst = arith.constant dense<0.000000e+00> : vector<1x64xf32>
    %1 = vector.multi_reduction <add>, %0, %cst [1] : vector<1x64x64xf32> to vector<1x64xf32>
    %2 = arith.mulf %0, %0 : vector<1x64x64xf32>
    %cst_2 = arith.constant dense<0.000000e+00> : vector<1x64xf32>
    %3 = vector.multi_reduction <add>, %2, %cst_2 [1] : vector<1x64x64xf32> to vector<1x64xf32>
    %c0_3 = arith.constant 0 : index
    %c0_4 = arith.constant 0 : index
    %4 = vector.load %arg4[%c0_3, %c0_4] : memref<64x64xf32, #tpu.memory_space<vmem>>, vector<64x64xf32>
    %cst_5 = arith.constant dense<0.000000e+00> : vector<1x64xf32>
    %5 = tpu.matmul %1, %4, %cst_5 {dimension_numbers = #tpu.dot_dimension_numbers<[1], [0], [0], [1], [0, 0, 1, 1], [], []>} : vector<1x64xf32>, vector<64x64xf32>, vector<1x64xf32> -> vector<1x64xf32>
    %cst_6 = arith.constant 7.812500e-03 : f32
    %6 = vector.broadcast %cst_6 : f32 to vector<1x64xf32>
    %7 = arith.mulf %5, %6 : vector<1x64xf32>
    %cst_7 = arith.constant dense<0.000000e+00> : vector<1x64xf32>
    %8 = tpu.matmul %3, %4, %cst_7 {dimension_numbers = #tpu.dot_dimension_numbers<[1], [0], [0], [1], [0, 0, 1, 1], [], []>} : vector<1x64xf32>, vector<64x64xf32>, vector<1x64xf32> -> vector<1x64xf32>
    %cst_8 = arith.constant 7.812500e-03 : f32
    %9 = vector.broadcast %cst_8 : f32 to vector<1x64xf32>
    %10 = arith.mulf %8, %9 : vector<1x64xf32>
    %11 = arith.mulf %7, %7 : vector<1x64xf32>
    %12 = arith.subf %10, %11 : vector<1x64xf32>
    %cst_9 = arith.constant 9.99999997E-7 : f32
    %13 = vector.broadcast %cst_9 : f32 to vector<1x64xf32>
    %14 = arith.addf %12, %13 : vector<1x64xf32>
    %15 = math.rsqrt %14 : vector<1x64xf32>
    %16 = vector.shape_cast %7 : vector<1x64xf32> to vector<1x1x64xf32>
    %17 = vector.broadcast %16 : vector<1x1x64xf32> to vector<1x64x64xf32>
    %18 = arith.subf %0, %17 : vector<1x64x64xf32>
    %19 = vector.shape_cast %15 : vector<1x64xf32> to vector<1x1x64xf32>
    %20 = vector.broadcast %19 : vector<1x1x64xf32> to vector<1x64x64xf32>
    %21 = arith.mulf %18, %20 : vector<1x64x64xf32>
    %c0_10 = arith.constant 0 : index
    %c0_11 = arith.constant 0 : index
    %22 = vector.load %arg2[%c0_10, %c0_11] : memref<1x64xf32, #tpu.memory_space<vmem>>, vector<1x64xf32>
    %23 = vector.shape_cast %22 : vector<1x64xf32> to vector<1x1x64xf32>
    %24 = vector.broadcast %23 : vector<1x1x64xf32> to vector<1x64x64xf32>
    %25 = arith.mulf %21, %24 : vector<1x64x64xf32>
    %c0_12 = arith.constant 0 : index
    %c0_13 = arith.constant 0 : index
    %26 = vector.load %arg3[%c0_12, %c0_13] : memref<1x64xf32, #tpu.memory_space<vmem>>, vector<1x64xf32>
    %27 = vector.shape_cast %26 : vector<1x64xf32> to vector<1x1x64xf32>
    %28 = vector.broadcast %27 : vector<1x1x64xf32> to vector<1x64x64xf32>
    %29 = arith.addf %25, %28 : vector<1x64x64xf32>
    %c0_14 = arith.constant 0 : index
    %c0_15 = arith.constant 0 : index
    %c0_16 = arith.constant 0 : index
    %30 = vector.load %arg5[%c0_14, %c0_15, %c0_16] : memref<1x64x64xf32, #tpu.memory_space<vmem>>, vector<1x64x64xf32>
    tpu.vector_store %arg5[%c0_14, %c0_15, %c0_16], %29 {strides = array<i32>} : memref<1x64x64xf32, #tpu.memory_space<vmem>>, vector<1x64x64xf32>,
    return
  }
  func.func @transform_0(%arg0: i32) -> (i32, i32, i32) {
    %c0_i32 = arith.constant 0 : i32
    %c0_i32_0 = arith.constant 0 : i32
    %c0_i32_1 = arith.constant 0 : i32
    return %arg0, %c0_i32, %c0_i32_0 : i32, i32, i32
  }
  func.func @transform_1(%arg0: i32) -> (i32, i32) {
    %c0_i32 = arith.constant 0 : i32
    %c0_i32_0 = arith.constant 0 : i32
    %c0_i32_1 = arith.constant 0 : i32
    return %c0_i32, %c0_i32_0 : i32, i32
  }
  func.func @transform_2(%arg0: i32) -> (i32, i32) {
    %c0_i32 = arith.constant 0 : i32
    %c0_i32_0 = arith.constant 0 : i32
    %c0_i32_1 = arith.constant 0 : i32
    return %c0_i32, %c0_i32_0 : i32, i32
  }
  func.func @transform_3(%arg0: i32) -> (i32, i32) {
    %c0_i32 = arith.constant 0 : i32
    %c0_i32_0 = arith.constant 0 : i32
    %c0_i32_1 = arith.constant 0 : i32
    return %c0_i32, %c0_i32_0 : i32, i32
  }
  func.func @transform_4(%arg0: i32) -> (i32, i32, i32) {
    %c0_i32 = arith.constant 0 : i32
    %c0_i32_0 = arith.constant 0 : i32
    %c0_i32_1 = arith.constant 0 : i32
    return %arg0, %c0_i32, %c0_i32_0 : i32, i32, i32
  }
}

module attributes {stable_mosaic.version = 11 : i64} {
  func.func @_attention_kernel(%arg0: i32, %arg1: memref<1x64x64xf32, #tpu.memory_space<vmem>>, %arg2: memref<1x64x64xf32, #tpu.memory_space<vmem>>, %arg3: memref<1x64x64xf32, #tpu.memory_space<vmem>>, %arg4: memref<1x64x64xf32, #tpu.memory_space<vmem>>) attributes {dimension_semantics = [#tpu.dimension_semantics<parallel>], iteration_bounds = array<i64: 2>, scalar_prefetch = 0 : i64, scratch_operands = 0 : i64, tpu.core_type = #tpu.core_type<tc>, window_params = [{transform_indices = @transform_0, window_bounds = array<i64: 1, 64, 64>}, {transform_indices = @transform_1, window_bounds = array<i64: 1, 64, 64>}, {transform_indices = @transform_2, window_bounds = array<i64: 1, 64, 64>}, {transform_indices = @transform_3, window_bounds = array<i64: 1, 64, 64>}]} {
    %c0 = arith.constant 0 : index
    %c0_0 = arith.constant 0 : index
    %c0_1 = arith.constant 0 : index
    %0 = vector.load %arg1[%c0, %c0_0, %c0_1] : memref<1x64x64xf32, #tpu.memory_space<vmem>>, vector<1x64x64xf32>
    %c0_2 = arith.constant 0 : index
    %c0_3 = arith.constant 0 : index
    %c0_4 = arith.constant 0 : index
    %1 = vector.load %arg2[%c0_2, %c0_3, %c0_4] : memref<1x64x64xf32, #tpu.memory_space<vmem>>, vector<1x64x64xf32>
    %c0_5 = arith.constant 0 : index
    %c0_6 = arith.constant 0 : index
    %c0_7 = arith.constant 0 : index
    %2 = vector.load %arg3[%c0_5, %c0_6, %c0_7] : memref<1x64x64xf32, #tpu.memory_space<vmem>>, vector<1x64x64xf32>
    "tpu.trace_start"() <{level = 10 : i32, message = "bqc,bkc->bqk"}> : () -> ()
    %cst = arith.constant dense<0.000000e+00> : vector<1x64x64xf32>
    %3 = tpu.matmul %0, %1, %cst {dimension_numbers = #tpu.dot_dimension_numbers<[2], [2], [1], [1], [0, 0, 0, 1, 1, 1], [0], [0]>} : vector<1x64x64xf32>, vector<1x64x64xf32>, vector<1x64x64xf32> -> vector<1x64x64xf32>
    "tpu.trace_stop"() : () -> ()
    %cst_8 = arith.constant 1.250000e-01 : f32
    %4 = vector.broadcast %cst_8 : f32 to vector<1x64x64xf32>
    %5 = arith.mulf %3, %4 : vector<1x64x64xf32>
    %cst_9 = arith.constant dense<0xFF800000> : vector<1x64xf32>
    %6 = vector.multi_reduction <maximumf>, %5, %cst_9 [2] : vector<1x64x64xf32> to vector<1x64xf32>
    %7 = vector.shape_cast %6 : vector<1x64xf32> to vector<1x64x1xf32>
    %8 = vector.broadcast %7 : vector<1x64x1xf32> to vector<1x64x64xf32>
    %9 = arith.subf %5, %8 : vector<1x64x64xf32>
    %10 = math.exp %9 : vector<1x64x64xf32>
    %cst_10 = arith.constant dense<0.000000e+00> : vector<1x64xf32>
    %11 = vector.multi_reduction <add>, %10, %cst_10 [2] : vector<1x64x64xf32> to vector<1x64xf32>
    %12 = vector.shape_cast %11 : vector<1x64xf32> to vector<1x64x1xf32>
    "tpu.trace_start"() <{level = 10 : i32, message = "bqk,bkc->bqc"}> : () -> ()
    %cst_11 = arith.constant dense<0.000000e+00> : vector<1x64x64xf32>
    %13 = tpu.matmul %10, %2, %cst_11 {dimension_numbers = #tpu.dot_dimension_numbers<[2], [1], [1], [2], [0, 0, 0, 1, 1, 2], [0], [0]>} : vector<1x64x64xf32>, vector<1x64x64xf32>, vector<1x64x64xf32> -> vector<1x64x64xf32>
    "tpu.trace_stop"() : () -> ()
    %14 = vector.broadcast %12 : vector<1x64x1xf32> to vector<1x64x64xf32>
    %15 = arith.divf %13, %14 : vector<1x64x64xf32>
    %c0_12 = arith.constant 0 : index
    %c0_13 = arith.constant 0 : index
    %c0_14 = arith.constant 0 : index
    %16 = vector.load %arg4[%c0_12, %c0_13, %c0_14] : memref<1x64x64xf32, #tpu.memory_space<vmem>>, vector<1x64x64xf32>
    tpu.vector_store %arg4[%c0_12, %c0_13, %c0_14], %15 {strides = array<i32>} : memref<1x64x64xf32, #tpu.memory_space<vmem>>, vector<1x64x64xf32>,
    return
  }
  func.func @transform_0(%arg0: i32) -> (i32, i32, i32) {
    %c0_i32 = arith.constant 0 : i32
    %c0_i32_0 = arith.constant 0 : i32
    %c0_i32_1 = arith.constant 0 : i32
    return %arg0, %c0_i32, %c0_i32_0 : i32, i32, i32
  }
  func.func @transform_1(%arg0: i32) -> (i32, i32, i32) {
    %c0_i32 = arith.constant 0 : i32
    %c0_i32_0 = arith.constant 0 : i32
    %c0_i32_1 = arith.constant 0 : i32
    return %arg0, %c0_i32, %c0_i32_0 : i32, i32, i32
  }
  func.func @transform_2(%arg0: i32) -> (i32, i32, i32) {
    %c0_i32 = arith.constant 0 : i32
    %c0_i32_0 = arith.constant 0 : i32
    %c0_i32_1 = arith.constant 0 : i32
    return %arg0, %c0_i32, %c0_i32_0 : i32, i32, i32
  }
  func.func @transform_3(%arg0: i32) -> (i32, i32, i32) {
    %c0_i32 = arith.constant 0 : i32
    %c0_i32_0 = arith.constant 0 : i32
    %c0_i32_1 = arith.constant 0 : i32
    return %arg0, %c0_i32, %c0_i32_0 : i32, i32, i32
  }
}

module attributes {stable_mosaic.version = 11 : i64} {
  func.func @_matmul_bias_kernel(%arg0: i32, %arg1: i32, %arg2: i32, %arg3: memref<128x128xbf16, #tpu.memory_space<vmem>>, %arg4: memref<128x128xbf16, #tpu.memory_space<vmem>>, %arg5: memref<1x128xf32, #tpu.memory_space<vmem>>, %arg6: memref<128x128xf32, #tpu.memory_space<vmem>>, %arg7: memref<128x128xf32, #tpu.memory_space<vmem>>, %arg8: memref<128x128xf32, #tpu.memory_space<vmem>>) attributes {dimension_semantics = [#tpu.dimension_semantics<parallel>, #tpu.dimension_semantics<parallel>, #tpu.dimension_semantics<arbitrary>], iteration_bounds = array<i64: 1, 1, 1>, scalar_prefetch = 0 : i64, scratch_operands = 1 : i64, tpu.core_type = #tpu.core_type<tc>, window_params = [{transform_indices = @transform_0, window_bounds = array<i64: 128, 128>}, {transform_indices = @transform_1, window_bounds = array<i64: 128, 128>}, {transform_indices = @transform_2, window_bounds = array<i64: 1, 128>}, {transform_indices = @transform_3, window_bounds = array<i64: 128, 128>}, {transform_indices = @transform_4, window_bounds = array<i64: 128, 128>}]} {
    %c0_i32 = arith.constant 0 : i32
    %0 = arith.cmpi eq, %arg2, %c0_i32 : i32
    %1 = arith.extui %0 : i1 to i32
    %c0_i32_0 = arith.constant 0 : i32
    %2 = arith.cmpi ne, %1, %c0_i32_0 : i32
    scf.if %2 {
      %cst_10 = arith.constant 0.000000e+00 : f32
      %12 = vector.broadcast %cst_10 : f32 to vector<128x128xf32>
      %c0_11 = arith.constant 0 : index
      %c0_12 = arith.constant 0 : index
      %13 = vector.load %arg8[%c0_11, %c0_12] : memref<128x128xf32, #tpu.memory_space<vmem>>, vector<128x128xf32>
      tpu.vector_store %arg8[%c0_11, %c0_12], %12 {strides = array<i32>} : memref<128x128xf32, #tpu.memory_space<vmem>>, vector<128x128xf32>,
    } else {
    }
    %c0 = arith.constant 0 : index
    %c0_1 = arith.constant 0 : index
    %3 = vector.load %arg8[%c0, %c0_1] : memref<128x128xf32, #tpu.memory_space<vmem>>, vector<128x128xf32>
    %c0_2 = arith.constant 0 : index
    %c0_3 = arith.constant 0 : index
    %4 = vector.load %arg3[%c0_2, %c0_3] : memref<128x128xbf16, #tpu.memory_space<vmem>>, vector<128x128xbf16>
    %c0_4 = arith.constant 0 : index
    %c0_5 = arith.constant 0 : index
    %5 = vector.load %arg4[%c0_4, %c0_5] : memref<128x128xbf16, #tpu.memory_space<vmem>>, vector<128x128xbf16>
    %cst = arith.constant dense<0.000000e+00> : vector<128x128xf32>
    %6 = tpu.matmul %4, %5, %cst {dimension_numbers = #tpu.dot_dimension_numbers<[1], [0], [0], [1], [0, 0, 1, 1], [], []>} : vector<128x128xbf16>, vector<128x128xbf16>, vector<128x128xf32> -> vector<128x128xf32>
    %7 = arith.addf %3, %6 : vector<128x128xf32>
    %c0_6 = arith.constant 0 : index
    %c0_7 = arith.constant 0 : index
    %8 = vector.load %arg8[%c0_6, %c0_7] : memref<128x128xf32, #tpu.memory_space<vmem>>, vector<128x128xf32>
    tpu.vector_store %arg8[%c0_6, %c0_7], %7 {strides = array<i32>} : memref<128x128xf32, #tpu.memory_space<vmem>>, vector<128x128xf32>,
    %c0_i32_8 = arith.constant 0 : i32
    %9 = arith.cmpi eq, %arg2, %c0_i32_8 : i32
    %10 = arith.extui %9 : i1 to i32
    %c0_i32_9 = arith.constant 0 : i32
    %11 = arith.cmpi ne, %10, %c0_i32_9 : i32
    scf.if %11 {
      %c0_10 = arith.constant 0 : index
      %c0_11 = arith.constant 0 : index
      %12 = vector.load %arg8[%c0_10, %c0_11] : memref<128x128xf32, #tpu.memory_space<vmem>>, vector<128x128xf32>
      %c0_12 = arith.constant 0 : index
      %c0_13 = arith.constant 0 : index
      %13 = vector.load %arg5[%c0_12, %c0_13] : memref<1x128xf32, #tpu.memory_space<vmem>>, vector<1x128xf32>
      %14 = vector.broadcast %13 : vector<1x128xf32> to vector<128x128xf32>
      %15 = arith.addf %12, %14 : vector<128x128xf32>
      %c0_14 = arith.constant 0 : index
      %c0_15 = arith.constant 0 : index
      %16 = vector.load %arg6[%c0_14, %c0_15] : memref<128x128xf32, #tpu.memory_space<vmem>>, vector<128x128xf32>
      %17 = arith.addf %15, %16 : vector<128x128xf32>
      %c0_16 = arith.constant 0 : index
      %c0_17 = arith.constant 0 : index
      %18 = vector.load %arg7[%c0_16, %c0_17] : memref<128x128xf32, #tpu.memory_space<vmem>>, vector<128x128xf32>
      tpu.vector_store %arg7[%c0_16, %c0_17], %17 {strides = array<i32>} : memref<128x128xf32, #tpu.memory_space<vmem>>, vector<128x128xf32>,
    } else {
    }
    return
  }
  func.func @transform_0(%arg0: i32, %arg1: i32, %arg2: i32) -> (i32, i32) {
    %c0_i32 = arith.constant 0 : i32
    return %arg0, %arg2 : i32, i32
  }
  func.func @transform_1(%arg0: i32, %arg1: i32, %arg2: i32) -> (i32, i32) {
    %c0_i32 = arith.constant 0 : i32
    return %arg2, %arg1 : i32, i32
  }
  func.func @transform_2(%arg0: i32, %arg1: i32, %arg2: i32) -> (i32, i32) {
    %c0_i32 = arith.constant 0 : i32
    %c0_i32_0 = arith.constant 0 : i32
    return %c0_i32, %arg1 : i32, i32
  }
  func.func @transform_3(%arg0: i32, %arg1: i32, %arg2: i32) -> (i32, i32) {
    %c0_i32 = arith.constant 0 : i32
    return %arg0, %arg1 : i32, i32
  }
  func.func @transform_4(%arg0: i32, %arg1: i32, %arg2: i32) -> (i32, i32) {
    %c0_i32 = arith.constant 0 : i32
    return %arg0, %arg1 : i32, i32
  }
}

</mosaic_0001>

<bundles_post_ra>
// kernel: vae_encoder_forward.28
= control target key start
LH: loop header
LB: loop body
LE: loop exit
PB: predicated region body
PF: predicated region fallthrough
CT: control target
= control target key end

     0   :  { %s1288_s15 = smov 0   ;;  %s2020_s0 = inlined_call_operand.vmem [shape: f32[2,256,32], index: 0, kind: input, shape index: {}]   ;;  %s2021_s1 = inlined_call_operand.vmem [shape: f32[1,32], index: 1, kind: input, shape index: {}]   ;;  %s2022_s2 = inlined_call_operand.vmem [shape: f32[1,32], index: 2, kind: input, shape index: {}]   ;;  %s2023_s3 = inlined_call_operand.vmem [shape: f32[32,32], index: 3, kind: input, shape index: {}]   ;;  %s2024_s4 = inlined_call_operand.vmem [shape: f32[2,256,32], index: 4, kind: output, shape index: {}]  }
   0x1 LB: > { %s1018_s16 = sadd.s32 4294967295, %s1258_s15   ;;  %p1022_p0 = scmp.ge.s32.totalorder %s1258_s15, 1  ;;  %s1258_s15 = sphi %s1288_s15, %s14_s15  }
   0x2   : > { %p162_p1 = scmp.lt.s32.totalorder %s1258_s15, 3 }
   0x4   : > { %p163_p2 = pnand %p1022_p0, %p162_p1 }
   0x6   : > { %166 = sbr.rel (%p163_p2) target bundleno = 424 (0x1a8), region = 36 }
   0xd   : > { %v401_v0 = vld [vmem:[%s2023_s3] sm:$0xff]  ;;  %v402_v1 = vld [vmem:[%s2023_s3 + $0x8] sm:$0xff]  ;;  %v403_v2 = vld [vmem:[%s2023_s3 + $0x10] sm:$0xff]  ;;  %v1260_v3 = vmov 0.0|0.0   ;;  %p188_p3 = scmp.lt.s32.totalorder %s1018_s16, 1  ;;  %vm1261_vm0 = vmmov 0  }
   0xe   : > { %1099 = vmatprep.subr.bf16.mxu0 %v1260_v3  ;;  %v1100_v4 = vpack.c.bf16 %v402_v1, %v401_v0  ;;  %1105 = vmatprep.subr.bf16.mxu1 %v1260_v3  ;;  %v404_v5 = vld [vmem:[%s2023_s3 + $0x18] sm:$0xff]  ;;  %v1262_v6 = vmov 0.0   ;;  %vm230_vm1 = vcmask 261120  }
   0xf   : > { %1085 = vmatprep.mubr.msk.f32.mxu0 %vm1261_vm0, %v1262_v6  ;;  %1096 = vmatprep.mubr.msk.f32.mxu1 %vm1261_vm0, %v1262_v6  ;;  %v1103_v7 = vpack.c.bf16 %v404_v5, %v403_v2  ;;  %s2029_s16 = smov (!%p188_p3, %s1018_s16), 1 }
  0x10   : > { %1101 = vmatpush3.bf16.msra.mxu0 %v1100_v4  ;;  %1107 = vmatpush3.bf16.msra.mxu1 %v1100_v4  ;;  %s1065_s25 = sshll.u32 %s2029_s16, 8 }
  0x11   : > { %1102 = vmatprep.subr.bf16.mxu0 %v1260_v3  ;;  %1108 = vmatprep.subr.bf16.mxu1 %v1260_v3  ;;  %s1316_s28 = scalar_lea.vmem %s2020_s0, %s1065_s25  ;;  %s1907_s9 = scalar_lea.vmem %s2024_s4, %s1065_s25 }
  0x12   : > { %v1319_v8 = vld [vmem:[%s1316_s28] sm:$0xff]  ;;  %v1322_v9 = vld [vmem:[%s1316_s28 + $0x8] sm:$0xff]  ;;  %v1325_v10 = vld [vmem:[%s1316_s28 + $0x10] sm:$0xff] }
  0x13   : > { %v1328_v11 = vld [vmem:[%s1316_s28 + $0x18] sm:$0xff]  ;;  %v231_v12 = vsel %vm230_vm1, %v1319_v8, 0.0  ;;  %v232_v13 = vsel %vm230_vm1, %v1322_v9, 0.0  ;;  %v234_v14 = vsel %vm230_vm1, %v1325_v10, 0.0  ;;  %v1337_v15 = vld [vmem:[%s1316_s28 + $0x20] sm:$0xff]  ;;  %v1342_v18 = vld [vmem:[%s1316_s28 + $0x28] sm:$0xff]  ;;  %v300_v37 = vmul.f32 %v1319_v8, %v1319_v8 }
  0x14   : > { %1104 = vmatpush3.bf16.msra.mxu0 %v1103_v7  ;;  %1110 = vmatpush3.bf16.msra.mxu1 %v1103_v7  ;;  %v233_v16 = vadd.f32 %v232_v13, %v231_v12  ;;  %v236_v17 = vsel %vm230_vm1, %v1328_v11, 0.0  ;;  %v238_v20 = vsel %vm230_vm1, %v1337_v15, 0.0  ;;  %v1347_v21 = vld [vmem:[%s1316_s28 + $0x30] sm:$0xff]  ;;  %v240_v23 = vsel %vm230_vm1, %v1342_v18, 0.0  ;;  %v1352_v24 = vld [vmem:[%s1316_s28 + $0x38] sm:$0xff]  ;;  %v1357_v27 = vld [vmem:[%s1316_s28 + $0x40] sm:$0xff] }
  0x15   : > { %v242_v26 = vsel %vm230_vm1, %v1347_v21, 0.0  ;;  %v244_v29 = vsel %vm230_vm1, %v1352_v24, 0.0  ;;  %v1362_v30 = vld [vmem:[%s1316_s28 + $0x48] sm:$0xff]  ;;  %v246_v32 = vsel %vm230_vm1, %v1357_v27, 0.0  ;;  %v1367_v33 = vld [vmem:[%s1316_s28 + $0x50] sm:$0xff]  ;;  %v1370_v35 = vld [vmem:[%s1316_s28 + $0x58] sm:$0xff]  ;;  %v301_v38 = vmul.f32 %v1322_v9, %v1322_v9 }
  0x16   : > { %v235_v19 = vadd.f32 %v234_v14, %v233_v16  ;;  %v248_v36 = vsel %vm230_vm1, %v1362_v30, 0.0  ;;  %v302_v39 = vmul.f32 %v1325_v10, %v1325_v10  ;;  %v250_v41 = vsel %vm230_vm1, %v1367_v33, 0.0  ;;  %v1385_v43 = vld [vmem:[%s1316_s28 + $0x60] sm:$0xff]  ;;  %v1395_v50 = vld [vmem:[%s1316_s28 + $0x68] sm:$0xff]  ;;  %v1403_v56 = vld [vmem:[%s1316_s28 + $0x70] sm:$0xff] }
  0x17   : > { %v303_v42 = vmul.f32 %v1328_v11, %v1328_v11  ;;  %v252_v45 = vsel %vm230_vm1, %v1370_v35, 0.0  ;;  %v304_v46 = vmul.f32 %v1337_v15, %v1337_v15  ;;  %v332_v47 = vsel %vm230_vm1, %v300_v37, 0.0  ;;  %v1411_v62 = vld [vmem:[%s1316_s28 + $0x78] sm:$0xff]  ;;  %v1419_v4 = vld [vmem:[%s1316_s28 + $0x80] sm:$0xff]  ;;  %v1427_v14 = vld [vmem:[%s1316_s28 + $0x88] sm:$0xff] }
  0x18   : > { %v237_v22 = vadd.f32 %v236_v17, %v235_v19  ;;  %v333_v48 = vsel %vm230_vm1, %v301_v38, 0.0  ;;  %v335_v49 = vsel %vm230_vm1, %v302_v39, 0.0  ;;  %v254_v53 = vsel %vm230_vm1, %v1385_v43, 0.0 }
  0x19   : > { %v334_v52 = vadd.f32 %v333_v48, %v332_v47  ;;  %v305_v54 = vmul.f32 %v1342_v18, %v1342_v18  ;;  %v337_v55 = vsel %vm230_vm1, %v303_v42, 0.0  ;;  %v256_v59 = vsel %vm230_vm1, %v1395_v50, 0.0  ;;  %v1459_v47 = vld [vmem:[%s1316_s28 + $0xa8] sm:$0xff] }
  0x1a   : > { %v239_v25 = vadd.f32 %v238_v20, %v237_v22  ;;  %v306_v60 = vmul.f32 %v1347_v21, %v1347_v21  ;;  %v339_v61 = vsel %vm230_vm1, %v304_v46, 0.0  ;;  %v258_v1 = vsel %vm230_vm1, %v1403_v56, 0.0 }
  0x1b   : > { %v336_v58 = vadd.f32 %v335_v49, %v334_v52  ;;  %v307_v2 = vmul.f32 %v1352_v24, %v1352_v24  ;;  %v341_v3 = vsel %vm230_vm1, %v305_v54, 0.0  ;;  %v260_v7 = vsel %vm230_vm1, %v1411_v62, 0.0  ;;  %v1467_v54 = vld [vmem:[%s1316_s28 + $0xb0] sm:$0xff] }
  0x1c   : > { %v241_v28 = vadd.f32 %v240_v23, %v239_v25  ;;  %v308_v12 = vmul.f32 %v1357_v27, %v1357_v27  ;;  %v343_v13 = vsel %vm230_vm1, %v306_v60, 0.0  ;;  %v262_v19 = vsel %vm230_vm1, %v1419_v4, 0.0  ;;  %v1435_v23 = vld [vmem:[%s1316_s28 + $0x90] sm:$0xff] }
  0x1d   : > { %v338_v0 = vadd.f32 %v337_v55, %v336_v58  ;;  %v309_v20 = vmul.f32 %v1362_v30, %v1362_v30  ;;  %v345_v22 = vsel %vm230_vm1, %v307_v2, 0.0  ;;  %v266_v37 = vsel %vm230_vm1, %v1435_v23, 0.0 }
  0x1e   : > { %v243_v31 = vadd.f32 %v242_v26, %v241_v28  ;;  %v264_v28 = vsel %vm230_vm1, %v1427_v14, 0.0  ;;  %v311_v38 = vmul.f32 %v1370_v35, %v1370_v35  ;;  %v313_v52 = vmul.f32 %v1395_v50, %v1395_v50 }
  0x1f   : > { %v340_v6 = vadd.f32 %v339_v61, %v338_v0  ;;  %v349_v39 = vsel %vm230_vm1, %v309_v20, 0.0  ;;  %v272_v58 = vsel %vm230_vm1, %v1459_v47, 0.0  ;;  %v1475_v61 = vld [vmem:[%s1316_s28 + $0xb8] sm:$0xff]  ;;  %v315_v2 = vmul.f32 %v1411_v62, %v1411_v62 }
  0x20   : > { %v245_v34 = vadd.f32 %v244_v29, %v243_v31  ;;  %v310_v29 = vmul.f32 %v1367_v33, %v1367_v33  ;;  %v347_v31 = vsel %vm230_vm1, %v308_v12, 0.0  ;;  %v276_v12 = vsel %vm230_vm1, %v1475_v61, 0.0 }
  0x21   : > { %v342_v17 = vadd.f32 %v341_v3, %v340_v6  ;;  %v357_v3 = vsel %vm230_vm1, %v313_v52, 0.0 }
  0x22   : > { %v247_v40 = vadd.f32 %v246_v32, %v245_v34  ;;  %v1443_v32 = vld [vmem:[%s1316_s28 + $0x98] sm:$0xff]  ;;  %v351_v46 = vsel %vm230_vm1, %v310_v29, 0.0 }
  0x23   : > { %v344_v26 = vadd.f32 %v343_v13, %v342_v17  ;;  %v316_v13 = vmul.f32 %v1419_v4, %v1419_v4  ;;  %v1491_v17 = vld [vmem:[%s1316_s28 + $0xc8] sm:$0xff] }
  0x24   : > { %v249_v44 = vadd.f32 %v248_v36, %v247_v40  ;;  %v1451_v40 = vld [vmem:[%s1316_s28 + $0xa0] sm:$0xff] }
  0x25   : > { %v346_v36 = vadd.f32 %v345_v22, %v344_v26  ;;  %v361_v26 = vsel %vm230_vm1, %v315_v2, 0.0  ;;  %v320_v52 = vmul.f32 %v1451_v40, %v1451_v40 }
  0x26   : > { %v251_v51 = vadd.f32 %v250_v41, %v249_v44  ;;  %v268_v44 = vsel %vm230_vm1, %v1443_v32, 0.0 }
  0x27   : > { %v348_v42 = vadd.f32 %v347_v31, %v346_v36  ;;  %v318_v36 = vmul.f32 %v1435_v23, %v1435_v23 }
  0x28   : > { %v253_v57 = vadd.f32 %v252_v45, %v251_v51  ;;  %v312_v45 = vmul.f32 %v1385_v43, %v1385_v43  ;;  %v270_v51 = vsel %vm230_vm1, %v1451_v40, 0.0 }
  0x29   : > { %v350_v49 = vadd.f32 %v349_v39, %v348_v42 }
  0x2a   : > { %v255_v63 = vadd.f32 %v254_v53, %v253_v57  ;;  %v353_v53 = vsel %vm230_vm1, %v311_v38, 0.0  ;;  %v355_v60 = vsel %vm230_vm1, %v312_v45, 0.0  ;;  %v1507_v38 = vld [vmem:[%s1316_s28 + $0xd8] sm:$0xff] }
  0x2b   : > { %v352_v57 = vadd.f32 %v351_v46, %v350_v49  ;;  %v1515_v46 = vld [vmem:[%s1316_s28 + $0xe0] sm:$0xff] }
  0x2c   : > { %v257_v5 = vadd.f32 %v256_v59, %v255_v63  ;;  %v314_v59 = vmul.f32 %v1403_v56, %v1403_v56 }
  0x2d   : > { %v354_v0 = vadd.f32 %v353_v53, %v352_v57  ;;  %v367_v53 = vsel %vm230_vm1, %v318_v36, 0.0 }
  0x2e   : > { %v259_v16 = vadd.f32 %v258_v1, %v257_v5  ;;  %v274_v1 = vsel %vm230_vm1, %v1467_v54, 0.0  ;;  %v1483_v5 = vld [vmem:[%s1316_s28 + $0xc0] sm:$0xff] }
  0x2f   : > { %v278_v22 = vsel %vm230_vm1, %v1483_v5, 0.0 }
  0x30   : > { %v261_v25 = vadd.f32 %v260_v7, %v259_v16  ;;  %v356_v7 = vadd.f32 %v355_v60, %v354_v0  ;;  %v359_v16 = vsel %vm230_vm1, %v314_v59, 0.0  ;;  %v286_v59 = vsel %vm230_vm1, %v1515_v46, 0.0  ;;  %v1531_v0 = vld [vmem:[%s1316_s28 + $0xf0] sm:$0xff] }
  0x31   : > { %v321_v60 = vmul.f32 %v1459_v47, %v1459_v47 }
  0x32   : > { %v263_v34 = vadd.f32 %v262_v19, %v261_v25  ;;  %v358_v20 = vadd.f32 %v357_v3, %v356_v7  ;;  %v317_v25 = vmul.f32 %v1427_v14, %v1427_v14  ;;  %v371_v7 = vsel %vm230_vm1, %v320_v52, 0.0 }
  0x33   : > { %v327_v52 = vmul.f32 %v1507_v38, %v1507_v38 }
  0x34   : > { %v265_v41 = vadd.f32 %v264_v28, %v263_v34  ;;  %v1499_v28 = vld [vmem:[%s1316_s28 + $0xd0] sm:$0xff]  ;;  %v360_v31 = vadd.f32 %v359_v16, %v358_v20  ;;  %v280_v34 = vsel %vm230_vm1, %v1491_v17, 0.0  ;;  %v365_v45 = vsel %vm230_vm1, %v317_v25, 0.0 }
  0x35   : > { %v282_v42 = vsel %vm230_vm1, %v1499_v28, 0.0  ;;  %v323_v20 = vmul.f32 %v1475_v61, %v1475_v61 }
  0x36   : > { %v267_v48 = vadd.f32 %v266_v37, %v265_v41  ;;  %v363_v37 = vsel %vm230_vm1, %v316_v13, 0.0  ;;  %v362_v41 = vadd.f32 %v361_v26, %v360_v31  ;;  %v324_v31 = vmul.f32 %v1483_v5, %v1483_v5 }
  0x38   : > { %v269_v55 = vadd.f32 %v268_v44, %v267_v48  ;;  %v319_v44 = vmul.f32 %v1443_v32, %v1443_v32  ;;  %v364_v49 = vadd.f32 %v363_v37, %v362_v41  ;;  %v377_v41 = vsel %vm230_vm1, %v323_v20, 0.0 }
  0x3a   : > { %v271_v63 = vadd.f32 %v270_v51, %v269_v55  ;;  %v284_v51 = vsel %vm230_vm1, %v1507_v38, 0.0  ;;  %v1523_v55 = vld [vmem:[%s1316_s28 + $0xe8] sm:$0xff] }
  0x3b   : > { %v288_v3 = vsel %vm230_vm1, %v1523_v55, 0.0 }
  0x3c   : > { %v273_v6 = vadd.f32 %v272_v58, %v271_v63  ;;  %v366_v58 = vadd.f32 %v365_v45, %v364_v49  ;;  %v369_v63 = vsel %vm230_vm1, %v319_v44, 0.0  ;;  %v326_v45 = vmul.f32 %v1499_v28, %v1499_v28 }
  0x3e   : > { %v275_v19 = vadd.f32 %v274_v1, %v273_v6  ;;  %v368_v2 = vadd.f32 %v367_v53, %v366_v58  ;;  %v322_v6 = vmul.f32 %v1467_v54, %v1467_v54 }
  0x40   : > { %v277_v29 = vadd.f32 %v276_v12, %v275_v19  ;;  %v1539_v12 = vld [vmem:[%s1316_s28 + $0xf8] sm:$0xff]  ;;  %v370_v16 = vadd.f32 %v369_v63, %v368_v2  ;;  %v290_v19 = vsel %vm230_vm1, %v1531_v0, 0.0  ;;  %v329_v2 = vmul.f32 %v1523_v55, %v1523_v55 }
  0x42   : > { %v279_v39 = vadd.f32 %v278_v22, %v277_v29  ;;  %v373_v22 = vsel %vm230_vm1, %v321_v60, 0.0  ;;  %v372_v26 = vadd.f32 %v371_v7, %v370_v16  ;;  %v292_v29 = vsel %vm230_vm1, %v1539_v12, 0.0 }
  0x43   : > { %v383_v60 = vsel %vm230_vm1, %v326_v45, 0.0 }
  0x44   : > { %v281_v48 = vadd.f32 %v280_v34, %v279_v39  ;;  %v375_v34 = vsel %vm230_vm1, %v322_v6, 0.0  ;;  %v374_v37 = vadd.f32 %v373_v22, %v372_v26  ;;  %v325_v39 = vmul.f32 %v1491_v17, %v1491_v17 }
  0x45   : > { %v331_v22 = vmul.f32 %v1539_v12, %v1539_v12 }
  0x46   : > { %v283_v57 = vadd.f32 %v282_v42, %v281_v48  ;;  %v376_v44 = vadd.f32 %v375_v34, %v374_v37  ;;  %v379_v48 = vsel %vm230_vm1, %v324_v31, 0.0  ;;  %v381_v53 = vsel %vm230_vm1, %v325_v39, 0.0 }
  0x48   : > { %v285_v1 = vadd.f32 %v284_v51, %v283_v57  ;;  %v378_v51 = vadd.f32 %v377_v41, %v376_v44 }
  0x4a   : > { %v287_v13 = vadd.f32 %v286_v59, %v285_v1  ;;  %v380_v58 = vadd.f32 %v379_v48, %v378_v51  ;;  %v328_v59 = vmul.f32 %v1515_v46, %v1515_v46 }
  0x4c   : > { %v289_v25 = vadd.f32 %v288_v3, %v287_v13  ;;  %v382_v1 = vadd.f32 %v381_v53, %v380_v58  ;;  %v385_v3 = vsel %vm230_vm1, %v327_v52, 0.0  ;;  %v330_v13 = vmul.f32 %v1531_v0, %v1531_v0 }
  0x4d   : > { %v387_v16 = vsel %vm230_vm1, %v328_v59, 0.0 }
  0x4e   : > { %v291_v36 = vadd.f32 %v290_v19, %v289_v25  ;;  %v384_v7 = vadd.f32 %v383_v60, %v382_v1  ;;  %v389_v25 = vsel %vm230_vm1, %v329_v2, 0.0  ;;  %v391_v31 = vsel %vm230_vm1, %v330_v13, 0.0 }
  0x50   : > { %v293_v42 = vadd.f32 %v292_v29, %v291_v36  ;;  %v386_v20 = vadd.f32 %v385_v3, %v384_v7  ;;  %v393_v36 = vsel %vm230_vm1, %v331_v22, 0.0 }
  0x52   : > { %v294_v49 = vrot.slane %v293_v42, 4  ;;  %v388_v29 = vadd.f32 %v387_v16, %v386_v20 }
  0x54   : > { %v295_v57 = vadd.f32 %v294_v49, %v293_v42  ;;  %v390_v34 = vadd.f32 %v389_v25, %v388_v29 }
  0x56   : > { %v296_v63 = vrot.slane %v295_v57, 2  ;;  %v392_v37 = vadd.f32 %v391_v31, %v390_v34 }
  0x58   : > { %v297_v6 = vadd.f32 %v296_v63, %v295_v57  ;;  %v394_v39 = vadd.f32 %v393_v36, %v392_v37  ;;  %v557_v57 = vlaneseq }
  0x5a   : > { %v298_v19 = vrot.slane %v297_v6, 1  ;;  %v395_v41 = vrot.slane %v394_v39, 4  ;;  %v558_v59 = vshrl.u32 %v557_v57, 7 }
  0x5c   : > { %v299_v26 = vadd.f32 %v298_v19, %v297_v6  ;;  %v396_v42 = vadd.f32 %v395_v41, %v394_v39  ;;  %v559_v2 = vsub.s32 0, %v558_v59 }
  0x5e   : > { %1086 = vmatmul.mubr.msk.f32.vlgmr.msra.gmra.mrb[0].mxu0 %vm230_vm1, %v299_v26  ;;  %v397_v44 = vrot.slane %v396_v42, 2 }
  0x60   : > { %v398_v45 = vadd.f32 %v397_v44, %v396_v42 }
  0x62   : > { %v399_v48 = vrot.slane %v398_v45, 1 }
  0x64   : > { %v400_v49 = vadd.f32 %v399_v48, %v398_v45 }
  0x66   : > { %1097 = vmatmul.mubr.msk.f32.vlgmr.msra.gmra.mrb[0].mxu1 %vm230_vm1, %v400_v49 }
 0x131   : > { %v474_v51 = vpop.f32.mrb[0].mxu0 }
 0x132   : > { %v1087_v52 = vpop.f32.mrb[1].mxu0  ;;  %v478_v53 = vmul.f32 0.00390625, %v474_v51 }
 0x134   : > { %v553_v58 = vmul.f32 %v478_v53, %v478_v53  ;;  %v1576_v7 = vrot.slane %v478_v53, %v559_v2 }
 0x136   : > { %v561_v13 = vsub.f32 %v1319_v8, %v1576_v7  ;;  %v562_v16 = vsub.f32 %v1322_v9, %v1576_v7  ;;  %v563_v19 = vsub.f32 %v1325_v10, %v1576_v7  ;;  %v564_v20 = vsub.f32 %v1328_v11, %v1576_v7 }
 0x137   : > { %v565_v22 = vsub.f32 %v1337_v15, %v1576_v7  ;;  %v566_v25 = vsub.f32 %v1342_v18, %v1576_v7  ;;  %v567_v26 = vsub.f32 %v1347_v21, %v1576_v7  ;;  %v568_v8 = vsub.f32 %v1352_v24, %v1576_v7 }
 0x138   : > { %v569_v9 = vsub.f32 %v1357_v27, %v1576_v7  ;;  %v570_v10 = vsub.f32 %v1362_v30, %v1576_v7  ;;  %v571_v11 = vsub.f32 %v1367_v33, %v1576_v7  ;;  %v572_v15 = vsub.f32 %v1370_v35, %v1576_v7 }
 0x139   : > { %v548_v60 = vpop.f32.mrb[0].mxu1  ;;  %v573_v18 = vsub.f32 %v1385_v43, %v1576_v7  ;;  %v574_v21 = vsub.f32 %v1395_v50, %v1576_v7  ;;  %v575_v24 = vsub.f32 %v1403_v56, %v1576_v7  ;;  %v576_v27 = vsub.f32 %v1411_v62, %v1576_v7 }
 0x13a   : > { %v552_v63 = vmul.f32 0.00390625, %v548_v60  ;;  %v1098_v1 = vpop.f32.mrb[1].mxu1  ;;  %v577_v30 = vsub.f32 %v1419_v4, %v1576_v7  ;;  %v578_v33 = vsub.f32 %v1427_v14, %v1576_v7  ;;  %v579_v35 = vsub.f32 %v1435_v23, %v1576_v7 }
 0x13b   : > { %v580_v43 = vsub.f32 %v1443_v32, %v1576_v7  ;;  %v581_v50 = vsub.f32 %v1451_v40, %v1576_v7  ;;  %v582_v56 = vsub.f32 %v1459_v47, %v1576_v7  ;;  %v583_v62 = vsub.f32 %v1467_v54, %v1576_v7 }
 0x13c   : > { %v554_v3 = vsub.f32 %v552_v63, %v553_v58  ;;  %v584_v4 = vsub.f32 %v1475_v61, %v1576_v7  ;;  %v585_v14 = vsub.f32 %v1483_v5, %v1576_v7  ;;  %v586_v23 = vsub.f32 %v1491_v17, %v1576_v7 }
 0x13d   : > { %v587_v32 = vsub.f32 %v1499_v28, %v1576_v7  ;;  %v588_v40 = vsub.f32 %v1507_v38, %v1576_v7  ;;  %v589_v47 = vsub.f32 %v1515_v46, %v1576_v7  ;;  %v590_v54 = vsub.f32 %v1523_v55, %v1576_v7 }
 0x13e   : > { %v555_v6 = vadd.f32 1e-06, %v554_v3  ;;  %v591_v61 = vsub.f32 %v1531_v0, %v1576_v7  ;;  %v592_v5 = vsub.f32 %v1539_v12, %v1576_v7 }
 0x140   : > { %1122 = vrsqrt.f32 %v555_v6 }
 0x14a   : > { %v1123_v29 = vpop.eup %1122 }
 0x14b   : > { %v596_v31 = vrot.slane %v1123_v29, %v559_v2 }
 0x14d   : > { %v597_v17 = vmul.f32 %v596_v31, %v561_v13  ;;  %v598_v34 = vmul.f32 %v596_v31, %v562_v16  ;;  %v599_v36 = vmul.f32 %v596_v31, %v563_v19  ;;  %v600_v28 = vmul.f32 %v596_v31, %v564_v20  ;;  %v1673_v19 = vld [vmem:[%s2021_s1] ss:$0 sm:$0xff] }
 0x14e   : > { %v601_v37 = vmul.f32 %v596_v31, %v565_v22  ;;  %v602_v39 = vmul.f32 %v596_v31, %v566_v25  ;;  %v603_v38 = vmul.f32 %v596_v31, %v567_v26  ;;  %v604_v41 = vmul.f32 %v596_v31, %v568_v8  ;;  %v1682_v8 = vld [vmem:[%s2022_s2] ss:$0 sm:$0xff] }
 0x14f   : > { %v605_v42 = vmul.f32 %v596_v31, %v569_v9  ;;  %v606_v44 = vmul.f32 %v596_v31, %v570_v10  ;;  %v607_v46 = vmul.f32 %v596_v31, %v571_v11  ;;  %v608_v45 = vmul.f32 %v596_v31, %v572_v15 }
 0x150   : > { %v609_v48 = vmul.f32 %v596_v31, %v573_v18  ;;  %v610_v55 = vmul.f32 %v596_v31, %v574_v21  ;;  %v611_v49 = vmul.f32 %v596_v31, %v575_v24  ;;  %v612_v51 = vmul.f32 %v596_v31, %v576_v27 }
 0x151   : > { %v613_v0 = vmul.f32 %v596_v31, %v577_v30  ;;  %v614_v52 = vmul.f32 %v596_v31, %v578_v33  ;;  %v1642_v53 = vmul.f32 %v596_v31, %v579_v35  ;;  %v1644_v12 = vmul.f32 %v596_v31, %v580_v43 }
 0x152   : > { %v1646_v57 = vmul.f32 %v596_v31, %v581_v50  ;;  %v1648_v58 = vmul.f32 %v596_v31, %v582_v56  ;;  %v1650_v59 = vmul.f32 %v596_v31, %v583_v62  ;;  %v1652_v60 = vmul.f32 %v596_v31, %v584_v4 }
 0x153   : > { %v1654_v63 = vmul.f32 %v596_v31, %v585_v14  ;;  %v1656_v1 = vmul.f32 %v596_v31, %v586_v23  ;;  %v1658_v2 = vmul.f32 %v596_v31, %v587_v32  ;;  %v1660_v3 = vmul.f32 %v596_v31, %v588_v40 }
 0x154   : > { %v1662_v6 = vmul.f32 %v596_v31, %v589_v47  ;;  %v1664_v7 = vmul.f32 %v596_v31, %v590_v54  ;;  %v1666_v13 = vmul.f32 %v596_v31, %v591_v61  ;;  %v1668_v16 = vmul.f32 %v596_v31, %v592_v5 }
 0x155   : > { %v636_v20 = vmul.f32 %v1673_v19, %v597_v17  ;;  %v637_v22 = vmul.f32 %v1673_v19, %v598_v34  ;;  %v638_v25 = vmul.f32 %v1673_v19, %v599_v36  ;;  %v639_v26 = vmul.f32 %v1673_v19, %v600_v28 }
 0x156   : > { %v640_v9 = vmul.f32 %v1673_v19, %v601_v37  ;;  %v641_v10 = vmul.f32 %v1673_v19, %v602_v39  ;;  %v642_v11 = vmul.f32 %v1673_v19, %v603_v38  ;;  %v643_v24 = vmul.f32 %v1673_v19, %v604_v41 }
 0x157   : > { %v1688_v15 = vadd.f32 %v1682_v8, %v636_v20  ;;  %v1691_v18 = vadd.f32 %v1682_v8, %v637_v22  ;;  %v1694_v21 = vadd.f32 %v1682_v8, %v638_v25  ;;  %v1698_v27 = vadd.f32 %v1682_v8, %v639_v26 }
 0x158   : > { %v644_v30 = vmul.f32 %v1673_v19, %v605_v42  ;;  %v1702_v33 = vadd.f32 %v1682_v8, %v640_v9  ;;  %v645_v35 = vmul.f32 %v1673_v19, %v606_v44  ;;  %v646_v43 = vmul.f32 %v1673_v19, %v607_v46 }
 0x159   : > { %v1707_v50 = vadd.f32 %v1682_v8, %v641_v10  ;;  %v1710_v29 = vadd.f32 %v1682_v8, %v642_v11  ;;  %v1031_v56 = vmul.f32 -1.442695, %v1688_v15  ;;  %v1032_v62 = vmul.f32 -1.442695, %v1691_v18 }
 0x15a   : > { %v1033_v4 = vmul.f32 -1.442695, %v1694_v21  ;;  %v647_v14 = vmul.f32 %v1673_v19, %v608_v45  ;;  %v1717_v23 = vadd.f32 %v1682_v8, %v643_v24  ;;  %v1034_v32 = vmul.f32 -1.442695, %v1698_v27 }
 0x15b   : > { %v648_v40 = vmul.f32 %v1673_v19, %v609_v48  ;;  %v1722_v31 = vadd.f32 %v1682_v8, %v644_v30  ;;  %1124 = vpow2.f32 %v1031_v56  ;;  %v1035_v47 = vmul.f32 -1.442695, %v1702_v33 }
 0x15c   : > { %v649_v54 = vmul.f32 %v1673_v19, %v610_v55  ;;  %v1727_v61 = vadd.f32 %v1682_v8, %v645_v35  ;;  %1126 = vpow2.f32 %v1032_v62  ;;  %v1036_v5 = vmul.f32 -1.442695, %v1707_v50 }
 0x15d   : > { %v650_v17 = vmul.f32 %v1673_v19, %v611_v49  ;;  %v1732_v34 = vadd.f32 %v1682_v8, %v646_v43  ;;  %1128 = vpow2.f32 %v1033_v4  ;;  %v1037_v36 = vmul.f32 -1.442695, %v1710_v29 }
 0x15e   : > { %v651_v28 = vmul.f32 %v1673_v19, %v612_v51  ;;  %v1737_v37 = vadd.f32 %v1682_v8, %v647_v14  ;;  %1130 = vpow2.f32 %v1034_v32  ;;  %v1038_v39 = vmul.f32 -1.442695, %v1717_v23 }
 0x15f   : > { %v652_v38 = vmul.f32 %v1673_v19, %v613_v0  ;;  %v1742_v41 = vadd.f32 %v1682_v8, %v648_v40  ;;  %1132 = vpow2.f32 %v1035_v47  ;;  %v1039_v42 = vmul.f32 -1.442695, %v1722_v31 }
 0x160   : > { %v653_v44 = vmul.f32 %v1673_v19, %v614_v52  ;;  %v1747_v46 = vadd.f32 %v1682_v8, %v649_v54  ;;  %1134 = vpow2.f32 %v1036_v5  ;;  %v1040_v45 = vmul.f32 -1.442695, %v1727_v61 }
 0x161   : > { %v654_v48 = vmul.f32 %v1673_v19, %v1642_v53  ;;  %v1753_v55 = vadd.f32 %v1682_v8, %v650_v17  ;;  %1136 = vpow2.f32 %v1037_v36  ;;  %v1041_v49 = vmul.f32 -1.442695, %v1732_v34 }
 0x162   : > { %v655_v51 = vmul.f32 %v1673_v19, %v1644_v12  ;;  %v1759_v0 = vadd.f32 %v1682_v8, %v651_v28  ;;  %1138 = vpow2.f32 %v1038_v39  ;;  %v1042_v52 = vmul.f32 -1.442695, %v1737_v37 }
 0x163   : > { %v656_v20 = vmul.f32 %v1673_v19, %v1646_v57  ;;  %v1765_v53 = vadd.f32 %v1682_v8, %v652_v38  ;;  %1140 = vpow2.f32 %v1039_v42  ;;  %v1043_v22 = vmul.f32 -1.442695, %v1742_v41 }
 0x164   : > { %v657_v25 = vmul.f32 %v1673_v19, %v1648_v58  ;;  %v1771_v12 = vadd.f32 %v1682_v8, %v653_v44  ;;  %1142 = vpow2.f32 %v1040_v45  ;;  %v1044_v26 = vmul.f32 -1.442695, %v1747_v46 }
 0x165   : > { %v1774_v9 = vpop.eup %1124  ;;  %v658_v57 = vmul.f32 %v1673_v19, %v1650_v59  ;;  %v1779_v10 = vadd.f32 %v1682_v8, %v654_v48  ;;  %1144 = vpow2.f32 %v1041_v49  ;;  %v1045_v11 = vmul.f32 -1.442695, %v1753_v55 }
 0x166   : > { %v1782_v24 = vpop.eup %1126  ;;  %v659_v58 = vmul.f32 %v1673_v19, %v1652_v60  ;;  %v1787_v30 = vadd.f32 %v1682_v8, %v655_v51  ;;  %1146 = vpow2.f32 %v1042_v52  ;;  %v1046_v35 = vmul.f32 -1.442695, %v1759_v0 }
 0x167   : > { %v1790_v43 = vpop.eup %1128  ;;  %v660_v59 = vmul.f32 %v1673_v19, %v1654_v63  ;;  %v1795_v56 = vadd.f32 %v1682_v8, %v656_v20  ;;  %1148 = vpow2.f32 %v1043_v22  ;;  %v1047_v62 = vmul.f32 -1.442695, %v1765_v53 }
 0x168   : > { %v1798_v4 = vpop.eup %1130  ;;  %v661_v60 = vmul.f32 %v1673_v19, %v1656_v1  ;;  %v1803_v14 = vadd.f32 %v1682_v8, %v657_v25  ;;  %1150 = vpow2.f32 %v1044_v26  ;;  %v1048_v32 = vmul.f32 -1.442695, %v1771_v12 }
 0x169   : > { %v1806_v40 = vpop.eup %1132  ;;  %v662_v63 = vmul.f32 %v1673_v19, %v1658_v2  ;;  %v1811_v47 = vadd.f32 %v1682_v8, %v658_v57  ;;  %1152 = vpow2.f32 %v1045_v11  ;;  %v1049_v54 = vmul.f32 -1.442695, %v1779_v10 }
 0x16a   : > { %v1814_v5 = vpop.eup %1134  ;;  %v663_v1 = vmul.f32 %v1673_v19, %v1660_v3  ;;  %v1819_v17 = vadd.f32 %v1682_v8, %v659_v58  ;;  %1154 = vpow2.f32 %v1046_v35  ;;  %v1050_v36 = vmul.f32 -1.442695, %v1787_v30 }
 0x16b   : > { %v1822_v28 = vpop.eup %1136  ;;  %v664_v2 = vmul.f32 %v1673_v19, %v1662_v6  ;;  %v1827_v39 = vadd.f32 %v1682_v8, %v660_v59  ;;  %1156 = vpow2.f32 %v1047_v62  ;;  %v1051_v38 = vmul.f32 -1.442695, %v1795_v56 }
 0x16c   : > { %v1830_v42 = vpop.eup %1138  ;;  %v665_v3 = vmul.f32 %v1673_v19, %v1664_v7  ;;  %v1835_v44 = vadd.f32 %v1682_v8, %v661_v60  ;;  %1158 = vpow2.f32 %v1048_v32  ;;  %v1052_v45 = vmul.f32 -1.442695, %v1803_v14 }
 0x16d   : > { %v1141_v48 = vpop.eup %1140  ;;  %v666_v6 = vmul.f32 %v1673_v19, %v1666_v13  ;;  %v1841_v49 = vadd.f32 %v1682_v8, %v662_v63  ;;  %1160 = vpow2.f32 %v1049_v54  ;;  %v1053_v51 = vmul.f32 -1.442695, %v1811_v47 }
 0x16e   : > { %v1143_v52 = vpop.eup %1142  ;;  %v667_v7 = vmul.f32 %v1673_v19, %v1668_v16  ;;  %v1847_v20 = vadd.f32 %v1682_v8, %v663_v1  ;;  %1162 = vpow2.f32 %v1050_v36  ;;  %v1054_v22 = vmul.f32 -1.442695, %v1819_v17 }
 0x16f   : > { %v1145_v25 = vpop.eup %1144  ;;  %v1851_v26 = vadd.f32 %v1682_v8, %v664_v2  ;;  %1164 = vpow2.f32 %v1051_v38  ;;  %v1055_v13 = vmul.f32 -1.442695, %v1827_v39  ;;  %v1855_v11 = vadd.f32 %v1682_v8, %v665_v3 }
 0x170   : > { %v1147_v57 = vpop.eup %1146  ;;  %1166 = vpow2.f32 %v1052_v45  ;;  %v1056_v16 = vmul.f32 -1.442695, %v1835_v44  ;;  %v1859_v58 = vadd.f32 %v1682_v8, %v666_v6  ;;  %v1057_v35 = vmul.f32 -1.442695, %v1841_v49 }
 0x171   : > { %v1149_v19 = vpop.eup %1148  ;;  %1168 = vpow2.f32 %v1053_v51  ;;  %v1863_v62 = vadd.f32 %v1682_v8, %v667_v7  ;;  %v1058_v60 = vmul.f32 -1.442695, %v1847_v20  ;;  %v1059_v63 = vmul.f32 -1.442695, %v1851_v26 }
 0x172   : > { %v1151_v59 = vpop.eup %1150  ;;  %1170 = vpow2.f32 %v1054_v22  ;;  %v1060_v1 = vmul.f32 -1.442695, %v1855_v11  ;;  %v1061_v2 = vmul.f32 -1.442695, %v1859_v58  ;;  %v803_v45 = vadd.f32 1.0, %v1774_v9 }
 0x173   : > { %2026 = vst [vmem:[#allocation2_spill] sm:$0xff] %v1863_v62  ;;  %v1153_v32 = vpop.eup %1152  ;;  %1172 = vpow2.f32 %v1055_v13  ;;  %v1062_v8 = vmul.f32 -1.442695, %v1863_v62  ;;  %v804_v51 = vadd.f32 1.0, %v1782_v24  ;;  %v805_v22 = vadd.f32 1.0, %v1790_v43 }
 0x174   : > { %v1155_v54 = vpop.eup %1154  ;;  %1174 = vpow2.f32 %v1056_v16  ;;  %v806_v16 = vadd.f32 1.0, %v1798_v4 }
 0x175   : > { %v1157_v36 = vpop.eup %1156  ;;  %1176 = vpow2.f32 %v1057_v35 }
 0x176   : > { %v1159_v38 = vpop.eup %1158  ;;  %1178 = vpow2.f32 %v1058_v60  ;;  %v807_v60 = vadd.f32 1.0, %v1806_v40 }
 0x177   : > { %v1161_v3 = vpop.eup %1160  ;;  %1180 = vpow2.f32 %v1059_v63  ;;  %v808_v63 = vadd.f32 1.0, %v1814_v5 }
 0x178   : > { %v1163_v6 = vpop.eup %1162  ;;  %1182 = vpow2.f32 %v1060_v1  ;;  %v809_v1 = vadd.f32 1.0, %v1822_v28 }
 0x179   : > { %v1872_v7 = vpop.eup %1164  ;;  %1184 = vpow2.f32 %v1061_v2  ;;  %v810_v2 = vadd.f32 1.0, %v1830_v42  ;;  %v815_v42 = vadd.f32 1.0, %v1149_v19 }
 0x17a   : > { %v1875_v13 = vpop.eup %1166  ;;  %1186 = vpow2.f32 %v1062_v8  ;;  %v811_v8 = vadd.f32 1.0, %v1141_v48  ;;  %v816_v48 = vadd.f32 1.0, %v1151_v59 }
 0x17b   : > { %v1878_v35 = vpop.eup %1168  ;;  %1188 = vrcp.f32 %v803_v45  ;;  %v812_v45 = vadd.f32 1.0, %v1143_v52  ;;  %v817_v52 = vadd.f32 1.0, %v1153_v32 }
 0x17c   : > { %v1881_v9 = vpop.eup %1170  ;;  %1190 = vrcp.f32 %v804_v51  ;;  %v813_v51 = vadd.f32 1.0, %v1145_v25 }
 0x17d   : > { %v1884_v24 = vpop.eup %1172  ;;  %1192 = vrcp.f32 %v805_v22  ;;  %v814_v22 = vadd.f32 1.0, %v1147_v57  ;;  %v818_v57 = vadd.f32 1.0, %v1155_v54  ;;  %v821_v54 = vadd.f32 1.0, %v1161_v3 }
 0x17e   : > { %v1887_v43 = vpop.eup %1174  ;;  %1194 = vrcp.f32 %v806_v16 }
 0x17f   : > { %v1890_v4 = vpop.eup %1176  ;;  %1196 = vrcp.f32 %v807_v60 }
 0x180   : > { %v1892_v40 = vpop.eup %1178  ;;  %1198 = vrcp.f32 %v808_v63 }
 0x181   : > { %v1894_v5 = vpop.eup %1180  ;;  %1200 = vrcp.f32 %v809_v1  ;;  %v819_v1 = vadd.f32 1.0, %v1157_v36  ;;  %v822_v36 = vadd.f32 1.0, %v1163_v6 }
 0x182   : > { %v1896_v28 = vpop.eup %1182  ;;  %1202 = vrcp.f32 %v810_v2 }
 0x183   : > { %v1898_v62 = vpop.eup %1184  ;;  %1204 = vrcp.f32 %v811_v8  ;;  %v820_v8 = vadd.f32 1.0, %v1159_v38  ;;  %v823_v38 = vadd.f32 1.0, %v1872_v7 }
 0x184   : > { %v1900_v16 = vpop.eup %1186  ;;  %1206 = vrcp.f32 %v812_v45 }
 0x185   : > { %v1189_v60 = vpop.eup %1188  ;;  %1208 = vrcp.f32 %v813_v51 }
 0x186   : > { %v1191_v25 = vpop.eup %1190  ;;  %1210 = vrcp.f32 %v814_v22  ;;  %v899_v19 = vmul.f32 %v1189_v60, %v1688_v15  ;;  %v824_v22 = vadd.f32 1.0, %v1875_v13  ;;  %v827_v60 = vadd.f32 1.0, %v1884_v24 }
 0x187   : > { %v1193_v63 = vpop.eup %1192  ;;  %1212 = vrcp.f32 %v815_v42  ;;  %v900_v59 = vmul.f32 %v1191_v25, %v1691_v18  ;;  %v825_v42 = vadd.f32 1.0, %v1878_v35  ;;  %v829_v25 = vadd.f32 1.0, %v1890_v4 }
 0x188   : > { %v1195_v2 = vpop.eup %1194  ;;  %1214 = vrcp.f32 %v816_v48  ;;  %v901_v45 = vmul.f32 %v1193_v63, %v1694_v21  ;;  %931 = vst.msk [vmem:[%s1907_s9] sm:$0xff] %vm230_vm1, %v899_v19  ;;  %v826_v48 = vadd.f32 1.0, %v1881_v9  ;;  %v831_v19 = vadd.f32 1.0, %v1894_v5 }
 0x189   : > { %v1197_v32 = vpop.eup %1196  ;;  %1216 = vrcp.f32 %v817_v52  ;;  %v902_v51 = vmul.f32 %v1195_v2, %v1698_v27  ;;  %932 = vst.msk [vmem:[%s1907_s9 + $0x8] sm:$0xff] %vm230_vm1, %v900_v59  ;;  %v828_v52 = vadd.f32 1.0, %v1887_v43  ;;  %v832_v63 = vadd.f32 1.0, %v1896_v28 }
 0x18a   : > { %v1199_v15 = vpop.eup %1198  ;;  %1218 = vrcp.f32 %v818_v57  ;;  %v903_v18 = vmul.f32 %v1197_v32, %v1702_v33  ;;  %933 = vst.msk [vmem:[%s1907_s9 + $0x10] sm:$0xff] %vm230_vm1, %v901_v45  ;;  %v830_v57 = vadd.f32 1.0, %v1892_v40  ;;  %v834_v59 = vadd.f32 1.0, %v1900_v16 }
 0x18b   : > { %v1201_v21 = vpop.eup %1200  ;;  %1220 = vrcp.f32 %v819_v1  ;;  %v904_v3 = vmul.f32 %v1199_v15, %v1707_v50  ;;  %934 = vst.msk [vmem:[%s1907_s9 + $0x18] sm:$0xff] %vm230_vm1, %v902_v51  ;;  %v833_v1 = vadd.f32 1.0, %v1898_v62 }
 0x18c   : > { %v1203_v27 = vpop.eup %1202  ;;  %1222 = vrcp.f32 %v820_v8  ;;  %v905_v6 = vmul.f32 %v1201_v21, %v1710_v29  ;;  %935 = vst.msk [vmem:[%s1907_s9 + $0x20] sm:$0xff] %vm230_vm1, %v903_v18 }
 0x18d   : > { %v1205_v33 = vpop.eup %1204  ;;  %1224 = vrcp.f32 %v821_v54  ;;  %v906_v7 = vmul.f32 %v1203_v27, %v1717_v23  ;;  %936 = vst.msk [vmem:[%s1907_s9 + $0x28] sm:$0xff] %vm230_vm1, %v904_v3 }
 0x18e   : > { %v1207_v50 = vpop.eup %1206  ;;  %1226 = vrcp.f32 %v822_v36  ;;  %v907_v13 = vmul.f32 %v1205_v33, %v1722_v31  ;;  %937 = vst.msk [vmem:[%s1907_s9 + $0x30] sm:$0xff] %vm230_vm1, %v905_v6 }
 0x18f   : > { %v1209_v29 = vpop.eup %1208  ;;  %1228 = vrcp.f32 %v823_v38  ;;  %v908_v35 = vmul.f32 %v1207_v50, %v1727_v61  ;;  %938 = vst.msk [vmem:[%s1907_s9 + $0x38] sm:$0xff] %vm230_vm1, %v906_v7 }
 0x190   : > { %v1211_v23 = vpop.eup %1210  ;;  %1230 = vrcp.f32 %v824_v22  ;;  %v909_v9 = vmul.f32 %v1209_v29, %v1732_v34  ;;  %939 = vst.msk [vmem:[%s1907_s9 + $0x40] sm:$0xff] %vm230_vm1, %v907_v13  ;;  %v2027_v22 = vld [vmem:[#allocation2_spill] sm:$0xff] }
 0x191   : > { %v1213_v31 = vpop.eup %1212  ;;  %1232 = vrcp.f32 %v825_v42  ;;  %v910_v24 = vmul.f32 %v1211_v23, %v1737_v37  ;;  %940 = vst.msk [vmem:[%s1907_s9 + $0x48] sm:$0xff] %vm230_vm1, %v908_v35 }
 0x192   : > { %v1215_v61 = vpop.eup %1214  ;;  %1234 = vrcp.f32 %v826_v48  ;;  %v911_v43 = vmul.f32 %v1213_v31, %v1742_v41  ;;  %941 = vst.msk [vmem:[%s1907_s9 + $0x50] sm:$0xff] %vm230_vm1, %v909_v9 }
 0x193   : > { %v1217_v34 = vpop.eup %1216  ;;  %1236 = vrcp.f32 %v827_v60  ;;  %v912_v4 = vmul.f32 %v1215_v61, %v1747_v46  ;;  %942 = vst.msk [vmem:[%s1907_s9 + $0x58] sm:$0xff] %vm230_vm1, %v910_v24 }
 0x194   : > { %v1219_v37 = vpop.eup %1218  ;;  %1238 = vrcp.f32 %v828_v52  ;;  %v913_v40 = vmul.f32 %v1217_v34, %v1753_v55  ;;  %943 = vst.msk [vmem:[%s1907_s9 + $0x60] sm:$0xff] %vm230_vm1, %v911_v43 }
 0x195   : > { %v1221_v41 = vpop.eup %1220  ;;  %1240 = vrcp.f32 %v829_v25  ;;  %v914_v5 = vmul.f32 %v1219_v37, %v1759_v0  ;;  %944 = vst.msk [vmem:[%s1907_s9 + $0x68] sm:$0xff] %vm230_vm1, %v912_v4 }
 0x196   : > { %v1223_v46 = vpop.eup %1222  ;;  %1242 = vrcp.f32 %v830_v57  ;;  %v915_v28 = vmul.f32 %v1221_v41, %v1765_v53  ;;  %945 = vst.msk [vmem:[%s1907_s9 + $0x70] sm:$0xff] %vm230_vm1, %v913_v40 }
 0x197   : > { %v1225_v55 = vpop.eup %1224  ;;  %1244 = vrcp.f32 %v831_v19  ;;  %v916_v62 = vmul.f32 %v1223_v46, %v1771_v12  ;;  %946 = vst.msk [vmem:[%s1907_s9 + $0x78] sm:$0xff] %vm230_vm1, %v914_v5 }
 0x198   : > { %v1227_v0 = vpop.eup %1226  ;;  %1246 = vrcp.f32 %v832_v63  ;;  %v917_v2 = vmul.f32 %v1225_v55, %v1779_v10  ;;  %947 = vst.msk [vmem:[%s1907_s9 + $0x80] sm:$0xff] %vm230_vm1, %v915_v28 }
 0x199   : > { %v1229_v16 = vpop.eup %1228  ;;  %1248 = vrcp.f32 %v833_v1  ;;  %v918_v53 = vmul.f32 %v1227_v0, %v1787_v30  ;;  %948 = vst.msk [vmem:[%s1907_s9 + $0x88] sm:$0xff] %vm230_vm1, %v916_v62 }
 0x19a   : > { %v1231_v8 = vpop.eup %1230  ;;  %1250 = vrcp.f32 %v834_v59  ;;  %v919_v12 = vmul.f32 %v1229_v16, %v1795_v56  ;;  %949 = vst.msk [vmem:[%s1907_s9 + $0x90] sm:$0xff] %vm230_vm1, %v917_v2 }
 0x19b   : > { %v1233_v45 = vpop.eup %1232  ;;  %v920_v10 = vmul.f32 %v1231_v8, %v1803_v14  ;;  %950 = vst.msk [vmem:[%s1907_s9 + $0x98] sm:$0xff] %vm230_vm1, %v918_v53 }
 0x19c   : > { %v1235_v32 = vpop.eup %1234  ;;  %v921_v54 = vmul.f32 %v1233_v45, %v1811_v47  ;;  %951 = vst.msk [vmem:[%s1907_s9 + $0xa0] sm:$0xff] %vm230_vm1, %v919_v12 }
 0x19d   : > { %v1237_v30 = vpop.eup %1236  ;;  %v922_v51 = vmul.f32 %v1235_v32, %v1819_v17  ;;  %952 = vst.msk [vmem:[%s1907_s9 + $0xa8] sm:$0xff] %vm230_vm1, %v920_v10 }
 0x19e   : > { %v1239_v56 = vpop.eup %1238  ;;  %v923_v15 = vmul.f32 %v1237_v30, %v1827_v39  ;;  %953 = vst.msk [vmem:[%s1907_s9 + $0xb0] sm:$0xff] %vm230_vm1, %v921_v54 }
 0x19f   : > { %v1241_v14 = vpop.eup %1240  ;;  %v924_v36 = vmul.f32 %v1239_v56, %v1835_v44  ;;  %954 = vst.msk [vmem:[%s1907_s9 + $0xb8] sm:$0xff] %vm230_vm1, %v922_v51 }
 0x1a0   : > { %v1243_v47 = vpop.eup %1242  ;;  %v925_v18 = vmul.f32 %v1241_v14, %v1841_v49  ;;  %955 = vst.msk [vmem:[%s1907_s9 + $0xc0] sm:$0xff] %vm230_vm1, %v923_v15 }
 0x1a1   : > { %v1245_v17 = vpop.eup %1244  ;;  %v926_v39 = vmul.f32 %v1243_v47, %v1847_v20  ;;  %956 = vst.msk [vmem:[%s1907_s9 + $0xc8] sm:$0xff] %vm230_vm1, %v924_v36 }
 0x1a2   : > { %v1247_v21 = vpop.eup %1246  ;;  %v927_v38 = vmul.f32 %v1245_v17, %v1851_v26  ;;  %957 = vst.msk [vmem:[%s1907_s9 + $0xd0] sm:$0xff] %vm230_vm1, %v925_v18 }
 0x1a3   : > { %v1249_v44 = vpop.eup %1248  ;;  %v928_v3 = vmul.f32 %v1247_v21, %v1855_v11  ;;  %958 = vst.msk [vmem:[%s1907_s9 + $0xd8] sm:$0xff] %vm230_vm1, %v926_v39 }
 0x1a4   : > { %v1251_v49 = vpop.eup %1250  ;;  %v929_v27 = vmul.f32 %v1249_v44, %v1859_v58  ;;  %959 = vst.msk [vmem:[%s1907_s9 + $0xe0] sm:$0xff] %vm230_vm1, %v927_v38 }
 0x1a5   : > { %v930_v6 = vmul.f32 %v1251_v49, %v2027_v22  ;;  %960 = vst.msk [vmem:[%s1907_s9 + $0xe8] sm:$0xff] %vm230_vm1, %v928_v3 }
 0x1a6   : > { %961 = vst.msk [vmem:[%s1907_s9 + $0xf0] sm:$0xff] %vm230_vm1, %v929_v27 }
 0x1a7   : > { %962 = vst.msk [vmem:[%s1907_s9 + $0xf8] sm:$0xff] %vm230_vm1, %v930_v6 }
 0x1a8 PF: > { %s14_s15 = sadd.s32 1, %s1258_s15  }
 0x1a9   : > { %p11_p4 = scmp.ge.s32.totalorder %s14_s15, 4  }
 0x1ab   :  { %13 = sbr.rel (!%p11_p4) target bundleno = 1 (0x1), region = 66 }

// kernel: vae_encoder_forward.27
= control target key start
LH: loop header
LB: loop body
LE: loop exit
PB: predicated region body
PF: predicated region fallthrough
CT: control target
= control target key end

     0   :  { %s1180_s12 = smov 0   ;;  %s1182_s13 = smov 0   ;;  %s1330_s0 = inlined_call_operand.vmem [shape: bf16[512,128], index: 0, kind: input, shape index: {}]   ;;  %s1331_s1 = inlined_call_operand.vmem [shape: bf16[128,128], index: 1, kind: input, shape index: {}]   ;;  %s1332_s2 = inlined_call_operand.vmem [shape: f32[1,128], index: 2, kind: input, shape index: {}]   ;;  %s1333_s3 = inlined_call_operand.vmem [shape: f32[512,128], index: 3, kind: output, shape index: {}]  }
   0x1   :  { %s1184_s14 = smov 0  }
   0x2 LB: > { %s32_s15 = sadd.s32 1, %s1154_s13  ;;  %p968_p0 = scmp.ge.s32.totalorder %s1158_s14, 1  ;;  %s1158_s14 = sphi %s1184_s14, %s13_s14   ;;  %s1154_s13 = sphi %s1182_s13, %s1335_s13   ;;  %s1150_s12 = sphi %s1180_s12, %s1334_s12  }
   0x3   : > { %p34_p1 = scmp.ge.s32.totalorder %s32_s15, 2  ;;  %p188_p2 = scmp.lt.s32.totalorder %s1158_s14, 3 }
   0x5   : > { %s1337_s15 = smov (%p34_p1, %s32_s15), 0  ;;  %p189_p3 = pnand %p968_p0, %p188_p2 }
   0x6   : > { %v1112_v0 = vld [vmem:[%s1331_s1] sm:$0xff] (!%p189_p3)   ;;  %s969_s18 = sshll.u32 (!%p189_p3), %s1150_s12, 5  ;;  %v1113_v1 = vld [vmem:[%s1331_s1 + $0x8] sm:$0xff] (!%p189_p3)   ;;  %v1114_v2 = vld [vmem:[%s1331_s1 + $0x10] sm:$0xff] (!%p189_p3)  }
   0x7   : > { %192 = sbr.rel (%p189_p3) target bundleno = 281 (0x119), region = 32  ;;  %p230_p4 = scmp.lt.s32.totalorder (!%p189_p3), %s969_s18, 63  ;;  %1024 = vmatprep.subr.bf16.mxu0 (!%p189_p3), %v1112_v0  ;;  %1072 = vmatprep.subr.bf16.mxu1 (!%p189_p3), %v1112_v0  ;;  %v1115_v3 = vld [vmem:[%s1331_s1 + $0x18] sm:$0xff] (!%p189_p3)   ;;  %v1116_v6 = vld [vmem:[%s1331_s1 + $0x20] sm:$0xff] (!%p189_p3)   ;;  %v1117_v7 = vld [vmem:[%s1331_s1 + $0x28] sm:$0xff] (!%p189_p3)  }
   0x8   : > { %1025 = vmatpush3.bf16.msra.mxu0 (!%p189_p3), %v1112_v0  ;;  %1080 = vmatpush3.bf16.msra.mxu1 (!%p189_p3), %v1112_v0  ;;  %v1118_v8 = vld [vmem:[%s1331_s1 + $0x30] sm:$0xff] (!%p189_p3)   ;;  %v1119_v9 = vld [vmem:[%s1331_s1 + $0x38] sm:$0xff] (!%p189_p3)   ;;  %v1250_v24 = vld [vmem:[%s1332_s2] ss:$0 sm:$0xff] (!%p189_p3) }
   0x9   : > { %1026 = vmatprep.subr.bf16.mxu0 (!%p189_p3), %v1113_v1  ;;  %1073 = vmatprep.subr.bf16.mxu1 (!%p189_p3), %v1113_v1 }
   0xc   : > { %1027 = vmatpush3.bf16.msra.mxu0 (!%p189_p3), %v1113_v1  ;;  %1081 = vmatpush3.bf16.msra.mxu1 (!%p189_p3), %v1113_v1 }
   0xd   : > { %1028 = vmatprep.subr.bf16.mxu0 (!%p189_p3), %v1114_v2  ;;  %1074 = vmatprep.subr.bf16.mxu1 (!%p189_p3), %v1114_v2 }
   0xe   : > { %s1339_s18 = smov (!%p230_p4, %s969_s18), 63 }
   0xf   : > { %s970_s23 = sshll.u32 %s1339_s18, 2  ;;  %s972_s10 = sshll.u32 %s1339_s18, 3 }
  0x10   : > { %s1213_s26 = scalar_lea.vmem %s1330_s0, %s970_s23  ;;  %1029 = vmatpush3.bf16.msra.mxu0 %v1114_v2  ;;  %1082 = vmatpush3.bf16.msra.mxu1 %v1114_v2  ;;  %s1255_s19 = scalar_lea.vmem %s1333_s3, %s972_s10 }
  0x11   : > { %v1120_v4 = vld [vmem:[%s1213_s26] sm:$0xff]   ;;  %1030 = vmatprep.subr.bf16.mxu0 %v1115_v3  ;;  %1075 = vmatprep.subr.bf16.mxu1 %v1115_v3  ;;  %v1122_v10 = vld [vmem:[%s1213_s26 + $0x8] sm:$0xff]   ;;  %v1124_v12 = vld [vmem:[%s1213_s26 + $0x10] sm:$0xff]  }
  0x12   : > { %v1121_v5 = vld [vmem:[%s1213_s26 + $0x40] sm:$0xff]   ;;  %1040 = vmatprep.mubr.bf16.mxu0 %v1120_v4  ;;  %v1123_v11 = vld [vmem:[%s1213_s26 + $0x48] sm:$0xff]   ;;  %v1125_v13 = vld [vmem:[%s1213_s26 + $0x50] sm:$0xff]  }
  0x13   : > { %1056 = vmatprep.mubr.bf16.mxu1 %v1121_v5  ;;  %v1126_v14 = vld [vmem:[%s1213_s26 + $0x18] sm:$0xff]   ;;  %v1128_v16 = vld [vmem:[%s1213_s26 + $0x20] sm:$0xff]   ;;  %v1130_v18 = vld [vmem:[%s1213_s26 + $0x28] sm:$0xff]  }
  0x14   : > { %1031 = vmatpush3.bf16.msra.mxu0 %v1115_v3  ;;  %1083 = vmatpush3.bf16.msra.mxu1 %v1115_v3  ;;  %v1127_v15 = vld [vmem:[%s1213_s26 + $0x58] sm:$0xff]   ;;  %v1129_v17 = vld [vmem:[%s1213_s26 + $0x60] sm:$0xff]   ;;  %v1131_v19 = vld [vmem:[%s1213_s26 + $0x68] sm:$0xff]  }
  0x15   : > { %1032 = vmatprep.subr.bf16.mxu0 %v1116_v6  ;;  %1076 = vmatprep.subr.bf16.mxu1 %v1116_v6  ;;  %v1132_v20 = vld [vmem:[%s1213_s26 + $0x30] sm:$0xff]   ;;  %v1134_v22 = vld [vmem:[%s1213_s26 + $0x38] sm:$0xff]  }
  0x16   : > { %v1133_v21 = vld [vmem:[%s1213_s26 + $0x70] sm:$0xff]   ;;  %v1135_v23 = vld [vmem:[%s1213_s26 + $0x78] sm:$0xff]  }
  0x18   : > { %1033 = vmatpush3.bf16.msra.mxu0 %v1116_v6  ;;  %1084 = vmatpush3.bf16.msra.mxu1 %v1116_v6 }
  0x19   : > { %1034 = vmatprep.subr.bf16.mxu0 %v1117_v7  ;;  %1077 = vmatprep.subr.bf16.mxu1 %v1117_v7 }
  0x1c   : > { %1035 = vmatpush3.bf16.msra.mxu0 %v1117_v7  ;;  %1085 = vmatpush3.bf16.msra.mxu1 %v1117_v7 }
  0x1d   : > { %1036 = vmatprep.subr.bf16.mxu0 %v1118_v8  ;;  %1078 = vmatprep.subr.bf16.mxu1 %v1118_v8 }
  0x20   : > { %1037 = vmatpush3.bf16.msra.mxu0 %v1118_v8  ;;  %1086 = vmatpush3.bf16.msra.mxu1 %v1118_v8 }
  0x21   : > { %1038 = vmatprep.subr.bf16.mxu0 %v1119_v9  ;;  %1079 = vmatprep.subr.bf16.mxu1 %v1119_v9 }
  0x24   : > { %1039 = vmatpush3.bf16.msra.mxu0 %v1119_v9  ;;  %1087 = vmatpush3.bf16.msra.mxu1 %v1119_v9 }
  0x27   : > { %1041 = vmatmul.mubr.bf16.vlgmr.msra.gmra.mrb[0].mxu0 %v1122_v10  ;;  %1057 = vmatmul.mubr.bf16.vlgmr.msra.gmra.mrb[0].mxu1 %v1123_v11 }
  0x28   : > { %1044 = vmatprep.mubr.bf16.mxu0 %v1124_v12  ;;  %1060 = vmatprep.mubr.bf16.mxu1 %v1125_v13 }
  0x2f   : > { %1045 = vmatmul.mubr.bf16.gmra.mrb[4].mxu0 %v1126_v14  ;;  %1061 = vmatmul.mubr.bf16.gmra.mrb[4].mxu1 %v1127_v15 }
  0x30   : > { %1048 = vmatprep.mubr.bf16.mxu0 %v1128_v16  ;;  %1064 = vmatprep.mubr.bf16.mxu1 %v1129_v17 }
  0x37   : > { %1049 = vmatmul.mubr.bf16.gmra.mrb[8].mxu0 %v1130_v18  ;;  %1065 = vmatmul.mubr.bf16.gmra.mrb[8].mxu1 %v1131_v19 }
  0x38   : > { %1052 = vmatprep.mubr.bf16.mxu0 %v1132_v20  ;;  %1068 = vmatprep.mubr.bf16.mxu1 %v1133_v21 }
  0x3f   : > { %1053 = vmatmul.mubr.bf16.gmra.mrb[12].mxu0 %v1134_v22  ;;  %1069 = vmatmul.mubr.bf16.gmra.mrb[12].mxu1 %v1135_v23 }
  0xfa   : > { %v1042_v25 = vpop.f32.mrb[0].mxu0  ;;  %v1058_v26 = vpop.f32.mrb[0].mxu1 }
  0xfb   : > { %v789_v27 = vadd.f32 %v1042_v25, %v1250_v24  ;;  %v805_v28 = vadd.f32 %v1058_v26, %v1250_v24  ;;  %v554_v29 = vpop.f32.mrb[1].mxu0  ;;  %v618_v30 = vpop.f32.mrb[1].mxu1 }
  0xfc   : > { %v787_v31 = vadd.f32 %v1250_v24, %v554_v29  ;;  %v803_v32 = vadd.f32 %v1250_v24, %v618_v30  ;;  %v1043_v33 = vpop.f32.mrb[2].mxu0  ;;  %v1059_v34 = vpop.f32.mrb[2].mxu1 }
  0xfd   : > { %821 = vst [vmem:[%s1255_s19 + $0x10] sm:$0xff] %v789_v27  ;;  %837 = vst [vmem:[%s1255_s19 + $0x90] sm:$0xff] %v805_v28  ;;  %v790_v35 = vadd.f32 %v1043_v33, %v1250_v24  ;;  %v806_v36 = vadd.f32 %v1059_v34, %v1250_v24  ;;  %v557_v37 = vpop.f32.mrb[3].mxu0  ;;  %v621_v38 = vpop.f32.mrb[3].mxu1 }
  0xfe   : > { %819 = vst [vmem:[%s1255_s19] sm:$0xff] %v787_v31  ;;  %835 = vst [vmem:[%s1255_s19 + $0x80] sm:$0xff] %v803_v32  ;;  %v788_v39 = vadd.f32 %v1250_v24, %v557_v37  ;;  %v804_v40 = vadd.f32 %v1250_v24, %v621_v38 }
  0xff   : > { %822 = vst [vmem:[%s1255_s19 + $0x18] sm:$0xff] %v790_v35  ;;  %838 = vst [vmem:[%s1255_s19 + $0x98] sm:$0xff] %v806_v36 }
 0x100   : > { %820 = vst [vmem:[%s1255_s19 + $0x8] sm:$0xff] %v788_v39  ;;  %836 = vst [vmem:[%s1255_s19 + $0x88] sm:$0xff] %v804_v40 }
 0x102   : > { %v1046_v41 = vpop.f32.mrb[4].mxu0  ;;  %v1062_v42 = vpop.f32.mrb[4].mxu1 }
 0x103   : > { %v793_v43 = vadd.f32 %v1046_v41, %v1250_v24  ;;  %v809_v44 = vadd.f32 %v1062_v42, %v1250_v24  ;;  %v570_v45 = vpop.f32.mrb[5].mxu0  ;;  %v634_v46 = vpop.f32.mrb[5].mxu1 }
 0x104   : > { %v791_v47 = vadd.f32 %v1250_v24, %v570_v45  ;;  %v807_v48 = vadd.f32 %v1250_v24, %v634_v46  ;;  %v1047_v49 = vpop.f32.mrb[6].mxu0  ;;  %v1063_v50 = vpop.f32.mrb[6].mxu1 }
 0x105   : > { %825 = vst [vmem:[%s1255_s19 + $0x30] sm:$0xff] %v793_v43  ;;  %841 = vst [vmem:[%s1255_s19 + $0xb0] sm:$0xff] %v809_v44  ;;  %v794_v51 = vadd.f32 %v1047_v49, %v1250_v24  ;;  %v810_v52 = vadd.f32 %v1063_v50, %v1250_v24  ;;  %v573_v53 = vpop.f32.mrb[7].mxu0  ;;  %v637_v54 = vpop.f32.mrb[7].mxu1 }
 0x106   : > { %823 = vst [vmem:[%s1255_s19 + $0x20] sm:$0xff] %v791_v47  ;;  %839 = vst [vmem:[%s1255_s19 + $0xa0] sm:$0xff] %v807_v48  ;;  %v792_v55 = vadd.f32 %v1250_v24, %v573_v53  ;;  %v808_v56 = vadd.f32 %v1250_v24, %v637_v54 }
 0x107   : > { %826 = vst [vmem:[%s1255_s19 + $0x38] sm:$0xff] %v794_v51  ;;  %842 = vst [vmem:[%s1255_s19 + $0xb8] sm:$0xff] %v810_v52 }
 0x108   : > { %824 = vst [vmem:[%s1255_s19 + $0x28] sm:$0xff] %v792_v55  ;;  %840 = vst [vmem:[%s1255_s19 + $0xa8] sm:$0xff] %v808_v56 }
 0x10a   : > { %v1050_v57 = vpop.f32.mrb[8].mxu0  ;;  %v1066_v58 = vpop.f32.mrb[8].mxu1 }
 0x10b   : > { %v797_v59 = vadd.f32 %v1050_v57, %v1250_v24  ;;  %v813_v60 = vadd.f32 %v1066_v58, %v1250_v24  ;;  %v586_v61 = vpop.f32.mrb[9].mxu0  ;;  %v650_v62 = vpop.f32.mrb[9].mxu1 }
 0x10c   : > { %v795_v63 = vadd.f32 %v1250_v24, %v586_v61  ;;  %v811_v0 = vadd.f32 %v1250_v24, %v650_v62  ;;  %v1051_v1 = vpop.f32.mrb[10].mxu0  ;;  %v1067_v2 = vpop.f32.mrb[10].mxu1 }
 0x10d   : > { %829 = vst [vmem:[%s1255_s19 + $0x50] sm:$0xff] %v797_v59  ;;  %845 = vst [vmem:[%s1255_s19 + $0xd0] sm:$0xff] %v813_v60  ;;  %v798_v3 = vadd.f32 %v1051_v1, %v1250_v24  ;;  %v814_v4 = vadd.f32 %v1067_v2, %v1250_v24  ;;  %v589_v5 = vpop.f32.mrb[11].mxu0  ;;  %v653_v6 = vpop.f32.mrb[11].mxu1 }
 0x10e   : > { %827 = vst [vmem:[%s1255_s19 + $0x40] sm:$0xff] %v795_v63  ;;  %843 = vst [vmem:[%s1255_s19 + $0xc0] sm:$0xff] %v811_v0  ;;  %v796_v7 = vadd.f32 %v1250_v24, %v589_v5  ;;  %v812_v8 = vadd.f32 %v1250_v24, %v653_v6 }
 0x10f   : > { %830 = vst [vmem:[%s1255_s19 + $0x58] sm:$0xff] %v798_v3  ;;  %846 = vst [vmem:[%s1255_s19 + $0xd8] sm:$0xff] %v814_v4 }
 0x110   : > { %828 = vst [vmem:[%s1255_s19 + $0x48] sm:$0xff] %v796_v7  ;;  %844 = vst [vmem:[%s1255_s19 + $0xc8] sm:$0xff] %v812_v8 }
 0x112   : > { %v1054_v9 = vpop.f32.mrb[12].mxu0  ;;  %v1070_v10 = vpop.f32.mrb[12].mxu1 }
 0x113   : > { %v801_v11 = vadd.f32 %v1054_v9, %v1250_v24  ;;  %v817_v12 = vadd.f32 %v1070_v10, %v1250_v24  ;;  %v602_v13 = vpop.f32.mrb[13].mxu0  ;;  %v666_v14 = vpop.f32.mrb[13].mxu1 }
 0x114   : > { %v799_v15 = vadd.f32 %v1250_v24, %v602_v13  ;;  %v815_v16 = vadd.f32 %v1250_v24, %v666_v14  ;;  %v1055_v17 = vpop.f32.mrb[14].mxu0  ;;  %v1071_v18 = vpop.f32.mrb[14].mxu1 }
 0x115   : > { %833 = vst [vmem:[%s1255_s19 + $0x70] sm:$0xff] %v801_v11  ;;  %849 = vst [vmem:[%s1255_s19 + $0xf0] sm:$0xff] %v817_v12  ;;  %v802_v19 = vadd.f32 %v1055_v17, %v1250_v24  ;;  %v818_v20 = vadd.f32 %v1071_v18, %v1250_v24  ;;  %v605_v21 = vpop.f32.mrb[15].mxu0  ;;  %v669_v22 = vpop.f32.mrb[15].mxu1 }
 0x116   : > { %831 = vst [vmem:[%s1255_s19 + $0x60] sm:$0xff] %v799_v15  ;;  %847 = vst [vmem:[%s1255_s19 + $0xe0] sm:$0xff] %v815_v16  ;;  %v800_v23 = vadd.f32 %v1250_v24, %v605_v21  ;;  %v816_v25 = vadd.f32 %v1250_v24, %v669_v22 }
 0x117   : > { %834 = vst [vmem:[%s1255_s19 + $0x78] sm:$0xff] %v802_v19  ;;  %850 = vst [vmem:[%s1255_s19 + $0xf8] sm:$0xff] %v818_v20 }
 0x118   : > { %832 = vst [vmem:[%s1255_s19 + $0x68] sm:$0xff] %v800_v23  ;;  %848 = vst [vmem:[%s1255_s19 + $0xe8] sm:$0xff] %v816_v25 }
 0x119 PF: > { %s13_s14 = sadd.s32 1, %s1158_s14   ;;  %s1334_s12 = smov %s1154_s13 }
 0x11a   : > { %p10_p5 = scmp.ge.s32.totalorder %s13_s14, 4   ;;  %s1335_s13 = smov %s1337_s15 }
 0x11c   :  { %12 = sbr.rel (!%p10_p5) target bundleno = 2 (0x2), region = 76 }

// kernel: vae_encoder_forward.29
= control target key start
LH: loop header
LB: loop body
LE: loop exit
PB: predicated region body
PF: predicated region fallthrough
CT: control target
= control target key end

     0   :  { %s1897_s12 = smov 0   ;;  %s1899_s13 = smov 0   ;;  %s2151_s0 = inlined_call_operand.vmem [shape: bf16[512,384], index: 0, kind: input, shape index: {}]   ;;  %s2152_s1 = inlined_call_operand.vmem [shape: bf16[384,128], index: 1, kind: input, shape index: {}]   ;;  %s2153_s2 = inlined_call_operand.vmem [shape: f32[1,128], index: 2, kind: input, shape index: {}]   ;;  %s2154_s3 = inlined_call_operand.vmem [shape: f32[512,128], index: 3, kind: output, shape index: {}]  }
   0x1   :  { %s1901_s14 = smov 0  }
   0x2 LB: > { %s32_s15 = sadd.s32 1, %s1871_s13  ;;  %p1460_p0 = scmp.ge.s32.totalorder %s1875_s14, 1  ;;  %s1875_s14 = sphi %s1901_s14, %s13_s14   ;;  %s1871_s13 = sphi %s1899_s13, %s2156_s13   ;;  %s1867_s12 = sphi %s1897_s12, %s2155_s12  }
   0x3   : > { %p34_p1 = scmp.ge.s32.totalorder %s32_s15, 2  ;;  %p191_p2 = scmp.lt.s32.totalorder %s1875_s14, 3 }
   0x5   : > { %s2158_s15 = smov (%p34_p1, %s32_s15), 0  ;;  %p192_p3 = pnand %p1460_p0, %p191_p2 }
   0x6   : > { %v1765_v0 = vld [vmem:[%s2152_s1 + $0x40] sm:$0xff] (!%p192_p3)   ;;  %s1461_s18 = sshll.u32 (!%p192_p3), %s1867_s12, 5  ;;  %v1767_v2 = vld [vmem:[%s2152_s1 + $0x48] sm:$0xff] (!%p192_p3)   ;;  %v1769_v4 = vld [vmem:[%s2152_s1 + $0x50] sm:$0xff] (!%p192_p3)  }
   0x7   : > { %195 = sbr.rel (%p192_p3) target bundleno = 349 (0x15d), region = 32  ;;  %v1766_v1 = vld [vmem:[%s2152_s1] sm:$0xff] (!%p192_p3)   ;;  %1540 = vmatprep.subr.bf16.mxu0 (!%p192_p3), %v1765_v0  ;;  %1724 = vmatprep.subr.bf16.mxu1 (!%p192_p3), %v1765_v0  ;;  %p236_p4 = scmp.lt.s32.totalorder (!%p192_p3), %s1461_s18, 63  ;;  %v1768_v3 = vld [vmem:[%s2152_s1 + $0x8] sm:$0xff] (!%p192_p3)   ;;  %v1770_v5 = vld [vmem:[%s2152_s1 + $0x10] sm:$0xff] (!%p192_p3)  }
   0x8   : > { %1541 = vmatpush3.bf16.msra.mxu0 (!%p192_p3), %v1766_v1  ;;  %1732 = vmatpush3.bf16.msra.mxu1 (!%p192_p3), %v1766_v1  ;;  %v1771_v6 = vld [vmem:[%s2152_s1 + $0x58] sm:$0xff] (!%p192_p3)   ;;  %v1773_v8 = vld [vmem:[%s2152_s1 + $0x60] sm:$0xff] (!%p192_p3)   ;;  %v1775_v10 = vld [vmem:[%s2152_s1 + $0x68] sm:$0xff] (!%p192_p3)  }
   0x9   : > { %1542 = vmatprep.subr.bf16.mxu0 (!%p192_p3), %v1767_v2  ;;  %1725 = vmatprep.subr.bf16.mxu1 (!%p192_p3), %v1767_v2  ;;  %v1772_v7 = vld [vmem:[%s2152_s1 + $0x18] sm:$0xff] (!%p192_p3)   ;;  %v1774_v9 = vld [vmem:[%s2152_s1 + $0x20] sm:$0xff] (!%p192_p3)   ;;  %v1776_v13 = vld [vmem:[%s2152_s1 + $0x28] sm:$0xff] (!%p192_p3)  }
   0xa   : > { %v1777_v14 = vld [vmem:[%s2152_s1 + $0x70] sm:$0xff] (!%p192_p3)   ;;  %v1779_v16 = vld [vmem:[%s2152_s1 + $0x78] sm:$0xff] (!%p192_p3)   ;;  %v1787_v18 = vld [vmem:[%s2152_s1 + $0x80] sm:$0xff] (!%p192_p3)  }
   0xb   : > { %v1778_v15 = vld [vmem:[%s2152_s1 + $0x30] sm:$0xff] (!%p192_p3)   ;;  %v1780_v17 = vld [vmem:[%s2152_s1 + $0x38] sm:$0xff] (!%p192_p3)   ;;  %v1788_v22 = vld [vmem:[%s2152_s1 + $0x88] sm:$0xff] (!%p192_p3)  }
   0xc   : > { %1543 = vmatpush3.bf16.msra.mxu0 (!%p192_p3), %v1768_v3  ;;  %1733 = vmatpush3.bf16.msra.mxu1 (!%p192_p3), %v1768_v3  ;;  %v1795_v25 = vld [vmem:[%s2152_s1 + $0x90] sm:$0xff] (!%p192_p3)   ;;  %v1796_v27 = vld [vmem:[%s2152_s1 + $0x98] sm:$0xff] (!%p192_p3)   ;;  %v1803_v30 = vld [vmem:[%s2152_s1 + $0xa0] sm:$0xff] (!%p192_p3)  }
   0xd   : > { %1544 = vmatprep.subr.bf16.mxu0 (!%p192_p3), %v1769_v4  ;;  %1726 = vmatprep.subr.bf16.mxu1 (!%p192_p3), %v1769_v4  ;;  %v1804_v33 = vld [vmem:[%s2152_s1 + $0xa8] sm:$0xff] (!%p192_p3)   ;;  %v1811_v36 = vld [vmem:[%s2152_s1 + $0xb0] sm:$0xff] (!%p192_p3)   ;;  %v1812_v40 = vld [vmem:[%s2152_s1 + $0xb8] sm:$0xff] (!%p192_p3)  }
   0xe   : > { %s2160_s18 = smov (!%p236_p4, %s1461_s18), 63 }
   0xf   : > { %s1740_s4 = smul.u32 12, %s2160_s18 }
  0x10   : > { %1545 = vmatpush3.bf16.msra.mxu0 %v1770_v5  ;;  %1734 = vmatpush3.bf16.msra.mxu1 %v1770_v5 }
  0x11   : > { %1546 = vmatprep.subr.bf16.mxu0 %v1771_v6  ;;  %1727 = vmatprep.subr.bf16.mxu1 %v1771_v6  ;;  %s1948_s11 = scalar_lea.vmem %s2151_s0, %s1740_s4 }
  0x12   : > { %v1783_v11 = vld [vmem:[%s1948_s11 + $0x4] ss:$12 sps:$4 sm:$0xff]   ;;  %v1781_v19 = vld [vmem:[%s1948_s11] ss:$12 sps:$4 sm:$0xff]   ;;  %v1789_v21 = vld [vmem:[%s1948_s11 + $0x1c] ss:$12 sps:$4 sm:$0xff]  }
  0x13   : > { %v1786_v12 = vld [vmem:[%s1948_s11 + $0x124] ss:$12 sps:$4 sm:$0xff]   ;;  %880 = vmatprep.mubr.bf16.mxu0 %v1783_v11  ;;  %v1784_v20 = vld [vmem:[%s1948_s11 + $0x120] ss:$12 sps:$4 sm:$0xff]   ;;  %v1791_v23 = vld [vmem:[%s1948_s11 + $0x13c] ss:$12 sps:$4 sm:$0xff]  }
  0x14   : > { %1547 = vmatpush3.bf16.msra.mxu0 %v1772_v7  ;;  %1735 = vmatpush3.bf16.msra.mxu1 %v1772_v7  ;;  %v1793_v24 = vld [vmem:[%s1948_s11 + $0x18] ss:$12 sps:$4 sm:$0xff]   ;;  %v1797_v28 = vld [vmem:[%s1948_s11 + $0x34] ss:$12 sps:$4 sm:$0xff]   ;;  %v1801_v31 = vld [vmem:[%s1948_s11 + $0x30] ss:$12 sps:$4 sm:$0xff]  }
  0x15   : > { %1548 = vmatprep.subr.bf16.mxu0 %v1773_v8  ;;  %1728 = vmatprep.subr.bf16.mxu1 %v1773_v8  ;;  %v1794_v26 = vld [vmem:[%s1948_s11 + $0x138] ss:$12 sps:$4 sm:$0xff]   ;;  %v1799_v29 = vld [vmem:[%s1948_s11 + $0x154] ss:$12 sps:$4 sm:$0xff]   ;;  %v1802_v32 = vld [vmem:[%s1948_s11 + $0x150] ss:$12 sps:$4 sm:$0xff]  }
  0x16   : > { %976 = vmatprep.mubr.bf16.mxu1 %v1786_v12  ;;  %v1805_v34 = vld [vmem:[%s1948_s11 + $0x4c] ss:$12 sps:$4 sm:$0xff]   ;;  %v1809_v37 = vld [vmem:[%s1948_s11 + $0x48] ss:$12 sps:$4 sm:$0xff]   ;;  %v1813_v39 = vld [vmem:[%s1948_s11 + $0x64] ss:$12 sps:$4 sm:$0xff]  }
  0x17   : > { %v1807_v35 = vld [vmem:[%s1948_s11 + $0x16c] ss:$12 sps:$4 sm:$0xff]   ;;  %v1810_v38 = vld [vmem:[%s1948_s11 + $0x168] ss:$12 sps:$4 sm:$0xff]   ;;  %v1822_v47 = vld [vmem:[%s1948_s11 + $0x50] ss:$12 sps:$4 sm:$0xff]  }
  0x18   : > { %1549 = vmatpush3.bf16.msra.mxu0 %v1774_v9  ;;  %1736 = vmatpush3.bf16.msra.mxu1 %v1774_v9  ;;  %v1815_v41 = vld [vmem:[%s1948_s11 + $0x8] ss:$12 sps:$4 sm:$0xff]   ;;  %v1816_v42 = vld [vmem:[%s1948_s11 + $0x60] ss:$12 sps:$4 sm:$0xff]   ;;  %v1820_v45 = vld [vmem:[%s1948_s11 + $0x38] ss:$12 sps:$4 sm:$0xff]  }
  0x19   : > { %1550 = vmatprep.subr.bf16.mxu0 %v1775_v10  ;;  %1729 = vmatprep.subr.bf16.mxu1 %v1775_v10  ;;  %v1817_v43 = vld [vmem:[%s1948_s11 + $0x20] ss:$12 sps:$4 sm:$0xff]   ;;  %v1818_v44 = vld [vmem:[%s1948_s11 + $0x7c] ss:$12 sps:$4 sm:$0xff]   ;;  %v1821_v46 = vld [vmem:[%s1948_s11 + $0x78] ss:$12 sps:$4 sm:$0xff]  }
  0x1a   : > { %v1823_v48 = vld [vmem:[%s1948_s11 + $0x94] ss:$12 sps:$4 sm:$0xff]   ;;  %v1826_v50 = vld [vmem:[%s1948_s11 + $0x90] ss:$12 sps:$4 sm:$0xff]   ;;  %v1828_v52 = vld [vmem:[%s1948_s11 + $0xac] ss:$12 sps:$4 sm:$0xff]  }
  0x1b   : > { %v1825_v49 = vld [vmem:[%s1948_s11 + $0x68] ss:$12 sps:$4 sm:$0xff]   ;;  %v1827_v51 = vld [vmem:[%s1948_s11 + $0x80] ss:$12 sps:$4 sm:$0xff]   ;;  %v1830_v53 = vld [vmem:[%s1948_s11 + $0x98] ss:$12 sps:$4 sm:$0xff]  }
  0x1c   : > { %1551 = vmatpush3.bf16.msra.mxu0 %v1776_v13  ;;  %1737 = vmatpush3.bf16.msra.mxu1 %v1776_v13  ;;  %v1831_v54 = vld [vmem:[%s1948_s11 + $0xa8] ss:$12 sps:$4 sm:$0xff]   ;;  %v1832_v55 = vld [vmem:[%s1948_s11 + $0xb0] ss:$12 sps:$4 sm:$0xff]   ;;  %v1836_v58 = vld [vmem:[%s1948_s11 + $0xc0] ss:$12 sps:$4 sm:$0xff]  }
  0x1d   : > { %1552 = vmatprep.subr.bf16.mxu0 %v1777_v14  ;;  %1730 = vmatprep.subr.bf16.mxu1 %v1777_v14  ;;  %v1833_v56 = vld [vmem:[%s1948_s11 + $0xc4] ss:$12 sps:$4 sm:$0xff]   ;;  %v1835_v57 = vld [vmem:[%s1948_s11 + $0xc8] ss:$12 sps:$4 sm:$0xff]   ;;  %v1837_v59 = vld [vmem:[%s1948_s11 + $0xe0] ss:$12 sps:$4 sm:$0xff]  }
  0x1e   : > { %v1838_v60 = vld [vmem:[%s1948_s11 + $0xdc] ss:$12 sps:$4 sm:$0xff]   ;;  %v1840_v61 = vld [vmem:[%s1948_s11 + $0xf8] ss:$12 sps:$4 sm:$0xff]   ;;  %v1843_v0 = vld [vmem:[%s1948_s11 + $0xf4] ss:$12 sps:$4 sm:$0xff]  }
  0x1f   : > { %v1841_v62 = vld [vmem:[%s1948_s11 + $0xd8] ss:$12 sps:$4 sm:$0xff]   ;;  %v1842_v63 = vld [vmem:[%s1948_s11 + $0x110] ss:$12 sps:$4 sm:$0xff]   ;;  %v1845_v1 = vld [vmem:[%s1948_s11 + $0x128] ss:$12 sps:$4 sm:$0xff]  }
  0x20   : > { %1553 = vmatpush3.bf16.msra.mxu0 %v1778_v15  ;;  %1738 = vmatpush3.bf16.msra.mxu1 %v1778_v15  ;;  %v1846_v2 = vld [vmem:[%s1948_s11 + $0xf0] ss:$12 sps:$4 sm:$0xff]   ;;  %v1847_v3 = vld [vmem:[%s1948_s11 + $0x140] ss:$12 sps:$4 sm:$0xff]   ;;  %v1850_v5 = vld [vmem:[%s1948_s11 + $0x158] ss:$12 sps:$4 sm:$0xff]  }
  0x21   : > { %1554 = vmatprep.subr.bf16.mxu0 %v1779_v16  ;;  %1731 = vmatprep.subr.bf16.mxu1 %v1779_v16  ;;  %v1848_v4 = vld [vmem:[%s1948_s11 + $0x10c] ss:$12 sps:$4 sm:$0xff]   ;;  %v1851_v6 = vld [vmem:[%s1948_s11 + $0x108] ss:$12 sps:$4 sm:$0xff]   ;;  %v1852_v7 = vld [vmem:[%s1948_s11 + $0x170] ss:$12 sps:$4 sm:$0xff]  }
  0x22   : > { %s1464_s11 = sshll.u32 %s2160_s18, 3 }
  0x23   : > { %s2068_s28 = scalar_lea.vmem %s2154_s3, %s1464_s11 }
  0x24   : > { %1555 = vmatpush3.bf16.msra.mxu0 %v1780_v17  ;;  %1739 = vmatpush3.bf16.msra.mxu1 %v1780_v17 }
  0x25   : > { %1676 = vmatprep.subr.bf16.mxu1 %v1787_v18 }
  0x27   : > { %881 = vmatmul.mubr.bf16.vlgmr.msra.gmra.mrb[0].mxu0 %v1781_v19  ;;  %977 = vmatmul.mubr.bf16.vlgmr.msra.gmra.mrb[0].mxu1 %v1784_v20 }
  0x28   : > { %1677 = vmatpush3.bf16.msra.mxu1 %v1787_v18  ;;  %888 = vmatprep.mubr.bf16.mxu0 %v1789_v21 }
  0x29   : > { %1678 = vmatprep.subr.bf16.mxu1 %v1788_v22  ;;  %984 = vmatprep.mubr.bf16.mxu1 %v1791_v23 }
  0x2c   : > { %1679 = vmatpush3.bf16.msra.mxu1 %v1788_v22 }
  0x2d   : > { %1680 = vmatprep.subr.bf16.mxu1 %v1795_v25 }
  0x2f   : > { %889 = vmatmul.mubr.bf16.gmra.mrb[4].mxu0 %v1793_v24  ;;  %985 = vmatmul.mubr.bf16.gmra.mrb[4].mxu1 %v1794_v26 }
  0x30   : > { %1681 = vmatpush3.bf16.msra.mxu1 %v1795_v25  ;;  %896 = vmatprep.mubr.bf16.mxu0 %v1797_v28 }
  0x31   : > { %1682 = vmatprep.subr.bf16.mxu1 %v1796_v27  ;;  %992 = vmatprep.mubr.bf16.mxu1 %v1799_v29 }
  0x34   : > { %1683 = vmatpush3.bf16.msra.mxu1 %v1796_v27 }
  0x35   : > { %1684 = vmatprep.subr.bf16.mxu1 %v1803_v30 }
  0x37   : > { %897 = vmatmul.mubr.bf16.gmra.mrb[8].mxu0 %v1801_v31  ;;  %993 = vmatmul.mubr.bf16.gmra.mrb[8].mxu1 %v1802_v32 }
  0x38   : > { %1685 = vmatpush3.bf16.msra.mxu1 %v1803_v30  ;;  %904 = vmatprep.mubr.bf16.mxu0 %v1805_v34 }
  0x39   : > { %1686 = vmatprep.subr.bf16.mxu1 %v1804_v33  ;;  %1000 = vmatprep.mubr.bf16.mxu1 %v1807_v35 }
  0x3c   : > { %1687 = vmatpush3.bf16.msra.mxu1 %v1804_v33 }
  0x3d   : > { %1688 = vmatprep.subr.bf16.mxu1 %v1811_v36 }
  0x3f   : > { %905 = vmatmul.mubr.bf16.gmra.mrb[12].mxu0 %v1809_v37  ;;  %1001 = vmatmul.mubr.bf16.gmra.mrb[12].mxu1 %v1810_v38 }
  0x40   : > { %1689 = vmatpush3.bf16.msra.mxu1 %v1811_v36  ;;  %912 = vmatprep.mubr.bf16.mxu0 %v1813_v39 }
  0x41   : > { %1690 = vmatprep.subr.bf16.mxu1 %v1812_v40  ;;  %1692 = vmatprep.mubr.bf16.mxu1 %v1815_v41 }
  0x44   : > { %1691 = vmatpush3.bf16.msra.mxu1 %v1812_v40 }
  0x47   : > { %913 = vmatmul.mubr.bf16.gmra.mrb[16].mxu0 %v1816_v42  ;;  %1693 = vmatmul.mubr.bf16.vlgmr.msra.gmra.mrb[16].mxu1 %v1817_v43 }
  0x48   : > { %920 = vmatprep.mubr.bf16.mxu0 %v1818_v44  ;;  %1696 = vmatprep.mubr.bf16.mxu1 %v1820_v45 }
  0x4f   : > { %921 = vmatmul.mubr.bf16.gmra.mrb[20].mxu0 %v1821_v46  ;;  %1697 = vmatmul.mubr.bf16.gmra.mrb[20].mxu1 %v1822_v47 }
  0x50   : > { %928 = vmatprep.mubr.bf16.mxu0 %v1823_v48  ;;  %1700 = vmatprep.mubr.bf16.mxu1 %v1825_v49 }
  0x57   : > { %929 = vmatmul.mubr.bf16.gmra.mrb[24].mxu0 %v1826_v50  ;;  %1701 = vmatmul.mubr.bf16.gmra.mrb[24].mxu1 %v1827_v51 }
  0x58   : > { %936 = vmatprep.mubr.bf16.mxu0 %v1828_v52  ;;  %1704 = vmatprep.mubr.bf16.mxu1 %v1830_v53 }
  0x5f   : > { %937 = vmatmul.mubr.bf16.gmra.mrb[28].mxu0 %v1831_v54  ;;  %1705 = vmatmul.mubr.bf16.gmra.mrb[28].mxu1 %v1832_v55 }
  0x60   : > { %944 = vmatprep.mubr.bf16.mxu0 %v1833_v56  ;;  %1708 = vmatprep.mubr.bf16.mxu1 %v1835_v57 }
  0x67   : > { %945 = vmatmul.mubr.bf16.gmra.mrb[32].mxu0 %v1836_v58  ;;  %1709 = vmatmul.mubr.bf16.gmra.mrb[32].mxu1 %v1837_v59  ;;  %v2063_v58 = vld [vmem:[%s2153_s2] ss:$0 sm:$0xff] }
  0x68   : > { %952 = vmatprep.mubr.bf16.mxu0 %v1838_v60  ;;  %1712 = vmatprep.mubr.bf16.mxu1 %v1840_v61 }
  0x6f   : > { %953 = vmatmul.mubr.bf16.gmra.mrb[36].mxu0 %v1841_v62  ;;  %1713 = vmatmul.mubr.bf16.gmra.mrb[36].mxu1 %v1842_v63 }
  0x70   : > { %960 = vmatprep.mubr.bf16.mxu0 %v1843_v0  ;;  %1716 = vmatprep.mubr.bf16.mxu1 %v1845_v1 }
  0x77   : > { %961 = vmatmul.mubr.bf16.gmra.mrb[40].mxu0 %v1846_v2  ;;  %1717 = vmatmul.mubr.bf16.gmra.mrb[40].mxu1 %v1847_v3 }
  0x78   : > { %968 = vmatprep.mubr.bf16.mxu0 %v1848_v4  ;;  %1720 = vmatprep.mubr.bf16.mxu1 %v1850_v5 }
  0x7f   : > { %969 = vmatmul.mubr.bf16.gmra.mrb[44].mxu0 %v1851_v6  ;;  %1721 = vmatmul.mubr.bf16.gmra.mrb[44].mxu1 %v1852_v7 }
  0xfa   : > { %v1556_v8 = vpop.f32.mrb[0].mxu0  ;;  %v1628_v9 = vpop.f32.mrb[0].mxu1 }
  0xfb   : > { %v1557_v10 = vpop.f32.mrb[1].mxu0  ;;  %v1629_v11 = vpop.f32.mrb[1].mxu1 }
  0xfc   : > { %v1558_v12 = vadd.f32 %v1557_v10, %v1556_v8  ;;  %v2043_v13 = vadd.f32 %v1629_v11, %v1628_v9  ;;  %v1559_v14 = vpop.f32.mrb[2].mxu0  ;;  %v1631_v15 = vpop.f32.mrb[2].mxu1 }
  0xfd   : > { %v1560_v16 = vpop.f32.mrb[3].mxu0  ;;  %v1632_v17 = vpop.f32.mrb[3].mxu1 }
  0xfe   : > { %v1561_v18 = vadd.f32 %v1560_v16, %v1559_v14  ;;  %v2045_v19 = vadd.f32 %v1632_v17, %v1631_v15 }
 0x102   : > { %v1562_v20 = vpop.f32.mrb[4].mxu0  ;;  %v1634_v21 = vpop.f32.mrb[4].mxu1 }
 0x103   : > { %v1563_v22 = vpop.f32.mrb[5].mxu0  ;;  %v1635_v23 = vpop.f32.mrb[5].mxu1 }
 0x104   : > { %v1564_v24 = vadd.f32 %v1563_v22, %v1562_v20  ;;  %v2047_v25 = vadd.f32 %v1635_v23, %v1634_v21  ;;  %v1565_v26 = vpop.f32.mrb[6].mxu0  ;;  %v1637_v27 = vpop.f32.mrb[6].mxu1 }
 0x105   : > { %v1566_v28 = vpop.f32.mrb[7].mxu0  ;;  %v1638_v29 = vpop.f32.mrb[7].mxu1 }
 0x106   : > { %v1567_v30 = vadd.f32 %v1566_v28, %v1565_v26  ;;  %v2049_v31 = vadd.f32 %v1638_v29, %v1637_v27 }
 0x10a   : > { %v1568_v32 = vpop.f32.mrb[8].mxu0  ;;  %v1640_v33 = vpop.f32.mrb[8].mxu1 }
 0x10b   : > { %v1569_v34 = vpop.f32.mrb[9].mxu0  ;;  %v1641_v35 = vpop.f32.mrb[9].mxu1 }
 0x10c   : > { %v1570_v36 = vadd.f32 %v1569_v34, %v1568_v32  ;;  %v2051_v37 = vadd.f32 %v1641_v35, %v1640_v33  ;;  %v1571_v38 = vpop.f32.mrb[10].mxu0  ;;  %v1643_v39 = vpop.f32.mrb[10].mxu1 }
 0x10d   : > { %v1572_v40 = vpop.f32.mrb[11].mxu0  ;;  %v1644_v41 = vpop.f32.mrb[11].mxu1 }
 0x10e   : > { %v1573_v42 = vadd.f32 %v1572_v40, %v1571_v38  ;;  %v2053_v43 = vadd.f32 %v1644_v41, %v1643_v39 }
 0x112   : > { %v1574_v44 = vpop.f32.mrb[12].mxu0  ;;  %v1646_v45 = vpop.f32.mrb[12].mxu1 }
 0x113   : > { %v1575_v46 = vpop.f32.mrb[13].mxu0  ;;  %v1647_v47 = vpop.f32.mrb[13].mxu1 }
 0x114   : > { %v1576_v48 = vadd.f32 %v1575_v46, %v1574_v44  ;;  %v2055_v49 = vadd.f32 %v1647_v47, %v1646_v45  ;;  %v1577_v50 = vpop.f32.mrb[14].mxu0  ;;  %v1649_v51 = vpop.f32.mrb[14].mxu1 }
 0x115   : > { %v1578_v52 = vpop.f32.mrb[15].mxu0  ;;  %v1650_v53 = vpop.f32.mrb[15].mxu1 }
 0x116   : > { %v1579_v54 = vadd.f32 %v1578_v52, %v1577_v50  ;;  %v2057_v55 = vadd.f32 %v1650_v53, %v1649_v51 }
 0x11a   : > { %v1580_v56 = vpop.f32.mrb[16].mxu0  ;;  %v1694_v57 = vpop.f32.mrb[16].mxu1 }
 0x11b   : > { %v1052_v59 = vadd.f32 %v1694_v57, %v1564_v24  ;;  %v1581_v60 = vpop.f32.mrb[17].mxu0  ;;  %v1043_v61 = vpop.f32.mrb[17].mxu1 }
 0x11c   : > { %v1582_v62 = vadd.f32 %v1581_v60, %v1580_v56  ;;  %v1044_v63 = vadd.f32 %v1558_v12, %v1043_v61  ;;  %v1583_v0 = vpop.f32.mrb[18].mxu0  ;;  %v1695_v1 = vpop.f32.mrb[18].mxu1 }
 0x11d   : > { %v1278_v2 = vadd.f32 %v2063_v58, %v1052_v59  ;;  %v1055_v3 = vadd.f32 %v1695_v1, %v1567_v30  ;;  %v1584_v4 = vpop.f32.mrb[19].mxu0  ;;  %v1046_v5 = vpop.f32.mrb[19].mxu1 }
 0x11e   : > { %v1276_v6 = vadd.f32 %v2063_v58, %v1044_v63  ;;  %v1585_v7 = vadd.f32 %v1584_v4, %v1583_v0  ;;  %v1047_v8 = vadd.f32 %v1561_v18, %v1046_v5 }
 0x11f   : > { %1310 = vst [vmem:[%s2068_s28 + $0x10] sm:$0xff] %v1278_v2  ;;  %v1279_v9 = vadd.f32 %v2063_v58, %v1055_v3 }
 0x120   : > { %1308 = vst [vmem:[%s2068_s28] sm:$0xff] %v1276_v6  ;;  %v1277_v10 = vadd.f32 %v2063_v58, %v1047_v8 }
 0x121   : > { %1311 = vst [vmem:[%s2068_s28 + $0x18] sm:$0xff] %v1279_v9 }
 0x122   : > { %1309 = vst [vmem:[%s2068_s28 + $0x8] sm:$0xff] %v1277_v10  ;;  %v1586_v11 = vpop.f32.mrb[20].mxu0  ;;  %v1698_v12 = vpop.f32.mrb[20].mxu1 }
 0x123   : > { %v1068_v14 = vadd.f32 %v1698_v12, %v1576_v48  ;;  %v1587_v15 = vpop.f32.mrb[21].mxu0  ;;  %v1059_v16 = vpop.f32.mrb[21].mxu1 }
 0x124   : > { %v1588_v17 = vadd.f32 %v1587_v15, %v1586_v11  ;;  %v1060_v20 = vadd.f32 %v1570_v36, %v1059_v16  ;;  %v1589_v18 = vpop.f32.mrb[22].mxu0  ;;  %v1699_v21 = vpop.f32.mrb[22].mxu1 }
 0x125   : > { %v1282_v22 = vadd.f32 %v2063_v58, %v1068_v14  ;;  %v1071_v23 = vadd.f32 %v1699_v21, %v1579_v54  ;;  %v1590_v24 = vpop.f32.mrb[23].mxu0  ;;  %v1062_v26 = vpop.f32.mrb[23].mxu1 }
 0x126   : > { %v1280_v27 = vadd.f32 %v2063_v58, %v1060_v20  ;;  %v1591_v28 = vadd.f32 %v1590_v24, %v1589_v18  ;;  %v1063_v29 = vadd.f32 %v1573_v42, %v1062_v26 }
 0x127   : > { %1314 = vst [vmem:[%s2068_s28 + $0x30] sm:$0xff] %v1282_v22  ;;  %v1283_v30 = vadd.f32 %v2063_v58, %v1071_v23 }
 0x128   : > { %1312 = vst [vmem:[%s2068_s28 + $0x20] sm:$0xff] %v1280_v27  ;;  %v1281_v32 = vadd.f32 %v2063_v58, %v1063_v29 }
 0x129   : > { %1315 = vst [vmem:[%s2068_s28 + $0x38] sm:$0xff] %v1283_v30 }
 0x12a   : > { %1313 = vst [vmem:[%s2068_s28 + $0x28] sm:$0xff] %v1281_v32  ;;  %v1592_v33 = vpop.f32.mrb[24].mxu0  ;;  %v1702_v34 = vpop.f32.mrb[24].mxu1 }
 0x12b   : > { %v1084_v35 = vadd.f32 %v1702_v34, %v1588_v17  ;;  %v1593_v36 = vpop.f32.mrb[25].mxu0  ;;  %v1075_v38 = vpop.f32.mrb[25].mxu1 }
 0x12c   : > { %v1594_v39 = vadd.f32 %v1593_v36, %v1592_v33  ;;  %v1076_v40 = vadd.f32 %v1582_v62, %v1075_v38  ;;  %v1595_v41 = vpop.f32.mrb[26].mxu0  ;;  %v1703_v42 = vpop.f32.mrb[26].mxu1 }
 0x12d   : > { %v1286_v44 = vadd.f32 %v2063_v58, %v1084_v35  ;;  %v1087_v45 = vadd.f32 %v1703_v42, %v1591_v28  ;;  %v1596_v46 = vpop.f32.mrb[27].mxu0  ;;  %v1078_v47 = vpop.f32.mrb[27].mxu1 }
 0x12e   : > { %v1284_v48 = vadd.f32 %v2063_v58, %v1076_v40  ;;  %v1597_v50 = vadd.f32 %v1596_v46, %v1595_v41  ;;  %v1079_v51 = vadd.f32 %v1585_v7, %v1078_v47 }
 0x12f   : > { %1318 = vst [vmem:[%s2068_s28 + $0x50] sm:$0xff] %v1286_v44  ;;  %v1287_v52 = vadd.f32 %v2063_v58, %v1087_v45 }
 0x130   : > { %1316 = vst [vmem:[%s2068_s28 + $0x40] sm:$0xff] %v1284_v48  ;;  %v1285_v53 = vadd.f32 %v2063_v58, %v1079_v51 }
 0x131   : > { %1319 = vst [vmem:[%s2068_s28 + $0x58] sm:$0xff] %v1287_v52 }
 0x132   : > { %1317 = vst [vmem:[%s2068_s28 + $0x48] sm:$0xff] %v1285_v53  ;;  %v1598_v54 = vpop.f32.mrb[28].mxu0  ;;  %v1706_v56 = vpop.f32.mrb[28].mxu1 }
 0x133   : > { %v1599_v57 = vpop.f32.mrb[29].mxu0  ;;  %v1091_v59 = vpop.f32.mrb[29].mxu1 }
 0x134   : > { %v1600_v60 = vadd.f32 %v1599_v57, %v1598_v54  ;;  %v1092_v61 = vadd.f32 %v1594_v39, %v1091_v59  ;;  %v1601_v62 = vpop.f32.mrb[30].mxu0  ;;  %v1707_v63 = vpop.f32.mrb[30].mxu1 }
 0x135   : > { %v1602_v0 = vpop.f32.mrb[31].mxu0  ;;  %v1094_v1 = vpop.f32.mrb[31].mxu1 }
 0x136   : > { %v1100_v2 = vadd.f32 %v1706_v56, %v1600_v60  ;;  %v1288_v3 = vadd.f32 %v2063_v58, %v1092_v61  ;;  %v1603_v4 = vadd.f32 %v1602_v0, %v1601_v62  ;;  %v1095_v5 = vadd.f32 %v1597_v50, %v1094_v1 }
 0x138   : > { %v1290_v6 = vadd.f32 %v2063_v58, %v1100_v2  ;;  %1320 = vst [vmem:[%s2068_s28 + $0x60] sm:$0xff] %v1288_v3  ;;  %v1103_v7 = vadd.f32 %v1707_v63, %v1603_v4  ;;  %v1289_v8 = vadd.f32 %v2063_v58, %v1095_v5 }
 0x13a   : > { %1322 = vst [vmem:[%s2068_s28 + $0x70] sm:$0xff] %v1290_v6  ;;  %v1291_v9 = vadd.f32 %v2063_v58, %v1103_v7  ;;  %1321 = vst [vmem:[%s2068_s28 + $0x68] sm:$0xff] %v1289_v8  ;;  %v1604_v10 = vpop.f32.mrb[32].mxu0  ;;  %v1710_v11 = vpop.f32.mrb[32].mxu1 }
 0x13b   : > { %v1605_v12 = vpop.f32.mrb[33].mxu0  ;;  %v1107_v14 = vpop.f32.mrb[33].mxu1 }
 0x13c   : > { %1323 = vst [vmem:[%s2068_s28 + $0x78] sm:$0xff] %v1291_v9  ;;  %v1606_v15 = vadd.f32 %v1605_v12, %v1604_v10  ;;  %v1607_v16 = vpop.f32.mrb[34].mxu0  ;;  %v1711_v17 = vpop.f32.mrb[34].mxu1 }
 0x13d   : > { %v1608_v20 = vpop.f32.mrb[35].mxu0  ;;  %v1110_v18 = vpop.f32.mrb[35].mxu1 }
 0x13e   : > { %v1108_v21 = vadd.f32 %v1606_v15, %v1107_v14  ;;  %v1609_v22 = vadd.f32 %v1608_v20, %v1607_v16 }
 0x140   : > { %v1292_v23 = vadd.f32 %v2063_v58, %v1108_v21  ;;  %v1111_v24 = vadd.f32 %v1609_v22, %v1110_v18 }
 0x142   : > { %1324 = vst [vmem:[%s2068_s28 + $0x80] sm:$0xff] %v1292_v23  ;;  %v1293_v26 = vadd.f32 %v2063_v58, %v1111_v24  ;;  %v1610_v27 = vpop.f32.mrb[36].mxu0  ;;  %v1714_v28 = vpop.f32.mrb[36].mxu1 }
 0x143   : > { %v1611_v29 = vpop.f32.mrb[37].mxu0  ;;  %v1123_v30 = vpop.f32.mrb[37].mxu1 }
 0x144   : > { %1325 = vst [vmem:[%s2068_s28 + $0x88] sm:$0xff] %v1293_v26  ;;  %v1612_v32 = vadd.f32 %v1611_v29, %v1610_v27  ;;  %v1613_v33 = vpop.f32.mrb[38].mxu0  ;;  %v1715_v34 = vpop.f32.mrb[38].mxu1 }
 0x145   : > { %v1614_v35 = vpop.f32.mrb[39].mxu0  ;;  %v1126_v36 = vpop.f32.mrb[39].mxu1 }
 0x146   : > { %v1116_v38 = vadd.f32 %v1710_v11, %v1612_v32  ;;  %v1615_v39 = vadd.f32 %v1614_v35, %v1613_v33 }
 0x148   : > { %v1294_v40 = vadd.f32 %v2063_v58, %v1116_v38  ;;  %v1119_v41 = vadd.f32 %v1711_v17, %v1615_v39 }
 0x14a   : > { %1326 = vst [vmem:[%s2068_s28 + $0x90] sm:$0xff] %v1294_v40  ;;  %v1295_v42 = vadd.f32 %v2063_v58, %v1119_v41  ;;  %v1616_v44 = vpop.f32.mrb[40].mxu0  ;;  %v1718_v45 = vpop.f32.mrb[40].mxu1 }
 0x14b   : > { %v1148_v46 = vadd.f32 %v1718_v45, %v2047_v25  ;;  %v1617_v47 = vpop.f32.mrb[41].mxu0  ;;  %v1139_v48 = vpop.f32.mrb[41].mxu1 }
 0x14c   : > { %1327 = vst [vmem:[%s2068_s28 + $0x98] sm:$0xff] %v1295_v42  ;;  %v1618_v50 = vadd.f32 %v1617_v47, %v1616_v44  ;;  %v1140_v51 = vadd.f32 %v2043_v13, %v1139_v48  ;;  %v1619_v52 = vpop.f32.mrb[42].mxu0  ;;  %v1719_v53 = vpop.f32.mrb[42].mxu1 }
 0x14d   : > { %v1302_v54 = vadd.f32 %v2063_v58, %v1148_v46  ;;  %v1151_v56 = vadd.f32 %v1719_v53, %v2049_v31  ;;  %v1620_v57 = vpop.f32.mrb[43].mxu0  ;;  %v1142_v59 = vpop.f32.mrb[43].mxu1 }
 0x14e   : > { %v1124_v25 = vadd.f32 %v1618_v50, %v1123_v30  ;;  %v1300_v60 = vadd.f32 %v2063_v58, %v1140_v51  ;;  %v1621_v61 = vadd.f32 %v1620_v57, %v1619_v52  ;;  %v1143_v62 = vadd.f32 %v2045_v19, %v1142_v59 }
 0x14f   : > { %1334 = vst [vmem:[%s2068_s28 + $0xd0] sm:$0xff] %v1302_v54  ;;  %v1303_v13 = vadd.f32 %v2063_v58, %v1151_v56 }
 0x150   : > { %v1296_v63 = vadd.f32 %v2063_v58, %v1124_v25  ;;  %1332 = vst [vmem:[%s2068_s28 + $0xc0] sm:$0xff] %v1300_v60  ;;  %v1127_v0 = vadd.f32 %v1621_v61, %v1126_v36  ;;  %v1301_v1 = vadd.f32 %v2063_v58, %v1143_v62 }
 0x151   : > { %1335 = vst [vmem:[%s2068_s28 + $0xd8] sm:$0xff] %v1303_v13 }
 0x152   : > { %1328 = vst [vmem:[%s2068_s28 + $0xa0] sm:$0xff] %v1296_v63  ;;  %v1297_v31 = vadd.f32 %v2063_v58, %v1127_v0  ;;  %1333 = vst [vmem:[%s2068_s28 + $0xc8] sm:$0xff] %v1301_v1  ;;  %v1622_v2 = vpop.f32.mrb[44].mxu0  ;;  %v1722_v3 = vpop.f32.mrb[44].mxu1 }
 0x153   : > { %v1164_v4 = vadd.f32 %v1722_v3, %v2055_v49  ;;  %v1623_v19 = vpop.f32.mrb[45].mxu0  ;;  %v1155_v5 = vpop.f32.mrb[45].mxu1 }
 0x154   : > { %1329 = vst [vmem:[%s2068_s28 + $0xa8] sm:$0xff] %v1297_v31  ;;  %v1624_v6 = vadd.f32 %v1623_v19, %v1622_v2  ;;  %v1156_v7 = vadd.f32 %v2051_v37, %v1155_v5  ;;  %v1625_v8 = vpop.f32.mrb[46].mxu0  ;;  %v1723_v9 = vpop.f32.mrb[46].mxu1 }
 0x155   : > { %v1306_v10 = vadd.f32 %v2063_v58, %v1164_v4  ;;  %v1167_v11 = vadd.f32 %v1723_v9, %v2057_v55  ;;  %v1626_v12 = vpop.f32.mrb[47].mxu0  ;;  %v1158_v49 = vpop.f32.mrb[47].mxu1 }
 0x156   : > { %v1132_v14 = vadd.f32 %v1714_v28, %v1624_v6  ;;  %v1304_v15 = vadd.f32 %v2063_v58, %v1156_v7  ;;  %v1627_v16 = vadd.f32 %v1626_v12, %v1625_v8  ;;  %v1159_v17 = vadd.f32 %v2053_v43, %v1158_v49 }
 0x157   : > { %1338 = vst [vmem:[%s2068_s28 + $0xf0] sm:$0xff] %v1306_v10  ;;  %v1307_v37 = vadd.f32 %v2063_v58, %v1167_v11 }
 0x158   : > { %v1298_v20 = vadd.f32 %v2063_v58, %v1132_v14  ;;  %1336 = vst [vmem:[%s2068_s28 + $0xe0] sm:$0xff] %v1304_v15  ;;  %v1135_v18 = vadd.f32 %v1715_v34, %v1627_v16  ;;  %v1305_v21 = vadd.f32 %v2063_v58, %v1159_v17 }
 0x159   : > { %1339 = vst [vmem:[%s2068_s28 + $0xf8] sm:$0xff] %v1307_v37 }
 0x15a   : > { %1330 = vst [vmem:[%s2068_s28 + $0xb0] sm:$0xff] %v1298_v20  ;;  %v1299_v55 = vadd.f32 %v2063_v58, %v1135_v18  ;;  %1337 = vst [vmem:[%s2068_s28 + $0xe8] sm:$0xff] %v1305_v21 }
 0x15c   : > { %1331 = vst [vmem:[%s2068_s28 + $0xb8] sm:$0xff] %v1299_v55 }
 0x15d PF: > { %s13_s14 = sadd.s32 1, %s1875_s14   ;;  %s2155_s12 = smov %s1871_s13 }
 0x15e   : > { %p10_p5 = scmp.ge.s32.totalorder %s13_s14, 4   ;;  %s2156_s13 = smov %s2158_s15 }
 0x160   :  { %12 = sbr.rel (!%p10_p5) target bundleno = 2 (0x2), region = 76 }

// kernel: vae_encoder_forward.31
= control target key start
LH: loop header
LB: loop body
LE: loop exit
PB: predicated region body
PF: predicated region fallthrough
CT: control target
= control target key end

     0   :  { %s2043_s15 = smov 0   ;;  %s2045_s16 = smov 0   ;;  %s2343_s0 = inlined_call_operand.vmem [shape: bf16[512,384], index: 0, kind: input, shape index: {}]   ;;  %s2344_s1 = inlined_call_operand.vmem [shape: bf16[384,128], index: 1, kind: input, shape index: {}]   ;;  %s2345_s2 = inlined_call_operand.vmem [shape: f32[1,128], index: 2, kind: input, shape index: {}]   ;;  %s2346_s3 = inlined_call_operand.vmem [shape: f32[512,128], index: 3, kind: input, shape index: {}]   ;;  %s2347_s4 = inlined_call_operand.vmem [shape: f32[512,128], index: 4, kind: output, shape index: {}]  }
   0x1   :  { %s2047_s17 = smov 0  }
   0x2 LB: > { %s33_s18 = sadd.s32 1, %s2012_s16  ;;  %p1599_p0 = scmp.ge.s32.totalorder %s2016_s17, 1  ;;  %s2016_s17 = sphi %s2047_s17, %s14_s17   ;;  %s2012_s16 = sphi %s2045_s16, %s2349_s16   ;;  %s2008_s15 = sphi %s2043_s15, %s2348_s15  }
   0x3   : > { %p35_p1 = scmp.ge.s32.totalorder %s33_s18, 2  ;;  %p232_p2 = scmp.lt.s32.totalorder %s2016_s17, 3 }
   0x5   : > { %s2351_s18 = smov (%p35_p1, %s33_s18), 0  ;;  %p233_p3 = pnand %p1599_p0, %p232_p2 }
   0x6   : > { %v1906_v0 = vld [vmem:[%s2344_s1 + $0x40] sm:$0xff] (!%p233_p3)   ;;  %s1600_s21 = sshll.u32 (!%p233_p3), %s2008_s15, 5  ;;  %v1908_v2 = vld [vmem:[%s2344_s1 + $0x48] sm:$0xff] (!%p233_p3)   ;;  %v1910_v4 = vld [vmem:[%s2344_s1 + $0x50] sm:$0xff] (!%p233_p3)  }
   0x7   : > { %236 = sbr.rel (%p233_p3) target bundleno = 351 (0x15f), region = 36  ;;  %v1907_v1 = vld [vmem:[%s2344_s1] sm:$0xff] (!%p233_p3)   ;;  %1681 = vmatprep.subr.bf16.mxu0 (!%p233_p3), %v1906_v0  ;;  %1865 = vmatprep.subr.bf16.mxu1 (!%p233_p3), %v1906_v0  ;;  %p287_p4 = scmp.lt.s32.totalorder (!%p233_p3), %s1600_s21, 63  ;;  %v1909_v3 = vld [vmem:[%s2344_s1 + $0x8] sm:$0xff] (!%p233_p3)   ;;  %v1911_v5 = vld [vmem:[%s2344_s1 + $0x10] sm:$0xff] (!%p233_p3)  }
   0x8   : > { %1682 = vmatpush3.bf16.msra.mxu0 (!%p233_p3), %v1907_v1  ;;  %1873 = vmatpush3.bf16.msra.mxu1 (!%p233_p3), %v1907_v1  ;;  %v1912_v6 = vld [vmem:[%s2344_s1 + $0x58] sm:$0xff] (!%p233_p3)   ;;  %v1914_v8 = vld [vmem:[%s2344_s1 + $0x60] sm:$0xff] (!%p233_p3)   ;;  %v1916_v10 = vld [vmem:[%s2344_s1 + $0x68] sm:$0xff] (!%p233_p3)  }
   0x9   : > { %1683 = vmatprep.subr.bf16.mxu0 (!%p233_p3), %v1908_v2  ;;  %1866 = vmatprep.subr.bf16.mxu1 (!%p233_p3), %v1908_v2  ;;  %v1913_v7 = vld [vmem:[%s2344_s1 + $0x18] sm:$0xff] (!%p233_p3)   ;;  %v1915_v9 = vld [vmem:[%s2344_s1 + $0x20] sm:$0xff] (!%p233_p3)   ;;  %v1917_v13 = vld [vmem:[%s2344_s1 + $0x28] sm:$0xff] (!%p233_p3)  }
   0xa   : > { %v1918_v14 = vld [vmem:[%s2344_s1 + $0x70] sm:$0xff] (!%p233_p3)   ;;  %v1920_v16 = vld [vmem:[%s2344_s1 + $0x78] sm:$0xff] (!%p233_p3)   ;;  %v1928_v18 = vld [vmem:[%s2344_s1 + $0x80] sm:$0xff] (!%p233_p3)  }
   0xb   : > { %v1919_v15 = vld [vmem:[%s2344_s1 + $0x30] sm:$0xff] (!%p233_p3)   ;;  %v1921_v17 = vld [vmem:[%s2344_s1 + $0x38] sm:$0xff] (!%p233_p3)   ;;  %v1929_v22 = vld [vmem:[%s2344_s1 + $0x88] sm:$0xff] (!%p233_p3)  }
   0xc   : > { %1684 = vmatpush3.bf16.msra.mxu0 (!%p233_p3), %v1909_v3  ;;  %1874 = vmatpush3.bf16.msra.mxu1 (!%p233_p3), %v1909_v3  ;;  %v1936_v25 = vld [vmem:[%s2344_s1 + $0x90] sm:$0xff] (!%p233_p3)   ;;  %v1937_v27 = vld [vmem:[%s2344_s1 + $0x98] sm:$0xff] (!%p233_p3)   ;;  %v1944_v30 = vld [vmem:[%s2344_s1 + $0xa0] sm:$0xff] (!%p233_p3)  }
   0xd   : > { %1685 = vmatprep.subr.bf16.mxu0 (!%p233_p3), %v1910_v4  ;;  %1867 = vmatprep.subr.bf16.mxu1 (!%p233_p3), %v1910_v4  ;;  %v1945_v33 = vld [vmem:[%s2344_s1 + $0xa8] sm:$0xff] (!%p233_p3)   ;;  %v1952_v36 = vld [vmem:[%s2344_s1 + $0xb0] sm:$0xff] (!%p233_p3)   ;;  %v1953_v40 = vld [vmem:[%s2344_s1 + $0xb8] sm:$0xff] (!%p233_p3)  }
   0xe   : > { %s2353_s21 = smov (!%p287_p4, %s1600_s21), 63 }
   0xf   : > { %s1881_s8 = smul.u32 12, %s2353_s21 }
  0x10   : > { %1686 = vmatpush3.bf16.msra.mxu0 %v1911_v5  ;;  %1875 = vmatpush3.bf16.msra.mxu1 %v1911_v5 }
  0x11   : > { %1687 = vmatprep.subr.bf16.mxu0 %v1912_v6  ;;  %1868 = vmatprep.subr.bf16.mxu1 %v1912_v6  ;;  %s2094_s15 = scalar_lea.vmem %s2343_s0, %s1881_s8 }
  0x12   : > { %v1924_v11 = vld [vmem:[%s2094_s15 + $0x4] ss:$12 sps:$4 sm:$0xff]   ;;  %v1922_v19 = vld [vmem:[%s2094_s15] ss:$12 sps:$4 sm:$0xff]   ;;  %v1930_v21 = vld [vmem:[%s2094_s15 + $0x1c] ss:$12 sps:$4 sm:$0xff]  }
  0x13   : > { %v1927_v12 = vld [vmem:[%s2094_s15 + $0x124] ss:$12 sps:$4 sm:$0xff]   ;;  %940 = vmatprep.mubr.bf16.mxu0 %v1924_v11  ;;  %v1925_v20 = vld [vmem:[%s2094_s15 + $0x120] ss:$12 sps:$4 sm:$0xff]   ;;  %v1932_v23 = vld [vmem:[%s2094_s15 + $0x13c] ss:$12 sps:$4 sm:$0xff]  }
  0x14   : > { %1688 = vmatpush3.bf16.msra.mxu0 %v1913_v7  ;;  %1876 = vmatpush3.bf16.msra.mxu1 %v1913_v7  ;;  %v1934_v24 = vld [vmem:[%s2094_s15 + $0x18] ss:$12 sps:$4 sm:$0xff]   ;;  %v1938_v28 = vld [vmem:[%s2094_s15 + $0x34] ss:$12 sps:$4 sm:$0xff]   ;;  %v1942_v31 = vld [vmem:[%s2094_s15 + $0x30] ss:$12 sps:$4 sm:$0xff]  }
  0x15   : > { %1689 = vmatprep.subr.bf16.mxu0 %v1914_v8  ;;  %1869 = vmatprep.subr.bf16.mxu1 %v1914_v8  ;;  %v1935_v26 = vld [vmem:[%s2094_s15 + $0x138] ss:$12 sps:$4 sm:$0xff]   ;;  %v1940_v29 = vld [vmem:[%s2094_s15 + $0x154] ss:$12 sps:$4 sm:$0xff]   ;;  %v1943_v32 = vld [vmem:[%s2094_s15 + $0x150] ss:$12 sps:$4 sm:$0xff]  }
  0x16   : > { %1036 = vmatprep.mubr.bf16.mxu1 %v1927_v12  ;;  %v1946_v34 = vld [vmem:[%s2094_s15 + $0x4c] ss:$12 sps:$4 sm:$0xff]   ;;  %v1950_v37 = vld [vmem:[%s2094_s15 + $0x48] ss:$12 sps:$4 sm:$0xff]   ;;  %v1954_v39 = vld [vmem:[%s2094_s15 + $0x64] ss:$12 sps:$4 sm:$0xff]  }
  0x17   : > { %v1948_v35 = vld [vmem:[%s2094_s15 + $0x16c] ss:$12 sps:$4 sm:$0xff]   ;;  %v1951_v38 = vld [vmem:[%s2094_s15 + $0x168] ss:$12 sps:$4 sm:$0xff]   ;;  %v1963_v47 = vld [vmem:[%s2094_s15 + $0x50] ss:$12 sps:$4 sm:$0xff]  }
  0x18   : > { %1690 = vmatpush3.bf16.msra.mxu0 %v1915_v9  ;;  %1877 = vmatpush3.bf16.msra.mxu1 %v1915_v9  ;;  %v1956_v41 = vld [vmem:[%s2094_s15 + $0x8] ss:$12 sps:$4 sm:$0xff]   ;;  %v1957_v42 = vld [vmem:[%s2094_s15 + $0x60] ss:$12 sps:$4 sm:$0xff]   ;;  %v1961_v45 = vld [vmem:[%s2094_s15 + $0x38] ss:$12 sps:$4 sm:$0xff]  }
  0x19   : > { %1691 = vmatprep.subr.bf16.mxu0 %v1916_v10  ;;  %1870 = vmatprep.subr.bf16.mxu1 %v1916_v10  ;;  %v1958_v43 = vld [vmem:[%s2094_s15 + $0x20] ss:$12 sps:$4 sm:$0xff]   ;;  %v1959_v44 = vld [vmem:[%s2094_s15 + $0x7c] ss:$12 sps:$4 sm:$0xff]   ;;  %v1962_v46 = vld [vmem:[%s2094_s15 + $0x78] ss:$12 sps:$4 sm:$0xff]  }
  0x1a   : > { %v1964_v48 = vld [vmem:[%s2094_s15 + $0x94] ss:$12 sps:$4 sm:$0xff]   ;;  %v1967_v50 = vld [vmem:[%s2094_s15 + $0x90] ss:$12 sps:$4 sm:$0xff]   ;;  %v1969_v52 = vld [vmem:[%s2094_s15 + $0xac] ss:$12 sps:$4 sm:$0xff]  }
  0x1b   : > { %v1966_v49 = vld [vmem:[%s2094_s15 + $0x68] ss:$12 sps:$4 sm:$0xff]   ;;  %v1968_v51 = vld [vmem:[%s2094_s15 + $0x80] ss:$12 sps:$4 sm:$0xff]   ;;  %v1971_v53 = vld [vmem:[%s2094_s15 + $0x98] ss:$12 sps:$4 sm:$0xff]  }
  0x1c   : > { %1692 = vmatpush3.bf16.msra.mxu0 %v1917_v13  ;;  %1878 = vmatpush3.bf16.msra.mxu1 %v1917_v13  ;;  %v1972_v54 = vld [vmem:[%s2094_s15 + $0xa8] ss:$12 sps:$4 sm:$0xff]   ;;  %v1973_v55 = vld [vmem:[%s2094_s15 + $0xb0] ss:$12 sps:$4 sm:$0xff]   ;;  %v1977_v58 = vld [vmem:[%s2094_s15 + $0xc0] ss:$12 sps:$4 sm:$0xff]  }
  0x1d   : > { %1693 = vmatprep.subr.bf16.mxu0 %v1918_v14  ;;  %1871 = vmatprep.subr.bf16.mxu1 %v1918_v14  ;;  %v1974_v56 = vld [vmem:[%s2094_s15 + $0xc4] ss:$12 sps:$4 sm:$0xff]   ;;  %v1976_v57 = vld [vmem:[%s2094_s15 + $0xc8] ss:$12 sps:$4 sm:$0xff]   ;;  %v1978_v59 = vld [vmem:[%s2094_s15 + $0xe0] ss:$12 sps:$4 sm:$0xff]  }
  0x1e   : > { %v1979_v60 = vld [vmem:[%s2094_s15 + $0xdc] ss:$12 sps:$4 sm:$0xff]   ;;  %v1981_v61 = vld [vmem:[%s2094_s15 + $0xf8] ss:$12 sps:$4 sm:$0xff]   ;;  %v1984_v0 = vld [vmem:[%s2094_s15 + $0xf4] ss:$12 sps:$4 sm:$0xff]  }
  0x1f   : > { %v1982_v62 = vld [vmem:[%s2094_s15 + $0xd8] ss:$12 sps:$4 sm:$0xff]   ;;  %v1983_v63 = vld [vmem:[%s2094_s15 + $0x110] ss:$12 sps:$4 sm:$0xff]   ;;  %v1986_v1 = vld [vmem:[%s2094_s15 + $0x128] ss:$12 sps:$4 sm:$0xff]  }
  0x20   : > { %1694 = vmatpush3.bf16.msra.mxu0 %v1919_v15  ;;  %1879 = vmatpush3.bf16.msra.mxu1 %v1919_v15  ;;  %v1987_v2 = vld [vmem:[%s2094_s15 + $0xf0] ss:$12 sps:$4 sm:$0xff]   ;;  %v1988_v3 = vld [vmem:[%s2094_s15 + $0x140] ss:$12 sps:$4 sm:$0xff]   ;;  %v1991_v5 = vld [vmem:[%s2094_s15 + $0x158] ss:$12 sps:$4 sm:$0xff]  }
  0x21   : > { %1695 = vmatprep.subr.bf16.mxu0 %v1920_v16  ;;  %1872 = vmatprep.subr.bf16.mxu1 %v1920_v16  ;;  %v1989_v4 = vld [vmem:[%s2094_s15 + $0x10c] ss:$12 sps:$4 sm:$0xff]   ;;  %v1992_v6 = vld [vmem:[%s2094_s15 + $0x108] ss:$12 sps:$4 sm:$0xff]   ;;  %v1993_v7 = vld [vmem:[%s2094_s15 + $0x170] ss:$12 sps:$4 sm:$0xff]  }
  0x22   : > { %s1603_s15 = sshll.u32 %s2353_s21, 3 }
  0x23   : > { %s2211_s5 = scalar_lea.vmem %s2346_s3, %s1603_s15  ;;  %s2224_s9 = scalar_lea.vmem %s2347_s4, %s1603_s15 }
  0x24   : > { %1696 = vmatpush3.bf16.msra.mxu0 %v1921_v17  ;;  %1880 = vmatpush3.bf16.msra.mxu1 %v1921_v17 }
  0x25   : > { %1817 = vmatprep.subr.bf16.mxu1 %v1928_v18 }
  0x27   : > { %941 = vmatmul.mubr.bf16.vlgmr.msra.gmra.mrb[0].mxu0 %v1922_v19  ;;  %1037 = vmatmul.mubr.bf16.vlgmr.msra.gmra.mrb[0].mxu1 %v1925_v20 }
  0x28   : > { %1818 = vmatpush3.bf16.msra.mxu1 %v1928_v18  ;;  %948 = vmatprep.mubr.bf16.mxu0 %v1930_v21 }
  0x29   : > { %1819 = vmatprep.subr.bf16.mxu1 %v1929_v22  ;;  %1044 = vmatprep.mubr.bf16.mxu1 %v1932_v23 }
  0x2c   : > { %1820 = vmatpush3.bf16.msra.mxu1 %v1929_v22 }
  0x2d   : > { %1821 = vmatprep.subr.bf16.mxu1 %v1936_v25 }
  0x2f   : > { %949 = vmatmul.mubr.bf16.gmra.mrb[4].mxu0 %v1934_v24  ;;  %1045 = vmatmul.mubr.bf16.gmra.mrb[4].mxu1 %v1935_v26 }
  0x30   : > { %1822 = vmatpush3.bf16.msra.mxu1 %v1936_v25  ;;  %956 = vmatprep.mubr.bf16.mxu0 %v1938_v28 }
  0x31   : > { %1823 = vmatprep.subr.bf16.mxu1 %v1937_v27  ;;  %1052 = vmatprep.mubr.bf16.mxu1 %v1940_v29 }
  0x34   : > { %1824 = vmatpush3.bf16.msra.mxu1 %v1937_v27 }
  0x35   : > { %1825 = vmatprep.subr.bf16.mxu1 %v1944_v30 }
  0x37   : > { %957 = vmatmul.mubr.bf16.gmra.mrb[8].mxu0 %v1942_v31  ;;  %1053 = vmatmul.mubr.bf16.gmra.mrb[8].mxu1 %v1943_v32 }
  0x38   : > { %1826 = vmatpush3.bf16.msra.mxu1 %v1944_v30  ;;  %964 = vmatprep.mubr.bf16.mxu0 %v1946_v34 }
  0x39   : > { %1827 = vmatprep.subr.bf16.mxu1 %v1945_v33  ;;  %1060 = vmatprep.mubr.bf16.mxu1 %v1948_v35 }
  0x3c   : > { %1828 = vmatpush3.bf16.msra.mxu1 %v1945_v33 }
  0x3d   : > { %1829 = vmatprep.subr.bf16.mxu1 %v1952_v36 }
  0x3f   : > { %965 = vmatmul.mubr.bf16.gmra.mrb[12].mxu0 %v1950_v37  ;;  %1061 = vmatmul.mubr.bf16.gmra.mrb[12].mxu1 %v1951_v38 }
  0x40   : > { %1830 = vmatpush3.bf16.msra.mxu1 %v1952_v36  ;;  %972 = vmatprep.mubr.bf16.mxu0 %v1954_v39 }
  0x41   : > { %1831 = vmatprep.subr.bf16.mxu1 %v1953_v40  ;;  %1833 = vmatprep.mubr.bf16.mxu1 %v1956_v41 }
  0x44   : > { %1832 = vmatpush3.bf16.msra.mxu1 %v1953_v40 }
  0x47   : > { %973 = vmatmul.mubr.bf16.gmra.mrb[16].mxu0 %v1957_v42  ;;  %1834 = vmatmul.mubr.bf16.vlgmr.msra.gmra.mrb[16].mxu1 %v1958_v43 }
  0x48   : > { %980 = vmatprep.mubr.bf16.mxu0 %v1959_v44  ;;  %1837 = vmatprep.mubr.bf16.mxu1 %v1961_v45 }
  0x4f   : > { %981 = vmatmul.mubr.bf16.gmra.mrb[20].mxu0 %v1962_v46  ;;  %1838 = vmatmul.mubr.bf16.gmra.mrb[20].mxu1 %v1963_v47 }
  0x50   : > { %988 = vmatprep.mubr.bf16.mxu0 %v1964_v48  ;;  %1841 = vmatprep.mubr.bf16.mxu1 %v1966_v49 }
  0x57   : > { %989 = vmatmul.mubr.bf16.gmra.mrb[24].mxu0 %v1967_v50  ;;  %1842 = vmatmul.mubr.bf16.gmra.mrb[24].mxu1 %v1968_v51 }
  0x58   : > { %996 = vmatprep.mubr.bf16.mxu0 %v1969_v52  ;;  %1845 = vmatprep.mubr.bf16.mxu1 %v1971_v53 }
  0x5f   : > { %997 = vmatmul.mubr.bf16.gmra.mrb[28].mxu0 %v1972_v54  ;;  %1846 = vmatmul.mubr.bf16.gmra.mrb[28].mxu1 %v1973_v55 }
  0x60   : > { %1004 = vmatprep.mubr.bf16.mxu0 %v1974_v56  ;;  %1849 = vmatprep.mubr.bf16.mxu1 %v1976_v57 }
  0x67   : > { %1005 = vmatmul.mubr.bf16.gmra.mrb[32].mxu0 %v1977_v58  ;;  %1850 = vmatmul.mubr.bf16.gmra.mrb[32].mxu1 %v1978_v59  ;;  %v2216_v58 = vld [vmem:[%s2345_s2] ss:$0 sm:$0xff] }
  0x68   : > { %1012 = vmatprep.mubr.bf16.mxu0 %v1979_v60  ;;  %1853 = vmatprep.mubr.bf16.mxu1 %v1981_v61 }
  0x6f   : > { %1013 = vmatmul.mubr.bf16.gmra.mrb[36].mxu0 %v1982_v62  ;;  %1854 = vmatmul.mubr.bf16.gmra.mrb[36].mxu1 %v1983_v63  ;;  %v1370_v62 = vld [vmem:[%s2211_s5 + $0x10] sm:$0xff] }
  0x70   : > { %1020 = vmatprep.mubr.bf16.mxu0 %v1984_v0  ;;  %1857 = vmatprep.mubr.bf16.mxu1 %v1986_v1 }
  0x77   : > { %1021 = vmatmul.mubr.bf16.gmra.mrb[40].mxu0 %v1987_v2  ;;  %1858 = vmatmul.mubr.bf16.gmra.mrb[40].mxu1 %v1988_v3 }
  0x78   : > { %1028 = vmatprep.mubr.bf16.mxu0 %v1989_v4  ;;  %1861 = vmatprep.mubr.bf16.mxu1 %v1991_v5  ;;  %v1368_v4 = vld [vmem:[%s2211_s5] sm:$0xff] }
  0x7f   : > { %1029 = vmatmul.mubr.bf16.gmra.mrb[44].mxu0 %v1992_v6  ;;  %1862 = vmatmul.mubr.bf16.gmra.mrb[44].mxu1 %v1993_v7 }
  0xfa   : > { %v1697_v8 = vpop.f32.mrb[0].mxu0  ;;  %v1769_v9 = vpop.f32.mrb[0].mxu1 }
  0xfb   : > { %v1698_v10 = vpop.f32.mrb[1].mxu0  ;;  %v1770_v11 = vpop.f32.mrb[1].mxu1 }
  0xfc   : > { %v1699_v12 = vadd.f32 %v1698_v10, %v1697_v8  ;;  %v2189_v13 = vadd.f32 %v1770_v11, %v1769_v9  ;;  %v1700_v14 = vpop.f32.mrb[2].mxu0  ;;  %v1772_v15 = vpop.f32.mrb[2].mxu1  ;;  %v1371_v9 = vld [vmem:[%s2211_s5 + $0x18] sm:$0xff] }
  0xfd   : > { %v1701_v16 = vpop.f32.mrb[3].mxu0  ;;  %v1773_v17 = vpop.f32.mrb[3].mxu1 }
  0xfe   : > { %v1702_v18 = vadd.f32 %v1701_v16, %v1700_v14  ;;  %v2191_v19 = vadd.f32 %v1773_v17, %v1772_v15  ;;  %v1369_v15 = vld [vmem:[%s2211_s5 + $0x8] sm:$0xff] }
 0x102   : > { %v1703_v20 = vpop.f32.mrb[4].mxu0  ;;  %v1775_v21 = vpop.f32.mrb[4].mxu1 }
 0x103   : > { %v1704_v22 = vpop.f32.mrb[5].mxu0  ;;  %v1776_v23 = vpop.f32.mrb[5].mxu1 }
 0x104   : > { %v1705_v24 = vadd.f32 %v1704_v22, %v1703_v20  ;;  %v2193_v25 = vadd.f32 %v1776_v23, %v1775_v21  ;;  %v1706_v26 = vpop.f32.mrb[6].mxu0  ;;  %v1778_v27 = vpop.f32.mrb[6].mxu1 }
 0x105   : > { %v1707_v28 = vpop.f32.mrb[7].mxu0  ;;  %v1779_v29 = vpop.f32.mrb[7].mxu1 }
 0x106   : > { %v1708_v30 = vadd.f32 %v1707_v28, %v1706_v26  ;;  %v2195_v31 = vadd.f32 %v1779_v29, %v1778_v27  ;;  %v1374_v27 = vld [vmem:[%s2211_s5 + $0x30] sm:$0xff] }
 0x10a   : > { %v1709_v32 = vpop.f32.mrb[8].mxu0  ;;  %v1781_v33 = vpop.f32.mrb[8].mxu1 }
 0x10b   : > { %v1710_v34 = vpop.f32.mrb[9].mxu0  ;;  %v1782_v35 = vpop.f32.mrb[9].mxu1 }
 0x10c   : > { %v1711_v36 = vadd.f32 %v1710_v34, %v1709_v32  ;;  %v2197_v37 = vadd.f32 %v1782_v35, %v1781_v33  ;;  %v1712_v38 = vpop.f32.mrb[10].mxu0  ;;  %v1784_v39 = vpop.f32.mrb[10].mxu1  ;;  %v1372_v34 = vld [vmem:[%s2211_s5 + $0x20] sm:$0xff] }
 0x10d   : > { %v1713_v40 = vpop.f32.mrb[11].mxu0  ;;  %v1785_v41 = vpop.f32.mrb[11].mxu1 }
 0x10e   : > { %v2199_v42 = vadd.f32 %v1713_v40, %v1712_v38  ;;  %v2201_v43 = vadd.f32 %v1785_v41, %v1784_v39  ;;  %v1375_v41 = vld [vmem:[%s2211_s5 + $0x38] sm:$0xff] }
 0x112   : > { %v1715_v44 = vpop.f32.mrb[12].mxu0  ;;  %v1787_v45 = vpop.f32.mrb[12].mxu1 }
 0x113   : > { %v1716_v46 = vpop.f32.mrb[13].mxu0  ;;  %v1788_v47 = vpop.f32.mrb[13].mxu1 }
 0x114   : > { %v1717_v48 = vadd.f32 %v1716_v46, %v1715_v44  ;;  %v2203_v49 = vadd.f32 %v1788_v47, %v1787_v45  ;;  %v1718_v50 = vpop.f32.mrb[14].mxu0  ;;  %v1790_v51 = vpop.f32.mrb[14].mxu1  ;;  %v1373_v47 = vld [vmem:[%s2211_s5 + $0x28] sm:$0xff] }
 0x115   : > { %v1719_v52 = vpop.f32.mrb[15].mxu0  ;;  %v1791_v53 = vpop.f32.mrb[15].mxu1 }
 0x116   : > { %v1720_v54 = vadd.f32 %v1719_v52, %v1718_v50  ;;  %v2205_v55 = vadd.f32 %v1791_v53, %v1790_v51 }
 0x11a   : > { %v1721_v56 = vpop.f32.mrb[16].mxu0  ;;  %v1835_v57 = vpop.f32.mrb[16].mxu1 }
 0x11b   : > { %v1112_v59 = vadd.f32 %v1835_v57, %v1705_v24  ;;  %v1722_v60 = vpop.f32.mrb[17].mxu0  ;;  %v1103_v61 = vpop.f32.mrb[17].mxu1 }
 0x11c   : > { %v1723_v63 = vadd.f32 %v1722_v60, %v1721_v56  ;;  %v1104_v0 = vadd.f32 %v1699_v12, %v1103_v61  ;;  %v1724_v1 = vpop.f32.mrb[18].mxu0  ;;  %v1836_v2 = vpop.f32.mrb[18].mxu1 }
 0x11d   : > { %v1338_v3 = vadd.f32 %v2216_v58, %v1112_v59  ;;  %v1115_v5 = vadd.f32 %v1836_v2, %v1708_v30  ;;  %v1725_v6 = vpop.f32.mrb[19].mxu0  ;;  %v1106_v7 = vpop.f32.mrb[19].mxu1  ;;  %v1378_v59 = vld [vmem:[%s2211_s5 + $0x50] sm:$0xff]  ;;  %v1376_v2 = vld [vmem:[%s2211_s5 + $0x40] sm:$0xff] }
 0x11e   : > { %v1336_v8 = vadd.f32 %v2216_v58, %v1104_v0  ;;  %v1726_v10 = vadd.f32 %v1725_v6, %v1724_v1  ;;  %v1107_v11 = vadd.f32 %v1702_v18, %v1106_v7  ;;  %v1379_v7 = vld [vmem:[%s2211_s5 + $0x58] sm:$0xff] }
 0x11f   : > { %v1402_v12 = vadd.f32 %v1370_v62, %v1338_v3  ;;  %v1339_v14 = vadd.f32 %v2216_v58, %v1115_v5 }
 0x120   : > { %v1400_v16 = vadd.f32 %v1368_v4, %v1336_v8  ;;  %v1337_v17 = vadd.f32 %v2216_v58, %v1107_v11 }
 0x121   : > { %1434 = vst [vmem:[%s2224_s9 + $0x10] sm:$0xff] %v1402_v12  ;;  %v1403_v20 = vadd.f32 %v1371_v9, %v1339_v14  ;;  %v1377_v12 = vld [vmem:[%s2211_s5 + $0x48] sm:$0xff] }
 0x122   : > { %1432 = vst [vmem:[%s2224_s9] sm:$0xff] %v1400_v16  ;;  %v1401_v21 = vadd.f32 %v1369_v15, %v1337_v17  ;;  %v1727_v22 = vpop.f32.mrb[20].mxu0  ;;  %v1839_v23 = vpop.f32.mrb[20].mxu1 }
 0x123   : > { %1435 = vst [vmem:[%s2224_s9 + $0x18] sm:$0xff] %v1403_v20  ;;  %v1128_v24 = vadd.f32 %v1839_v23, %v1717_v48  ;;  %v1728_v18 = vpop.f32.mrb[21].mxu0  ;;  %v1119_v26 = vpop.f32.mrb[21].mxu1 }
 0x124   : > { %1433 = vst [vmem:[%s2224_s9 + $0x8] sm:$0xff] %v1401_v21  ;;  %v1729_v28 = vadd.f32 %v1728_v18, %v1727_v22  ;;  %v1120_v29 = vadd.f32 %v1711_v36, %v1119_v26  ;;  %v1730_v30 = vpop.f32.mrb[22].mxu0  ;;  %v1840_v32 = vpop.f32.mrb[22].mxu1 }
 0x125   : > { %v1342_v33 = vadd.f32 %v2216_v58, %v1128_v24  ;;  %v1131_v35 = vadd.f32 %v1840_v32, %v1720_v54  ;;  %v1731_v38 = vpop.f32.mrb[23].mxu0  ;;  %v1122_v39 = vpop.f32.mrb[23].mxu1 }
 0x126   : > { %v1340_v40 = vadd.f32 %v2216_v58, %v1120_v29  ;;  %v1732_v44 = vadd.f32 %v1731_v38, %v1730_v30  ;;  %v1123_v45 = vadd.f32 %v2199_v42, %v1122_v39  ;;  %v1381_v38 = vld [vmem:[%s2211_s5 + $0x68] sm:$0xff] }
 0x127   : > { %v1406_v46 = vadd.f32 %v1374_v27, %v1342_v33  ;;  %v1343_v36 = vadd.f32 %v2216_v58, %v1131_v35  ;;  %v1380_v27 = vld [vmem:[%s2211_s5 + $0x60] sm:$0xff]  ;;  %v1382_v35 = vld [vmem:[%s2211_s5 + $0x70] sm:$0xff] }
 0x128   : > { %v1404_v48 = vadd.f32 %v1372_v34, %v1340_v40  ;;  %v1341_v50 = vadd.f32 %v2216_v58, %v1123_v45  ;;  %v1383_v45 = vld [vmem:[%s2211_s5 + $0x78] sm:$0xff] }
 0x129   : > { %1438 = vst [vmem:[%s2224_s9 + $0x30] sm:$0xff] %v1406_v46  ;;  %v1407_v51 = vadd.f32 %v1375_v41, %v1343_v36 }
 0x12a   : > { %1436 = vst [vmem:[%s2224_s9 + $0x20] sm:$0xff] %v1404_v48  ;;  %v1405_v52 = vadd.f32 %v1373_v47, %v1341_v50  ;;  %v1733_v53 = vpop.f32.mrb[24].mxu0  ;;  %v1843_v54 = vpop.f32.mrb[24].mxu1 }
 0x12b   : > { %1439 = vst [vmem:[%s2224_s9 + $0x38] sm:$0xff] %v1407_v51  ;;  %v1144_v56 = vadd.f32 %v1843_v54, %v1729_v28  ;;  %v1734_v42 = vpop.f32.mrb[25].mxu0  ;;  %v1135_v57 = vpop.f32.mrb[25].mxu1 }
 0x12c   : > { %1437 = vst [vmem:[%s2224_s9 + $0x28] sm:$0xff] %v1405_v52  ;;  %v1735_v60 = vadd.f32 %v1734_v42, %v1733_v53  ;;  %v1136_v61 = vadd.f32 %v1723_v63, %v1135_v57  ;;  %v1736_v62 = vpop.f32.mrb[26].mxu0  ;;  %v1844_v0 = vpop.f32.mrb[26].mxu1 }
 0x12d   : > { %v1346_v1 = vadd.f32 %v2216_v58, %v1144_v56  ;;  %v1147_v3 = vadd.f32 %v1844_v0, %v1732_v44  ;;  %v1737_v4 = vpop.f32.mrb[27].mxu0  ;;  %v1138_v5 = vpop.f32.mrb[27].mxu1 }
 0x12e   : > { %v1344_v6 = vadd.f32 %v2216_v58, %v1136_v61  ;;  %v1738_v8 = vadd.f32 %v1737_v4, %v1736_v62  ;;  %v1139_v9 = vadd.f32 %v1726_v10, %v1138_v5  ;;  %v1384_v62 = vld [vmem:[%s2211_s5 + $0x80] sm:$0xff] }
 0x12f   : > { %v1410_v11 = vadd.f32 %v1378_v59, %v1346_v1  ;;  %v1347_v63 = vadd.f32 %v2216_v58, %v1147_v3 }
 0x130   : > { %v1408_v14 = vadd.f32 %v1376_v2, %v1344_v6  ;;  %v1345_v15 = vadd.f32 %v2216_v58, %v1139_v9  ;;  %v1385_v2 = vld [vmem:[%s2211_s5 + $0x88] sm:$0xff] }
 0x131   : > { %1442 = vst [vmem:[%s2224_s9 + $0x50] sm:$0xff] %v1410_v11  ;;  %v1411_v16 = vadd.f32 %v1379_v7, %v1347_v63 }
 0x132   : > { %1440 = vst [vmem:[%s2224_s9 + $0x40] sm:$0xff] %v1408_v14  ;;  %v1409_v17 = vadd.f32 %v1377_v12, %v1345_v15  ;;  %v1739_v20 = vpop.f32.mrb[28].mxu0  ;;  %v1847_v21 = vpop.f32.mrb[28].mxu1 }
 0x133   : > { %1443 = vst [vmem:[%s2224_s9 + $0x58] sm:$0xff] %v1411_v16  ;;  %v1740_v22 = vpop.f32.mrb[29].mxu0  ;;  %v1151_v23 = vpop.f32.mrb[29].mxu1 }
 0x134   : > { %1441 = vst [vmem:[%s2224_s9 + $0x48] sm:$0xff] %v1409_v17  ;;  %v1741_v10 = vadd.f32 %v1740_v22, %v1739_v20  ;;  %v1152_v24 = vadd.f32 %v1735_v60, %v1151_v23  ;;  %v1742_v18 = vpop.f32.mrb[30].mxu0  ;;  %v1848_v26 = vpop.f32.mrb[30].mxu1  ;;  %v1386_v20 = vld [vmem:[%s2211_s5 + $0x90] sm:$0xff]  ;;  %v1387_v23 = vld [vmem:[%s2211_s5 + $0x98] sm:$0xff] }
 0x135   : > { %v1743_v28 = vpop.f32.mrb[31].mxu0  ;;  %v1154_v29 = vpop.f32.mrb[31].mxu1 }
 0x136   : > { %v1160_v30 = vadd.f32 %v1847_v21, %v1741_v10  ;;  %v1348_v32 = vadd.f32 %v2216_v58, %v1152_v24  ;;  %v1744_v33 = vadd.f32 %v1743_v28, %v1742_v18  ;;  %v1155_v34 = vadd.f32 %v1738_v8, %v1154_v29 }
 0x138   : > { %v1350_v39 = vadd.f32 %v2216_v58, %v1160_v30  ;;  %v1412_v40 = vadd.f32 %v1380_v27, %v1348_v32  ;;  %v1163_v41 = vadd.f32 %v1848_v26, %v1744_v33  ;;  %v1349_v44 = vadd.f32 %v2216_v58, %v1155_v34  ;;  %v1394_v32 = vld [vmem:[%s2211_s5 + $0xd0] sm:$0xff] }
 0x13a   : > { %v1414_v46 = vadd.f32 %v1382_v35, %v1350_v39  ;;  %1444 = vst [vmem:[%s2224_s9 + $0x60] sm:$0xff] %v1412_v40  ;;  %v1351_v36 = vadd.f32 %v2216_v58, %v1163_v41  ;;  %v1413_v47 = vadd.f32 %v1381_v38, %v1349_v44  ;;  %v1745_v48 = vpop.f32.mrb[32].mxu0  ;;  %v1851_v50 = vpop.f32.mrb[32].mxu1  ;;  %v1392_v40 = vld [vmem:[%s2211_s5 + $0xc0] sm:$0xff] }
 0x13b   : > { %v1746_v51 = vpop.f32.mrb[33].mxu0  ;;  %v1167_v52 = vpop.f32.mrb[33].mxu1 }
 0x13c   : > { %1446 = vst [vmem:[%s2224_s9 + $0x70] sm:$0xff] %v1414_v46  ;;  %v1415_v53 = vadd.f32 %v1383_v45, %v1351_v36  ;;  %1445 = vst [vmem:[%s2224_s9 + $0x68] sm:$0xff] %v1413_v47  ;;  %v1747_v54 = vadd.f32 %v1746_v51, %v1745_v48  ;;  %v1748_v56 = vpop.f32.mrb[34].mxu0  ;;  %v1852_v42 = vpop.f32.mrb[34].mxu1  ;;  %v1395_v36 = vld [vmem:[%s2211_s5 + $0xd8] sm:$0xff] }
 0x13d   : > { %v1749_v57 = vpop.f32.mrb[35].mxu0  ;;  %v1170_v59 = vpop.f32.mrb[35].mxu1 }
 0x13e   : > { %1447 = vst [vmem:[%s2224_s9 + $0x78] sm:$0xff] %v1415_v53  ;;  %v1168_v60 = vadd.f32 %v1747_v54, %v1167_v52  ;;  %v1750_v61 = vadd.f32 %v1749_v57, %v1748_v56  ;;  %v1393_v52 = vld [vmem:[%s2211_s5 + $0xc8] sm:$0xff] }
 0x13f   : > { %v1389_v57 = vld [vmem:[%s2211_s5 + $0xa8] sm:$0xff] }
 0x140   : > { %v1352_v0 = vadd.f32 %v2216_v58, %v1168_v60  ;;  %v1171_v1 = vadd.f32 %v1750_v61, %v1170_v59 }
 0x142   : > { %v1416_v3 = vadd.f32 %v1384_v62, %v1352_v0  ;;  %v1353_v4 = vadd.f32 %v2216_v58, %v1171_v1  ;;  %v1751_v5 = vpop.f32.mrb[36].mxu0  ;;  %v2276_v6 = vpop.f32.mrb[36].mxu1 }
 0x143   : > { %v1752_v7 = vpop.f32.mrb[37].mxu0  ;;  %v1183_v8 = vpop.f32.mrb[37].mxu1 }
 0x144   : > { %1448 = vst [vmem:[%s2224_s9 + $0x80] sm:$0xff] %v1416_v3  ;;  %v1417_v9 = vadd.f32 %v1385_v2, %v1353_v4  ;;  %v1753_v11 = vadd.f32 %v1752_v7, %v1751_v5  ;;  %v1754_v63 = vpop.f32.mrb[38].mxu0  ;;  %v2279_v12 = vpop.f32.mrb[38].mxu1  ;;  %v1398_v4 = vld [vmem:[%s2211_s5 + $0xf0] sm:$0xff] }
 0x145   : > { %v1755_v14 = vpop.f32.mrb[39].mxu0  ;;  %v1186_v15 = vpop.f32.mrb[39].mxu1 }
 0x146   : > { %1449 = vst [vmem:[%s2224_s9 + $0x88] sm:$0xff] %v1417_v9  ;;  %v1176_v16 = vadd.f32 %v1851_v50, %v1753_v11  ;;  %v1756_v17 = vadd.f32 %v1755_v14, %v1754_v63  ;;  %v1388_v50 = vld [vmem:[%s2211_s5 + $0xa0] sm:$0xff] }
 0x147   : > { %v1396_v63 = vld [vmem:[%s2211_s5 + $0xe0] sm:$0xff] }
 0x148   : > { %v1354_v21 = vadd.f32 %v2216_v58, %v1176_v16  ;;  %v1179_v22 = vadd.f32 %v1852_v42, %v1756_v17 }
 0x14a   : > { %v1418_v10 = vadd.f32 %v1386_v20, %v1354_v21  ;;  %v1355_v24 = vadd.f32 %v2216_v58, %v1179_v22  ;;  %v1757_v18 = vpop.f32.mrb[40].mxu0  ;;  %v1859_v26 = vpop.f32.mrb[40].mxu1  ;;  %v1399_v20 = vld [vmem:[%s2211_s5 + $0xf8] sm:$0xff] }
 0x14b   : > { %v1208_v27 = vadd.f32 %v1859_v26, %v2193_v25  ;;  %v1758_v28 = vpop.f32.mrb[41].mxu0  ;;  %v1199_v29 = vpop.f32.mrb[41].mxu1 }
 0x14c   : > { %1450 = vst [vmem:[%s2224_s9 + $0x90] sm:$0xff] %v1418_v10  ;;  %v1419_v30 = vadd.f32 %v1387_v23, %v1355_v24  ;;  %v1759_v33 = vadd.f32 %v1758_v28, %v1757_v18  ;;  %v1200_v34 = vadd.f32 %v2189_v13, %v1199_v29  ;;  %v1760_v35 = vpop.f32.mrb[42].mxu0  ;;  %v1860_v38 = vpop.f32.mrb[42].mxu1  ;;  %v1390_v23 = vld [vmem:[%s2211_s5 + $0xb0] sm:$0xff]  ;;  %v1397_v10 = vld [vmem:[%s2211_s5 + $0xe8] sm:$0xff]  ;;  %v1391_v28 = vld [vmem:[%s2211_s5 + $0xb8] sm:$0xff] }
 0x14d   : > { %v1362_v39 = vadd.f32 %v2216_v58, %v1208_v27  ;;  %v1211_v41 = vadd.f32 %v1860_v38, %v2195_v31  ;;  %v1761_v44 = vpop.f32.mrb[43].mxu0  ;;  %v1202_v25 = vpop.f32.mrb[43].mxu1 }
 0x14e   : > { %1451 = vst [vmem:[%s2224_s9 + $0x98] sm:$0xff] %v1419_v30  ;;  %v1184_v45 = vadd.f32 %v1759_v33, %v1183_v8  ;;  %v1360_v46 = vadd.f32 %v2216_v58, %v1200_v34  ;;  %v1762_v47 = vadd.f32 %v1761_v44, %v1760_v35  ;;  %v1203_v13 = vadd.f32 %v2191_v19, %v1202_v25 }
 0x14f   : > { %v1426_v48 = vadd.f32 %v1394_v32, %v1362_v39  ;;  %v1363_v51 = vadd.f32 %v2216_v58, %v1211_v41 }
 0x150   : > { %v1356_v31 = vadd.f32 %v2216_v58, %v1184_v45  ;;  %v1424_v53 = vadd.f32 %v1392_v40, %v1360_v46  ;;  %v1187_v54 = vadd.f32 %v1762_v47, %v1186_v15  ;;  %v1361_v56 = vadd.f32 %v2216_v58, %v1203_v13 }
 0x151   : > { %1458 = vst [vmem:[%s2224_s9 + $0xd0] sm:$0xff] %v1426_v48  ;;  %v1427_v42 = vadd.f32 %v1395_v36, %v1363_v51 }
 0x152   : > { %v1420_v59 = vadd.f32 %v1388_v50, %v1356_v31  ;;  %1456 = vst [vmem:[%s2224_s9 + $0xc0] sm:$0xff] %v1424_v53  ;;  %v1357_v19 = vadd.f32 %v2216_v58, %v1187_v54  ;;  %v1425_v60 = vadd.f32 %v1393_v52, %v1361_v56  ;;  %v1763_v61 = vpop.f32.mrb[44].mxu0  ;;  %v1863_v62 = vpop.f32.mrb[44].mxu1 }
 0x153   : > { %1459 = vst [vmem:[%s2224_s9 + $0xd8] sm:$0xff] %v1427_v42  ;;  %v1224_v0 = vadd.f32 %v1863_v62, %v2203_v49  ;;  %v1764_v1 = vpop.f32.mrb[45].mxu0  ;;  %v1215_v2 = vpop.f32.mrb[45].mxu1 }
 0x154   : > { %1452 = vst [vmem:[%s2224_s9 + $0xa0] sm:$0xff] %v1420_v59  ;;  %v1421_v3 = vadd.f32 %v1389_v57, %v1357_v19  ;;  %1457 = vst [vmem:[%s2224_s9 + $0xc8] sm:$0xff] %v1425_v60  ;;  %v1765_v5 = vadd.f32 %v1764_v1, %v1763_v61  ;;  %v1216_v7 = vadd.f32 %v2197_v37, %v1215_v2  ;;  %v1766_v8 = vpop.f32.mrb[46].mxu0  ;;  %v1864_v9 = vpop.f32.mrb[46].mxu1 }
 0x155   : > { %v1366_v11 = vadd.f32 %v2216_v58, %v1224_v0  ;;  %v1227_v49 = vadd.f32 %v1864_v9, %v2205_v55  ;;  %v1767_v14 = vpop.f32.mrb[47].mxu0  ;;  %v1218_v15 = vpop.f32.mrb[47].mxu1 }
 0x156   : > { %1453 = vst [vmem:[%s2224_s9 + $0xa8] sm:$0xff] %v1421_v3  ;;  %v1192_v16 = vadd.f32 %v2276_v6, %v1765_v5  ;;  %v1364_v17 = vadd.f32 %v2216_v58, %v1216_v7  ;;  %v1768_v37 = vadd.f32 %v1767_v14, %v1766_v8  ;;  %v1219_v21 = vadd.f32 %v2201_v43, %v1218_v15 }
 0x157   : > { %v1430_v22 = vadd.f32 %v1398_v4, %v1366_v11  ;;  %v1367_v55 = vadd.f32 %v2216_v58, %v1227_v49 }
 0x158   : > { %v1358_v24 = vadd.f32 %v2216_v58, %v1192_v16  ;;  %v1428_v18 = vadd.f32 %v1396_v63, %v1364_v17  ;;  %v1195_v6 = vadd.f32 %v2279_v12, %v1768_v37  ;;  %v1365_v26 = vadd.f32 %v2216_v58, %v1219_v21 }
 0x159   : > { %1462 = vst [vmem:[%s2224_s9 + $0xf0] sm:$0xff] %v1430_v22  ;;  %v1431_v27 = vadd.f32 %v1399_v20, %v1367_v55 }
 0x15a   : > { %v1422_v43 = vadd.f32 %v1390_v23, %v1358_v24  ;;  %1460 = vst [vmem:[%s2224_s9 + $0xe0] sm:$0xff] %v1428_v18  ;;  %v1359_v29 = vadd.f32 %v2216_v58, %v1195_v6  ;;  %v1429_v30 = vadd.f32 %v1397_v10, %v1365_v26 }
 0x15b   : > { %1463 = vst [vmem:[%s2224_s9 + $0xf8] sm:$0xff] %v1431_v27 }
 0x15c   : > { %1454 = vst [vmem:[%s2224_s9 + $0xb0] sm:$0xff] %v1422_v43  ;;  %v1423_v32 = vadd.f32 %v1391_v28, %v1359_v29  ;;  %1461 = vst [vmem:[%s2224_s9 + $0xe8] sm:$0xff] %v1429_v30 }
 0x15e   : > { %1455 = vst [vmem:[%s2224_s9 + $0xb8] sm:$0xff] %v1423_v32 }
 0x15f PF: > { %s14_s17 = sadd.s32 1, %s2016_s17   ;;  %s2348_s15 = smov %s2012_s16 }
 0x160   : > { %p11_p5 = scmp.ge.s32.totalorder %s14_s17, 4   ;;  %s2349_s16 = smov %s2351_s18 }
 0x162   :  { %13 = sbr.rel (!%p11_p5) target bundleno = 2 (0x2), region = 83 }

// kernel: vae_encoder_forward.33
= control target key start
LH: loop header
LB: loop body
LE: loop exit
PB: predicated region body
PF: predicated region fallthrough
CT: control target
= control target key end

     0   :  { %s736_s15 = smov 0   ;;  %s852_s0 = inlined_call_operand.vmem [shape: f32[2,64,32], index: 0, kind: input, shape index: {}]   ;;  %s853_s1 = inlined_call_operand.vmem [shape: f32[1,32], index: 1, kind: input, shape index: {}]   ;;  %s854_s2 = inlined_call_operand.vmem [shape: f32[1,32], index: 2, kind: input, shape index: {}]   ;;  %s855_s3 = inlined_call_operand.vmem [shape: f32[32,32], index: 3, kind: input, shape index: {}]   ;;  %s856_s4 = inlined_call_operand.vmem [shape: f32[2,64,32], index: 4, kind: output, shape index: {}]  }
   0x1 LB: > { %s586_s16 = sadd.s32 4294967295, %s706_s15   ;;  %p590_p0 = scmp.ge.s32.totalorder %s706_s15, 1  ;;  %s706_s15 = sphi %s736_s15, %s14_s15  }
   0x2   : > { %p162_p1 = scmp.lt.s32.totalorder %s706_s15, 3 }
   0x4   : > { %p163_p2 = pnand %p590_p0, %p162_p1 }
   0x5   : > { %v257_v0 = vld [vmem:[%s855_s3] sm:$0xff] (!%p163_p2)  ;;  %v258_v1 = vld [vmem:[%s855_s3 + $0x8] sm:$0xff] (!%p163_p2)  ;;  %v259_v2 = vld [vmem:[%s855_s3 + $0x10] sm:$0xff] (!%p163_p2)  ;;  %v708_v3 = vmov (!%p163_p2), 0.0|0.0   ;;  %p188_p3 = scmp.lt.s32.totalorder (!%p163_p2), %s586_s16, 1  ;;  %vm709_vm0 = vmmov (!%p163_p2), 0  }
   0x6   : > { %166 = sbr.rel (%p163_p2) target bundleno = 320 (0x140), region = 36  ;;  %643 = vmatprep.subr.bf16.mxu0 (!%p163_p2), %v708_v3  ;;  %v644_v4 = vpack.c.bf16 (!%p163_p2), %v258_v1, %v257_v0  ;;  %649 = vmatprep.subr.bf16.mxu1 (!%p163_p2), %v708_v3  ;;  %v260_v5 = vld [vmem:[%s855_s3 + $0x18] sm:$0xff] (!%p163_p2)  ;;  %v710_v6 = vmov (!%p163_p2), 0.0   ;;  %vm206_vm1 = vcmask (!%p163_p2), 261120  }
   0x7   : > { %629 = vmatprep.mubr.msk.f32.mxu0 (!%p163_p2), %vm709_vm0, %v710_v6  ;;  %640 = vmatprep.mubr.msk.f32.mxu1 (!%p163_p2), %vm709_vm0, %v710_v6  ;;  %v647_v7 = vpack.c.bf16 (!%p163_p2), %v260_v5, %v259_v2 }
   0x8   : > { %645 = vmatpush3.bf16.msra.mxu0 (!%p163_p2), %v644_v4  ;;  %651 = vmatpush3.bf16.msra.mxu1 (!%p163_p2), %v644_v4 }
   0x9   : > { %646 = vmatprep.subr.bf16.mxu0 (!%p163_p2), %v708_v3  ;;  %652 = vmatprep.subr.bf16.mxu1 (!%p163_p2), %v708_v3 }
   0xc   : > { %648 = vmatpush3.bf16.msra.mxu0 (!%p163_p2), %v647_v7  ;;  %654 = vmatpush3.bf16.msra.mxu1 (!%p163_p2), %v647_v7 }
   0xd   : > { %s858_s16 = smov (!%p188_p3, %s586_s16), 1 }
   0xe   : > { %s609_s25 = sshll.u32 %s858_s16, 6 }
   0xf   : > { %s192_s28 = scalar_lea.vmem %s852_s0, %s609_s25  ;;  %s197_s9 = scalar_lea.vmem %s856_s4, %s609_s25 }
  0x10   : > { %v764_v8 = vld [vmem:[%s192_s28] sm:$0xff]  ;;  %v766_v9 = vld [vmem:[%s192_s28 + $0x8] sm:$0xff]  ;;  %v768_v10 = vld [vmem:[%s192_s28 + $0x10] sm:$0xff] }
  0x11   : > { %v770_v11 = vld [vmem:[%s192_s28 + $0x18] sm:$0xff]  ;;  %v207_v12 = vsel %vm206_vm1, %v764_v8, 0.0  ;;  %v208_v13 = vsel %vm206_vm1, %v766_v9, 0.0  ;;  %v210_v14 = vsel %vm206_vm1, %v768_v10, 0.0  ;;  %v228_v15 = vmul.f32 %v764_v8, %v764_v8  ;;  %v780_v16 = vld [vmem:[%s192_s28 + $0x20] sm:$0xff]  ;;  %v788_v21 = vld [vmem:[%s192_s28 + $0x28] sm:$0xff] }
  0x12   : > { %v209_v17 = vadd.f32 %v208_v13, %v207_v12  ;;  %v212_v18 = vsel %vm206_vm1, %v770_v11, 0.0  ;;  %v229_v19 = vmul.f32 %v766_v9, %v766_v9  ;;  %v230_v20 = vmul.f32 %v768_v10, %v768_v10  ;;  %v798_v28 = vld [vmem:[%s192_s28 + $0x30] sm:$0xff]  ;;  %v806_v35 = vld [vmem:[%s192_s28 + $0x38] sm:$0xff] }
  0x13   : > { %v231_v23 = vmul.f32 %v770_v11, %v770_v11  ;;  %v214_v24 = vsel %vm206_vm1, %v780_v16, 0.0  ;;  %v232_v25 = vmul.f32 %v780_v16, %v780_v16  ;;  %v236_v26 = vsel %vm206_vm1, %v228_v15, 0.0 }
  0x14   : > { %v211_v22 = vadd.f32 %v210_v14, %v209_v17  ;;  %v237_v27 = vsel %vm206_vm1, %v229_v19, 0.0  ;;  %v239_v31 = vsel %vm206_vm1, %v230_v20, 0.0  ;;  %v216_v32 = vsel %vm206_vm1, %v788_v21, 0.0 }
  0x15   : > { %v238_v30 = vadd.f32 %v237_v27, %v236_v26  ;;  %v233_v33 = vmul.f32 %v788_v21, %v788_v21  ;;  %v241_v34 = vsel %vm206_vm1, %v231_v23, 0.0  ;;  %v218_v38 = vsel %vm206_vm1, %v798_v28, 0.0 }
  0x16   : > { %v213_v29 = vadd.f32 %v212_v18, %v211_v22  ;;  %v234_v39 = vmul.f32 %v798_v28, %v798_v28  ;;  %v243_v40 = vsel %vm206_vm1, %v232_v25, 0.0  ;;  %v220_v43 = vsel %vm206_vm1, %v806_v35, 0.0 }
  0x17   : > { %v240_v37 = vadd.f32 %v239_v31, %v238_v30  ;;  %v235_v44 = vmul.f32 %v806_v35, %v806_v35  ;;  %v245_v45 = vsel %vm206_vm1, %v233_v33, 0.0  ;;  %v413_v12 = vlaneseq }
  0x18   : > { %v215_v36 = vadd.f32 %v214_v24, %v213_v29  ;;  %v247_v48 = vsel %vm206_vm1, %v234_v39, 0.0 }
  0x19   : > { %v242_v42 = vadd.f32 %v241_v34, %v240_v37  ;;  %v249_v51 = vsel %vm206_vm1, %v235_v44, 0.0  ;;  %v414_v15 = vshrl.u32 %v413_v12, 7 }
  0x1a   : > { %v217_v41 = vadd.f32 %v216_v32, %v215_v36  ;;  %v597_v32 = vld [vmem:[%s853_s1] ss:$0 sm:$0xff] }
  0x1b   : > { %v244_v47 = vadd.f32 %v243_v40, %v242_v42  ;;  %v415_v18 = vsub.s32 0, %v414_v15 }
  0x1c   : > { %v219_v46 = vadd.f32 %v218_v38, %v217_v41 }
  0x1d   : > { %v246_v50 = vadd.f32 %v245_v45, %v244_v47 }
  0x1e   : > { %v221_v49 = vadd.f32 %v220_v43, %v219_v46 }
  0x1f   : > { %v248_v53 = vadd.f32 %v247_v48, %v246_v50 }
  0x20   : > { %v222_v52 = vrot.slane %v221_v49, 4 }
  0x21   : > { %v250_v55 = vadd.f32 %v249_v51, %v248_v53 }
  0x22   : > { %v223_v54 = vadd.f32 %v222_v52, %v221_v49 }
  0x23   : > { %v251_v57 = vrot.slane %v250_v55, 4 }
  0x24   : > { %v224_v56 = vrot.slane %v223_v54, 2 }
  0x25   : > { %v252_v59 = vadd.f32 %v251_v57, %v250_v55 }
  0x26   : > { %v225_v58 = vadd.f32 %v224_v56, %v223_v54 }
  0x27   : > { %v253_v61 = vrot.slane %v252_v59, 2 }
  0x28   : > { %v226_v60 = vrot.slane %v225_v58, 1 }
  0x29   : > { %v254_v63 = vadd.f32 %v253_v61, %v252_v59 }
  0x2a   : > { %v227_v62 = vadd.f32 %v226_v60, %v225_v58 }
  0x2b   : > { %v255_v0 = vrot.slane %v254_v63, 1 }
  0x2c   : > { %630 = vmatmul.mubr.msk.f32.vlgmr.msra.gmra.mrb[0].mxu0 %vm206_vm1, %v227_v62 }
  0x2d   : > { %v256_v1 = vadd.f32 %v255_v0, %v254_v63 }
  0x2f   : > { %641 = vmatmul.mubr.msk.f32.vlgmr.msra.gmra.mrb[0].mxu1 %vm206_vm1, %v256_v1 }
  0xff   : > { %v330_v2 = vpop.f32.mrb[0].mxu0 }
 0x100   : > { %v334_v3 = vmul.f32 0.015625, %v330_v2  ;;  %v631_v4 = vpop.f32.mrb[1].mxu0 }
 0x102   : > { %v404_v5 = vpop.f32.mrb[0].mxu1  ;;  %v409_v6 = vmul.f32 %v334_v3, %v334_v3  ;;  %v416_v19 = vrot.slane %v334_v3, %v415_v18 }
 0x103   : > { %v642_v7 = vpop.f32.mrb[1].mxu1  ;;  %v408_v13 = vmul.f32 0.015625, %v404_v5 }
 0x104   : > { %v417_v22 = vsub.f32 %v764_v8, %v416_v19  ;;  %v418_v23 = vsub.f32 %v766_v9, %v416_v19  ;;  %v419_v24 = vsub.f32 %v768_v10, %v416_v19  ;;  %v420_v25 = vsub.f32 %v770_v11, %v416_v19 }
 0x105   : > { %v410_v14 = vsub.f32 %v408_v13, %v409_v6  ;;  %v421_v27 = vsub.f32 %v780_v16, %v416_v19  ;;  %v422_v29 = vsub.f32 %v788_v21, %v416_v19  ;;  %v423_v30 = vsub.f32 %v798_v28, %v416_v19  ;;  %v598_v16 = vld [vmem:[%s854_s2] ss:$0 sm:$0xff] }
 0x106   : > { %v424_v31 = vsub.f32 %v806_v35, %v416_v19 }
 0x107   : > { %v411_v17 = vadd.f32 1e-06, %v410_v14 }
 0x109   : > { %666 = vrsqrt.f32 %v411_v17 }
 0x113   : > { %v667_v20 = vpop.eup %666 }
 0x114   : > { %v428_v26 = vrot.slane %v667_v20, %v415_v18 }
 0x116   : > { %v429_v8 = vmul.f32 %v428_v26, %v417_v22  ;;  %v430_v33 = vmul.f32 %v428_v26, %v418_v23  ;;  %v431_v9 = vmul.f32 %v428_v26, %v419_v24  ;;  %v432_v34 = vmul.f32 %v428_v26, %v420_v25 }
 0x117   : > { %v433_v10 = vmul.f32 %v428_v26, %v421_v27  ;;  %v434_v36 = vmul.f32 %v428_v26, %v422_v29  ;;  %v435_v11 = vmul.f32 %v428_v26, %v423_v30  ;;  %v436_v37 = vmul.f32 %v428_v26, %v424_v31 }
 0x118   : > { %v444_v21 = vmul.f32 %v597_v32, %v429_v8  ;;  %v445_v28 = vmul.f32 %v597_v32, %v430_v33  ;;  %v446_v38 = vmul.f32 %v597_v32, %v431_v9  ;;  %v447_v35 = vmul.f32 %v597_v32, %v432_v34 }
 0x119   : > { %v448_v39 = vmul.f32 %v597_v32, %v433_v10  ;;  %v449_v40 = vmul.f32 %v597_v32, %v434_v36  ;;  %v450_v41 = vmul.f32 %v597_v32, %v435_v11  ;;  %v451_v42 = vmul.f32 %v597_v32, %v436_v37 }
 0x11a   : > { %v459_v43 = vadd.f32 %v598_v16, %v444_v21  ;;  %v460_v44 = vadd.f32 %v598_v16, %v445_v28  ;;  %v461_v45 = vadd.f32 %v598_v16, %v446_v38  ;;  %v462_v46 = vadd.f32 %v598_v16, %v447_v35 }
 0x11b   : > { %v463_v47 = vadd.f32 %v598_v16, %v448_v39  ;;  %v464_v48 = vadd.f32 %v598_v16, %v449_v40  ;;  %v465_v49 = vadd.f32 %v598_v16, %v450_v41  ;;  %v466_v53 = vadd.f32 %v598_v16, %v451_v42 }
 0x11c   : > { %v599_v50 = vmul.f32 -1.442695, %v459_v43  ;;  %v600_v51 = vmul.f32 -1.442695, %v460_v44  ;;  %v601_v52 = vmul.f32 -1.442695, %v461_v45 }
 0x11d   : > { %v602_v54 = vmul.f32 -1.442695, %v462_v46  ;;  %v603_v55 = vmul.f32 -1.442695, %v463_v47  ;;  %v604_v56 = vmul.f32 -1.442695, %v464_v48 }
 0x11e   : > { %668 = vpow2.f32 %v599_v50  ;;  %v605_v57 = vmul.f32 -1.442695, %v465_v49  ;;  %v606_v58 = vmul.f32 -1.442695, %v466_v53 }
 0x11f   : > { %670 = vpow2.f32 %v600_v51 }
 0x120   : > { %672 = vpow2.f32 %v601_v52 }
 0x121   : > { %674 = vpow2.f32 %v602_v54 }
 0x122   : > { %676 = vpow2.f32 %v603_v55 }
 0x123   : > { %678 = vpow2.f32 %v604_v56 }
 0x124   : > { %680 = vpow2.f32 %v605_v57 }
 0x125   : > { %682 = vpow2.f32 %v606_v58 }
 0x128   : > { %v669_v59 = vpop.eup %668 }
 0x129   : > { %v671_v60 = vpop.eup %670  ;;  %v491_v61 = vadd.f32 1.0, %v669_v59 }
 0x12a   : > { %v673_v62 = vpop.eup %672  ;;  %v492_v63 = vadd.f32 1.0, %v671_v60 }
 0x12b   : > { %v675_v0 = vpop.eup %674  ;;  %v493_v1 = vadd.f32 1.0, %v673_v62  ;;  %684 = vrcp.f32 %v491_v61 }
 0x12c   : > { %v677_v2 = vpop.eup %676  ;;  %v494_v3 = vadd.f32 1.0, %v675_v0  ;;  %686 = vrcp.f32 %v492_v63 }
 0x12d   : > { %v679_v4 = vpop.eup %678  ;;  %v495_v5 = vadd.f32 1.0, %v677_v2  ;;  %688 = vrcp.f32 %v493_v1 }
 0x12e   : > { %v681_v6 = vpop.eup %680  ;;  %v496_v7 = vadd.f32 1.0, %v679_v4  ;;  %690 = vrcp.f32 %v494_v3 }
 0x12f   : > { %v683_v12 = vpop.eup %682  ;;  %v497_v13 = vadd.f32 1.0, %v681_v6  ;;  %692 = vrcp.f32 %v495_v5 }
 0x130   : > { %v498_v14 = vadd.f32 1.0, %v683_v12  ;;  %694 = vrcp.f32 %v496_v7 }
 0x131   : > { %696 = vrcp.f32 %v497_v13 }
 0x132   : > { %698 = vrcp.f32 %v498_v14 }
 0x135   : > { %v685_v15 = vpop.eup %684 }
 0x136   : > { %v687_v17 = vpop.eup %686  ;;  %v515_v18 = vmul.f32 %v685_v15, %v459_v43 }
 0x137   : > { %v689_v19 = vpop.eup %688  ;;  %v516_v20 = vmul.f32 %v687_v17, %v460_v44 }
 0x138   : > { %v691_v22 = vpop.eup %690  ;;  %v517_v23 = vmul.f32 %v689_v19, %v461_v45  ;;  %523 = vst.msk [vmem:[%s197_s9] sm:$0xff] %vm206_vm1, %v515_v18 }
 0x139   : > { %v693_v24 = vpop.eup %692  ;;  %v518_v25 = vmul.f32 %v691_v22, %v462_v46  ;;  %524 = vst.msk [vmem:[%s197_s9 + $0x8] sm:$0xff] %vm206_vm1, %v516_v20 }
 0x13a   : > { %v695_v26 = vpop.eup %694  ;;  %v519_v27 = vmul.f32 %v693_v24, %v463_v47  ;;  %525 = vst.msk [vmem:[%s197_s9 + $0x10] sm:$0xff] %vm206_vm1, %v517_v23 }
 0x13b   : > { %v697_v29 = vpop.eup %696  ;;  %v520_v30 = vmul.f32 %v695_v26, %v464_v48  ;;  %526 = vst.msk [vmem:[%s197_s9 + $0x18] sm:$0xff] %vm206_vm1, %v518_v25 }
 0x13c   : > { %v699_v31 = vpop.eup %698  ;;  %v521_v32 = vmul.f32 %v697_v29, %v465_v49  ;;  %527 = vst.msk [vmem:[%s197_s9 + $0x20] sm:$0xff] %vm206_vm1, %v519_v27 }
 0x13d   : > { %v522_v8 = vmul.f32 %v699_v31, %v466_v53  ;;  %528 = vst.msk [vmem:[%s197_s9 + $0x28] sm:$0xff] %vm206_vm1, %v520_v30 }
 0x13e   : > { %529 = vst.msk [vmem:[%s197_s9 + $0x30] sm:$0xff] %vm206_vm1, %v521_v32 }
 0x13f   : > { %530 = vst.msk [vmem:[%s197_s9 + $0x38] sm:$0xff] %vm206_vm1, %v522_v8 }
 0x140 PF: > { %s14_s15 = sadd.s32 1, %s706_s15  }
 0x141   : > { %p11_p4 = scmp.ge.s32.totalorder %s14_s15, 4  }
 0x143   :  { %13 = sbr.rel (!%p11_p4) target bundleno = 1 (0x1), region = 66 }

// kernel: vae_encoder_forward.32
= control target key start
LH: loop header
LB: loop body
LE: loop exit
PB: predicated region body
PF: predicated region fallthrough
CT: control target
= control target key end

     0   :  { %s1141_s1 = inlined_call_operand.vmem [shape: bf16[384,128], index: 1, kind: input, shape index: {}]   ;;  %s1142_s0 = inlined_call_operand.vmem [shape: bf16[128,384], index: 0, kind: input, shape index: {}]   ;;  %s1143_s2 = inlined_call_operand.vmem [shape: f32[1,128], index: 2, kind: input, shape index: {}]   ;;  %s1144_s3 = inlined_call_operand.vmem [shape: f32[128,128], index: 3, kind: output, shape index: {}]  }
   0x1   :  { %v852_v0 = vld [vmem:[%s1141_s1 + $0x40] sm:$0xff]   ;;  %v855_v3 = vld [vmem:[%s1141_s1 + $0x48] sm:$0xff]   ;;  %v858_v6 = vld [vmem:[%s1141_s1 + $0x50] sm:$0xff]  }
   0x2   :  { %v853_v1 = vld [vmem:[%s1141_s1] sm:$0xff]   ;;  %740 = vmatprep.subr.bf16.mxu0 %v852_v0  ;;  %v856_v4 = vld [vmem:[%s1141_s1 + $0x8] sm:$0xff]   ;;  %v859_v7 = vld [vmem:[%s1141_s1 + $0x10] sm:$0xff]  }
   0x3   :  { %v854_v2 = vld [vmem:[%s1141_s1 + $0x80] sm:$0xff]   ;;  %741 = vmatpush3.bf16.msra.mxu0 %v853_v1  ;;  %v857_v5 = vld [vmem:[%s1141_s1 + $0x88] sm:$0xff]   ;;  %v860_v8 = vld [vmem:[%s1141_s1 + $0x90] sm:$0xff]  }
   0x4   :  { %820 = vmatprep.subr.bf16.mxu1 %v854_v2  ;;  %742 = vmatprep.subr.bf16.mxu0 %v855_v3  ;;  %v861_v9 = vld [vmem:[%s1141_s1 + $0x58] sm:$0xff]   ;;  %v864_v12 = vld [vmem:[%s1141_s1 + $0x60] sm:$0xff]   ;;  %v867_v15 = vld [vmem:[%s1141_s1 + $0x68] sm:$0xff]  }
   0x5   :  { %821 = vmatpush3.bf16.msra.mxu1 %v854_v2  ;;  %v862_v10 = vld [vmem:[%s1141_s1 + $0x18] sm:$0xff]   ;;  %v866_v13 = vld [vmem:[%s1141_s1 + $0xa0] sm:$0xff]   ;;  %v869_v16 = vld [vmem:[%s1141_s1 + $0xa8] sm:$0xff]  }
   0x6   :  { %822 = vmatprep.subr.bf16.mxu1 %v857_v5  ;;  %v863_v11 = vld [vmem:[%s1141_s1 + $0x98] sm:$0xff]   ;;  %v865_v14 = vld [vmem:[%s1141_s1 + $0x20] sm:$0xff]   ;;  %v868_v17 = vld [vmem:[%s1141_s1 + $0x28] sm:$0xff]  }
   0x7   :  { %743 = vmatpush3.bf16.msra.mxu0 %v856_v4  ;;  %v870_v18 = vld [vmem:[%s1141_s1 + $0x70] sm:$0xff]   ;;  %v873_v21 = vld [vmem:[%s1141_s1 + $0x78] sm:$0xff]   ;;  %v876_v26 = vld [vmem:[%s1142_s0] ss:$12 sps:$4 sm:$0xff]  }
   0x8   :  { %744 = vmatprep.subr.bf16.mxu0 %v858_v6  ;;  %v871_v19 = vld [vmem:[%s1141_s1 + $0x30] sm:$0xff]   ;;  %v875_v22 = vld [vmem:[%s1141_s1 + $0xb8] sm:$0xff]   ;;  %v880_v28 = vld [vmem:[%s1142_s0 + $0x20] ss:$12 sps:$4 sm:$0xff]  }
   0x9   :  { %823 = vmatpush3.bf16.msra.mxu1 %v857_v5  ;;  %v872_v20 = vld [vmem:[%s1141_s1 + $0xb0] sm:$0xff]   ;;  %v874_v25 = vld [vmem:[%s1141_s1 + $0x38] sm:$0xff]   ;;  %v896_v36 = vld [vmem:[%s1142_s0 + $0x80] ss:$12 sps:$4 sm:$0xff]  }
   0xa   :  { %824 = vmatprep.subr.bf16.mxu1 %v860_v8  ;;  %v878_v23 = vld [vmem:[%s1142_s0 + $0x4] ss:$12 sps:$4 sm:$0xff]   ;;  %v879_v24 = vld [vmem:[%s1142_s0 + $0x8] ss:$12 sps:$4 sm:$0xff]   ;;  %v889_v35 = vld [vmem:[%s1142_s0 + $0x4c] ss:$12 sps:$4 sm:$0xff]  }
   0xb   :  { %745 = vmatpush3.bf16.msra.mxu0 %v859_v7  ;;  %435 = vmatprep.mubr.bf16.mxu0 %v878_v23  ;;  %v881_v27 = vld [vmem:[%s1142_s0 + $0x1c] ss:$12 sps:$4 sm:$0xff]   ;;  %v887_v29 = vld [vmem:[%s1142_s0 + $0x38] ss:$12 sps:$4 sm:$0xff]   ;;  %v884_v31 = vld [vmem:[%s1142_s0 + $0x34] ss:$12 sps:$4 sm:$0xff]  }
   0xc   :  { %746 = vmatprep.subr.bf16.mxu0 %v861_v9  ;;  %836 = vmatprep.mubr.bf16.mxu1 %v879_v24  ;;  %v883_v30 = vld [vmem:[%s1142_s0 + $0x18] ss:$12 sps:$4 sm:$0xff]   ;;  %v888_v32 = vld [vmem:[%s1142_s0 + $0x50] ss:$12 sps:$4 sm:$0xff]   ;;  %v895_v33 = vld [vmem:[%s1142_s0 + $0x68] ss:$12 sps:$4 sm:$0xff]  }
   0xd   :  { %825 = vmatpush3.bf16.msra.mxu1 %v860_v8  ;;  %v886_v34 = vld [vmem:[%s1142_s0 + $0x30] ss:$12 sps:$4 sm:$0xff]   ;;  %v903_v37 = vld [vmem:[%s1142_s0 + $0x98] ss:$12 sps:$4 sm:$0xff]   ;;  %v891_v38 = vld [vmem:[%s1142_s0 + $0x48] ss:$12 sps:$4 sm:$0xff]  }
   0xe   :  { %826 = vmatprep.subr.bf16.mxu1 %v863_v11  ;;  %v892_v39 = vld [vmem:[%s1142_s0 + $0x64] ss:$12 sps:$4 sm:$0xff]   ;;  %v894_v41 = vld [vmem:[%s1142_s0 + $0x60] ss:$12 sps:$4 sm:$0xff]   ;;  %v897_v42 = vld [vmem:[%s1142_s0 + $0x7c] ss:$12 sps:$4 sm:$0xff]  }
   0xf   :  { %747 = vmatpush3.bf16.msra.mxu0 %v862_v10  ;;  %v904_v40 = vld [vmem:[%s1142_s0 + $0xb0] ss:$12 sps:$4 sm:$0xff]   ;;  %v899_v43 = vld [vmem:[%s1142_s0 + $0x78] ss:$12 sps:$4 sm:$0xff]   ;;  %v900_v44 = vld [vmem:[%s1142_s0 + $0x94] ss:$12 sps:$4 sm:$0xff]  }
  0x10   :  { %748 = vmatprep.subr.bf16.mxu0 %v864_v12  ;;  %v902_v45 = vld [vmem:[%s1142_s0 + $0x90] ss:$12 sps:$4 sm:$0xff]   ;;  %v905_v46 = vld [vmem:[%s1142_s0 + $0xac] ss:$12 sps:$4 sm:$0xff]   ;;  %v907_v47 = vld [vmem:[%s1142_s0 + $0xa8] ss:$12 sps:$4 sm:$0xff]  }
  0x11   :  { %827 = vmatpush3.bf16.msra.mxu1 %v863_v11  ;;  %v1075_v55 = vld [vmem:[%s1143_s2] ss:$0 sm:$0xff] }
  0x12   :  { %828 = vmatprep.subr.bf16.mxu1 %v866_v13 }
  0x13   :  { %749 = vmatpush3.bf16.msra.mxu0 %v865_v14 }
  0x14   :  { %750 = vmatprep.subr.bf16.mxu0 %v867_v15 }
  0x15   :  { %829 = vmatpush3.bf16.msra.mxu1 %v866_v13 }
  0x16   :  { %830 = vmatprep.subr.bf16.mxu1 %v869_v16 }
  0x17   :  { %751 = vmatpush3.bf16.msra.mxu0 %v868_v17 }
  0x18   :  { %752 = vmatprep.subr.bf16.mxu0 %v870_v18 }
  0x19   :  { %831 = vmatpush3.bf16.msra.mxu1 %v869_v16 }
  0x1a   :  { %832 = vmatprep.subr.bf16.mxu1 %v872_v20 }
  0x1b   :  { %753 = vmatpush3.bf16.msra.mxu0 %v871_v19 }
  0x1c   :  { %754 = vmatprep.subr.bf16.mxu0 %v873_v21 }
  0x1d   :  { %833 = vmatpush3.bf16.msra.mxu1 %v872_v20 }
  0x1e   :  { %834 = vmatprep.subr.bf16.mxu1 %v875_v22 }
  0x1f   :  { %755 = vmatpush3.bf16.msra.mxu0 %v874_v25 }
  0x21   :  { %835 = vmatpush3.bf16.msra.mxu1 %v875_v22 }
  0x22   :  { %436 = vmatmul.mubr.bf16.vlgmr.msra.gmra.mrb[0].mxu0 %v876_v26 }
  0x23   :  { %443 = vmatprep.mubr.bf16.mxu0 %v881_v27 }
  0x24   :  { %837 = vmatmul.mubr.bf16.vlgmr.msra.gmra.mrb[0].mxu1 %v880_v28 }
  0x25   :  { %840 = vmatprep.mubr.bf16.mxu1 %v887_v29 }
  0x2a   :  { %444 = vmatmul.mubr.bf16.gmra.mrb[4].mxu0 %v883_v30 }
  0x2b   :  { %451 = vmatprep.mubr.bf16.mxu0 %v884_v31 }
  0x2c   :  { %841 = vmatmul.mubr.bf16.gmra.mrb[4].mxu1 %v888_v32 }
  0x2d   :  { %844 = vmatprep.mubr.bf16.mxu1 %v895_v33 }
  0x32   :  { %452 = vmatmul.mubr.bf16.gmra.mrb[8].mxu0 %v886_v34 }
  0x33   :  { %459 = vmatprep.mubr.bf16.mxu0 %v889_v35 }
  0x34   :  { %845 = vmatmul.mubr.bf16.gmra.mrb[8].mxu1 %v896_v36 }
  0x35   :  { %848 = vmatprep.mubr.bf16.mxu1 %v903_v37 }
  0x3a   :  { %460 = vmatmul.mubr.bf16.gmra.mrb[12].mxu0 %v891_v38 }
  0x3b   :  { %467 = vmatprep.mubr.bf16.mxu0 %v892_v39 }
  0x3c   :  { %849 = vmatmul.mubr.bf16.gmra.mrb[12].mxu1 %v904_v40 }
  0x42   :  { %468 = vmatmul.mubr.bf16.gmra.mrb[16].mxu0 %v894_v41 }
  0x43   :  { %475 = vmatprep.mubr.bf16.mxu0 %v897_v42 }
  0x4a   :  { %476 = vmatmul.mubr.bf16.gmra.mrb[20].mxu0 %v899_v43 }
  0x4b   :  { %483 = vmatprep.mubr.bf16.mxu0 %v900_v44 }
  0x52   :  { %484 = vmatmul.mubr.bf16.gmra.mrb[24].mxu0 %v902_v45 }
  0x53   :  { %491 = vmatprep.mubr.bf16.mxu0 %v905_v46 }
  0x5a   :  { %492 = vmatmul.mubr.bf16.gmra.mrb[28].mxu0 %v907_v47 }
  0xf5   :  { %v756_v48 = vpop.f32.mrb[0].mxu0 }
  0xf6   :  { %v757_v49 = vpop.f32.mrb[1].mxu0 }
  0xf7   :  { %v758_v50 = vadd.f32 %v757_v49, %v756_v48  ;;  %v759_v51 = vpop.f32.mrb[2].mxu0  ;;  %v838_v52 = vpop.f32.mrb[0].mxu1 }
  0xf8   :  { %v760_v53 = vpop.f32.mrb[3].mxu0  ;;  %v534_v54 = vpop.f32.mrb[1].mxu1 }
  0xf9   :  { %v761_v56 = vadd.f32 %v760_v53, %v759_v51  ;;  %v535_v57 = vadd.f32 %v758_v50, %v534_v54  ;;  %v839_v58 = vpop.f32.mrb[2].mxu1 }
  0xfa   :  { %v537_v59 = vpop.f32.mrb[3].mxu1 }
  0xfb   :  { %v655_v60 = vadd.f32 %v1075_v55, %v535_v57  ;;  %v538_v61 = vadd.f32 %v761_v56, %v537_v59 }
  0xfd   :  { %671 = vst [vmem:[%s1144_s3] sm:$0xff] %v655_v60  ;;  %v656_v62 = vadd.f32 %v1075_v55, %v538_v61  ;;  %v762_v63 = vpop.f32.mrb[4].mxu0 }
  0xfe   :  { %v763_v0 = vpop.f32.mrb[5].mxu0 }
  0xff   :  { %672 = vst [vmem:[%s1144_s3 + $0x8] sm:$0xff] %v656_v62  ;;  %v764_v1 = vadd.f32 %v763_v0, %v762_v63  ;;  %v765_v2 = vpop.f32.mrb[6].mxu0  ;;  %v842_v3 = vpop.f32.mrb[4].mxu1 }
 0x100   :  { %v766_v4 = vpop.f32.mrb[7].mxu0  ;;  %v550_v5 = vpop.f32.mrb[5].mxu1 }
 0x101   :  { %v543_v6 = vadd.f32 %v838_v52, %v764_v1  ;;  %v767_v7 = vadd.f32 %v766_v4, %v765_v2  ;;  %v843_v8 = vpop.f32.mrb[6].mxu1 }
 0x102   :  { %v553_v9 = vpop.f32.mrb[7].mxu1 }
 0x103   :  { %v657_v10 = vadd.f32 %v1075_v55, %v543_v6  ;;  %v546_v11 = vadd.f32 %v839_v58, %v767_v7 }
 0x105   :  { %673 = vst [vmem:[%s1144_s3 + $0x10] sm:$0xff] %v657_v10  ;;  %v658_v12 = vadd.f32 %v1075_v55, %v546_v11  ;;  %v768_v13 = vpop.f32.mrb[8].mxu0 }
 0x106   :  { %v769_v14 = vpop.f32.mrb[9].mxu0 }
 0x107   :  { %674 = vst [vmem:[%s1144_s3 + $0x18] sm:$0xff] %v658_v12  ;;  %v770_v15 = vadd.f32 %v769_v14, %v768_v13  ;;  %v771_v16 = vpop.f32.mrb[10].mxu0  ;;  %v846_v17 = vpop.f32.mrb[8].mxu1 }
 0x108   :  { %v772_v18 = vpop.f32.mrb[11].mxu0  ;;  %v566_v19 = vpop.f32.mrb[9].mxu1 }
 0x109   :  { %v773_v20 = vadd.f32 %v772_v18, %v771_v16  ;;  %v551_v21 = vadd.f32 %v770_v15, %v550_v5  ;;  %v847_v22 = vpop.f32.mrb[10].mxu1 }
 0x10a   :  { %v569_v23 = vpop.f32.mrb[11].mxu1 }
 0x10b   :  { %v659_v24 = vadd.f32 %v1075_v55, %v551_v21  ;;  %v554_v25 = vadd.f32 %v773_v20, %v553_v9 }
 0x10d   :  { %675 = vst [vmem:[%s1144_s3 + $0x20] sm:$0xff] %v659_v24  ;;  %v660_v26 = vadd.f32 %v1075_v55, %v554_v25  ;;  %v774_v27 = vpop.f32.mrb[12].mxu0 }
 0x10e   :  { %v775_v28 = vpop.f32.mrb[13].mxu0 }
 0x10f   :  { %676 = vst [vmem:[%s1144_s3 + $0x28] sm:$0xff] %v660_v26  ;;  %v776_v29 = vadd.f32 %v775_v28, %v774_v27  ;;  %v777_v30 = vpop.f32.mrb[14].mxu0  ;;  %v850_v31 = vpop.f32.mrb[12].mxu1 }
 0x110   :  { %v778_v32 = vpop.f32.mrb[15].mxu0  ;;  %v582_v33 = vpop.f32.mrb[13].mxu1 }
 0x111   :  { %v559_v34 = vadd.f32 %v842_v3, %v776_v29  ;;  %v779_v35 = vadd.f32 %v778_v32, %v777_v30  ;;  %v851_v36 = vpop.f32.mrb[14].mxu1 }
 0x112   :  { %v585_v37 = vpop.f32.mrb[15].mxu1 }
 0x113   :  { %v661_v38 = vadd.f32 %v1075_v55, %v559_v34  ;;  %v562_v39 = vadd.f32 %v843_v8, %v779_v35 }
 0x115   :  { %677 = vst [vmem:[%s1144_s3 + $0x30] sm:$0xff] %v661_v38  ;;  %v662_v40 = vadd.f32 %v1075_v55, %v562_v39  ;;  %v780_v41 = vpop.f32.mrb[16].mxu0 }
 0x116   :  { %v781_v42 = vpop.f32.mrb[17].mxu0 }
 0x117   :  { %678 = vst [vmem:[%s1144_s3 + $0x38] sm:$0xff] %v662_v40  ;;  %v782_v43 = vadd.f32 %v781_v42, %v780_v41  ;;  %v783_v44 = vpop.f32.mrb[18].mxu0 }
 0x118   :  { %v784_v45 = vpop.f32.mrb[19].mxu0 }
 0x119   :  { %v785_v46 = vadd.f32 %v784_v45, %v783_v44  ;;  %v567_v47 = vadd.f32 %v782_v43, %v566_v19 }
 0x11b   :  { %v663_v48 = vadd.f32 %v1075_v55, %v567_v47  ;;  %v570_v49 = vadd.f32 %v785_v46, %v569_v23 }
 0x11d   :  { %679 = vst [vmem:[%s1144_s3 + $0x40] sm:$0xff] %v663_v48  ;;  %v664_v50 = vadd.f32 %v1075_v55, %v570_v49  ;;  %v786_v51 = vpop.f32.mrb[20].mxu0 }
 0x11e   :  { %v787_v52 = vpop.f32.mrb[21].mxu0 }
 0x11f   :  { %680 = vst [vmem:[%s1144_s3 + $0x48] sm:$0xff] %v664_v50  ;;  %v788_v53 = vadd.f32 %v787_v52, %v786_v51  ;;  %v789_v54 = vpop.f32.mrb[22].mxu0 }
 0x120   :  { %v790_v56 = vpop.f32.mrb[23].mxu0 }
 0x121   :  { %v575_v57 = vadd.f32 %v846_v17, %v788_v53  ;;  %v791_v58 = vadd.f32 %v790_v56, %v789_v54 }
 0x123   :  { %v665_v59 = vadd.f32 %v1075_v55, %v575_v57  ;;  %v578_v60 = vadd.f32 %v847_v22, %v791_v58 }
 0x125   :  { %681 = vst [vmem:[%s1144_s3 + $0x50] sm:$0xff] %v665_v59  ;;  %v666_v61 = vadd.f32 %v1075_v55, %v578_v60  ;;  %v792_v62 = vpop.f32.mrb[24].mxu0 }
 0x126   :  { %v793_v63 = vpop.f32.mrb[25].mxu0 }
 0x127   :  { %682 = vst [vmem:[%s1144_s3 + $0x58] sm:$0xff] %v666_v61  ;;  %v794_v0 = vadd.f32 %v793_v63, %v792_v62  ;;  %v795_v1 = vpop.f32.mrb[26].mxu0 }
 0x128   :  { %v796_v2 = vpop.f32.mrb[27].mxu0 }
 0x129   :  { %v797_v3 = vadd.f32 %v796_v2, %v795_v1  ;;  %v583_v4 = vadd.f32 %v794_v0, %v582_v33 }
 0x12b   :  { %v667_v5 = vadd.f32 %v1075_v55, %v583_v4  ;;  %v586_v6 = vadd.f32 %v797_v3, %v585_v37 }
 0x12d   :  { %683 = vst [vmem:[%s1144_s3 + $0x60] sm:$0xff] %v667_v5  ;;  %v668_v7 = vadd.f32 %v1075_v55, %v586_v6  ;;  %v798_v8 = vpop.f32.mrb[28].mxu0 }
 0x12e   :  { %v799_v9 = vpop.f32.mrb[29].mxu0 }
 0x12f   :  { %684 = vst [vmem:[%s1144_s3 + $0x68] sm:$0xff] %v668_v7  ;;  %v800_v10 = vadd.f32 %v799_v9, %v798_v8  ;;  %v801_v11 = vpop.f32.mrb[30].mxu0 }
 0x130   :  { %v802_v12 = vpop.f32.mrb[31].mxu0 }
 0x131   :  { %v591_v13 = vadd.f32 %v850_v31, %v800_v10  ;;  %v803_v14 = vadd.f32 %v802_v12, %v801_v11 }
 0x133   :  { %v669_v15 = vadd.f32 %v1075_v55, %v591_v13  ;;  %v594_v16 = vadd.f32 %v851_v36, %v803_v14 }
 0x135   :  { %685 = vst [vmem:[%s1144_s3 + $0x70] sm:$0xff] %v669_v15  ;;  %v670_v17 = vadd.f32 %v1075_v55, %v594_v16 }
 0x137   :  { %686 = vst [vmem:[%s1144_s3 + $0x78] sm:$0xff] %v670_v17 }

// kernel: vae_encoder_forward.35
= control target key start
LH: loop header
LB: loop body
LE: loop exit
PB: predicated region body
PF: predicated region fallthrough
CT: control target
= control target key end

     0   :  { %s776_s15 = smov 0   ;;  %s914_s0 = inlined_call_operand.vmem [shape: f32[2,64,64], index: 0, kind: input, shape index: {}]   ;;  %s915_s1 = inlined_call_operand.vmem [shape: f32[1,64], index: 1, kind: input, shape index: {}]   ;;  %s916_s2 = inlined_call_operand.vmem [shape: f32[1,64], index: 2, kind: input, shape index: {}]   ;;  %s917_s3 = inlined_call_operand.vmem [shape: f32[64,64], index: 3, kind: input, shape index: {}]   ;;  %s918_s4 = inlined_call_operand.vmem [shape: f32[2,64,64], index: 4, kind: output, shape index: {}]  }
   0x1 LB: > { %s590_s16 = sadd.s32 4294967295, %s746_s15   ;;  %p594_p0 = scmp.ge.s32.totalorder %s746_s15, 1  ;;  %s746_s15 = sphi %s776_s15, %s14_s15  }
   0x2   : > { %p162_p1 = scmp.lt.s32.totalorder %s746_s15, 3 }
   0x4   : > { %p163_p2 = pnand %p594_p0, %p162_p1 }
   0x5   : > { %v257_v0 = vld [vmem:[%s917_s3] sm:$0xff] (!%p163_p2)  ;;  %v258_v1 = vld [vmem:[%s917_s3 + $0x8] sm:$0xff] (!%p163_p2)  ;;  %v259_v2 = vld [vmem:[%s917_s3 + $0x10] sm:$0xff] (!%p163_p2)  ;;  %v748_v3 = vmov (!%p163_p2), 0.0|0.0   ;;  %p188_p3 = scmp.lt.s32.totalorder (!%p163_p2), %s590_s16, 1  ;;  %vm749_vm0 = vmmov (!%p163_p2), 0  }
   0x6   : > { %166 = sbr.rel (%p163_p2) target bundleno = 320 (0x140), region = 36  ;;  %671 = vmatprep.subr.bf16.mxu0 (!%p163_p2), %v748_v3  ;;  %v672_v4 = vpack.c.bf16 (!%p163_p2), %v258_v1, %v257_v0  ;;  %683 = vmatprep.subr.bf16.mxu1 (!%p163_p2), %v748_v3  ;;  %v260_v5 = vld [vmem:[%s917_s3 + $0x18] sm:$0xff] (!%p163_p2)  ;;  %v750_v6 = vmov (!%p163_p2), 0.0   ;;  %v261_v8 = vld [vmem:[%s917_s3 + $0x20] sm:$0xff] (!%p163_p2)  ;;  %v262_v9 = vld [vmem:[%s917_s3 + $0x28] sm:$0xff] (!%p163_p2)  ;;  %vm206_vm1 = vcmask (!%p163_p2), 523264  }
   0x7   : > { %649 = vmatprep.mubr.msk.f32.mxu0 (!%p163_p2), %vm749_vm0, %v750_v6  ;;  %668 = vmatprep.mubr.msk.f32.mxu1 (!%p163_p2), %vm749_vm0, %v750_v6  ;;  %v675_v7 = vpack.c.bf16 (!%p163_p2), %v260_v5, %v259_v2  ;;  %v678_v10 = vpack.c.bf16 (!%p163_p2), %v262_v9, %v261_v8  ;;  %v263_v14 = vld [vmem:[%s917_s3 + $0x30] sm:$0xff] (!%p163_p2)  ;;  %v264_v15 = vld [vmem:[%s917_s3 + $0x38] sm:$0xff] (!%p163_p2) }
   0x8   : > { %673 = vmatpush3.bf16.msra.mxu0 (!%p163_p2), %v672_v4  ;;  %685 = vmatpush3.bf16.msra.mxu1 (!%p163_p2), %v672_v4  ;;  %v681_v26 = vpack.c.bf16 (!%p163_p2), %v264_v15, %v263_v14 }
   0x9   : > { %674 = vmatprep.subr.bf16.mxu0 (!%p163_p2), %v748_v3  ;;  %686 = vmatprep.subr.bf16.mxu1 (!%p163_p2), %v748_v3 }
   0xc   : > { %676 = vmatpush3.bf16.msra.mxu0 (!%p163_p2), %v675_v7  ;;  %688 = vmatpush3.bf16.msra.mxu1 (!%p163_p2), %v675_v7 }
   0xd   : > { %s920_s16 = smov (!%p188_p3, %s590_s16), 1  ;;  %677 = vmatprep.subr.bf16.mxu0 %v748_v3  ;;  %689 = vmatprep.subr.bf16.mxu1 %v748_v3 }
   0xe   : > { %s613_s29 = sshll.u32 %s920_s16, 6 }
   0xf   : > { %s810_s6 = scalar_lea.vmem %s914_s0, %s613_s29  ;;  %s197_s19 = scalar_lea.vmem %s918_s4, %s613_s29 }
  0x10   : > { %v813_v11 = vld [vmem:[%s810_s6] sm:$0xff]  ;;  %v816_v12 = vld [vmem:[%s810_s6 + $0x8] sm:$0xff]  ;;  %v819_v13 = vld [vmem:[%s810_s6 + $0x10] sm:$0xff]  ;;  %679 = vmatpush3.bf16.msra.mxu0 %v678_v10  ;;  %691 = vmatpush3.bf16.msra.mxu1 %v678_v10 }
  0x11   : > { %v828_v16 = vld [vmem:[%s810_s6 + $0x18] sm:$0xff]  ;;  %v207_v17 = vsel %vm206_vm1, %v813_v11, 0.0  ;;  %v208_v18 = vsel %vm206_vm1, %v816_v12, 0.0  ;;  %v210_v19 = vsel %vm206_vm1, %v819_v13, 0.0  ;;  %v228_v20 = vmul.f32 %v813_v11, %v813_v11  ;;  %v839_v21 = vld [vmem:[%s810_s6 + $0x20] sm:$0xff]  ;;  %v848_v27 = vld [vmem:[%s810_s6 + $0x28] sm:$0xff]  ;;  %680 = vmatprep.subr.bf16.mxu0 %v748_v3  ;;  %692 = vmatprep.subr.bf16.mxu1 %v748_v3 }
  0x12   : > { %v209_v22 = vadd.f32 %v208_v18, %v207_v17  ;;  %v212_v23 = vsel %vm206_vm1, %v828_v16, 0.0  ;;  %v229_v24 = vmul.f32 %v816_v12, %v816_v12  ;;  %v230_v25 = vmul.f32 %v819_v13, %v819_v13  ;;  %v859_v34 = vld [vmem:[%s810_s6 + $0x30] sm:$0xff]  ;;  %v868_v41 = vld [vmem:[%s810_s6 + $0x38] sm:$0xff] }
  0x13   : > { %v231_v29 = vmul.f32 %v828_v16, %v828_v16  ;;  %v236_v30 = vsel %vm206_vm1, %v228_v20, 0.0  ;;  %v214_v31 = vsel %vm206_vm1, %v839_v21, 0.0  ;;  %v232_v32 = vmul.f32 %v839_v21, %v839_v21 }
  0x14   : > { %v211_v28 = vadd.f32 %v210_v19, %v209_v22  ;;  %v237_v33 = vsel %vm206_vm1, %v229_v24, 0.0  ;;  %v239_v37 = vsel %vm206_vm1, %v230_v25, 0.0  ;;  %v216_v38 = vsel %vm206_vm1, %v848_v27, 0.0  ;;  %682 = vmatpush3.bf16.msra.mxu0 %v681_v26  ;;  %694 = vmatpush3.bf16.msra.mxu1 %v681_v26 }
  0x15   : > { %v238_v36 = vadd.f32 %v237_v33, %v236_v30  ;;  %v233_v39 = vmul.f32 %v848_v27, %v848_v27  ;;  %v241_v40 = vsel %vm206_vm1, %v231_v29, 0.0  ;;  %v218_v44 = vsel %vm206_vm1, %v859_v34, 0.0 }
  0x16   : > { %v213_v35 = vadd.f32 %v212_v23, %v211_v28  ;;  %v234_v45 = vmul.f32 %v859_v34, %v859_v34  ;;  %v243_v46 = vsel %vm206_vm1, %v232_v32, 0.0  ;;  %v220_v49 = vsel %vm206_vm1, %v868_v41, 0.0 }
  0x17   : > { %v240_v43 = vadd.f32 %v239_v37, %v238_v36  ;;  %v235_v50 = vmul.f32 %v868_v41, %v868_v41  ;;  %v245_v51 = vsel %vm206_vm1, %v233_v39, 0.0  ;;  %v417_v18 = vlaneseq }
  0x18   : > { %v215_v42 = vadd.f32 %v214_v31, %v213_v35  ;;  %v247_v54 = vsel %vm206_vm1, %v234_v45, 0.0 }
  0x19   : > { %v242_v48 = vadd.f32 %v241_v40, %v240_v43  ;;  %v249_v57 = vsel %vm206_vm1, %v235_v50, 0.0  ;;  %v418_v22 = vshrl.u32 %v417_v18, 7 }
  0x1a   : > { %v217_v47 = vadd.f32 %v216_v38, %v215_v42  ;;  %v601_v38 = vld [vmem:[%s915_s1] ss:$0 sm:$0xff] }
  0x1b   : > { %v244_v53 = vadd.f32 %v243_v46, %v242_v48  ;;  %v419_v24 = vsub.s32 0, %v418_v22 }
  0x1c   : > { %v219_v52 = vadd.f32 %v218_v44, %v217_v47 }
  0x1d   : > { %v246_v56 = vadd.f32 %v245_v51, %v244_v53 }
  0x1e   : > { %v221_v55 = vadd.f32 %v220_v49, %v219_v52 }
  0x1f   : > { %v248_v59 = vadd.f32 %v247_v54, %v246_v56 }
  0x20   : > { %v222_v58 = vrot.slane %v221_v55, 4 }
  0x21   : > { %v250_v61 = vadd.f32 %v249_v57, %v248_v59 }
  0x22   : > { %v223_v60 = vadd.f32 %v222_v58, %v221_v55 }
  0x23   : > { %v251_v63 = vrot.slane %v250_v61, 4 }
  0x24   : > { %v224_v62 = vrot.slane %v223_v60, 2 }
  0x25   : > { %v252_v1 = vadd.f32 %v251_v63, %v250_v61 }
  0x26   : > { %v225_v0 = vadd.f32 %v224_v62, %v223_v60 }
  0x27   : > { %v253_v3 = vrot.slane %v252_v1, 2 }
  0x28   : > { %v226_v2 = vrot.slane %v225_v0, 1 }
  0x29   : > { %v254_v5 = vadd.f32 %v253_v3, %v252_v1 }
  0x2a   : > { %v227_v4 = vadd.f32 %v226_v2, %v225_v0 }
  0x2b   : > { %v255_v6 = vrot.slane %v254_v5, 1 }
  0x2c   : > { %650 = vmatmul.mubr.msk.f32.vlgmr.msra.gmra.mrb[0].mxu0 %vm206_vm1, %v227_v4 }
  0x2d   : > { %v256_v7 = vadd.f32 %v255_v6, %v254_v5 }
  0x2f   : > { %669 = vmatmul.mubr.msk.f32.vlgmr.msra.gmra.mrb[0].mxu1 %vm206_vm1, %v256_v7 }
  0xff   : > { %v334_v8 = vpop.f32.mrb[0].mxu0 }
 0x100   : > { %v338_v9 = vmul.f32 0.0078125, %v334_v8  ;;  %v651_v10 = vpop.f32.mrb[1].mxu0 }
 0x102   : > { %v408_v14 = vpop.f32.mrb[0].mxu1  ;;  %v413_v15 = vmul.f32 %v338_v9, %v338_v9  ;;  %v420_v25 = vrot.slane %v338_v9, %v419_v24 }
 0x103   : > { %v670_v17 = vpop.f32.mrb[1].mxu1  ;;  %v412_v19 = vmul.f32 0.0078125, %v408_v14 }
 0x104   : > { %v421_v28 = vsub.f32 %v813_v11, %v420_v25  ;;  %v422_v29 = vsub.f32 %v816_v12, %v420_v25  ;;  %v423_v30 = vsub.f32 %v819_v13, %v420_v25  ;;  %v424_v31 = vsub.f32 %v828_v16, %v420_v25 }
 0x105   : > { %v414_v20 = vsub.f32 %v412_v19, %v413_v15  ;;  %v425_v33 = vsub.f32 %v839_v21, %v420_v25  ;;  %v426_v35 = vsub.f32 %v848_v27, %v420_v25  ;;  %v427_v36 = vsub.f32 %v859_v34, %v420_v25  ;;  %v602_v21 = vld [vmem:[%s916_s2] ss:$0 sm:$0xff] }
 0x106   : > { %v428_v37 = vsub.f32 %v868_v41, %v420_v25 }
 0x107   : > { %v415_v23 = vadd.f32 1e-06, %v414_v20 }
 0x109   : > { %706 = vrsqrt.f32 %v415_v23 }
 0x113   : > { %v707_v26 = vpop.eup %706 }
 0x114   : > { %v432_v32 = vrot.slane %v707_v26, %v419_v24 }
 0x116   : > { %v433_v11 = vmul.f32 %v432_v32, %v421_v28  ;;  %v434_v39 = vmul.f32 %v432_v32, %v422_v29  ;;  %v435_v12 = vmul.f32 %v432_v32, %v423_v30  ;;  %v436_v40 = vmul.f32 %v432_v32, %v424_v31 }
 0x117   : > { %v437_v13 = vmul.f32 %v432_v32, %v425_v33  ;;  %v438_v42 = vmul.f32 %v432_v32, %v426_v35  ;;  %v439_v16 = vmul.f32 %v432_v32, %v427_v36  ;;  %v440_v43 = vmul.f32 %v432_v32, %v428_v37 }
 0x118   : > { %v448_v27 = vmul.f32 %v601_v38, %v433_v11  ;;  %v449_v34 = vmul.f32 %v601_v38, %v434_v39  ;;  %v450_v44 = vmul.f32 %v601_v38, %v435_v12  ;;  %v451_v41 = vmul.f32 %v601_v38, %v436_v40 }
 0x119   : > { %v452_v45 = vmul.f32 %v601_v38, %v437_v13  ;;  %v453_v46 = vmul.f32 %v601_v38, %v438_v42  ;;  %v454_v47 = vmul.f32 %v601_v38, %v439_v16  ;;  %v455_v48 = vmul.f32 %v601_v38, %v440_v43 }
 0x11a   : > { %v463_v49 = vadd.f32 %v602_v21, %v448_v27  ;;  %v464_v50 = vadd.f32 %v602_v21, %v449_v34  ;;  %v465_v51 = vadd.f32 %v602_v21, %v450_v44  ;;  %v466_v52 = vadd.f32 %v602_v21, %v451_v41 }
 0x11b   : > { %v467_v53 = vadd.f32 %v602_v21, %v452_v45  ;;  %v468_v54 = vadd.f32 %v602_v21, %v453_v46  ;;  %v469_v55 = vadd.f32 %v602_v21, %v454_v47  ;;  %v470_v59 = vadd.f32 %v602_v21, %v455_v48 }
 0x11c   : > { %v603_v56 = vmul.f32 -1.442695, %v463_v49  ;;  %v604_v57 = vmul.f32 -1.442695, %v464_v50  ;;  %v605_v58 = vmul.f32 -1.442695, %v465_v51 }
 0x11d   : > { %v606_v60 = vmul.f32 -1.442695, %v466_v52  ;;  %v607_v61 = vmul.f32 -1.442695, %v467_v53  ;;  %v608_v62 = vmul.f32 -1.442695, %v468_v54 }
 0x11e   : > { %708 = vpow2.f32 %v603_v56  ;;  %v609_v63 = vmul.f32 -1.442695, %v469_v55  ;;  %v610_v0 = vmul.f32 -1.442695, %v470_v59 }
 0x11f   : > { %710 = vpow2.f32 %v604_v57 }
 0x120   : > { %712 = vpow2.f32 %v605_v58 }
 0x121   : > { %714 = vpow2.f32 %v606_v60 }
 0x122   : > { %716 = vpow2.f32 %v607_v61 }
 0x123   : > { %718 = vpow2.f32 %v608_v62 }
 0x124   : > { %720 = vpow2.f32 %v609_v63 }
 0x125   : > { %722 = vpow2.f32 %v610_v0 }
 0x128   : > { %v709_v1 = vpop.eup %708 }
 0x129   : > { %v711_v2 = vpop.eup %710  ;;  %v495_v3 = vadd.f32 1.0, %v709_v1 }
 0x12a   : > { %v713_v4 = vpop.eup %712  ;;  %v496_v5 = vadd.f32 1.0, %v711_v2 }
 0x12b   : > { %v715_v6 = vpop.eup %714  ;;  %v497_v7 = vadd.f32 1.0, %v713_v4  ;;  %724 = vrcp.f32 %v495_v3 }
 0x12c   : > { %v717_v8 = vpop.eup %716  ;;  %v498_v9 = vadd.f32 1.0, %v715_v6  ;;  %726 = vrcp.f32 %v496_v5 }
 0x12d   : > { %v719_v10 = vpop.eup %718  ;;  %v499_v14 = vadd.f32 1.0, %v717_v8  ;;  %728 = vrcp.f32 %v497_v7 }
 0x12e   : > { %v721_v15 = vpop.eup %720  ;;  %v500_v17 = vadd.f32 1.0, %v719_v10  ;;  %730 = vrcp.f32 %v498_v9 }
 0x12f   : > { %v723_v18 = vpop.eup %722  ;;  %v501_v19 = vadd.f32 1.0, %v721_v15  ;;  %732 = vrcp.f32 %v499_v14 }
 0x130   : > { %v502_v20 = vadd.f32 1.0, %v723_v18  ;;  %734 = vrcp.f32 %v500_v17 }
 0x131   : > { %736 = vrcp.f32 %v501_v19 }
 0x132   : > { %738 = vrcp.f32 %v502_v20 }
 0x135   : > { %v725_v22 = vpop.eup %724 }
 0x136   : > { %v727_v23 = vpop.eup %726  ;;  %v519_v24 = vmul.f32 %v725_v22, %v463_v49 }
 0x137   : > { %v729_v25 = vpop.eup %728  ;;  %v520_v26 = vmul.f32 %v727_v23, %v464_v50 }
 0x138   : > { %v731_v28 = vpop.eup %730  ;;  %v521_v29 = vmul.f32 %v729_v25, %v465_v51  ;;  %527 = vst.msk [vmem:[%s197_s19] sm:$0xff] %vm206_vm1, %v519_v24 }
 0x139   : > { %v733_v30 = vpop.eup %732  ;;  %v522_v31 = vmul.f32 %v731_v28, %v466_v52  ;;  %528 = vst.msk [vmem:[%s197_s19 + $0x8] sm:$0xff] %vm206_vm1, %v520_v26 }
 0x13a   : > { %v735_v32 = vpop.eup %734  ;;  %v523_v33 = vmul.f32 %v733_v30, %v467_v53  ;;  %529 = vst.msk [vmem:[%s197_s19 + $0x10] sm:$0xff] %vm206_vm1, %v521_v29 }
 0x13b   : > { %v737_v35 = vpop.eup %736  ;;  %v524_v36 = vmul.f32 %v735_v32, %v468_v54  ;;  %530 = vst.msk [vmem:[%s197_s19 + $0x18] sm:$0xff] %vm206_vm1, %v522_v31 }
 0x13c   : > { %v739_v37 = vpop.eup %738  ;;  %v525_v38 = vmul.f32 %v737_v35, %v469_v55  ;;  %531 = vst.msk [vmem:[%s197_s19 + $0x20] sm:$0xff] %vm206_vm1, %v523_v33 }
 0x13d   : > { %v526_v11 = vmul.f32 %v739_v37, %v470_v59  ;;  %532 = vst.msk [vmem:[%s197_s19 + $0x28] sm:$0xff] %vm206_vm1, %v524_v36 }
 0x13e   : > { %533 = vst.msk [vmem:[%s197_s19 + $0x30] sm:$0xff] %vm206_vm1, %v525_v38 }
 0x13f   : > { %534 = vst.msk [vmem:[%s197_s19 + $0x38] sm:$0xff] %vm206_vm1, %v526_v11 }
 0x140 PF: > { %s14_s15 = sadd.s32 1, %s746_s15  }
 0x141   : > { %p11_p4 = scmp.ge.s32.totalorder %s14_s15, 4  }
 0x143   :  { %13 = sbr.rel (!%p11_p4) target bundleno = 1 (0x1), region = 66 }

// kernel: vae_encoder_forward.36
= control target key start
LH: loop header
LB: loop body
LE: loop exit
PB: predicated region body
PF: predicated region fallthrough
CT: control target
= control target key end

     0   :  { %s586_s1 = inlined_call_operand.vmem [shape: bf16[128,128], index: 1, kind: input, shape index: {}]   ;;  %s587_s0 = inlined_call_operand.vmem [shape: bf16[128,128], index: 0, kind: input, shape index: {}]   ;;  %s588_s2 = inlined_call_operand.vmem [shape: f32[1,128], index: 2, kind: input, shape index: {}]   ;;  %s589_s3 = inlined_call_operand.vmem [shape: f32[128,128], index: 3, kind: output, shape index: {}]  }
   0x1   :  { %v451_v0 = vld [vmem:[%s586_s1] sm:$0xff]   ;;  %v452_v1 = vld [vmem:[%s586_s1 + $0x8] sm:$0xff]   ;;  %v453_v2 = vld [vmem:[%s586_s1 + $0x10] sm:$0xff]  }
   0x2   :  { %403 = vmatprep.subr.bf16.mxu0 %v451_v0  ;;  %435 = vmatprep.subr.bf16.mxu1 %v451_v0  ;;  %v454_v3 = vld [vmem:[%s586_s1 + $0x18] sm:$0xff]   ;;  %v459_v4 = vld [vmem:[%s587_s0] sm:$0xff]   ;;  %v456_v7 = vld [vmem:[%s586_s1 + $0x28] sm:$0xff]  }
   0x3   :  { %404 = vmatpush3.bf16.msra.mxu0 %v451_v0  ;;  %443 = vmatpush3.bf16.msra.mxu1 %v451_v0  ;;  %v460_v5 = vld [vmem:[%s587_s0 + $0x20] sm:$0xff]   ;;  %v457_v8 = vld [vmem:[%s586_s1 + $0x30] sm:$0xff]   ;;  %v458_v9 = vld [vmem:[%s586_s1 + $0x38] sm:$0xff]  }
   0x4   :  { %405 = vmatprep.subr.bf16.mxu0 %v452_v1  ;;  %436 = vmatprep.subr.bf16.mxu1 %v452_v1  ;;  %v455_v6 = vld [vmem:[%s586_s1 + $0x20] sm:$0xff]   ;;  %v461_v10 = vld [vmem:[%s587_s0 + $0x8] sm:$0xff]   ;;  %v463_v12 = vld [vmem:[%s587_s0 + $0x10] sm:$0xff]  }
   0x5   :  { %419 = vmatprep.mubr.bf16.mxu0 %v459_v4  ;;  %427 = vmatprep.mubr.bf16.mxu1 %v460_v5  ;;  %v462_v11 = vld [vmem:[%s587_s0 + $0x28] sm:$0xff]   ;;  %v464_v13 = vld [vmem:[%s587_s0 + $0x30] sm:$0xff]   ;;  %v465_v14 = vld [vmem:[%s587_s0 + $0x18] sm:$0xff]  }
   0x6   :  { %v466_v15 = vld [vmem:[%s587_s0 + $0x38] sm:$0xff]   ;;  %v386_v16 = vld [vmem:[%s588_s2] ss:$0 sm:$0xff] }
   0x7   :  { %406 = vmatpush3.bf16.msra.mxu0 %v452_v1  ;;  %444 = vmatpush3.bf16.msra.mxu1 %v452_v1 }
   0x8   :  { %407 = vmatprep.subr.bf16.mxu0 %v453_v2  ;;  %437 = vmatprep.subr.bf16.mxu1 %v453_v2 }
   0xb   :  { %408 = vmatpush3.bf16.msra.mxu0 %v453_v2  ;;  %445 = vmatpush3.bf16.msra.mxu1 %v453_v2 }
   0xc   :  { %409 = vmatprep.subr.bf16.mxu0 %v454_v3  ;;  %438 = vmatprep.subr.bf16.mxu1 %v454_v3 }
   0xf   :  { %410 = vmatpush3.bf16.msra.mxu0 %v454_v3  ;;  %446 = vmatpush3.bf16.msra.mxu1 %v454_v3 }
  0x10   :  { %411 = vmatprep.subr.bf16.mxu0 %v455_v6  ;;  %439 = vmatprep.subr.bf16.mxu1 %v455_v6 }
  0x13   :  { %412 = vmatpush3.bf16.msra.mxu0 %v455_v6  ;;  %447 = vmatpush3.bf16.msra.mxu1 %v455_v6 }
  0x14   :  { %413 = vmatprep.subr.bf16.mxu0 %v456_v7  ;;  %440 = vmatprep.subr.bf16.mxu1 %v456_v7 }
  0x17   :  { %414 = vmatpush3.bf16.msra.mxu0 %v456_v7  ;;  %448 = vmatpush3.bf16.msra.mxu1 %v456_v7 }
  0x18   :  { %415 = vmatprep.subr.bf16.mxu0 %v457_v8  ;;  %441 = vmatprep.subr.bf16.mxu1 %v457_v8 }
  0x1b   :  { %416 = vmatpush3.bf16.msra.mxu0 %v457_v8  ;;  %449 = vmatpush3.bf16.msra.mxu1 %v457_v8 }
  0x1c   :  { %417 = vmatprep.subr.bf16.mxu0 %v458_v9  ;;  %442 = vmatprep.subr.bf16.mxu1 %v458_v9 }
  0x1f   :  { %418 = vmatpush3.bf16.msra.mxu0 %v458_v9  ;;  %450 = vmatpush3.bf16.msra.mxu1 %v458_v9 }
  0x22   :  { %420 = vmatmul.mubr.bf16.vlgmr.msra.gmra.mrb[0].mxu0 %v461_v10  ;;  %428 = vmatmul.mubr.bf16.vlgmr.msra.gmra.mrb[0].mxu1 %v462_v11 }
  0x23   :  { %423 = vmatprep.mubr.bf16.mxu0 %v463_v12  ;;  %431 = vmatprep.mubr.bf16.mxu1 %v464_v13 }
  0x2a   :  { %424 = vmatmul.mubr.bf16.gmra.mrb[4].mxu0 %v465_v14  ;;  %432 = vmatmul.mubr.bf16.gmra.mrb[4].mxu1 %v466_v15 }
  0xf5   :  { %v421_v17 = vpop.f32.mrb[0].mxu0  ;;  %v429_v18 = vpop.f32.mrb[0].mxu1 }
  0xf6   :  { %v336_v19 = vadd.f32 %v421_v17, %v386_v16  ;;  %v344_v20 = vadd.f32 %v429_v18, %v386_v16  ;;  %v213_v21 = vpop.f32.mrb[1].mxu0  ;;  %v245_v22 = vpop.f32.mrb[1].mxu1 }
  0xf7   :  { %v334_v23 = vadd.f32 %v386_v16, %v213_v21  ;;  %v342_v24 = vadd.f32 %v386_v16, %v245_v22  ;;  %v422_v25 = vpop.f32.mrb[2].mxu0  ;;  %v430_v26 = vpop.f32.mrb[2].mxu1 }
  0xf8   :  { %352 = vst [vmem:[%s589_s3 + $0x10] sm:$0xff] %v336_v19  ;;  %360 = vst [vmem:[%s589_s3 + $0x50] sm:$0xff] %v344_v20  ;;  %v337_v27 = vadd.f32 %v422_v25, %v386_v16  ;;  %v345_v28 = vadd.f32 %v430_v26, %v386_v16  ;;  %v216_v29 = vpop.f32.mrb[3].mxu0  ;;  %v248_v30 = vpop.f32.mrb[3].mxu1 }
  0xf9   :  { %350 = vst [vmem:[%s589_s3] sm:$0xff] %v334_v23  ;;  %358 = vst [vmem:[%s589_s3 + $0x40] sm:$0xff] %v342_v24  ;;  %v335_v31 = vadd.f32 %v386_v16, %v216_v29  ;;  %v343_v32 = vadd.f32 %v386_v16, %v248_v30 }
  0xfa   :  { %353 = vst [vmem:[%s589_s3 + $0x18] sm:$0xff] %v337_v27  ;;  %361 = vst [vmem:[%s589_s3 + $0x58] sm:$0xff] %v345_v28 }
  0xfb   :  { %351 = vst [vmem:[%s589_s3 + $0x8] sm:$0xff] %v335_v31  ;;  %359 = vst [vmem:[%s589_s3 + $0x48] sm:$0xff] %v343_v32 }
  0xfd   :  { %v425_v33 = vpop.f32.mrb[4].mxu0  ;;  %v433_v34 = vpop.f32.mrb[4].mxu1 }
  0xfe   :  { %v340_v35 = vadd.f32 %v425_v33, %v386_v16  ;;  %v348_v36 = vadd.f32 %v433_v34, %v386_v16  ;;  %v229_v37 = vpop.f32.mrb[5].mxu0  ;;  %v261_v38 = vpop.f32.mrb[5].mxu1 }
  0xff   :  { %v338_v39 = vadd.f32 %v386_v16, %v229_v37  ;;  %v346_v40 = vadd.f32 %v386_v16, %v261_v38  ;;  %v426_v41 = vpop.f32.mrb[6].mxu0  ;;  %v434_v42 = vpop.f32.mrb[6].mxu1 }
 0x100   :  { %356 = vst [vmem:[%s589_s3 + $0x30] sm:$0xff] %v340_v35  ;;  %364 = vst [vmem:[%s589_s3 + $0x70] sm:$0xff] %v348_v36  ;;  %v341_v43 = vadd.f32 %v426_v41, %v386_v16  ;;  %v349_v44 = vadd.f32 %v434_v42, %v386_v16  ;;  %v232_v45 = vpop.f32.mrb[7].mxu0  ;;  %v264_v46 = vpop.f32.mrb[7].mxu1 }
 0x101   :  { %354 = vst [vmem:[%s589_s3 + $0x20] sm:$0xff] %v338_v39  ;;  %362 = vst [vmem:[%s589_s3 + $0x60] sm:$0xff] %v346_v40  ;;  %v339_v47 = vadd.f32 %v386_v16, %v232_v45  ;;  %v347_v48 = vadd.f32 %v386_v16, %v264_v46 }
 0x102   :  { %357 = vst [vmem:[%s589_s3 + $0x38] sm:$0xff] %v341_v43  ;;  %365 = vst [vmem:[%s589_s3 + $0x78] sm:$0xff] %v349_v44 }
 0x103   :  { %355 = vst [vmem:[%s589_s3 + $0x28] sm:$0xff] %v339_v47  ;;  %363 = vst [vmem:[%s589_s3 + $0x68] sm:$0xff] %v347_v48 }

// kernel: vae_encoder_forward.42
= control target key start
LH: loop header
LB: loop body
LE: loop exit
PB: predicated region body
PF: predicated region fallthrough
CT: control target
= control target key end

     0   :  { %s680_s15 = smov 0   ;;  %s818_s0 = inlined_call_operand.vmem [shape: f32[2,64,64], index: 0, kind: input, shape index: {}]   ;;  %s819_s1 = inlined_call_operand.vmem [shape: f32[1,64], index: 1, kind: input, shape index: {}]   ;;  %s820_s2 = inlined_call_operand.vmem [shape: f32[1,64], index: 2, kind: input, shape index: {}]   ;;  %s821_s3 = inlined_call_operand.vmem [shape: f32[64,64], index: 3, kind: input, shape index: {}]   ;;  %s822_s4 = inlined_call_operand.vmem [shape: f32[2,64,64], index: 4, kind: output, shape index: {}]  }
   0x1 LB: > { %s534_s16 = sadd.s32 4294967295, %s650_s15   ;;  %p538_p0 = scmp.ge.s32.totalorder %s650_s15, 1  ;;  %s650_s15 = sphi %s680_s15, %s14_s15  }
   0x2   : > { %p162_p1 = scmp.lt.s32.totalorder %s650_s15, 3 }
   0x4   : > { %p163_p2 = pnand %p538_p0, %p162_p1 }
   0x5   : > { %v257_v0 = vld [vmem:[%s821_s3] sm:$0xff] (!%p163_p2)  ;;  %v258_v1 = vld [vmem:[%s821_s3 + $0x8] sm:$0xff] (!%p163_p2)  ;;  %v259_v2 = vld [vmem:[%s821_s3 + $0x10] sm:$0xff] (!%p163_p2)  ;;  %v652_v3 = vmov (!%p163_p2), 0.0|0.0   ;;  %p188_p3 = scmp.lt.s32.totalorder (!%p163_p2), %s534_s16, 1  ;;  %vm653_vm0 = vmmov (!%p163_p2), 0  }
   0x6   : > { %166 = sbr.rel (%p163_p2) target bundleno = 288 (0x120), region = 36  ;;  %607 = vmatprep.subr.bf16.mxu0 (!%p163_p2), %v652_v3  ;;  %v608_v4 = vpack.c.bf16 (!%p163_p2), %v258_v1, %v257_v0  ;;  %619 = vmatprep.subr.bf16.mxu1 (!%p163_p2), %v652_v3  ;;  %v260_v5 = vld [vmem:[%s821_s3 + $0x18] sm:$0xff] (!%p163_p2)  ;;  %v654_v6 = vmov (!%p163_p2), 0.0   ;;  %v261_v8 = vld [vmem:[%s821_s3 + $0x20] sm:$0xff] (!%p163_p2)  ;;  %v262_v9 = vld [vmem:[%s821_s3 + $0x28] sm:$0xff] (!%p163_p2)  ;;  %vm206_vm1 = vcmask (!%p163_p2), 523264  }
   0x7   : > { %585 = vmatprep.mubr.msk.f32.mxu0 (!%p163_p2), %vm653_vm0, %v654_v6  ;;  %604 = vmatprep.mubr.msk.f32.mxu1 (!%p163_p2), %vm653_vm0, %v654_v6  ;;  %v611_v7 = vpack.c.bf16 (!%p163_p2), %v260_v5, %v259_v2  ;;  %v614_v10 = vpack.c.bf16 (!%p163_p2), %v262_v9, %v261_v8  ;;  %v263_v14 = vld [vmem:[%s821_s3 + $0x30] sm:$0xff] (!%p163_p2)  ;;  %v264_v15 = vld [vmem:[%s821_s3 + $0x38] sm:$0xff] (!%p163_p2) }
   0x8   : > { %609 = vmatpush3.bf16.msra.mxu0 (!%p163_p2), %v608_v4  ;;  %621 = vmatpush3.bf16.msra.mxu1 (!%p163_p2), %v608_v4  ;;  %v617_v26 = vpack.c.bf16 (!%p163_p2), %v264_v15, %v263_v14 }
   0x9   : > { %610 = vmatprep.subr.bf16.mxu0 (!%p163_p2), %v652_v3  ;;  %622 = vmatprep.subr.bf16.mxu1 (!%p163_p2), %v652_v3 }
   0xc   : > { %612 = vmatpush3.bf16.msra.mxu0 (!%p163_p2), %v611_v7  ;;  %624 = vmatpush3.bf16.msra.mxu1 (!%p163_p2), %v611_v7 }
   0xd   : > { %s824_s16 = smov (!%p188_p3, %s534_s16), 1  ;;  %613 = vmatprep.subr.bf16.mxu0 %v652_v3  ;;  %625 = vmatprep.subr.bf16.mxu1 %v652_v3 }
   0xe   : > { %s549_s29 = sshll.u32 %s824_s16, 6 }
   0xf   : > { %s714_s6 = scalar_lea.vmem %s818_s0, %s549_s29  ;;  %s197_s19 = scalar_lea.vmem %s822_s4, %s549_s29 }
  0x10   : > { %v717_v11 = vld [vmem:[%s714_s6] sm:$0xff]  ;;  %v720_v12 = vld [vmem:[%s714_s6 + $0x8] sm:$0xff]  ;;  %v723_v13 = vld [vmem:[%s714_s6 + $0x10] sm:$0xff]  ;;  %615 = vmatpush3.bf16.msra.mxu0 %v614_v10  ;;  %627 = vmatpush3.bf16.msra.mxu1 %v614_v10 }
  0x11   : > { %v732_v16 = vld [vmem:[%s714_s6 + $0x18] sm:$0xff]  ;;  %v207_v17 = vsel %vm206_vm1, %v717_v11, 0.0  ;;  %v208_v18 = vsel %vm206_vm1, %v720_v12, 0.0  ;;  %v210_v19 = vsel %vm206_vm1, %v723_v13, 0.0  ;;  %v228_v20 = vmul.f32 %v717_v11, %v717_v11  ;;  %v743_v21 = vld [vmem:[%s714_s6 + $0x20] sm:$0xff]  ;;  %v752_v27 = vld [vmem:[%s714_s6 + $0x28] sm:$0xff]  ;;  %616 = vmatprep.subr.bf16.mxu0 %v652_v3  ;;  %628 = vmatprep.subr.bf16.mxu1 %v652_v3 }
  0x12   : > { %v209_v22 = vadd.f32 %v208_v18, %v207_v17  ;;  %v212_v23 = vsel %vm206_vm1, %v732_v16, 0.0  ;;  %v229_v24 = vmul.f32 %v720_v12, %v720_v12  ;;  %v230_v25 = vmul.f32 %v723_v13, %v723_v13  ;;  %v763_v34 = vld [vmem:[%s714_s6 + $0x30] sm:$0xff]  ;;  %v772_v41 = vld [vmem:[%s714_s6 + $0x38] sm:$0xff] }
  0x13   : > { %v231_v29 = vmul.f32 %v732_v16, %v732_v16  ;;  %v236_v30 = vsel %vm206_vm1, %v228_v20, 0.0  ;;  %v214_v31 = vsel %vm206_vm1, %v743_v21, 0.0  ;;  %v232_v32 = vmul.f32 %v743_v21, %v743_v21 }
  0x14   : > { %v211_v28 = vadd.f32 %v210_v19, %v209_v22  ;;  %v237_v33 = vsel %vm206_vm1, %v229_v24, 0.0  ;;  %v239_v37 = vsel %vm206_vm1, %v230_v25, 0.0  ;;  %v216_v38 = vsel %vm206_vm1, %v752_v27, 0.0  ;;  %618 = vmatpush3.bf16.msra.mxu0 %v617_v26  ;;  %630 = vmatpush3.bf16.msra.mxu1 %v617_v26 }
  0x15   : > { %v238_v36 = vadd.f32 %v237_v33, %v236_v30  ;;  %v233_v39 = vmul.f32 %v752_v27, %v752_v27  ;;  %v241_v40 = vsel %vm206_vm1, %v231_v29, 0.0  ;;  %v218_v44 = vsel %vm206_vm1, %v763_v34, 0.0 }
  0x16   : > { %v213_v35 = vadd.f32 %v212_v23, %v211_v28  ;;  %v234_v45 = vmul.f32 %v763_v34, %v763_v34  ;;  %v243_v46 = vsel %vm206_vm1, %v232_v32, 0.0  ;;  %v220_v49 = vsel %vm206_vm1, %v772_v41, 0.0 }
  0x17   : > { %v240_v43 = vadd.f32 %v239_v37, %v238_v36  ;;  %v235_v50 = vmul.f32 %v772_v41, %v772_v41  ;;  %v245_v51 = vsel %vm206_vm1, %v233_v39, 0.0  ;;  %v417_v18 = vlaneseq }
  0x18   : > { %v215_v42 = vadd.f32 %v214_v31, %v213_v35  ;;  %v247_v54 = vsel %vm206_vm1, %v234_v45, 0.0 }
  0x19   : > { %v242_v48 = vadd.f32 %v241_v40, %v240_v43  ;;  %v249_v57 = vsel %vm206_vm1, %v235_v50, 0.0  ;;  %v418_v22 = vshrl.u32 %v417_v18, 7 }
  0x1a   : > { %v217_v47 = vadd.f32 %v216_v38, %v215_v42 }
  0x1b   : > { %v244_v53 = vadd.f32 %v243_v46, %v242_v48  ;;  %v419_v24 = vsub.s32 0, %v418_v22 }
  0x1c   : > { %v219_v52 = vadd.f32 %v218_v44, %v217_v47 }
  0x1d   : > { %v246_v56 = vadd.f32 %v245_v51, %v244_v53 }
  0x1e   : > { %v221_v55 = vadd.f32 %v220_v49, %v219_v52 }
  0x1f   : > { %v248_v59 = vadd.f32 %v247_v54, %v246_v56 }
  0x20   : > { %v222_v58 = vrot.slane %v221_v55, 4 }
  0x21   : > { %v250_v61 = vadd.f32 %v249_v57, %v248_v59 }
  0x22   : > { %v223_v60 = vadd.f32 %v222_v58, %v221_v55 }
  0x23   : > { %v251_v63 = vrot.slane %v250_v61, 4 }
  0x24   : > { %v224_v62 = vrot.slane %v223_v60, 2 }
  0x25   : > { %v252_v1 = vadd.f32 %v251_v63, %v250_v61 }
  0x26   : > { %v225_v0 = vadd.f32 %v224_v62, %v223_v60 }
  0x27   : > { %v253_v3 = vrot.slane %v252_v1, 2 }
  0x28   : > { %v226_v2 = vrot.slane %v225_v0, 1 }
  0x29   : > { %v254_v5 = vadd.f32 %v253_v3, %v252_v1 }
  0x2a   : > { %v227_v4 = vadd.f32 %v226_v2, %v225_v0 }
  0x2b   : > { %v255_v6 = vrot.slane %v254_v5, 1 }
  0x2c   : > { %586 = vmatmul.mubr.msk.f32.vlgmr.msra.gmra.mrb[0].mxu0 %vm206_vm1, %v227_v4 }
  0x2d   : > { %v256_v7 = vadd.f32 %v255_v6, %v254_v5 }
  0x2f   : > { %605 = vmatmul.mubr.msk.f32.vlgmr.msra.gmra.mrb[0].mxu1 %vm206_vm1, %v256_v7 }
  0xff   : > { %v334_v8 = vpop.f32.mrb[0].mxu0 }
 0x100   : > { %v338_v9 = vmul.f32 0.0078125, %v334_v8  ;;  %v587_v10 = vpop.f32.mrb[1].mxu0 }
 0x102   : > { %v408_v14 = vpop.f32.mrb[0].mxu1  ;;  %v413_v15 = vmul.f32 %v338_v9, %v338_v9  ;;  %v420_v25 = vrot.slane %v338_v9, %v419_v24 }
 0x103   : > { %v606_v17 = vpop.f32.mrb[1].mxu1  ;;  %v412_v19 = vmul.f32 0.0078125, %v408_v14 }
 0x104   : > { %v421_v28 = vsub.f32 %v717_v11, %v420_v25  ;;  %v422_v29 = vsub.f32 %v720_v12, %v420_v25  ;;  %v423_v30 = vsub.f32 %v723_v13, %v420_v25  ;;  %v424_v31 = vsub.f32 %v732_v16, %v420_v25  ;;  %v545_v11 = vld [vmem:[%s819_s1] ss:$0 sm:$0xff] }
 0x105   : > { %v414_v20 = vsub.f32 %v412_v19, %v413_v15  ;;  %v425_v33 = vsub.f32 %v743_v21, %v420_v25  ;;  %v426_v35 = vsub.f32 %v752_v27, %v420_v25  ;;  %v427_v36 = vsub.f32 %v763_v34, %v420_v25  ;;  %v546_v21 = vld [vmem:[%s820_s2] ss:$0 sm:$0xff] }
 0x106   : > { %v428_v37 = vsub.f32 %v772_v41, %v420_v25 }
 0x107   : > { %v415_v23 = vadd.f32 1e-06, %v414_v20 }
 0x109   : > { %642 = vrsqrt.f32 %v415_v23 }
 0x113   : > { %v643_v26 = vpop.eup %642 }
 0x114   : > { %v432_v32 = vrot.slane %v643_v26, %v419_v24 }
 0x116   : > { %v433_v38 = vmul.f32 %v432_v32, %v421_v28  ;;  %v434_v12 = vmul.f32 %v432_v32, %v422_v29  ;;  %v435_v39 = vmul.f32 %v432_v32, %v423_v30  ;;  %v436_v13 = vmul.f32 %v432_v32, %v424_v31 }
 0x117   : > { %v437_v40 = vmul.f32 %v432_v32, %v425_v33  ;;  %v438_v16 = vmul.f32 %v432_v32, %v426_v35  ;;  %v439_v42 = vmul.f32 %v432_v32, %v427_v36  ;;  %v440_v43 = vmul.f32 %v432_v32, %v428_v37 }
 0x118   : > { %v448_v27 = vmul.f32 %v545_v11, %v433_v38  ;;  %v449_v34 = vmul.f32 %v545_v11, %v434_v12  ;;  %v450_v44 = vmul.f32 %v545_v11, %v435_v39  ;;  %v451_v41 = vmul.f32 %v545_v11, %v436_v13 }
 0x119   : > { %v452_v45 = vmul.f32 %v545_v11, %v437_v40  ;;  %v453_v46 = vmul.f32 %v545_v11, %v438_v16  ;;  %v454_v47 = vmul.f32 %v545_v11, %v439_v42  ;;  %v455_v48 = vmul.f32 %v545_v11, %v440_v43 }
 0x11a   : > { %v463_v49 = vadd.f32 %v546_v21, %v448_v27  ;;  %v464_v50 = vadd.f32 %v546_v21, %v449_v34  ;;  %v465_v51 = vadd.f32 %v546_v21, %v450_v44  ;;  %v466_v52 = vadd.f32 %v546_v21, %v451_v41 }
 0x11b   : > { %v467_v53 = vadd.f32 %v546_v21, %v452_v45  ;;  %v468_v54 = vadd.f32 %v546_v21, %v453_v46  ;;  %v469_v55 = vadd.f32 %v546_v21, %v454_v47  ;;  %v470_v56 = vadd.f32 %v546_v21, %v455_v48 }
 0x11c   : > { %471 = vst.msk [vmem:[%s197_s19] sm:$0xff] %vm206_vm1, %v463_v49  ;;  %472 = vst.msk [vmem:[%s197_s19 + $0x8] sm:$0xff] %vm206_vm1, %v464_v50 }
 0x11d   : > { %473 = vst.msk [vmem:[%s197_s19 + $0x10] sm:$0xff] %vm206_vm1, %v465_v51  ;;  %474 = vst.msk [vmem:[%s197_s19 + $0x18] sm:$0xff] %vm206_vm1, %v466_v52 }
 0x11e   : > { %475 = vst.msk [vmem:[%s197_s19 + $0x20] sm:$0xff] %vm206_vm1, %v467_v53  ;;  %476 = vst.msk [vmem:[%s197_s19 + $0x28] sm:$0xff] %vm206_vm1, %v468_v54 }
 0x11f   : > { %477 = vst.msk [vmem:[%s197_s19 + $0x30] sm:$0xff] %vm206_vm1, %v469_v55  ;;  %478 = vst.msk [vmem:[%s197_s19 + $0x38] sm:$0xff] %vm206_vm1, %v470_v56 }
 0x120 PF: > { %s14_s15 = sadd.s32 1, %s650_s15  }
 0x121   : > { %p11_p4 = scmp.ge.s32.totalorder %s14_s15, 4  }
 0x123   :  { %13 = sbr.rel (!%p11_p4) target bundleno = 1 (0x1), region = 66 }

// kernel: vae_encoder_forward.39
= control target key start
LH: loop header
LB: loop body
LE: loop exit
PB: predicated region body
PF: predicated region fallthrough
CT: control target
= control target key end

     0   :  { %s1609_s12 = smov 0   ;;  %s1611_s13 = smov 0   ;;  %s1863_s0 = inlined_call_operand.vmem [shape: bf16[128,1024], index: 0, kind: input, shape index: {}]   ;;  %s1864_s1 = inlined_call_operand.vmem [shape: bf16[1024,128], index: 1, kind: input, shape index: {}]   ;;  %s1865_s2 = inlined_call_operand.vmem [shape: f32[1,128], index: 2, kind: input, shape index: {}]   ;;  %s1866_s3 = inlined_call_operand.vmem [shape: f32[128,128], index: 3, kind: output, shape index: {}]  }
   0x1   :  { %s1613_s14 = smov 0   ;;  %s1615_s15 = smov 0  }
   0x2   :  { %s1617_s16 = smov 0  }
   0x3 LB: > { %s25_s17 = sadd.s32 1, %s1582_s15  ;;  %p48_p1 = scmp.ne.s32.totalorder %s1574_s13, %s1570_s12  ;;  %s1586_s16 = sphi %s1617_s16, %s13_s16   ;;  %s1582_s15 = sphi %s1615_s15, %s1870_s15   ;;  %s1578_s14 = sphi %s1613_s14, %s1869_s14   ;;  %s1574_s13 = sphi %s1611_s13, %s1868_s13   ;;  %s1570_s12 = sphi %s1609_s12, %s1867_s12  }
   0x4   : > { %p26_p0 = scmp.ge.s32.totalorder %s25_s17, 2  ;;  %p49_p2 = scmp.eq.s32.totalorder %s1586_s16, 0 }
   0x5   : > { %s41_s19 = sadd.s32 1, %s1574_s13  ;;  %p1219_p5 = scmp.ge.s32.totalorder %s1586_s16, 2 }
   0x6   : > { %s1872_s17 = smov (%p26_p0, %s25_s17), 0  ;;  %p50_p3 = por %p49_p2, %p48_p1 }
   0x7   : > { %s37_s18 = ssub.s32 %s1582_s15, %s1872_s17  ;;  %162 = sbr.rel (%p1219_p5) target bundleno = 34 (0x22), region = 20 }
   0x8   : > { %p39_p4 = scmp.eq.s32.totalorder %s37_s18, 0 }
   0xa   : > { %s1644_s20 = scalar_select %p39_p4, %s1574_s13, %s41_s19  }
   0xe   : > { %165 = sbr.rel (!%p50_p3) target bundleno = 34 (0x22), region = 24  ;;  %s167_s21 = sand.u32 (%p50_p3), 1, %s1574_s13  }
   0xf   : > { %s1298_s22 = sshll.u32 (%p50_p3), %s1582_s15, 4  ;;  %s1220_s23 = sshll.u32 (%p50_p3), %s167_s21, 8 }
  0x10   : > { %s1652_s26 = scalar_lea.vmem (%p50_p3), %s1863_s0, %s1298_s22  ;;  %s1657_s27 = scalar_lea.vmem (%p50_p3), [#allocation3], %s1220_s23 }
  0x11   : > { %v188_v0 = vld [vmem:[%s1652_s26] sm:$0xff] (%p50_p3)  ;;  %v190_v1 = vld [vmem:[%s1652_s26 + $0x8] sm:$0xff] (%p50_p3) }
  0x12   : > { %v192_v2 = vld [vmem:[%s1652_s26 + $0x20] sm:$0xff] (%p50_p3)  ;;  %189 = vst [vmem:[%s1657_s27] sm:$0xff] (%p50_p3), %v188_v0  ;;  %191 = vst [vmem:[%s1657_s27 + $0x8] sm:$0xff] (%p50_p3), %v190_v1  ;;  %v194_v3 = vld [vmem:[%s1652_s26 + $0x28] sm:$0xff] (%p50_p3) }
  0x13   : > { %193 = vst [vmem:[%s1657_s27 + $0x10] sm:$0xff] (%p50_p3), %v192_v2  ;;  %v196_v4 = vld [vmem:[%s1652_s26 + $0x40] sm:$0xff] (%p50_p3)  ;;  %v198_v5 = vld [vmem:[%s1652_s26 + $0x48] sm:$0xff] (%p50_p3)  ;;  %195 = vst [vmem:[%s1657_s27 + $0x18] sm:$0xff] (%p50_p3), %v194_v3 }
  0x14   : > { %197 = vst [vmem:[%s1657_s27 + $0x20] sm:$0xff] (%p50_p3), %v196_v4  ;;  %199 = vst [vmem:[%s1657_s27 + $0x28] sm:$0xff] (%p50_p3), %v198_v5  ;;  %v200_v6 = vld [vmem:[%s1652_s26 + $0x60] sm:$0xff] (%p50_p3)  ;;  %v202_v7 = vld [vmem:[%s1652_s26 + $0x68] sm:$0xff] (%p50_p3) }
  0x15   : > { %v204_v8 = vld [vmem:[%s1652_s26 + $0x80] sm:$0xff]  ;;  %201 = vst [vmem:[%s1657_s27 + $0x30] sm:$0xff] %v200_v6  ;;  %203 = vst [vmem:[%s1657_s27 + $0x38] sm:$0xff] %v202_v7  ;;  %v206_v9 = vld [vmem:[%s1652_s26 + $0x88] sm:$0xff] }
  0x16   : > { %205 = vst [vmem:[%s1657_s27 + $0x40] sm:$0xff] %v204_v8  ;;  %v208_v10 = vld [vmem:[%s1652_s26 + $0xa0] sm:$0xff]  ;;  %v210_v11 = vld [vmem:[%s1652_s26 + $0xa8] sm:$0xff]  ;;  %207 = vst [vmem:[%s1657_s27 + $0x48] sm:$0xff] %v206_v9 }
  0x17   : > { %209 = vst [vmem:[%s1657_s27 + $0x50] sm:$0xff] %v208_v10  ;;  %211 = vst [vmem:[%s1657_s27 + $0x58] sm:$0xff] %v210_v11  ;;  %v212_v12 = vld [vmem:[%s1652_s26 + $0xc0] sm:$0xff]  ;;  %v214_v13 = vld [vmem:[%s1652_s26 + $0xc8] sm:$0xff] }
  0x18   : > { %v216_v14 = vld [vmem:[%s1652_s26 + $0xe0] sm:$0xff]  ;;  %213 = vst [vmem:[%s1657_s27 + $0x60] sm:$0xff] %v212_v12  ;;  %215 = vst [vmem:[%s1657_s27 + $0x68] sm:$0xff] %v214_v13  ;;  %v218_v15 = vld [vmem:[%s1652_s26 + $0xe8] sm:$0xff] }
  0x19   : > { %217 = vst [vmem:[%s1657_s27 + $0x70] sm:$0xff] %v216_v14  ;;  %v220_v16 = vld [vmem:[%s1652_s26 + $0x100] sm:$0xff]  ;;  %v222_v17 = vld [vmem:[%s1652_s26 + $0x108] sm:$0xff]  ;;  %219 = vst [vmem:[%s1657_s27 + $0x78] sm:$0xff] %v218_v15 }
  0x1a   : > { %221 = vst [vmem:[%s1657_s27 + $0x80] sm:$0xff] %v220_v16  ;;  %223 = vst [vmem:[%s1657_s27 + $0x88] sm:$0xff] %v222_v17  ;;  %v224_v18 = vld [vmem:[%s1652_s26 + $0x120] sm:$0xff]  ;;  %v226_v19 = vld [vmem:[%s1652_s26 + $0x128] sm:$0xff] }
  0x1b   : > { %v228_v20 = vld [vmem:[%s1652_s26 + $0x140] sm:$0xff]  ;;  %225 = vst [vmem:[%s1657_s27 + $0x90] sm:$0xff] %v224_v18  ;;  %227 = vst [vmem:[%s1657_s27 + $0x98] sm:$0xff] %v226_v19  ;;  %v230_v21 = vld [vmem:[%s1652_s26 + $0x148] sm:$0xff] }
  0x1c   : > { %229 = vst [vmem:[%s1657_s27 + $0xa0] sm:$0xff] %v228_v20  ;;  %v232_v22 = vld [vmem:[%s1652_s26 + $0x160] sm:$0xff]  ;;  %v234_v23 = vld [vmem:[%s1652_s26 + $0x168] sm:$0xff]  ;;  %231 = vst [vmem:[%s1657_s27 + $0xa8] sm:$0xff] %v230_v21 }
  0x1d   : > { %233 = vst [vmem:[%s1657_s27 + $0xb0] sm:$0xff] %v232_v22  ;;  %235 = vst [vmem:[%s1657_s27 + $0xb8] sm:$0xff] %v234_v23  ;;  %v236_v24 = vld [vmem:[%s1652_s26 + $0x180] sm:$0xff]  ;;  %v238_v25 = vld [vmem:[%s1652_s26 + $0x188] sm:$0xff] }
  0x1e   : > { %v240_v26 = vld [vmem:[%s1652_s26 + $0x1a0] sm:$0xff]  ;;  %237 = vst [vmem:[%s1657_s27 + $0xc0] sm:$0xff] %v236_v24  ;;  %239 = vst [vmem:[%s1657_s27 + $0xc8] sm:$0xff] %v238_v25  ;;  %v242_v27 = vld [vmem:[%s1652_s26 + $0x1a8] sm:$0xff] }
  0x1f   : > { %241 = vst [vmem:[%s1657_s27 + $0xd0] sm:$0xff] %v240_v26  ;;  %v244_v28 = vld [vmem:[%s1652_s26 + $0x1c0] sm:$0xff]  ;;  %v246_v29 = vld [vmem:[%s1652_s26 + $0x1c8] sm:$0xff]  ;;  %243 = vst [vmem:[%s1657_s27 + $0xd8] sm:$0xff] %v242_v27 }
  0x20   : > { %245 = vst [vmem:[%s1657_s27 + $0xe0] sm:$0xff] %v244_v28  ;;  %247 = vst [vmem:[%s1657_s27 + $0xe8] sm:$0xff] %v246_v29  ;;  %v248_v30 = vld [vmem:[%s1652_s26 + $0x1e0] sm:$0xff]  ;;  %v250_v31 = vld [vmem:[%s1652_s26 + $0x1e8] sm:$0xff] }
  0x21   : > { %249 = vst [vmem:[%s1657_s27 + $0xf0] sm:$0xff] %v248_v30  ;;  %251 = vst [vmem:[%s1657_s27 + $0xf8] sm:$0xff] %v250_v31 }
  0x22 PF: > { %p1223_p6 = scmp.ge.s32.totalorder %s1586_s16, 1  ;;  %p268_p7 = scmp.lt.s32.totalorder %s1586_s16, 3 }
  0x24   : > { %p269_p8 = pnand %p1223_p6, %p268_p7 }
  0x25   : > { %s275_s28 = sand.u32 (!%p269_p8), 1, %s1570_s12   ;;  %s1225_s29 = sshll.u32 (!%p269_p8), %s1578_s14, 6 }
  0x26   : > { %272 = sbr.rel (%p269_p8) target bundleno = 378 (0x17a), region = 51  ;;  %s1224_s30 = sshll.u32 (!%p269_p8), %s275_s28, 8 }
  0x27   : > { %p315_p9 = scmp.lt.s32.totalorder (!%p269_p8), %s1225_s29, 127  ;;  %s1729_s8 = scalar_lea.vmem (!%p269_p8), [#allocation3], %s1224_s30 }
  0x28   : > { %p1227_p10 = scmp.ne.s32.totalorder (!%p269_p8), %s1578_s14, 0 }
  0x2d   : > { %s1874_s29 = smov (!%p315_p9, %s1225_s29), 127  ;;  %339 = sbr.rel (%p1227_p10) target bundleno = 55 (0x37), region = 59 }
  0x2e   : > { %s1226_s4 = sshll.u32 %s1874_s29, 2  ;;  %v1588_v32 = vmov (!%p1227_p10), 0.0  }
  0x2f   : > { %s1727_s7 = scalar_lea.vmem %s1864_s1, %s1226_s4  ;;  %340 = vst [vmem:[#allocation2] sm:$0xff] (!%p1227_p10), %v1588_v32  ;;  %341 = vst [vmem:[#allocation2 + $0x8] sm:$0xff] (!%p1227_p10), %v1588_v32 }
  0x30   : > { %342 = vst [vmem:[#allocation2 + $0x10] sm:$0xff] (!%p1227_p10), %v1588_v32  ;;  %343 = vst [vmem:[#allocation2 + $0x18] sm:$0xff] (!%p1227_p10), %v1588_v32 }
  0x31   : > { %344 = vst [vmem:[#allocation2 + $0x20] sm:$0xff] (!%p1227_p10), %v1588_v32  ;;  %345 = vst [vmem:[#allocation2 + $0x28] sm:$0xff] (!%p1227_p10), %v1588_v32 }
  0x32   : > { %346 = vst [vmem:[#allocation2 + $0x30] sm:$0xff] (!%p1227_p10), %v1588_v32  ;;  %347 = vst [vmem:[#allocation2 + $0x38] sm:$0xff] (!%p1227_p10), %v1588_v32 }
  0x33   : > { %348 = vst [vmem:[#allocation2 + $0x40] sm:$0xff] (!%p1227_p10), %v1588_v32  ;;  %349 = vst [vmem:[#allocation2 + $0x48] sm:$0xff] (!%p1227_p10), %v1588_v32 }
  0x34   : > { %350 = vst [vmem:[#allocation2 + $0x50] sm:$0xff] %v1588_v32  ;;  %351 = vst [vmem:[#allocation2 + $0x58] sm:$0xff] %v1588_v32 }
  0x35   : > { %352 = vst [vmem:[#allocation2 + $0x60] sm:$0xff] %v1588_v32  ;;  %353 = vst [vmem:[#allocation2 + $0x68] sm:$0xff] %v1588_v32 }
  0x36   : > { %354 = vst [vmem:[#allocation2 + $0x70] sm:$0xff] %v1588_v32  ;;  %355 = vst [vmem:[#allocation2 + $0x78] sm:$0xff] %v1588_v32 }
  0x37 PF: > { %v1468_v33 = vld [vmem:[%s1727_s7 + $0x40] sm:$0xff]   ;;  %v1472_v37 = vld [vmem:[%s1727_s7 + $0x48] sm:$0xff]   ;;  %v1476_v41 = vld [vmem:[%s1727_s7 + $0x50] sm:$0xff]   ;;  %p1292_p11 = scmp.ne.s32.totalorder %s1578_s14, 1 }
  0x38   : > { %v1469_v34 = vld [vmem:[%s1727_s7 + $0xc0] sm:$0xff]   ;;  %1299 = vmatprep.subr.bf16.mxu0 %v1468_v33  ;;  %v1473_v38 = vld [vmem:[%s1727_s7 + $0xc8] sm:$0xff]   ;;  %v1477_v42 = vld [vmem:[%s1727_s7 + $0xd0] sm:$0xff]  }
  0x39   : > { %v1470_v35 = vld [vmem:[%s1727_s7] sm:$0xff]   ;;  %1363 = vmatprep.subr.bf16.mxu1 %v1469_v34  ;;  %v1474_v39 = vld [vmem:[%s1727_s7 + $0x8] sm:$0xff]   ;;  %v1478_v43 = vld [vmem:[%s1727_s7 + $0x10] sm:$0xff]  }
  0x3a   : > { %v1471_v36 = vld [vmem:[%s1727_s7 + $0x80] sm:$0xff]   ;;  %1300 = vmatpush3.bf16.msra.mxu0 %v1470_v35  ;;  %v1475_v40 = vld [vmem:[%s1727_s7 + $0x88] sm:$0xff]   ;;  %v1479_v44 = vld [vmem:[%s1727_s7 + $0x90] sm:$0xff]  }
  0x3b   : > { %1364 = vmatpush3.bf16.msra.mxu1 %v1471_v36  ;;  %1301 = vmatprep.subr.bf16.mxu0 %v1472_v37  ;;  %v1480_v45 = vld [vmem:[%s1727_s7 + $0x58] sm:$0xff]   ;;  %v1484_v49 = vld [vmem:[%s1727_s7 + $0x60] sm:$0xff]   ;;  %v1488_v53 = vld [vmem:[%s1727_s7 + $0x68] sm:$0xff]  }
  0x3c   : > { %1365 = vmatprep.subr.bf16.mxu1 %v1473_v38  ;;  %v1481_v46 = vld [vmem:[%s1727_s7 + $0xd8] sm:$0xff]   ;;  %v1485_v50 = vld [vmem:[%s1727_s7 + $0xe0] sm:$0xff]   ;;  %v1489_v54 = vld [vmem:[%s1727_s7 + $0xe8] sm:$0xff]  }
  0x3d   : > { %v1482_v47 = vld [vmem:[%s1727_s7 + $0x18] sm:$0xff]   ;;  %v1486_v51 = vld [vmem:[%s1727_s7 + $0x20] sm:$0xff]   ;;  %v1490_v55 = vld [vmem:[%s1727_s7 + $0x28] sm:$0xff]  }
  0x3e   : > { %1302 = vmatpush3.bf16.msra.mxu0 %v1474_v39  ;;  %v1483_v48 = vld [vmem:[%s1727_s7 + $0x98] sm:$0xff]   ;;  %v1487_v52 = vld [vmem:[%s1727_s7 + $0xa0] sm:$0xff]   ;;  %v1491_v56 = vld [vmem:[%s1727_s7 + $0xa8] sm:$0xff]  }
  0x3f   : > { %1366 = vmatpush3.bf16.msra.mxu1 %v1475_v40  ;;  %1303 = vmatprep.subr.bf16.mxu0 %v1476_v41  ;;  %v1492_v57 = vld [vmem:[%s1727_s7 + $0x70] sm:$0xff]   ;;  %v1496_v61 = vld [vmem:[%s1727_s7 + $0x78] sm:$0xff]  }
  0x40   : > { %1367 = vmatprep.subr.bf16.mxu1 %v1477_v42  ;;  %v1493_v58 = vld [vmem:[%s1727_s7 + $0xf0] sm:$0xff]   ;;  %v1497_v62 = vld [vmem:[%s1727_s7 + $0xf8] sm:$0xff]   ;;  %v356_v42 = vld [vmem:[#allocation2] sm:$0xff] }
  0x41   : > { %v1494_v59 = vld [vmem:[%s1727_s7 + $0x30] sm:$0xff]   ;;  %v1498_v63 = vld [vmem:[%s1727_s7 + $0x38] sm:$0xff]  }
  0x42   : > { %1304 = vmatpush3.bf16.msra.mxu0 %v1478_v43  ;;  %v1495_v60 = vld [vmem:[%s1727_s7 + $0xb0] sm:$0xff]   ;;  %v1499_v0 = vld [vmem:[%s1727_s7 + $0xb8] sm:$0xff]  }
  0x43   : > { %1368 = vmatpush3.bf16.msra.mxu1 %v1479_v44  ;;  %1305 = vmatprep.subr.bf16.mxu0 %v1480_v45  ;;  %v1500_v1 = vld [vmem:[%s1729_s8] ss:$16 sps:$4 sm:$0xff]   ;;  %v1502_v2 = vld [vmem:[%s1729_s8 + $0x4] ss:$16 sps:$4 sm:$0xff]   ;;  %v1503_v3 = vld [vmem:[%s1729_s8 + $0x8] ss:$16 sps:$4 sm:$0xff]  }
  0x44   : > { %1369 = vmatprep.subr.bf16.mxu1 %v1481_v46  ;;  %v1505_v4 = vld [vmem:[%s1729_s8 + $0xc] ss:$16 sps:$4 sm:$0xff]   ;;  %852 = vmatprep.mubr.bf16.mxu0 %v1502_v2  ;;  %v1506_v5 = vld [vmem:[%s1729_s8 + $0x24] ss:$16 sps:$4 sm:$0xff]   ;;  %v1510_v7 = vld [vmem:[%s1729_s8 + $0x20] ss:$16 sps:$4 sm:$0xff]  }
  0x45   : > { %949 = vmatprep.mubr.bf16.mxu1 %v1505_v4  ;;  %v1508_v6 = vld [vmem:[%s1729_s8 + $0x2c] ss:$16 sps:$4 sm:$0xff]   ;;  %v1511_v8 = vld [vmem:[%s1729_s8 + $0x28] ss:$16 sps:$4 sm:$0xff]   ;;  %v1512_v9 = vld [vmem:[%s1729_s8 + $0x44] ss:$16 sps:$4 sm:$0xff]  }
  0x46   : > { %1306 = vmatpush3.bf16.msra.mxu0 %v1482_v47  ;;  %v1514_v10 = vld [vmem:[%s1729_s8 + $0x4c] ss:$16 sps:$4 sm:$0xff]   ;;  %v1516_v11 = vld [vmem:[%s1729_s8 + $0x40] ss:$16 sps:$4 sm:$0xff]   ;;  %v1517_v12 = vld [vmem:[%s1729_s8 + $0x48] ss:$16 sps:$4 sm:$0xff]  }
  0x47   : > { %1370 = vmatpush3.bf16.msra.mxu1 %v1483_v48  ;;  %1307 = vmatprep.subr.bf16.mxu0 %v1484_v49  ;;  %v1518_v13 = vld [vmem:[%s1729_s8 + $0x64] ss:$16 sps:$4 sm:$0xff]   ;;  %v1520_v14 = vld [vmem:[%s1729_s8 + $0x6c] ss:$16 sps:$4 sm:$0xff]   ;;  %v1522_v15 = vld [vmem:[%s1729_s8 + $0x60] ss:$16 sps:$4 sm:$0xff]  }
  0x48   : > { %1371 = vmatprep.subr.bf16.mxu1 %v1485_v50  ;;  %v1523_v16 = vld [vmem:[%s1729_s8 + $0x68] ss:$16 sps:$4 sm:$0xff]   ;;  %v1524_v17 = vld [vmem:[%s1729_s8 + $0x84] ss:$16 sps:$4 sm:$0xff]   ;;  %v1526_v18 = vld [vmem:[%s1729_s8 + $0x8c] ss:$16 sps:$4 sm:$0xff]  }
  0x49   : > { %v1528_v19 = vld [vmem:[%s1729_s8 + $0x80] ss:$16 sps:$4 sm:$0xff]   ;;  %v1529_v20 = vld [vmem:[%s1729_s8 + $0x88] ss:$16 sps:$4 sm:$0xff]   ;;  %v1530_v21 = vld [vmem:[%s1729_s8 + $0xa4] ss:$16 sps:$4 sm:$0xff]  }
  0x4a   : > { %1308 = vmatpush3.bf16.msra.mxu0 %v1486_v51  ;;  %v1532_v22 = vld [vmem:[%s1729_s8 + $0xac] ss:$16 sps:$4 sm:$0xff]   ;;  %v1534_v23 = vld [vmem:[%s1729_s8 + $0xa0] ss:$16 sps:$4 sm:$0xff]   ;;  %v1535_v24 = vld [vmem:[%s1729_s8 + $0xa8] ss:$16 sps:$4 sm:$0xff]  }
  0x4b   : > { %1372 = vmatpush3.bf16.msra.mxu1 %v1487_v52  ;;  %1309 = vmatprep.subr.bf16.mxu0 %v1488_v53  ;;  %v1536_v25 = vld [vmem:[%s1729_s8 + $0xc4] ss:$16 sps:$4 sm:$0xff]   ;;  %v1538_v26 = vld [vmem:[%s1729_s8 + $0xcc] ss:$16 sps:$4 sm:$0xff]   ;;  %v1540_v27 = vld [vmem:[%s1729_s8 + $0xc0] ss:$16 sps:$4 sm:$0xff]  }
  0x4c   : > { %1373 = vmatprep.subr.bf16.mxu1 %v1489_v54  ;;  %v1541_v28 = vld [vmem:[%s1729_s8 + $0xc8] ss:$16 sps:$4 sm:$0xff]   ;;  %v1542_v29 = vld [vmem:[%s1729_s8 + $0xe4] ss:$16 sps:$4 sm:$0xff]   ;;  %v1544_v30 = vld [vmem:[%s1729_s8 + $0xec] ss:$16 sps:$4 sm:$0xff]  }
  0x4d   : > { %v1546_v31 = vld [vmem:[%s1729_s8 + $0xe0] ss:$16 sps:$4 sm:$0xff]   ;;  %v1547_v32 = vld [vmem:[%s1729_s8 + $0xe8] ss:$16 sps:$4 sm:$0xff]  }
  0x4e   : > { %1310 = vmatpush3.bf16.msra.mxu0 %v1490_v55  ;;  %v357_v47 = vld [vmem:[#allocation2 + $0x8] sm:$0xff] }
  0x4f   : > { %1374 = vmatpush3.bf16.msra.mxu1 %v1491_v56  ;;  %1311 = vmatprep.subr.bf16.mxu0 %v1492_v57 }
  0x50   : > { %1375 = vmatprep.subr.bf16.mxu1 %v1493_v58 }
  0x52   : > { %1312 = vmatpush3.bf16.msra.mxu0 %v1494_v59 }
  0x53   : > { %1376 = vmatpush3.bf16.msra.mxu1 %v1495_v60  ;;  %1313 = vmatprep.subr.bf16.mxu0 %v1496_v61  ;;  %v358_v60 = vld [vmem:[#allocation2 + $0x10] sm:$0xff] }
  0x54   : > { %1377 = vmatprep.subr.bf16.mxu1 %v1497_v62 }
  0x56   : > { %1314 = vmatpush3.bf16.msra.mxu0 %v1498_v63 }
  0x57   : > { %1378 = vmatpush3.bf16.msra.mxu1 %v1499_v0 }
  0x59   : > { %853 = vmatmul.mubr.bf16.vlgmr.msra.gmra.mrb[0].mxu0 %v1500_v1  ;;  %v359_v1 = vld [vmem:[#allocation2 + $0x18] sm:$0xff] }
  0x5a   : > { %950 = vmatmul.mubr.bf16.vlgmr.msra.gmra.mrb[0].mxu1 %v1503_v3  ;;  %860 = vmatprep.mubr.bf16.mxu0 %v1506_v5 }
  0x5b   : > { %957 = vmatprep.mubr.bf16.mxu1 %v1508_v6 }
  0x61   : > { %861 = vmatmul.mubr.bf16.gmra.mrb[4].mxu0 %v1510_v7 }
  0x62   : > { %958 = vmatmul.mubr.bf16.gmra.mrb[4].mxu1 %v1511_v8  ;;  %868 = vmatprep.mubr.bf16.mxu0 %v1512_v9 }
  0x63   : > { %965 = vmatprep.mubr.bf16.mxu1 %v1514_v10 }
  0x69   : > { %869 = vmatmul.mubr.bf16.gmra.mrb[8].mxu0 %v1516_v11 }
  0x6a   : > { %966 = vmatmul.mubr.bf16.gmra.mrb[8].mxu1 %v1517_v12  ;;  %876 = vmatprep.mubr.bf16.mxu0 %v1518_v13 }
  0x6b   : > { %973 = vmatprep.mubr.bf16.mxu1 %v1520_v14  ;;  %v360_v14 = vld [vmem:[#allocation2 + $0x20] sm:$0xff] }
  0x71   : > { %877 = vmatmul.mubr.bf16.gmra.mrb[12].mxu0 %v1522_v15 }
  0x72   : > { %974 = vmatmul.mubr.bf16.gmra.mrb[12].mxu1 %v1523_v16  ;;  %884 = vmatprep.mubr.bf16.mxu0 %v1524_v17 }
  0x73   : > { %981 = vmatprep.mubr.bf16.mxu1 %v1526_v18 }
  0x79   : > { %885 = vmatmul.mubr.bf16.gmra.mrb[16].mxu0 %v1528_v19  ;;  %v361_v19 = vld [vmem:[#allocation2 + $0x28] sm:$0xff] }
  0x7a   : > { %982 = vmatmul.mubr.bf16.gmra.mrb[16].mxu1 %v1529_v20  ;;  %892 = vmatprep.mubr.bf16.mxu0 %v1530_v21 }
  0x7b   : > { %989 = vmatprep.mubr.bf16.mxu1 %v1532_v22 }
  0x81   : > { %893 = vmatmul.mubr.bf16.gmra.mrb[20].mxu0 %v1534_v23 }
  0x82   : > { %990 = vmatmul.mubr.bf16.gmra.mrb[20].mxu1 %v1535_v24  ;;  %900 = vmatprep.mubr.bf16.mxu0 %v1536_v25 }
  0x83   : > { %997 = vmatprep.mubr.bf16.mxu1 %v1538_v26 }
  0x89   : > { %901 = vmatmul.mubr.bf16.gmra.mrb[24].mxu0 %v1540_v27 }
  0x8a   : > { %998 = vmatmul.mubr.bf16.gmra.mrb[24].mxu1 %v1541_v28  ;;  %908 = vmatprep.mubr.bf16.mxu0 %v1542_v29 }
  0x8b   : > { %1005 = vmatprep.mubr.bf16.mxu1 %v1544_v30 }
  0x91   : > { %909 = vmatmul.mubr.bf16.gmra.mrb[28].mxu0 %v1546_v31 }
  0x92   : > { %1006 = vmatmul.mubr.bf16.gmra.mrb[28].mxu1 %v1547_v32  ;;  %v362_v32 = vld [vmem:[#allocation2 + $0x30] sm:$0xff] }
 0x12c   : > { %v1315_v33 = vpop.f32.mrb[0].mxu0 }
 0x12d   : > { %v1379_v34 = vpop.f32.mrb[0].mxu1  ;;  %v1316_v35 = vpop.f32.mrb[1].mxu0 }
 0x12e   : > { %v1317_v36 = vadd.f32 %v1316_v35, %v1315_v33  ;;  %v1380_v37 = vpop.f32.mrb[1].mxu1  ;;  %v1318_v38 = vpop.f32.mrb[2].mxu0 }
 0x12f   : > { %v1381_v39 = vadd.f32 %v1380_v37, %v1379_v34  ;;  %v1382_v40 = vpop.f32.mrb[2].mxu1  ;;  %v1319_v41 = vpop.f32.mrb[3].mxu0  ;;  %v363_v37 = vld [vmem:[#allocation2 + $0x38] sm:$0xff] }
 0x130   : > { %v1320_v43 = vadd.f32 %v1319_v41, %v1318_v38  ;;  %v1383_v44 = vpop.f32.mrb[3].mxu1 }
 0x131   : > { %v952_v45 = vadd.f32 %v1381_v39, %v1317_v36  ;;  %v1384_v46 = vadd.f32 %v1383_v44, %v1382_v40 }
 0x133   : > { %v1014_v48 = vadd.f32 %v952_v45, %v356_v42  ;;  %v955_v49 = vadd.f32 %v1384_v46, %v1320_v43 }
 0x134   : > { %v1321_v50 = vpop.f32.mrb[4].mxu0 }
 0x135   : > { %1030 = vst [vmem:[#allocation2] sm:$0xff] %v1014_v48  ;;  %v1015_v51 = vadd.f32 %v955_v49, %v357_v47  ;;  %v1385_v52 = vpop.f32.mrb[4].mxu1  ;;  %v1322_v53 = vpop.f32.mrb[5].mxu0 }
 0x136   : > { %v1323_v54 = vadd.f32 %v1322_v53, %v1321_v50  ;;  %v1386_v55 = vpop.f32.mrb[5].mxu1  ;;  %v1324_v56 = vpop.f32.mrb[6].mxu0  ;;  %v364_v50 = vld [vmem:[#allocation2 + $0x40] sm:$0xff] }
 0x137   : > { %1031 = vst [vmem:[#allocation2 + $0x8] sm:$0xff] %v1015_v51  ;;  %v1387_v57 = vadd.f32 %v1386_v55, %v1385_v52  ;;  %v1388_v58 = vpop.f32.mrb[6].mxu1  ;;  %v1325_v59 = vpop.f32.mrb[7].mxu0  ;;  %v365_v55 = vld [vmem:[#allocation2 + $0x48] sm:$0xff] }
 0x138   : > { %v1326_v61 = vadd.f32 %v1325_v59, %v1324_v56  ;;  %v1389_v62 = vpop.f32.mrb[7].mxu1 }
 0x139   : > { %v960_v63 = vadd.f32 %v1387_v57, %v1323_v54  ;;  %v1390_v0 = vadd.f32 %v1389_v62, %v1388_v58 }
 0x13b   : > { %v1016_v2 = vadd.f32 %v960_v63, %v358_v60  ;;  %v963_v3 = vadd.f32 %v1390_v0, %v1326_v61 }
 0x13c   : > { %v1327_v4 = vpop.f32.mrb[8].mxu0 }
 0x13d   : > { %1032 = vst [vmem:[#allocation2 + $0x10] sm:$0xff] %v1016_v2  ;;  %v1017_v5 = vadd.f32 %v963_v3, %v359_v1  ;;  %v1391_v6 = vpop.f32.mrb[8].mxu1  ;;  %v1328_v7 = vpop.f32.mrb[9].mxu0 }
 0x13e   : > { %v1329_v8 = vadd.f32 %v1328_v7, %v1327_v4  ;;  %v1392_v9 = vpop.f32.mrb[9].mxu1  ;;  %v1330_v10 = vpop.f32.mrb[10].mxu0  ;;  %v366_v4 = vld [vmem:[#allocation2 + $0x50] sm:$0xff] }
 0x13f   : > { %1033 = vst [vmem:[#allocation2 + $0x18] sm:$0xff] %v1017_v5  ;;  %v1393_v11 = vadd.f32 %v1392_v9, %v1391_v6  ;;  %v1394_v12 = vpop.f32.mrb[10].mxu1  ;;  %v1331_v13 = vpop.f32.mrb[11].mxu0  ;;  %v367_v9 = vld [vmem:[#allocation2 + $0x58] sm:$0xff] }
 0x140   : > { %v1332_v15 = vadd.f32 %v1331_v13, %v1330_v10  ;;  %v1395_v16 = vpop.f32.mrb[11].mxu1 }
 0x141   : > { %v968_v17 = vadd.f32 %v1393_v11, %v1329_v8  ;;  %v1396_v18 = vadd.f32 %v1395_v16, %v1394_v12 }
 0x143   : > { %v1018_v20 = vadd.f32 %v968_v17, %v360_v14  ;;  %v971_v21 = vadd.f32 %v1396_v18, %v1332_v15 }
 0x144   : > { %v1333_v22 = vpop.f32.mrb[12].mxu0 }
 0x145   : > { %1034 = vst [vmem:[#allocation2 + $0x20] sm:$0xff] %v1018_v20  ;;  %v1019_v23 = vadd.f32 %v971_v21, %v361_v19  ;;  %v1397_v24 = vpop.f32.mrb[12].mxu1  ;;  %v1334_v25 = vpop.f32.mrb[13].mxu0 }
 0x146   : > { %v1335_v26 = vadd.f32 %v1334_v25, %v1333_v22  ;;  %v1398_v27 = vpop.f32.mrb[13].mxu1  ;;  %v1336_v28 = vpop.f32.mrb[14].mxu0  ;;  %v368_v22 = vld [vmem:[#allocation2 + $0x60] sm:$0xff] }
 0x147   : > { %1035 = vst [vmem:[#allocation2 + $0x28] sm:$0xff] %v1019_v23  ;;  %v1399_v29 = vadd.f32 %v1398_v27, %v1397_v24  ;;  %v1400_v30 = vpop.f32.mrb[14].mxu1  ;;  %v1337_v31 = vpop.f32.mrb[15].mxu0  ;;  %v369_v27 = vld [vmem:[#allocation2 + $0x68] sm:$0xff] }
 0x148   : > { %v1338_v33 = vadd.f32 %v1337_v31, %v1336_v28  ;;  %v1401_v34 = vpop.f32.mrb[15].mxu1 }
 0x149   : > { %v976_v35 = vadd.f32 %v1399_v29, %v1335_v26  ;;  %v1402_v36 = vadd.f32 %v1401_v34, %v1400_v30 }
 0x14b   : > { %v1020_v38 = vadd.f32 %v976_v35, %v362_v32  ;;  %v979_v39 = vadd.f32 %v1402_v36, %v1338_v33 }
 0x14c   : > { %v1339_v40 = vpop.f32.mrb[16].mxu0 }
 0x14d   : > { %1036 = vst [vmem:[#allocation2 + $0x30] sm:$0xff] %v1020_v38  ;;  %v1021_v41 = vadd.f32 %v979_v39, %v363_v37  ;;  %v1403_v42 = vpop.f32.mrb[16].mxu1  ;;  %v1340_v43 = vpop.f32.mrb[17].mxu0 }
 0x14e   : > { %v1341_v44 = vadd.f32 %v1340_v43, %v1339_v40  ;;  %v1404_v45 = vpop.f32.mrb[17].mxu1  ;;  %v1342_v46 = vpop.f32.mrb[18].mxu0  ;;  %v370_v40 = vld [vmem:[#allocation2 + $0x70] sm:$0xff] }
 0x14f   : > { %1037 = vst [vmem:[#allocation2 + $0x38] sm:$0xff] %v1021_v41  ;;  %v1405_v47 = vadd.f32 %v1404_v45, %v1403_v42  ;;  %v1406_v48 = vpop.f32.mrb[18].mxu1  ;;  %v1343_v49 = vpop.f32.mrb[19].mxu0  ;;  %v371_v45 = vld [vmem:[#allocation2 + $0x78] sm:$0xff] }
 0x150   : > { %v1344_v51 = vadd.f32 %v1343_v49, %v1342_v46  ;;  %v1407_v52 = vpop.f32.mrb[19].mxu1  ;;  %v1050_v49 = vld [vmem:[#allocation2] sm:$0xff] (!%p1292_p11) }
 0x151   : > { %v984_v53 = vadd.f32 %v1405_v47, %v1341_v44  ;;  %v1408_v54 = vadd.f32 %v1407_v52, %v1406_v48 }
 0x153   : > { %v1022_v56 = vadd.f32 %v984_v53, %v364_v50  ;;  %v987_v57 = vadd.f32 %v1408_v54, %v1344_v51  ;;  %v1293_v50 = vld [vmem:[%s1865_s2] ss:$0 sm:$0xff] (!%p1292_p11)  ;;  %v1051_v51 = vld [vmem:[#allocation2 + $0x8] sm:$0xff] (!%p1292_p11)  ;;  %v1052_v54 = vld [vmem:[#allocation2 + $0x10] sm:$0xff] (!%p1292_p11) }
 0x154   : > { %v1345_v58 = vpop.f32.mrb[20].mxu0  ;;  %v1073_v52 = vadd.f32 (!%p1292_p11), %v1293_v50, %v1050_v49  ;;  %v1074_v53 = vadd.f32 (!%p1292_p11), %v1293_v50, %v1051_v51 }
 0x155   : > { %1038 = vst [vmem:[#allocation2 + $0x40] sm:$0xff] %v1022_v56  ;;  %v1023_v59 = vadd.f32 %v987_v57, %v365_v55  ;;  %v1409_v60 = vpop.f32.mrb[20].mxu1  ;;  %v1346_v61 = vpop.f32.mrb[21].mxu0  ;;  %v1053_v55 = vld [vmem:[#allocation2 + $0x18] sm:$0xff] (!%p1292_p11)  ;;  %v1054_v56 = vld [vmem:[#allocation2 + $0x20] sm:$0xff] (!%p1292_p11)  ;;  %v1075_v57 = vadd.f32 (!%p1292_p11), %v1293_v50, %v1052_v54 }
 0x156   : > { %v1347_v62 = vadd.f32 %v1346_v61, %v1345_v58  ;;  %v1410_v63 = vpop.f32.mrb[21].mxu1  ;;  %v1348_v0 = vpop.f32.mrb[22].mxu0  ;;  %v1076_v58 = vadd.f32 (!%p1292_p11), %v1293_v50, %v1053_v55  ;;  %v1056_v61 = vld [vmem:[#allocation2 + $0x30] sm:$0xff] (!%p1292_p11)  ;;  %1089 = vst [vmem:[%s1866_s3] sm:$0xff] (!%p1292_p11), %v1073_v52  ;;  %1090 = vst [vmem:[%s1866_s3 + $0x8] sm:$0xff] (!%p1292_p11), %v1074_v53 }
 0x157   : > { %1039 = vst [vmem:[#allocation2 + $0x48] sm:$0xff] %v1023_v59  ;;  %v1411_v1 = vadd.f32 %v1410_v63, %v1409_v60  ;;  %v1412_v2 = vpop.f32.mrb[22].mxu1  ;;  %v1349_v3 = vpop.f32.mrb[23].mxu0  ;;  %v1077_v59 = vadd.f32 (!%p1292_p11), %v1293_v50, %v1054_v56  ;;  %v1055_v60 = vld [vmem:[#allocation2 + $0x28] sm:$0xff] (!%p1292_p11)  ;;  %1091 = vst [vmem:[%s1866_s3 + $0x10] sm:$0xff] (!%p1292_p11), %v1075_v57 }
 0x158   : > { %v1350_v5 = vadd.f32 %v1349_v3, %v1348_v0  ;;  %v1413_v6 = vpop.f32.mrb[23].mxu1  ;;  %v1078_v63 = vadd.f32 (!%p1292_p11), %v1293_v50, %v1055_v60  ;;  %v1079_v0 = vadd.f32 (!%p1292_p11), %v1293_v50, %v1056_v61  ;;  %1092 = vst [vmem:[%s1866_s3 + $0x18] sm:$0xff] (!%p1292_p11), %v1076_v58 }
 0x159   : > { %v992_v7 = vadd.f32 %v1411_v1, %v1347_v62  ;;  %v1414_v8 = vadd.f32 %v1413_v6, %v1412_v2  ;;  %v1057_v62 = vld [vmem:[#allocation2 + $0x38] sm:$0xff] (!%p1292_p11)  ;;  %1093 = vst [vmem:[%s1866_s3 + $0x20] sm:$0xff] (!%p1292_p11), %v1077_v59 }
 0x15a   : > { %v1080_v1 = vadd.f32 (!%p1292_p11), %v1293_v50, %v1057_v62  ;;  %1094 = vst [vmem:[%s1866_s3 + $0x28] sm:$0xff] (!%p1292_p11), %v1078_v63  ;;  %1095 = vst [vmem:[%s1866_s3 + $0x30] sm:$0xff] (!%p1292_p11), %v1079_v0 }
 0x15b   : > { %v1024_v10 = vadd.f32 %v992_v7, %v366_v4  ;;  %v995_v11 = vadd.f32 %v1414_v8, %v1350_v5 }
 0x15c   : > { %v1351_v12 = vpop.f32.mrb[24].mxu0  ;;  %v1058_v2 = vld [vmem:[#allocation2 + $0x40] sm:$0xff] (!%p1292_p11)  ;;  %1096 = vst [vmem:[%s1866_s3 + $0x38] sm:$0xff] (!%p1292_p11), %v1080_v1 }
 0x15d   : > { %1040 = vst [vmem:[#allocation2 + $0x50] sm:$0xff] %v1024_v10  ;;  %v1025_v13 = vadd.f32 %v995_v11, %v367_v9  ;;  %v1415_v14 = vpop.f32.mrb[24].mxu1  ;;  %v1352_v15 = vpop.f32.mrb[25].mxu0  ;;  %v1081_v5 = vadd.f32 (!%p1292_p11), %v1293_v50, %v1058_v2 }
 0x15e   : > { %v1353_v16 = vadd.f32 %v1352_v15, %v1351_v12  ;;  %v1416_v17 = vpop.f32.mrb[25].mxu1  ;;  %v1354_v18 = vpop.f32.mrb[26].mxu0  ;;  %v1059_v3 = vld [vmem:[#allocation2 + $0x48] sm:$0xff] (!%p1292_p11) }
 0x15f   : > { %1041 = vst [vmem:[#allocation2 + $0x58] sm:$0xff] %v1025_v13  ;;  %v1417_v19 = vadd.f32 %v1416_v17, %v1415_v14  ;;  %v1418_v20 = vpop.f32.mrb[26].mxu1  ;;  %v1355_v21 = vpop.f32.mrb[27].mxu0  ;;  %v1082_v6 = vadd.f32 (!%p1292_p11), %v1293_v50, %v1059_v3  ;;  %1097 = vst [vmem:[%s1866_s3 + $0x40] sm:$0xff] (!%p1292_p11), %v1081_v5 }
 0x160   : > { %v1356_v23 = vadd.f32 %v1355_v21, %v1354_v18  ;;  %v1419_v24 = vpop.f32.mrb[27].mxu1 }
 0x161   : > { %v1000_v25 = vadd.f32 %v1417_v19, %v1353_v16  ;;  %v1420_v26 = vadd.f32 %v1419_v24, %v1418_v20  ;;  %1098 = vst [vmem:[%s1866_s3 + $0x48] sm:$0xff] (!%p1292_p11), %v1082_v6 }
 0x163   : > { %v1026_v28 = vadd.f32 %v1000_v25, %v368_v22  ;;  %v1003_v29 = vadd.f32 %v1420_v26, %v1356_v23 }
 0x164   : > { %v1357_v30 = vpop.f32.mrb[28].mxu0  ;;  %v1060_v4 = vld [vmem:[#allocation2 + $0x50] sm:$0xff] (!%p1292_p11) }
 0x165   : > { %1042 = vst [vmem:[#allocation2 + $0x60] sm:$0xff] %v1026_v28  ;;  %v1027_v31 = vadd.f32 %v1003_v29, %v369_v27  ;;  %v1421_v32 = vpop.f32.mrb[28].mxu1  ;;  %v1358_v33 = vpop.f32.mrb[29].mxu0  ;;  %v1083_v7 = vadd.f32 (!%p1292_p11), %v1293_v50, %v1060_v4 }
 0x166   : > { %v1359_v34 = vadd.f32 %v1358_v33, %v1357_v30  ;;  %v1422_v35 = vpop.f32.mrb[29].mxu1  ;;  %v1360_v36 = vpop.f32.mrb[30].mxu0  ;;  %v1061_v8 = vld [vmem:[#allocation2 + $0x58] sm:$0xff] (!%p1292_p11) }
 0x167   : > { %1043 = vst [vmem:[#allocation2 + $0x68] sm:$0xff] %v1027_v31  ;;  %v1423_v37 = vadd.f32 %v1422_v35, %v1421_v32  ;;  %v1424_v38 = vpop.f32.mrb[30].mxu1  ;;  %v1361_v39 = vpop.f32.mrb[31].mxu0  ;;  %v1084_v11 = vadd.f32 (!%p1292_p11), %v1293_v50, %v1061_v8  ;;  %1099 = vst [vmem:[%s1866_s3 + $0x50] sm:$0xff] (!%p1292_p11), %v1083_v7 }
 0x168   : > { %v1362_v41 = vadd.f32 %v1361_v39, %v1360_v36  ;;  %v1425_v42 = vpop.f32.mrb[31].mxu1 }
 0x169   : > { %v1008_v43 = vadd.f32 %v1423_v37, %v1359_v34  ;;  %v1426_v44 = vadd.f32 %v1425_v42, %v1424_v38  ;;  %1049 = sbr.rel (%p1292_p11) target bundleno = 378 (0x17a), region = 63  ;;  %1100 = vst [vmem:[%s1866_s3 + $0x58] sm:$0xff] (!%p1292_p11), %v1084_v11 }
 0x16b   : > { %v1028_v46 = vadd.f32 %v1008_v43, %v370_v40  ;;  %v1011_v47 = vadd.f32 %v1426_v44, %v1362_v41 }
 0x16c   : > { %v1062_v9 = vld [vmem:[#allocation2 + $0x60] sm:$0xff] (!%p1292_p11) }
 0x16d   : > { %1044 = vst [vmem:[#allocation2 + $0x70] sm:$0xff] %v1028_v46  ;;  %v1029_v48 = vadd.f32 %v1011_v47, %v371_v45  ;;  %v1085_v12 = vadd.f32 (!%p1292_p11), %v1293_v50, %v1062_v9 }
 0x16e   : > { %v1063_v10 = vld [vmem:[#allocation2 + $0x68] sm:$0xff] (!%p1292_p11) }
 0x16f   : > { %1045 = vst [vmem:[#allocation2 + $0x78] sm:$0xff] %v1029_v48  ;;  %v1086_v13 = vadd.f32 (!%p1292_p11), %v1293_v50, %v1063_v10  ;;  %1101 = vst [vmem:[%s1866_s3 + $0x60] sm:$0xff] (!%p1292_p11), %v1085_v12 }
 0x171   : > { %1102 = vst [vmem:[%s1866_s3 + $0x68] sm:$0xff] %v1086_v13 }
 0x174   : > { %v1064_v14 = vld [vmem:[#allocation2 + $0x70] sm:$0xff] }
 0x175   : > { %v1087_v16 = vadd.f32 %v1293_v50, %v1064_v14 }
 0x176   : > { %v1065_v15 = vld [vmem:[#allocation2 + $0x78] sm:$0xff] }
 0x177   : > { %v1088_v17 = vadd.f32 %v1293_v50, %v1065_v15  ;;  %1103 = vst [vmem:[%s1866_s3 + $0x70] sm:$0xff] %v1087_v16 }
 0x179   : > { %1104 = vst [vmem:[%s1866_s3 + $0x78] sm:$0xff] %v1088_v17 }
 0x17a PF: > { %s13_s16 = sadd.s32 1, %s1586_s16   ;;  %s1867_s12 = smov %s1574_s13 }
 0x17b   : > { %p10_p12 = scmp.ge.s32.totalorder %s13_s16, 4   ;;  %s1868_s13 = smov %s1644_s20 }
 0x17c   : > { %s1869_s14 = smov %s1582_s15  ;;  %s1870_s15 = smov %s1872_s17 }
 0x17d   :  { %12 = sbr.rel (!%p10_p12) target bundleno = 3 (0x3), region = 104 }

// kernel: vae_encoder_forward.37
= control target key start
LH: loop header
LB: loop body
LE: loop exit
PB: predicated region body
PF: predicated region fallthrough
CT: control target
= control target key end

     0   :  { %s1725_s15 = smov 0   ;;  %s1727_s16 = smov 0   ;;  %s2045_s0 = inlined_call_operand.vmem [shape: bf16[128,1024], index: 0, kind: input, shape index: {}]   ;;  %s2046_s1 = inlined_call_operand.vmem [shape: bf16[1024,128], index: 1, kind: input, shape index: {}]   ;;  %s2047_s2 = inlined_call_operand.vmem [shape: f32[1,128], index: 2, kind: input, shape index: {}]   ;;  %s2048_s3 = inlined_call_operand.vmem [shape: f32[128,128], index: 3, kind: input, shape index: {}]   ;;  %s2049_s4 = inlined_call_operand.vmem [shape: f32[128,128], index: 4, kind: output, shape index: {}]  }
   0x1   :  { %s1729_s17 = smov 0   ;;  %s1731_s18 = smov 0  }
   0x2   :  { %s1733_s19 = smov 0  }
   0x3 LB: > { %s26_s20 = sadd.s32 1, %s1693_s18  ;;  %p49_p1 = scmp.ne.s32.totalorder %s1685_s16, %s1681_s15  ;;  %s1697_s19 = sphi %s1733_s19, %s14_s19   ;;  %s1693_s18 = sphi %s1731_s18, %s2053_s18   ;;  %s1689_s17 = sphi %s1729_s17, %s2052_s17   ;;  %s1685_s16 = sphi %s1727_s16, %s2051_s16   ;;  %s1681_s15 = sphi %s1725_s15, %s2050_s15  }
   0x4   : > { %p27_p0 = scmp.ge.s32.totalorder %s26_s20, 2  ;;  %p50_p2 = scmp.eq.s32.totalorder %s1697_s19, 0 }
   0x5   : > { %s42_s22 = sadd.s32 1, %s1685_s16  ;;  %p1330_p5 = scmp.ge.s32.totalorder %s1697_s19, 2 }
   0x6   : > { %s2055_s20 = smov (%p27_p0, %s26_s20), 0  ;;  %p51_p3 = por %p50_p2, %p49_p1 }
   0x7   : > { %s38_s21 = ssub.s32 %s1693_s18, %s2055_s20  ;;  %203 = sbr.rel (%p1330_p5) target bundleno = 34 (0x22), region = 24 }
   0x8   : > { %p40_p4 = scmp.eq.s32.totalorder %s38_s21, 0 }
   0xa   : > { %s1760_s23 = scalar_select %p40_p4, %s1685_s16, %s42_s22  }
   0xe   : > { %206 = sbr.rel (!%p51_p3) target bundleno = 34 (0x22), region = 28  ;;  %s208_s24 = sand.u32 (%p51_p3), 1, %s1685_s16  }
   0xf   : > { %s1409_s25 = sshll.u32 (%p51_p3), %s1693_s18, 4  ;;  %s1331_s26 = sshll.u32 (%p51_p3), %s208_s24, 8 }
  0x10   : > { %s1768_s29 = scalar_lea.vmem (%p51_p3), %s2045_s0, %s1409_s25  ;;  %s1773_s30 = scalar_lea.vmem (%p51_p3), [#allocation3], %s1331_s26 }
  0x11   : > { %v229_v0 = vld [vmem:[%s1768_s29] sm:$0xff] (%p51_p3)  ;;  %v231_v1 = vld [vmem:[%s1768_s29 + $0x8] sm:$0xff] (%p51_p3) }
  0x12   : > { %v233_v2 = vld [vmem:[%s1768_s29 + $0x20] sm:$0xff] (%p51_p3)  ;;  %230 = vst [vmem:[%s1773_s30] sm:$0xff] (%p51_p3), %v229_v0  ;;  %232 = vst [vmem:[%s1773_s30 + $0x8] sm:$0xff] (%p51_p3), %v231_v1  ;;  %v235_v3 = vld [vmem:[%s1768_s29 + $0x28] sm:$0xff] (%p51_p3) }
  0x13   : > { %234 = vst [vmem:[%s1773_s30 + $0x10] sm:$0xff] (%p51_p3), %v233_v2  ;;  %v237_v4 = vld [vmem:[%s1768_s29 + $0x40] sm:$0xff] (%p51_p3)  ;;  %v239_v5 = vld [vmem:[%s1768_s29 + $0x48] sm:$0xff] (%p51_p3)  ;;  %236 = vst [vmem:[%s1773_s30 + $0x18] sm:$0xff] (%p51_p3), %v235_v3 }
  0x14   : > { %238 = vst [vmem:[%s1773_s30 + $0x20] sm:$0xff] (%p51_p3), %v237_v4  ;;  %240 = vst [vmem:[%s1773_s30 + $0x28] sm:$0xff] (%p51_p3), %v239_v5  ;;  %v241_v6 = vld [vmem:[%s1768_s29 + $0x60] sm:$0xff] (%p51_p3)  ;;  %v243_v7 = vld [vmem:[%s1768_s29 + $0x68] sm:$0xff] (%p51_p3) }
  0x15   : > { %v245_v8 = vld [vmem:[%s1768_s29 + $0x80] sm:$0xff]  ;;  %242 = vst [vmem:[%s1773_s30 + $0x30] sm:$0xff] %v241_v6  ;;  %244 = vst [vmem:[%s1773_s30 + $0x38] sm:$0xff] %v243_v7  ;;  %v247_v9 = vld [vmem:[%s1768_s29 + $0x88] sm:$0xff] }
  0x16   : > { %246 = vst [vmem:[%s1773_s30 + $0x40] sm:$0xff] %v245_v8  ;;  %v249_v10 = vld [vmem:[%s1768_s29 + $0xa0] sm:$0xff]  ;;  %v251_v11 = vld [vmem:[%s1768_s29 + $0xa8] sm:$0xff]  ;;  %248 = vst [vmem:[%s1773_s30 + $0x48] sm:$0xff] %v247_v9 }
  0x17   : > { %250 = vst [vmem:[%s1773_s30 + $0x50] sm:$0xff] %v249_v10  ;;  %252 = vst [vmem:[%s1773_s30 + $0x58] sm:$0xff] %v251_v11  ;;  %v253_v12 = vld [vmem:[%s1768_s29 + $0xc0] sm:$0xff]  ;;  %v255_v13 = vld [vmem:[%s1768_s29 + $0xc8] sm:$0xff] }
  0x18   : > { %v257_v14 = vld [vmem:[%s1768_s29 + $0xe0] sm:$0xff]  ;;  %254 = vst [vmem:[%s1773_s30 + $0x60] sm:$0xff] %v253_v12  ;;  %256 = vst [vmem:[%s1773_s30 + $0x68] sm:$0xff] %v255_v13  ;;  %v259_v15 = vld [vmem:[%s1768_s29 + $0xe8] sm:$0xff] }
  0x19   : > { %258 = vst [vmem:[%s1773_s30 + $0x70] sm:$0xff] %v257_v14  ;;  %v261_v16 = vld [vmem:[%s1768_s29 + $0x100] sm:$0xff]  ;;  %v263_v17 = vld [vmem:[%s1768_s29 + $0x108] sm:$0xff]  ;;  %260 = vst [vmem:[%s1773_s30 + $0x78] sm:$0xff] %v259_v15 }
  0x1a   : > { %262 = vst [vmem:[%s1773_s30 + $0x80] sm:$0xff] %v261_v16  ;;  %264 = vst [vmem:[%s1773_s30 + $0x88] sm:$0xff] %v263_v17  ;;  %v265_v18 = vld [vmem:[%s1768_s29 + $0x120] sm:$0xff]  ;;  %v267_v19 = vld [vmem:[%s1768_s29 + $0x128] sm:$0xff] }
  0x1b   : > { %v269_v20 = vld [vmem:[%s1768_s29 + $0x140] sm:$0xff]  ;;  %266 = vst [vmem:[%s1773_s30 + $0x90] sm:$0xff] %v265_v18  ;;  %268 = vst [vmem:[%s1773_s30 + $0x98] sm:$0xff] %v267_v19  ;;  %v271_v21 = vld [vmem:[%s1768_s29 + $0x148] sm:$0xff] }
  0x1c   : > { %270 = vst [vmem:[%s1773_s30 + $0xa0] sm:$0xff] %v269_v20  ;;  %v273_v22 = vld [vmem:[%s1768_s29 + $0x160] sm:$0xff]  ;;  %v275_v23 = vld [vmem:[%s1768_s29 + $0x168] sm:$0xff]  ;;  %272 = vst [vmem:[%s1773_s30 + $0xa8] sm:$0xff] %v271_v21 }
  0x1d   : > { %274 = vst [vmem:[%s1773_s30 + $0xb0] sm:$0xff] %v273_v22  ;;  %276 = vst [vmem:[%s1773_s30 + $0xb8] sm:$0xff] %v275_v23  ;;  %v277_v24 = vld [vmem:[%s1768_s29 + $0x180] sm:$0xff]  ;;  %v279_v25 = vld [vmem:[%s1768_s29 + $0x188] sm:$0xff] }
  0x1e   : > { %v281_v26 = vld [vmem:[%s1768_s29 + $0x1a0] sm:$0xff]  ;;  %278 = vst [vmem:[%s1773_s30 + $0xc0] sm:$0xff] %v277_v24  ;;  %280 = vst [vmem:[%s1773_s30 + $0xc8] sm:$0xff] %v279_v25  ;;  %v283_v27 = vld [vmem:[%s1768_s29 + $0x1a8] sm:$0xff] }
  0x1f   : > { %282 = vst [vmem:[%s1773_s30 + $0xd0] sm:$0xff] %v281_v26  ;;  %v285_v28 = vld [vmem:[%s1768_s29 + $0x1c0] sm:$0xff]  ;;  %v287_v29 = vld [vmem:[%s1768_s29 + $0x1c8] sm:$0xff]  ;;  %284 = vst [vmem:[%s1773_s30 + $0xd8] sm:$0xff] %v283_v27 }
  0x20   : > { %286 = vst [vmem:[%s1773_s30 + $0xe0] sm:$0xff] %v285_v28  ;;  %288 = vst [vmem:[%s1773_s30 + $0xe8] sm:$0xff] %v287_v29  ;;  %v289_v30 = vld [vmem:[%s1768_s29 + $0x1e0] sm:$0xff]  ;;  %v291_v31 = vld [vmem:[%s1768_s29 + $0x1e8] sm:$0xff] }
  0x21   : > { %290 = vst [vmem:[%s1773_s30 + $0xf0] sm:$0xff] %v289_v30  ;;  %292 = vst [vmem:[%s1773_s30 + $0xf8] sm:$0xff] %v291_v31 }
  0x22 PF: > { %p1334_p6 = scmp.ge.s32.totalorder %s1697_s19, 1  ;;  %p309_p7 = scmp.lt.s32.totalorder %s1697_s19, 3 }
  0x24   : > { %p310_p8 = pnand %p1334_p6, %p309_p7 }
  0x25   : > { %s316_s5 = sand.u32 (!%p310_p8), 1, %s1681_s15   ;;  %s1336_s6 = sshll.u32 (!%p310_p8), %s1689_s17, 6 }
  0x26   : > { %313 = sbr.rel (%p310_p8) target bundleno = 380 (0x17c), region = 55  ;;  %s1335_s7 = sshll.u32 (!%p310_p8), %s316_s5, 8 }
  0x27   : > { %p366_p9 = scmp.lt.s32.totalorder (!%p310_p8), %s1336_s6, 127  ;;  %s1845_s12 = scalar_lea.vmem (!%p310_p8), [#allocation3], %s1335_s7 }
  0x28   : > { %p1338_p10 = scmp.ne.s32.totalorder (!%p310_p8), %s1689_s17, 0 }
  0x2d   : > { %s2057_s6 = smov (!%p366_p9, %s1336_s6), 127  ;;  %399 = sbr.rel (%p1338_p10) target bundleno = 55 (0x37), region = 63 }
  0x2e   : > { %s1337_s8 = sshll.u32 %s2057_s6, 2  ;;  %v1699_v32 = vmov (!%p1338_p10), 0.0  }
  0x2f   : > { %s1843_s11 = scalar_lea.vmem %s2046_s1, %s1337_s8  ;;  %400 = vst [vmem:[#allocation2] sm:$0xff] (!%p1338_p10), %v1699_v32  ;;  %401 = vst [vmem:[#allocation2 + $0x8] sm:$0xff] (!%p1338_p10), %v1699_v32 }
  0x30   : > { %402 = vst [vmem:[#allocation2 + $0x10] sm:$0xff] (!%p1338_p10), %v1699_v32  ;;  %403 = vst [vmem:[#allocation2 + $0x18] sm:$0xff] (!%p1338_p10), %v1699_v32 }
  0x31   : > { %404 = vst [vmem:[#allocation2 + $0x20] sm:$0xff] (!%p1338_p10), %v1699_v32  ;;  %405 = vst [vmem:[#allocation2 + $0x28] sm:$0xff] (!%p1338_p10), %v1699_v32 }
  0x32   : > { %406 = vst [vmem:[#allocation2 + $0x30] sm:$0xff] (!%p1338_p10), %v1699_v32  ;;  %407 = vst [vmem:[#allocation2 + $0x38] sm:$0xff] (!%p1338_p10), %v1699_v32 }
  0x33   : > { %408 = vst [vmem:[#allocation2 + $0x40] sm:$0xff] (!%p1338_p10), %v1699_v32  ;;  %409 = vst [vmem:[#allocation2 + $0x48] sm:$0xff] (!%p1338_p10), %v1699_v32 }
  0x34   : > { %410 = vst [vmem:[#allocation2 + $0x50] sm:$0xff] %v1699_v32  ;;  %411 = vst [vmem:[#allocation2 + $0x58] sm:$0xff] %v1699_v32 }
  0x35   : > { %412 = vst [vmem:[#allocation2 + $0x60] sm:$0xff] %v1699_v32  ;;  %413 = vst [vmem:[#allocation2 + $0x68] sm:$0xff] %v1699_v32 }
  0x36   : > { %414 = vst [vmem:[#allocation2 + $0x70] sm:$0xff] %v1699_v32  ;;  %415 = vst [vmem:[#allocation2 + $0x78] sm:$0xff] %v1699_v32 }
  0x37 PF: > { %v1579_v33 = vld [vmem:[%s1843_s11 + $0x40] sm:$0xff]   ;;  %v1583_v37 = vld [vmem:[%s1843_s11 + $0x48] sm:$0xff]   ;;  %v1587_v41 = vld [vmem:[%s1843_s11 + $0x50] sm:$0xff]   ;;  %p1403_p11 = scmp.ne.s32.totalorder %s1689_s17, 1 }
  0x38   : > { %v1580_v34 = vld [vmem:[%s1843_s11 + $0xc0] sm:$0xff]   ;;  %1410 = vmatprep.subr.bf16.mxu0 %v1579_v33  ;;  %v1584_v38 = vld [vmem:[%s1843_s11 + $0xc8] sm:$0xff]   ;;  %v1588_v42 = vld [vmem:[%s1843_s11 + $0xd0] sm:$0xff]  }
  0x39   : > { %v1581_v35 = vld [vmem:[%s1843_s11] sm:$0xff]   ;;  %1474 = vmatprep.subr.bf16.mxu1 %v1580_v34  ;;  %v1585_v39 = vld [vmem:[%s1843_s11 + $0x8] sm:$0xff]   ;;  %v1589_v43 = vld [vmem:[%s1843_s11 + $0x10] sm:$0xff]  }
  0x3a   : > { %v1582_v36 = vld [vmem:[%s1843_s11 + $0x80] sm:$0xff]   ;;  %1411 = vmatpush3.bf16.msra.mxu0 %v1581_v35  ;;  %v1586_v40 = vld [vmem:[%s1843_s11 + $0x88] sm:$0xff]   ;;  %v1590_v44 = vld [vmem:[%s1843_s11 + $0x90] sm:$0xff]  }
  0x3b   : > { %1475 = vmatpush3.bf16.msra.mxu1 %v1582_v36  ;;  %1412 = vmatprep.subr.bf16.mxu0 %v1583_v37  ;;  %v1591_v45 = vld [vmem:[%s1843_s11 + $0x58] sm:$0xff]   ;;  %v1595_v49 = vld [vmem:[%s1843_s11 + $0x60] sm:$0xff]   ;;  %v1599_v53 = vld [vmem:[%s1843_s11 + $0x68] sm:$0xff]  }
  0x3c   : > { %1476 = vmatprep.subr.bf16.mxu1 %v1584_v38  ;;  %v1592_v46 = vld [vmem:[%s1843_s11 + $0xd8] sm:$0xff]   ;;  %v1596_v50 = vld [vmem:[%s1843_s11 + $0xe0] sm:$0xff]   ;;  %v1600_v54 = vld [vmem:[%s1843_s11 + $0xe8] sm:$0xff]  }
  0x3d   : > { %v1593_v47 = vld [vmem:[%s1843_s11 + $0x18] sm:$0xff]   ;;  %v1597_v51 = vld [vmem:[%s1843_s11 + $0x20] sm:$0xff]   ;;  %v1601_v55 = vld [vmem:[%s1843_s11 + $0x28] sm:$0xff]  }
  0x3e   : > { %1413 = vmatpush3.bf16.msra.mxu0 %v1585_v39  ;;  %v1594_v48 = vld [vmem:[%s1843_s11 + $0x98] sm:$0xff]   ;;  %v1598_v52 = vld [vmem:[%s1843_s11 + $0xa0] sm:$0xff]   ;;  %v1602_v56 = vld [vmem:[%s1843_s11 + $0xa8] sm:$0xff]  }
  0x3f   : > { %1477 = vmatpush3.bf16.msra.mxu1 %v1586_v40  ;;  %1414 = vmatprep.subr.bf16.mxu0 %v1587_v41  ;;  %v1603_v57 = vld [vmem:[%s1843_s11 + $0x70] sm:$0xff]   ;;  %v1607_v61 = vld [vmem:[%s1843_s11 + $0x78] sm:$0xff]  }
  0x40   : > { %1478 = vmatprep.subr.bf16.mxu1 %v1588_v42  ;;  %v1604_v58 = vld [vmem:[%s1843_s11 + $0xf0] sm:$0xff]   ;;  %v1608_v62 = vld [vmem:[%s1843_s11 + $0xf8] sm:$0xff]   ;;  %v416_v42 = vld [vmem:[#allocation2] sm:$0xff] }
  0x41   : > { %v1605_v59 = vld [vmem:[%s1843_s11 + $0x30] sm:$0xff]   ;;  %v1609_v63 = vld [vmem:[%s1843_s11 + $0x38] sm:$0xff]  }
  0x42   : > { %1415 = vmatpush3.bf16.msra.mxu0 %v1589_v43  ;;  %v1606_v60 = vld [vmem:[%s1843_s11 + $0xb0] sm:$0xff]   ;;  %v1610_v0 = vld [vmem:[%s1843_s11 + $0xb8] sm:$0xff]  }
  0x43   : > { %1479 = vmatpush3.bf16.msra.mxu1 %v1590_v44  ;;  %1416 = vmatprep.subr.bf16.mxu0 %v1591_v45  ;;  %v1611_v1 = vld [vmem:[%s1845_s12] ss:$16 sps:$4 sm:$0xff]   ;;  %v1613_v2 = vld [vmem:[%s1845_s12 + $0x4] ss:$16 sps:$4 sm:$0xff]   ;;  %v1614_v3 = vld [vmem:[%s1845_s12 + $0x8] ss:$16 sps:$4 sm:$0xff]  }
  0x44   : > { %1480 = vmatprep.subr.bf16.mxu1 %v1592_v46  ;;  %v1616_v4 = vld [vmem:[%s1845_s12 + $0xc] ss:$16 sps:$4 sm:$0xff]   ;;  %912 = vmatprep.mubr.bf16.mxu0 %v1613_v2  ;;  %v1617_v5 = vld [vmem:[%s1845_s12 + $0x24] ss:$16 sps:$4 sm:$0xff]   ;;  %v1621_v7 = vld [vmem:[%s1845_s12 + $0x20] ss:$16 sps:$4 sm:$0xff]  }
  0x45   : > { %1009 = vmatprep.mubr.bf16.mxu1 %v1616_v4  ;;  %v1619_v6 = vld [vmem:[%s1845_s12 + $0x2c] ss:$16 sps:$4 sm:$0xff]   ;;  %v1622_v8 = vld [vmem:[%s1845_s12 + $0x28] ss:$16 sps:$4 sm:$0xff]   ;;  %v1623_v9 = vld [vmem:[%s1845_s12 + $0x44] ss:$16 sps:$4 sm:$0xff]  }
  0x46   : > { %1417 = vmatpush3.bf16.msra.mxu0 %v1593_v47  ;;  %v1625_v10 = vld [vmem:[%s1845_s12 + $0x4c] ss:$16 sps:$4 sm:$0xff]   ;;  %v1627_v11 = vld [vmem:[%s1845_s12 + $0x40] ss:$16 sps:$4 sm:$0xff]   ;;  %v1628_v12 = vld [vmem:[%s1845_s12 + $0x48] ss:$16 sps:$4 sm:$0xff]  }
  0x47   : > { %1481 = vmatpush3.bf16.msra.mxu1 %v1594_v48  ;;  %1418 = vmatprep.subr.bf16.mxu0 %v1595_v49  ;;  %v1629_v13 = vld [vmem:[%s1845_s12 + $0x64] ss:$16 sps:$4 sm:$0xff]   ;;  %v1631_v14 = vld [vmem:[%s1845_s12 + $0x6c] ss:$16 sps:$4 sm:$0xff]   ;;  %v1633_v15 = vld [vmem:[%s1845_s12 + $0x60] ss:$16 sps:$4 sm:$0xff]  }
  0x48   : > { %1482 = vmatprep.subr.bf16.mxu1 %v1596_v50  ;;  %v1634_v16 = vld [vmem:[%s1845_s12 + $0x68] ss:$16 sps:$4 sm:$0xff]   ;;  %v1635_v17 = vld [vmem:[%s1845_s12 + $0x84] ss:$16 sps:$4 sm:$0xff]   ;;  %v1637_v18 = vld [vmem:[%s1845_s12 + $0x8c] ss:$16 sps:$4 sm:$0xff]  }
  0x49   : > { %v1639_v19 = vld [vmem:[%s1845_s12 + $0x80] ss:$16 sps:$4 sm:$0xff]   ;;  %v1640_v20 = vld [vmem:[%s1845_s12 + $0x88] ss:$16 sps:$4 sm:$0xff]   ;;  %v1641_v21 = vld [vmem:[%s1845_s12 + $0xa4] ss:$16 sps:$4 sm:$0xff]  }
  0x4a   : > { %1419 = vmatpush3.bf16.msra.mxu0 %v1597_v51  ;;  %v1643_v22 = vld [vmem:[%s1845_s12 + $0xac] ss:$16 sps:$4 sm:$0xff]   ;;  %v1645_v23 = vld [vmem:[%s1845_s12 + $0xa0] ss:$16 sps:$4 sm:$0xff]   ;;  %v1646_v24 = vld [vmem:[%s1845_s12 + $0xa8] ss:$16 sps:$4 sm:$0xff]  }
  0x4b   : > { %1483 = vmatpush3.bf16.msra.mxu1 %v1598_v52  ;;  %1420 = vmatprep.subr.bf16.mxu0 %v1599_v53  ;;  %v1647_v25 = vld [vmem:[%s1845_s12 + $0xc4] ss:$16 sps:$4 sm:$0xff]   ;;  %v1649_v26 = vld [vmem:[%s1845_s12 + $0xcc] ss:$16 sps:$4 sm:$0xff]   ;;  %v1651_v27 = vld [vmem:[%s1845_s12 + $0xc0] ss:$16 sps:$4 sm:$0xff]  }
  0x4c   : > { %1484 = vmatprep.subr.bf16.mxu1 %v1600_v54  ;;  %v1652_v28 = vld [vmem:[%s1845_s12 + $0xc8] ss:$16 sps:$4 sm:$0xff]   ;;  %v1653_v29 = vld [vmem:[%s1845_s12 + $0xe4] ss:$16 sps:$4 sm:$0xff]   ;;  %v1655_v30 = vld [vmem:[%s1845_s12 + $0xec] ss:$16 sps:$4 sm:$0xff]  }
  0x4d   : > { %v1657_v31 = vld [vmem:[%s1845_s12 + $0xe0] ss:$16 sps:$4 sm:$0xff]   ;;  %v1658_v32 = vld [vmem:[%s1845_s12 + $0xe8] ss:$16 sps:$4 sm:$0xff]  }
  0x4e   : > { %1421 = vmatpush3.bf16.msra.mxu0 %v1601_v55  ;;  %v417_v47 = vld [vmem:[#allocation2 + $0x8] sm:$0xff] }
  0x4f   : > { %1485 = vmatpush3.bf16.msra.mxu1 %v1602_v56  ;;  %1422 = vmatprep.subr.bf16.mxu0 %v1603_v57 }
  0x50   : > { %1486 = vmatprep.subr.bf16.mxu1 %v1604_v58 }
  0x52   : > { %1423 = vmatpush3.bf16.msra.mxu0 %v1605_v59 }
  0x53   : > { %1487 = vmatpush3.bf16.msra.mxu1 %v1606_v60  ;;  %1424 = vmatprep.subr.bf16.mxu0 %v1607_v61  ;;  %v418_v60 = vld [vmem:[#allocation2 + $0x10] sm:$0xff] }
  0x54   : > { %1488 = vmatprep.subr.bf16.mxu1 %v1608_v62 }
  0x56   : > { %1425 = vmatpush3.bf16.msra.mxu0 %v1609_v63 }
  0x57   : > { %1489 = vmatpush3.bf16.msra.mxu1 %v1610_v0 }
  0x59   : > { %913 = vmatmul.mubr.bf16.vlgmr.msra.gmra.mrb[0].mxu0 %v1611_v1  ;;  %v419_v1 = vld [vmem:[#allocation2 + $0x18] sm:$0xff] }
  0x5a   : > { %1010 = vmatmul.mubr.bf16.vlgmr.msra.gmra.mrb[0].mxu1 %v1614_v3  ;;  %920 = vmatprep.mubr.bf16.mxu0 %v1617_v5 }
  0x5b   : > { %1017 = vmatprep.mubr.bf16.mxu1 %v1619_v6 }
  0x61   : > { %921 = vmatmul.mubr.bf16.gmra.mrb[4].mxu0 %v1621_v7 }
  0x62   : > { %1018 = vmatmul.mubr.bf16.gmra.mrb[4].mxu1 %v1622_v8  ;;  %928 = vmatprep.mubr.bf16.mxu0 %v1623_v9 }
  0x63   : > { %1025 = vmatprep.mubr.bf16.mxu1 %v1625_v10 }
  0x69   : > { %929 = vmatmul.mubr.bf16.gmra.mrb[8].mxu0 %v1627_v11 }
  0x6a   : > { %1026 = vmatmul.mubr.bf16.gmra.mrb[8].mxu1 %v1628_v12  ;;  %936 = vmatprep.mubr.bf16.mxu0 %v1629_v13 }
  0x6b   : > { %1033 = vmatprep.mubr.bf16.mxu1 %v1631_v14  ;;  %v420_v14 = vld [vmem:[#allocation2 + $0x20] sm:$0xff] }
  0x71   : > { %937 = vmatmul.mubr.bf16.gmra.mrb[12].mxu0 %v1633_v15 }
  0x72   : > { %1034 = vmatmul.mubr.bf16.gmra.mrb[12].mxu1 %v1634_v16  ;;  %944 = vmatprep.mubr.bf16.mxu0 %v1635_v17 }
  0x73   : > { %1041 = vmatprep.mubr.bf16.mxu1 %v1637_v18 }
  0x79   : > { %945 = vmatmul.mubr.bf16.gmra.mrb[16].mxu0 %v1639_v19  ;;  %v421_v19 = vld [vmem:[#allocation2 + $0x28] sm:$0xff] }
  0x7a   : > { %1042 = vmatmul.mubr.bf16.gmra.mrb[16].mxu1 %v1640_v20  ;;  %952 = vmatprep.mubr.bf16.mxu0 %v1641_v21 }
  0x7b   : > { %1049 = vmatprep.mubr.bf16.mxu1 %v1643_v22 }
  0x81   : > { %953 = vmatmul.mubr.bf16.gmra.mrb[20].mxu0 %v1645_v23 }
  0x82   : > { %1050 = vmatmul.mubr.bf16.gmra.mrb[20].mxu1 %v1646_v24  ;;  %960 = vmatprep.mubr.bf16.mxu0 %v1647_v25 }
  0x83   : > { %1057 = vmatprep.mubr.bf16.mxu1 %v1649_v26 }
  0x89   : > { %961 = vmatmul.mubr.bf16.gmra.mrb[24].mxu0 %v1651_v27 }
  0x8a   : > { %1058 = vmatmul.mubr.bf16.gmra.mrb[24].mxu1 %v1652_v28  ;;  %968 = vmatprep.mubr.bf16.mxu0 %v1653_v29 }
  0x8b   : > { %1065 = vmatprep.mubr.bf16.mxu1 %v1655_v30 }
  0x91   : > { %969 = vmatmul.mubr.bf16.gmra.mrb[28].mxu0 %v1657_v31 }
  0x92   : > { %1066 = vmatmul.mubr.bf16.gmra.mrb[28].mxu1 %v1658_v32  ;;  %v422_v32 = vld [vmem:[#allocation2 + $0x30] sm:$0xff] }
 0x12c   : > { %v1426_v33 = vpop.f32.mrb[0].mxu0 }
 0x12d   : > { %v1490_v34 = vpop.f32.mrb[0].mxu1  ;;  %v1427_v35 = vpop.f32.mrb[1].mxu0 }
 0x12e   : > { %v1428_v36 = vadd.f32 %v1427_v35, %v1426_v33  ;;  %v1491_v37 = vpop.f32.mrb[1].mxu1  ;;  %v1429_v38 = vpop.f32.mrb[2].mxu0 }
 0x12f   : > { %v1492_v39 = vadd.f32 %v1491_v37, %v1490_v34  ;;  %v1493_v40 = vpop.f32.mrb[2].mxu1  ;;  %v1430_v41 = vpop.f32.mrb[3].mxu0  ;;  %v423_v37 = vld [vmem:[#allocation2 + $0x38] sm:$0xff] }
 0x130   : > { %v1431_v43 = vadd.f32 %v1430_v41, %v1429_v38  ;;  %v1494_v44 = vpop.f32.mrb[3].mxu1 }
 0x131   : > { %v1012_v45 = vadd.f32 %v1492_v39, %v1428_v36  ;;  %v1495_v46 = vadd.f32 %v1494_v44, %v1493_v40 }
 0x133   : > { %v1074_v48 = vadd.f32 %v1012_v45, %v416_v42  ;;  %v1015_v49 = vadd.f32 %v1495_v46, %v1431_v43 }
 0x134   : > { %v1432_v50 = vpop.f32.mrb[4].mxu0 }
 0x135   : > { %1090 = vst [vmem:[#allocation2] sm:$0xff] %v1074_v48  ;;  %v1075_v51 = vadd.f32 %v1015_v49, %v417_v47  ;;  %v1496_v52 = vpop.f32.mrb[4].mxu1  ;;  %v1433_v53 = vpop.f32.mrb[5].mxu0 }
 0x136   : > { %v1434_v54 = vadd.f32 %v1433_v53, %v1432_v50  ;;  %v1497_v55 = vpop.f32.mrb[5].mxu1  ;;  %v1435_v56 = vpop.f32.mrb[6].mxu0  ;;  %v424_v50 = vld [vmem:[#allocation2 + $0x40] sm:$0xff] }
 0x137   : > { %1091 = vst [vmem:[#allocation2 + $0x8] sm:$0xff] %v1075_v51  ;;  %v1498_v57 = vadd.f32 %v1497_v55, %v1496_v52  ;;  %v1499_v58 = vpop.f32.mrb[6].mxu1  ;;  %v1436_v59 = vpop.f32.mrb[7].mxu0  ;;  %v425_v55 = vld [vmem:[#allocation2 + $0x48] sm:$0xff] }
 0x138   : > { %v1437_v61 = vadd.f32 %v1436_v59, %v1435_v56  ;;  %v1500_v62 = vpop.f32.mrb[7].mxu1 }
 0x139   : > { %v1020_v63 = vadd.f32 %v1498_v57, %v1434_v54  ;;  %v1501_v0 = vadd.f32 %v1500_v62, %v1499_v58 }
 0x13b   : > { %v1076_v2 = vadd.f32 %v1020_v63, %v418_v60  ;;  %v1023_v3 = vadd.f32 %v1501_v0, %v1437_v61 }
 0x13c   : > { %v1438_v4 = vpop.f32.mrb[8].mxu0 }
 0x13d   : > { %1092 = vst [vmem:[#allocation2 + $0x10] sm:$0xff] %v1076_v2  ;;  %v1077_v5 = vadd.f32 %v1023_v3, %v419_v1  ;;  %v1502_v6 = vpop.f32.mrb[8].mxu1  ;;  %v1439_v7 = vpop.f32.mrb[9].mxu0 }
 0x13e   : > { %v1440_v8 = vadd.f32 %v1439_v7, %v1438_v4  ;;  %v1503_v9 = vpop.f32.mrb[9].mxu1  ;;  %v1441_v10 = vpop.f32.mrb[10].mxu0  ;;  %v426_v4 = vld [vmem:[#allocation2 + $0x50] sm:$0xff] }
 0x13f   : > { %1093 = vst [vmem:[#allocation2 + $0x18] sm:$0xff] %v1077_v5  ;;  %v1504_v11 = vadd.f32 %v1503_v9, %v1502_v6  ;;  %v1505_v12 = vpop.f32.mrb[10].mxu1  ;;  %v1442_v13 = vpop.f32.mrb[11].mxu0  ;;  %v427_v9 = vld [vmem:[#allocation2 + $0x58] sm:$0xff] }
 0x140   : > { %v1443_v15 = vadd.f32 %v1442_v13, %v1441_v10  ;;  %v1506_v16 = vpop.f32.mrb[11].mxu1 }
 0x141   : > { %v1028_v17 = vadd.f32 %v1504_v11, %v1440_v8  ;;  %v1507_v18 = vadd.f32 %v1506_v16, %v1505_v12 }
 0x143   : > { %v1078_v20 = vadd.f32 %v1028_v17, %v420_v14  ;;  %v1031_v21 = vadd.f32 %v1507_v18, %v1443_v15 }
 0x144   : > { %v1444_v22 = vpop.f32.mrb[12].mxu0 }
 0x145   : > { %1094 = vst [vmem:[#allocation2 + $0x20] sm:$0xff] %v1078_v20  ;;  %v1079_v23 = vadd.f32 %v1031_v21, %v421_v19  ;;  %v1508_v24 = vpop.f32.mrb[12].mxu1  ;;  %v1445_v25 = vpop.f32.mrb[13].mxu0 }
 0x146   : > { %v1446_v26 = vadd.f32 %v1445_v25, %v1444_v22  ;;  %v1509_v27 = vpop.f32.mrb[13].mxu1  ;;  %v1447_v28 = vpop.f32.mrb[14].mxu0  ;;  %v428_v22 = vld [vmem:[#allocation2 + $0x60] sm:$0xff] }
 0x147   : > { %1095 = vst [vmem:[#allocation2 + $0x28] sm:$0xff] %v1079_v23  ;;  %v1510_v29 = vadd.f32 %v1509_v27, %v1508_v24  ;;  %v1511_v30 = vpop.f32.mrb[14].mxu1  ;;  %v1448_v31 = vpop.f32.mrb[15].mxu0  ;;  %v429_v27 = vld [vmem:[#allocation2 + $0x68] sm:$0xff] }
 0x148   : > { %v1449_v33 = vadd.f32 %v1448_v31, %v1447_v28  ;;  %v1512_v34 = vpop.f32.mrb[15].mxu1 }
 0x149   : > { %v1036_v35 = vadd.f32 %v1510_v29, %v1446_v26  ;;  %v1513_v36 = vadd.f32 %v1512_v34, %v1511_v30 }
 0x14b   : > { %v1080_v38 = vadd.f32 %v1036_v35, %v422_v32  ;;  %v1039_v39 = vadd.f32 %v1513_v36, %v1449_v33 }
 0x14c   : > { %v1450_v40 = vpop.f32.mrb[16].mxu0 }
 0x14d   : > { %1096 = vst [vmem:[#allocation2 + $0x30] sm:$0xff] %v1080_v38  ;;  %v1081_v41 = vadd.f32 %v1039_v39, %v423_v37  ;;  %v1514_v42 = vpop.f32.mrb[16].mxu1  ;;  %v1451_v43 = vpop.f32.mrb[17].mxu0 }
 0x14e   : > { %v1452_v44 = vadd.f32 %v1451_v43, %v1450_v40  ;;  %v1515_v45 = vpop.f32.mrb[17].mxu1  ;;  %v1453_v46 = vpop.f32.mrb[18].mxu0  ;;  %v430_v40 = vld [vmem:[#allocation2 + $0x70] sm:$0xff] }
 0x14f   : > { %1097 = vst [vmem:[#allocation2 + $0x38] sm:$0xff] %v1081_v41  ;;  %v1516_v47 = vadd.f32 %v1515_v45, %v1514_v42  ;;  %v1517_v48 = vpop.f32.mrb[18].mxu1  ;;  %v1454_v49 = vpop.f32.mrb[19].mxu0  ;;  %v431_v45 = vld [vmem:[#allocation2 + $0x78] sm:$0xff] }
 0x150   : > { %v1455_v51 = vadd.f32 %v1454_v49, %v1453_v46  ;;  %v1518_v52 = vpop.f32.mrb[19].mxu1  ;;  %v1110_v49 = vld [vmem:[#allocation2] sm:$0xff] (!%p1403_p11) }
 0x151   : > { %v1044_v53 = vadd.f32 %v1516_v47, %v1452_v44  ;;  %v1519_v54 = vadd.f32 %v1518_v52, %v1517_v48 }
 0x153   : > { %v1082_v56 = vadd.f32 %v1044_v53, %v424_v50  ;;  %v1047_v57 = vadd.f32 %v1519_v54, %v1455_v51  ;;  %v1916_v50 = vld [vmem:[%s2047_s2] ss:$0 sm:$0xff] (!%p1403_p11)  ;;  %v1111_v53 = vld [vmem:[#allocation2 + $0x8] sm:$0xff] (!%p1403_p11) }
 0x154   : > { %v1456_v58 = vpop.f32.mrb[20].mxu0  ;;  %v1149_v51 = vld [vmem:[%s2048_s3] sm:$0xff] (!%p1403_p11)  ;;  %v1133_v52 = vadd.f32 (!%p1403_p11), %v1916_v50, %v1110_v49  ;;  %v1150_v54 = vld [vmem:[%s2048_s3 + $0x8] sm:$0xff] (!%p1403_p11) }
 0x155   : > { %1098 = vst [vmem:[#allocation2 + $0x40] sm:$0xff] %v1082_v56  ;;  %v1083_v59 = vadd.f32 %v1047_v57, %v425_v55  ;;  %v1520_v60 = vpop.f32.mrb[20].mxu1  ;;  %v1457_v61 = vpop.f32.mrb[21].mxu0  ;;  %v1112_v55 = vld [vmem:[#allocation2 + $0x10] sm:$0xff] (!%p1403_p11)  ;;  %v1134_v56 = vadd.f32 (!%p1403_p11), %v1916_v50, %v1111_v53 }
 0x156   : > { %v1458_v62 = vadd.f32 %v1457_v61, %v1456_v58  ;;  %v1521_v63 = vpop.f32.mrb[21].mxu1  ;;  %v1459_v0 = vpop.f32.mrb[22].mxu0  ;;  %v1135_v57 = vadd.f32 (!%p1403_p11), %v1916_v50, %v1112_v55  ;;  %v1151_v58 = vld [vmem:[%s2048_s3 + $0x10] sm:$0xff] (!%p1403_p11)  ;;  %v1165_v61 = vadd.f32 (!%p1403_p11), %v1149_v51, %v1133_v52 }
 0x157   : > { %1099 = vst [vmem:[#allocation2 + $0x48] sm:$0xff] %v1083_v59  ;;  %v1522_v1 = vadd.f32 %v1521_v63, %v1520_v60  ;;  %v1523_v2 = vpop.f32.mrb[22].mxu1  ;;  %v1460_v3 = vpop.f32.mrb[23].mxu0  ;;  %v1113_v59 = vld [vmem:[#allocation2 + $0x18] sm:$0xff] (!%p1403_p11)  ;;  %v1114_v63 = vld [vmem:[#allocation2 + $0x20] sm:$0xff] (!%p1403_p11) }
 0x158   : > { %v1461_v5 = vadd.f32 %v1460_v3, %v1459_v0  ;;  %v1524_v6 = vpop.f32.mrb[23].mxu1  ;;  %v1152_v60 = vld [vmem:[%s2048_s3 + $0x18] sm:$0xff] (!%p1403_p11)  ;;  %v1153_v0 = vld [vmem:[%s2048_s3 + $0x20] sm:$0xff] (!%p1403_p11)  ;;  %v1167_v3 = vadd.f32 (!%p1403_p11), %v1151_v58, %v1135_v57  ;;  %1181 = vst [vmem:[%s2049_s4] sm:$0xff] (!%p1403_p11), %v1165_v61 }
 0x159   : > { %v1052_v7 = vadd.f32 %v1522_v1, %v1458_v62  ;;  %v1525_v8 = vadd.f32 %v1524_v6, %v1523_v2  ;;  %v1136_v62 = vadd.f32 (!%p1403_p11), %v1916_v50, %v1113_v59  ;;  %v1115_v1 = vld [vmem:[#allocation2 + $0x28] sm:$0xff] (!%p1403_p11)  ;;  %v1166_v2 = vadd.f32 (!%p1403_p11), %v1150_v54, %v1134_v56 }
 0x15a   : > { %v1154_v6 = vld [vmem:[%s2048_s3 + $0x28] sm:$0xff] (!%p1403_p11)  ;;  %1183 = vst [vmem:[%s2049_s4 + $0x10] sm:$0xff] (!%p1403_p11), %v1167_v3 }
 0x15b   : > { %v1084_v10 = vadd.f32 %v1052_v7, %v426_v4  ;;  %v1055_v11 = vadd.f32 %v1525_v8, %v1461_v5  ;;  %v1137_v4 = vadd.f32 (!%p1403_p11), %v1916_v50, %v1114_v63  ;;  %v1138_v5 = vadd.f32 (!%p1403_p11), %v1916_v50, %v1115_v1  ;;  %v1116_v7 = vld [vmem:[#allocation2 + $0x30] sm:$0xff] (!%p1403_p11)  ;;  %1182 = vst [vmem:[%s2049_s4 + $0x8] sm:$0xff] (!%p1403_p11), %v1166_v2 }
 0x15c   : > { %v1462_v12 = vpop.f32.mrb[24].mxu0  ;;  %v1155_v8 = vld [vmem:[%s2048_s3 + $0x30] sm:$0xff] (!%p1403_p11) }
 0x15d   : > { %1100 = vst [vmem:[#allocation2 + $0x50] sm:$0xff] %v1084_v10  ;;  %v1085_v13 = vadd.f32 %v1055_v11, %v427_v9  ;;  %v1526_v14 = vpop.f32.mrb[24].mxu1  ;;  %v1463_v15 = vpop.f32.mrb[25].mxu0  ;;  %v1168_v9 = vadd.f32 (!%p1403_p11), %v1152_v60, %v1136_v62  ;;  %v1139_v10 = vadd.f32 (!%p1403_p11), %v1916_v50, %v1116_v7  ;;  %v1117_v11 = vld [vmem:[#allocation2 + $0x38] sm:$0xff] (!%p1403_p11) }
 0x15e   : > { %v1464_v16 = vadd.f32 %v1463_v15, %v1462_v12  ;;  %v1527_v17 = vpop.f32.mrb[25].mxu1  ;;  %v1465_v18 = vpop.f32.mrb[26].mxu0  ;;  %v1156_v12 = vld [vmem:[%s2048_s3 + $0x38] sm:$0xff] (!%p1403_p11)  ;;  %v1170_v15 = vadd.f32 (!%p1403_p11), %v1154_v6, %v1138_v5 }
 0x15f   : > { %1101 = vst [vmem:[#allocation2 + $0x58] sm:$0xff] %v1085_v13  ;;  %v1528_v19 = vadd.f32 %v1527_v17, %v1526_v14  ;;  %v1529_v20 = vpop.f32.mrb[26].mxu1  ;;  %v1466_v21 = vpop.f32.mrb[27].mxu0  ;;  %v1118_v13 = vld [vmem:[#allocation2 + $0x40] sm:$0xff] (!%p1403_p11)  ;;  %v1169_v14 = vadd.f32 (!%p1403_p11), %v1153_v0, %v1137_v4  ;;  %1184 = vst [vmem:[%s2049_s4 + $0x18] sm:$0xff] (!%p1403_p11), %v1168_v9 }
 0x160   : > { %v1467_v23 = vadd.f32 %v1466_v21, %v1465_v18  ;;  %v1530_v24 = vpop.f32.mrb[27].mxu1  ;;  %v1141_v17 = vadd.f32 (!%p1403_p11), %v1916_v50, %v1118_v13  ;;  %v1157_v18 = vld [vmem:[%s2048_s3 + $0x40] sm:$0xff] (!%p1403_p11)  ;;  %v1171_v21 = vadd.f32 (!%p1403_p11), %v1155_v8, %v1139_v10  ;;  %1186 = vst [vmem:[%s2049_s4 + $0x28] sm:$0xff] (!%p1403_p11), %v1170_v15 }
 0x161   : > { %v1060_v25 = vadd.f32 %v1528_v19, %v1464_v16  ;;  %v1531_v26 = vadd.f32 %v1530_v24, %v1529_v20  ;;  %v1140_v16 = vadd.f32 (!%p1403_p11), %v1916_v50, %v1117_v11  ;;  %v1119_v19 = vld [vmem:[#allocation2 + $0x48] sm:$0xff] (!%p1403_p11)  ;;  %v1159_v24 = vld [vmem:[%s2048_s3 + $0x50] sm:$0xff] (!%p1403_p11)  ;;  %1185 = vst [vmem:[%s2049_s4 + $0x20] sm:$0xff] (!%p1403_p11), %v1169_v14 }
 0x162   : > { %v1158_v20 = vld [vmem:[%s2048_s3 + $0x48] sm:$0xff] (!%p1403_p11)  ;;  %1187 = vst [vmem:[%s2049_s4 + $0x30] sm:$0xff] (!%p1403_p11), %v1171_v21 }
 0x163   : > { %v1086_v28 = vadd.f32 %v1060_v25, %v428_v22  ;;  %v1063_v29 = vadd.f32 %v1531_v26, %v1467_v23  ;;  %v1142_v22 = vadd.f32 (!%p1403_p11), %v1916_v50, %v1119_v19  ;;  %v1172_v26 = vadd.f32 (!%p1403_p11), %v1156_v12, %v1140_v16 }
 0x164   : > { %v1468_v30 = vpop.f32.mrb[28].mxu0  ;;  %v1120_v23 = vld [vmem:[#allocation2 + $0x50] sm:$0xff] (!%p1403_p11) }
 0x165   : > { %1102 = vst [vmem:[#allocation2 + $0x60] sm:$0xff] %v1086_v28  ;;  %v1087_v31 = vadd.f32 %v1063_v29, %v429_v27  ;;  %v1532_v32 = vpop.f32.mrb[28].mxu1  ;;  %v1469_v33 = vpop.f32.mrb[29].mxu0  ;;  %v1173_v27 = vadd.f32 (!%p1403_p11), %v1157_v18, %v1141_v17  ;;  %v1143_v28 = vadd.f32 (!%p1403_p11), %v1916_v50, %v1120_v23  ;;  %1188 = vst [vmem:[%s2049_s4 + $0x38] sm:$0xff] (!%p1403_p11), %v1172_v26 }
 0x166   : > { %v1470_v34 = vadd.f32 %v1469_v33, %v1468_v30  ;;  %v1533_v35 = vpop.f32.mrb[29].mxu1  ;;  %v1471_v36 = vpop.f32.mrb[30].mxu0  ;;  %v1121_v25 = vld [vmem:[#allocation2 + $0x58] sm:$0xff] (!%p1403_p11)  ;;  %v1174_v33 = vadd.f32 (!%p1403_p11), %v1158_v20, %v1142_v22 }
 0x167   : > { %1103 = vst [vmem:[#allocation2 + $0x68] sm:$0xff] %v1087_v31  ;;  %v1534_v37 = vadd.f32 %v1533_v35, %v1532_v32  ;;  %v1535_v38 = vpop.f32.mrb[30].mxu1  ;;  %v1472_v39 = vpop.f32.mrb[31].mxu0  ;;  %v1144_v29 = vadd.f32 (!%p1403_p11), %v1916_v50, %v1121_v25  ;;  %v1160_v30 = vld [vmem:[%s2048_s3 + $0x58] sm:$0xff] (!%p1403_p11)  ;;  %v1161_v32 = vld [vmem:[%s2048_s3 + $0x60] sm:$0xff] (!%p1403_p11)  ;;  %1189 = vst [vmem:[%s2049_s4 + $0x40] sm:$0xff] (!%p1403_p11), %v1173_v27 }
 0x168   : > { %v1473_v41 = vadd.f32 %v1472_v39, %v1471_v36  ;;  %v1536_v42 = vpop.f32.mrb[31].mxu1  ;;  %v1162_v36 = vld [vmem:[%s2048_s3 + $0x68] sm:$0xff] (!%p1403_p11)  ;;  %1190 = vst [vmem:[%s2049_s4 + $0x48] sm:$0xff] (!%p1403_p11), %v1174_v33 }
 0x169   : > { %v1068_v43 = vadd.f32 %v1534_v37, %v1470_v34  ;;  %v1537_v44 = vadd.f32 %v1536_v42, %v1535_v38  ;;  %1109 = sbr.rel (%p1403_p11) target bundleno = 380 (0x17c), region = 67  ;;  %v1175_v38 = vadd.f32 (!%p1403_p11), %v1159_v24, %v1143_v28  ;;  %v1176_v39 = vadd.f32 (!%p1403_p11), %v1160_v30, %v1144_v29  ;;  %v1163_v42 = vld [vmem:[%s2048_s3 + $0x70] sm:$0xff] (!%p1403_p11) }
 0x16b   : > { %v1088_v46 = vadd.f32 %v1068_v43, %v430_v40  ;;  %v1071_v47 = vadd.f32 %v1537_v44, %v1473_v41  ;;  %v1164_v44 = vld [vmem:[%s2048_s3 + $0x78] sm:$0xff] (!%p1403_p11)  ;;  %1191 = vst [vmem:[%s2049_s4 + $0x50] sm:$0xff] (!%p1403_p11), %v1175_v38  ;;  %1192 = vst [vmem:[%s2049_s4 + $0x58] sm:$0xff] (!%p1403_p11), %v1176_v39 }
 0x16c   : > { %v1122_v31 = vld [vmem:[#allocation2 + $0x60] sm:$0xff] (!%p1403_p11) }
 0x16d   : > { %1104 = vst [vmem:[#allocation2 + $0x70] sm:$0xff] %v1088_v46  ;;  %v1089_v48 = vadd.f32 %v1071_v47, %v431_v45  ;;  %v1145_v34 = vadd.f32 (!%p1403_p11), %v1916_v50, %v1122_v31 }
 0x16e   : > { %v1123_v35 = vld [vmem:[#allocation2 + $0x68] sm:$0xff] (!%p1403_p11) }
 0x16f   : > { %1105 = vst [vmem:[#allocation2 + $0x78] sm:$0xff] %v1089_v48  ;;  %v1146_v40 = vadd.f32 (!%p1403_p11), %v1916_v50, %v1123_v35  ;;  %v1177_v45 = vadd.f32 (!%p1403_p11), %v1161_v32, %v1145_v34 }
 0x171   : > { %v1178_v47 = vadd.f32 %v1162_v36, %v1146_v40  ;;  %1193 = vst [vmem:[%s2049_s4 + $0x60] sm:$0xff] %v1177_v45 }
 0x173   : > { %1194 = vst [vmem:[%s2049_s4 + $0x68] sm:$0xff] %v1178_v47 }
 0x174   : > { %v1124_v37 = vld [vmem:[#allocation2 + $0x70] sm:$0xff] }
 0x175   : > { %v1147_v41 = vadd.f32 %v1916_v50, %v1124_v37 }
 0x176   : > { %v1125_v43 = vld [vmem:[#allocation2 + $0x78] sm:$0xff] }
 0x177   : > { %v1148_v46 = vadd.f32 %v1916_v50, %v1125_v43  ;;  %v1179_v48 = vadd.f32 %v1163_v42, %v1147_v41 }
 0x179   : > { %v1180_v49 = vadd.f32 %v1164_v44, %v1148_v46  ;;  %1195 = vst [vmem:[%s2049_s4 + $0x70] sm:$0xff] %v1179_v48 }
 0x17b   : > { %1196 = vst [vmem:[%s2049_s4 + $0x78] sm:$0xff] %v1180_v49 }
 0x17c PF: > { %s14_s19 = sadd.s32 1, %s1697_s19   ;;  %s2050_s15 = smov %s1685_s16 }
 0x17d   : > { %p11_p12 = scmp.ge.s32.totalorder %s14_s19, 4   ;;  %s2051_s16 = smov %s1760_s23 }
 0x17e   : > { %s2052_s17 = smov %s1693_s18  ;;  %s2053_s18 = smov %s2055_s20 }
 0x17f   :  { %13 = sbr.rel (!%p11_p12) target bundleno = 3 (0x3), region = 111 }

// kernel: vae_encoder_forward.46
= control target key start
LH: loop header
LB: loop body
LE: loop exit
PB: predicated region body
PF: predicated region fallthrough
CT: control target
= control target key end

     0   :  { %s940_s12 = smov 0   ;;  %s1055_s0 = inlined_call_operand.vmem [shape: f32[2,64,64], index: 0, kind: input, shape index: {}]   ;;  %s1056_s1 = inlined_call_operand.vmem [shape: f32[2,64,64], index: 1, kind: input, shape index: {}]   ;;  %s1057_s2 = inlined_call_operand.vmem [shape: f32[2,64,64], index: 2, kind: input, shape index: {}]   ;;  %s1058_s3 = inlined_call_operand.vmem [shape: f32[2,64,64], index: 3, kind: output, shape index: {}]  }
   0x1 LB: > { %s701_s13 = sadd.s32 4294967295, %s918_s12   ;;  %p705_p0 = scmp.ge.s32.totalorder %s918_s12, 1  ;;  %s918_s12 = sphi %s940_s12, %s13_s12  }
   0x2   : > { %p157_p1 = scmp.lt.s32.totalorder %s918_s12, 3 }
   0x4   : > { %p158_p2 = pnand %p705_p0, %p157_p1 }
   0x5   : > { %p191_p3 = scmp.lt.s32.totalorder (!%p158_p2), %s701_s13, 1  ;;  %vm235_vm0 = vcmask (!%p158_p2), 523264  }
   0x6   : > { %161 = sbr.rel (%p158_p2) target bundleno = 656 (0x290), region = 32  ;;  %vm956_vm1 = vmpackc.low (!%p158_p2), %vm235_vm0, %vm235_vm0 }
   0xd   : > { %s1062_s13 = smov (!%p191_p3, %s701_s13), 1 }
   0xe   : > { %s948_s14 = sshll.u32 %s1062_s13, 6 }
   0xf   : > { %s200_s17 = scalar_lea.vmem %s1056_s1, %s948_s14  ;;  %s964_s20 = scalar_lea.vmem %s1055_s0, %s948_s14 }
  0x10   : > { %v219_v1 = vld [vmem:[%s200_s17] sm:$0xff]  ;;  %v220_v2 = vld [vmem:[%s200_s17 + $0x8] sm:$0xff]  ;;  %v221_v3 = vld [vmem:[%s200_s17 + $0x10] sm:$0xff]  ;;  %s205_s23 = scalar_lea.vmem %s1057_s2, %s948_s14  ;;  %s1034_s26 = scalar_lea.vmem %s1058_s3, %s948_s14 }
  0x11   : > { %v832_v4 = vpack.c.bf16 %v220_v2, %v219_v1  ;;  %v222_v5 = vld [vmem:[%s200_s17 + $0x18] sm:$0xff]  ;;  %v211_v7 = vld [vmem:[%s964_s20] sm:$0xff]  ;;  %v224_v9 = vld [vmem:[%s200_s17 + $0x28] sm:$0xff] }
  0x12   : > { %v838_v6 = vpack.c.bf16 %v222_v5, %v221_v3  ;;  %792 = vmatprep.mubr.msk.f32.mxu0 %vm235_vm0, %v211_v7  ;;  %v223_v8 = vld [vmem:[%s200_s17 + $0x20] sm:$0xff]  ;;  %v225_v11 = vld [vmem:[%s200_s17 + $0x30] sm:$0xff]  ;;  %v226_v12 = vld [vmem:[%s200_s17 + $0x38] sm:$0xff] }
  0x13   : > { %834 = vmatprep.subr.msk.bf16.mxu0 %vm956_vm1, %v832_v4  ;;  %v844_v10 = vpack.c.bf16 %v224_v9, %v223_v8  ;;  %v850_v13 = vpack.c.bf16 %v226_v12, %v225_v11  ;;  %v212_v14 = vld [vmem:[%s964_s20 + $0x8] sm:$0xff]  ;;  %v213_v15 = vld [vmem:[%s964_s20 + $0x10] sm:$0xff]  ;;  %v214_v16 = vld [vmem:[%s964_s20 + $0x18] sm:$0xff] }
  0x14   : > { %837 = vmatpush3.bf16.xpose.msk.msra.mxu0 %vm956_vm1, %v832_v4  ;;  %v215_v17 = vld [vmem:[%s964_s20 + $0x20] sm:$0xff]  ;;  %v216_v18 = vld [vmem:[%s964_s20 + $0x28] sm:$0xff]  ;;  %v217_v19 = vld [vmem:[%s964_s20 + $0x30] sm:$0xff] }
  0x15   : > { %840 = vmatprep.subr.msk.bf16.mxu0 %vm956_vm1, %v838_v6  ;;  %v218_v20 = vld [vmem:[%s964_s20 + $0x38] sm:$0xff]  ;;  %v227_v44 = vld [vmem:[%s205_s23] sm:$0xff]  ;;  %v228_v45 = vld [vmem:[%s205_s23 + $0x8] sm:$0xff] }
  0x16   : > { %v856_v47 = vpack.c.bf16 %v228_v45, %v227_v44  ;;  %v229_v48 = vld [vmem:[%s205_s23 + $0x10] sm:$0xff]  ;;  %v230_v49 = vld [vmem:[%s205_s23 + $0x18] sm:$0xff]  ;;  %v231_v51 = vld [vmem:[%s205_s23 + $0x20] sm:$0xff] }
  0x17   : > { %v860_v50 = vpack.c.bf16 %v230_v49, %v229_v48  ;;  %v232_v52 = vld [vmem:[%s205_s23 + $0x28] sm:$0xff]  ;;  %v233_v54 = vld [vmem:[%s205_s23 + $0x30] sm:$0xff]  ;;  %v234_v55 = vld [vmem:[%s205_s23 + $0x38] sm:$0xff] }
  0x18   : > { %857 = vmatprep.subr.bf16.mxu1 %v856_v47  ;;  %v864_v53 = vpack.c.bf16 %v232_v52, %v231_v51  ;;  %v868_v56 = vpack.c.bf16 %v234_v55, %v233_v54 }
  0x19   : > { %859 = vmatpush3.bf16.msra.mxu1 %v856_v47 }
  0x1a   : > { %861 = vmatprep.subr.bf16.mxu1 %v860_v50 }
  0x1c   : > { %843 = vmatpush3.bf16.xpose.msk.msra.mxu0 %vm956_vm1, %v838_v6 }
  0x1d   : > { %846 = vmatprep.subr.msk.bf16.mxu0 %vm956_vm1, %v844_v10  ;;  %863 = vmatpush3.bf16.msra.mxu1 %v860_v50 }
  0x1e   : > { %865 = vmatprep.subr.bf16.mxu1 %v864_v53 }
  0x21   : > { %867 = vmatpush3.bf16.msra.mxu1 %v864_v53 }
  0x22   : > { %869 = vmatprep.subr.bf16.mxu1 %v868_v56 }
  0x24   : > { %849 = vmatpush3.bf16.xpose.msk.msra.mxu0 %vm956_vm1, %v844_v10 }
  0x25   : > { %852 = vmatprep.subr.msk.bf16.mxu0 %vm956_vm1, %v850_v13  ;;  %871 = vmatpush3.bf16.msra.mxu1 %v868_v56 }
  0x2c   : > { %855 = vmatpush3.bf16.xpose.msk.msra.mxu0 %vm956_vm1, %v850_v13 }
  0x33   : > { %793 = vmatmul.mubr.msk.f32.vlgmr.msra.gmra.mrb[0].mxu0 %vm235_vm0, %v212_v14 }
  0x34   : > { %795 = vmatprep.mubr.msk.f32.mxu0 %vm235_vm0, %v213_v15 }
  0x37   : > { %796 = vmatmul.mubr.msk.f32.gmra.mrb[2].mxu0 %vm235_vm0, %v214_v16 }
  0x38   : > { %798 = vmatprep.mubr.msk.f32.mxu0 %vm235_vm0, %v215_v17 }
  0x3b   : > { %799 = vmatmul.mubr.msk.f32.gmra.mrb[4].mxu0 %vm235_vm0, %v216_v18 }
  0x3c   : > { %801 = vmatprep.mubr.msk.f32.mxu0 %vm235_vm0, %v217_v19 }
  0x3f   : > { %802 = vmatmul.mubr.msk.f32.gmra.mrb[6].mxu0 %vm235_vm0, %v218_v20 }
 0x106   : > { %v794_v21 = vpop.f32.mrb[0].mxu0 }
 0x107   : > { %v350_v22 = vpop.f32.mrb[1].mxu0  ;;  %v390_v24 = vmul.f32 0.125, %v794_v21 }
 0x108   : > { %v389_v23 = vmul.f32 0.125, %v350_v22 }
 0x109   : > { %v400_v31 = vsel %vm235_vm0, %v390_v24, -inf }
 0x10a   : > { %v797_v25 = vpop.f32.mrb[2].mxu0  ;;  %v397_v26 = vsel %vm235_vm0, %v389_v23, -inf }
 0x10b   : > { %398 = vmax.xlane.f32.xlu0 %v397_v26  ;;  %v360_v27 = vpop.f32.mrb[3].mxu0  ;;  %v392_v29 = vmul.f32 0.125, %v797_v25 }
 0x10c   : > { %v391_v28 = vmul.f32 0.125, %v360_v27 }
 0x10d   : > { %v406_v37 = vsel %vm235_vm0, %v392_v29, -inf }
 0x10e   : > { %v800_v30 = vpop.f32.mrb[4].mxu0  ;;  %v403_v32 = vsel %vm235_vm0, %v391_v28, -inf }
 0x10f   : > { %401 = vmax.xlane.f32.xlu0 %v400_v31  ;;  %404 = vmax.xlane.f32.xlu1 %v403_v32  ;;  %v370_v33 = vpop.f32.mrb[5].mxu0  ;;  %v394_v35 = vmul.f32 0.125, %v800_v30 }
 0x110   : > { %v393_v34 = vmul.f32 0.125, %v370_v33 }
 0x111   : > { %v412_v42 = vsel %vm235_vm0, %v394_v35, -inf }
 0x112   : > { %v803_v36 = vpop.f32.mrb[6].mxu0  ;;  %v409_v38 = vsel %vm235_vm0, %v393_v34, -inf }
 0x113   : > { %407 = vmax.xlane.f32.xlu1 %v406_v37  ;;  %410 = vmax.xlane.f32.xlu0 %v409_v38  ;;  %v380_v39 = vpop.f32.mrb[7].mxu0  ;;  %v1003_v41 = vmul.f32 0.125, %v803_v36 }
 0x114   : > { %v395_v40 = vmul.f32 0.125, %v380_v39 }
 0x115   : > { %v418_v46 = vsel %vm235_vm0, %v1003_v41, -inf }
 0x116   : > { %v415_v43 = vsel %vm235_vm0, %v395_v40, -inf }
 0x117   : > { %413 = vmax.xlane.f32.xlu1 %v412_v42  ;;  %416 = vmax.xlane.f32.xlu0 %v415_v43 }
 0x11b   : > { %419 = vmax.xlane.f32.xlu1 %v418_v46 }
 0x198   : > { %v399_v57 = vpop.xlane.xlu0 %398 }
 0x199   : > { %v421_v58 = vsub.f32 %v389_v23, %v399_v57 }
 0x19b   : > { %v429_v59 = vmul.f32 1.442695, %v421_v58 }
 0x19c   : > { %v402_v60 = vpop.xlane.xlu0 %401  ;;  %v405_v61 = vpop.xlane.xlu1 %404 }
 0x19d   : > { %880 = vpow2.f32 %v429_v59  ;;  %v422_v62 = vsub.f32 %v390_v24, %v402_v60  ;;  %v423_v63 = vsub.f32 %v391_v28, %v405_v61 }
 0x19f   : > { %v431_v0 = vmul.f32 1.442695, %v422_v62  ;;  %v433_v1 = vmul.f32 1.442695, %v423_v63 }
 0x1a0   : > { %v408_v2 = vpop.xlane.xlu1 %407  ;;  %v411_v3 = vpop.xlane.xlu0 %410 }
 0x1a1   : > { %882 = vpow2.f32 %v431_v0  ;;  %v424_v4 = vsub.f32 %v392_v29, %v408_v2  ;;  %v425_v5 = vsub.f32 %v393_v34, %v411_v3 }
 0x1a2   : > { %884 = vpow2.f32 %v433_v1 }
 0x1a3   : > { %v435_v6 = vmul.f32 1.442695, %v424_v4  ;;  %v437_v7 = vmul.f32 1.442695, %v425_v5 }
 0x1a4   : > { %v414_v8 = vpop.xlane.xlu1 %413  ;;  %v417_v9 = vpop.xlane.xlu0 %416 }
 0x1a5   : > { %886 = vpow2.f32 %v435_v6  ;;  %v426_v10 = vsub.f32 %v394_v35, %v414_v8  ;;  %v427_v11 = vsub.f32 %v395_v40, %v417_v9 }
 0x1a6   : > { %888 = vpow2.f32 %v437_v7 }
 0x1a7   : > { %v881_v12 = vpop.eup %880  ;;  %v439_v13 = vmul.f32 1.442695, %v426_v10  ;;  %v441_v14 = vmul.f32 1.442695, %v427_v11 }
 0x1a8   : > { %820 = vmatprep.mubr.msk.f32.mxu1 %vm235_vm0, %v881_v12  ;;  %v420_v15 = vpop.xlane.xlu1 %419  ;;  %v445_v16 = vsel %vm235_vm0, %v881_v12, 0.0 }
 0x1a9   : > { %890 = vpow2.f32 %v439_v13  ;;  %v428_v17 = vsub.f32 %v1003_v41, %v420_v15  ;;  %446 = vadd.xlane.f32.xlu0 %v445_v16 }
 0x1aa   : > { %892 = vpow2.f32 %v441_v14 }
 0x1ab   : > { %v883_v18 = vpop.eup %882  ;;  %v443_v19 = vmul.f32 1.442695, %v428_v17 }
 0x1ac   : > { %v885_v20 = vpop.eup %884  ;;  %821 = vmatmul.mubr.msk.f32.vlgmr.msra.gmra.mrb[0].mxu1 %vm235_vm0, %v883_v18  ;;  %v448_v21 = vsel %vm235_vm0, %v883_v18, 0.0 }
 0x1ad   : > { %894 = vpow2.f32 %v443_v19  ;;  %823 = vmatprep.mubr.msk.f32.mxu1 %vm235_vm0, %v885_v20  ;;  %449 = vadd.xlane.f32.xlu1 %v448_v21  ;;  %v451_v22 = vsel %vm235_vm0, %v885_v20, 0.0 }
 0x1ae   : > { %452 = vadd.xlane.f32.xlu0 %v451_v22 }
 0x1af   : > { %v887_v23 = vpop.eup %886 }
 0x1b0   : > { %v889_v24 = vpop.eup %888  ;;  %824 = vmatmul.mubr.msk.f32.gmra.mrb[2].mxu1 %vm235_vm0, %v887_v23  ;;  %v454_v25 = vsel %vm235_vm0, %v887_v23, 0.0 }
 0x1b1   : > { %826 = vmatprep.mubr.msk.f32.mxu1 %vm235_vm0, %v889_v24  ;;  %455 = vadd.xlane.f32.xlu1 %v454_v25  ;;  %v457_v26 = vsel %vm235_vm0, %v889_v24, 0.0 }
 0x1b2   : > { %458 = vadd.xlane.f32.xlu0 %v457_v26 }
 0x1b3   : > { %v891_v27 = vpop.eup %890 }
 0x1b4   : > { %v893_v28 = vpop.eup %892  ;;  %827 = vmatmul.mubr.msk.f32.gmra.mrb[4].mxu1 %vm235_vm0, %v891_v27  ;;  %v460_v29 = vsel %vm235_vm0, %v891_v27, 0.0 }
 0x1b5   : > { %461 = vadd.xlane.f32.xlu1 %v460_v29  ;;  %829 = vmatprep.mubr.msk.f32.mxu1 %vm235_vm0, %v893_v28  ;;  %v463_v30 = vsel %vm235_vm0, %v893_v28, 0.0 }
 0x1b6   : > { %464 = vadd.xlane.f32.xlu0 %v463_v30 }
 0x1b7   : > { %v895_v31 = vpop.eup %894 }
 0x1b8   : > { %830 = vmatmul.mubr.msk.f32.gmra.mrb[6].mxu1 %vm235_vm0, %v895_v31  ;;  %v466_v32 = vsel %vm235_vm0, %v895_v31, 0.0 }
 0x1b9   : > { %467 = vadd.xlane.f32.xlu1 %v466_v32 }
 0x236   : > { %v447_v34 = vpop.xlane.xlu0 %446 }
 0x23a   : > { %v450_v33 = vpop.xlane.xlu1 %449 }
 0x23b   : > { %v453_v36 = vpop.xlane.xlu0 %452  ;;  %896 = vrcp.f32 %v450_v33 }
 0x23c   : > { %898 = vrcp.f32 %v447_v34 }
 0x23e   : > { %v456_v35 = vpop.xlane.xlu1 %455 }
 0x23f   : > { %900 = vrcp.f32 %v456_v35  ;;  %v459_v38 = vpop.xlane.xlu0 %458 }
 0x240   : > { %902 = vrcp.f32 %v453_v36 }
 0x242   : > { %v462_v37 = vpop.xlane.xlu1 %461 }
 0x243   : > { %904 = vrcp.f32 %v462_v37  ;;  %v465_v41 = vpop.xlane.xlu0 %464 }
 0x244   : > { %906 = vrcp.f32 %v459_v38 }
 0x245   : > { %v897_v40 = vpop.eup %896 }
 0x246   : > { %v468_v39 = vpop.xlane.xlu1 %467  ;;  %v899_v43 = vpop.eup %898 }
 0x247   : > { %908 = vrcp.f32 %v468_v39 }
 0x248   : > { %910 = vrcp.f32 %v465_v41 }
 0x249   : > { %v901_v47 = vpop.eup %900 }
 0x24a   : > { %v903_v49 = vpop.eup %902 }
 0x24d   : > { %v905_v53 = vpop.eup %904 }
 0x24e   : > { %v907_v55 = vpop.eup %906 }
 0x251   : > { %v909_v59 = vpop.eup %908 }
 0x252   : > { %v911_v61 = vpop.eup %910 }
 0x27f   : > { %v822_v42 = vpop.f32.mrb[0].mxu1 }
 0x280   : > { %v601_v44 = vmul.f32 %v897_v40, %v822_v42  ;;  %v559_v45 = vpop.f32.mrb[1].mxu1 }
 0x281   : > { %v599_v46 = vmul.f32 %v899_v43, %v559_v45 }
 0x282   : > { %615 = vst.msk [vmem:[%s1034_s26 + $0x8] sm:$0xff] %vm235_vm0, %v601_v44 }
 0x283   : > { %614 = vst.msk [vmem:[%s1034_s26] sm:$0xff] %vm235_vm0, %v599_v46  ;;  %v825_v48 = vpop.f32.mrb[2].mxu1 }
 0x284   : > { %v605_v50 = vmul.f32 %v901_v47, %v825_v48  ;;  %v569_v51 = vpop.f32.mrb[3].mxu1 }
 0x285   : > { %v603_v52 = vmul.f32 %v903_v49, %v569_v51 }
 0x286   : > { %617 = vst.msk [vmem:[%s1034_s26 + $0x18] sm:$0xff] %vm235_vm0, %v605_v50 }
 0x287   : > { %616 = vst.msk [vmem:[%s1034_s26 + $0x10] sm:$0xff] %vm235_vm0, %v603_v52  ;;  %v828_v54 = vpop.f32.mrb[4].mxu1 }
 0x288   : > { %v609_v56 = vmul.f32 %v905_v53, %v828_v54  ;;  %v579_v57 = vpop.f32.mrb[5].mxu1 }
 0x289   : > { %v607_v58 = vmul.f32 %v907_v55, %v579_v57 }
 0x28a   : > { %619 = vst.msk [vmem:[%s1034_s26 + $0x28] sm:$0xff] %vm235_vm0, %v609_v56 }
 0x28b   : > { %618 = vst.msk [vmem:[%s1034_s26 + $0x20] sm:$0xff] %vm235_vm0, %v607_v58  ;;  %v831_v60 = vpop.f32.mrb[6].mxu1 }
 0x28c   : > { %v613_v62 = vmul.f32 %v909_v59, %v831_v60  ;;  %v589_v63 = vpop.f32.mrb[7].mxu1 }
 0x28d   : > { %v611_v0 = vmul.f32 %v911_v61, %v589_v63 }
 0x28e   : > { %621 = vst.msk [vmem:[%s1034_s26 + $0x38] sm:$0xff] %vm235_vm0, %v613_v62 }
 0x28f   : > { %620 = vst.msk [vmem:[%s1034_s26 + $0x30] sm:$0xff] %vm235_vm0, %v611_v0 }
 0x290 PF: > { %s13_s12 = sadd.s32 1, %s918_s12  }
 0x291   : > { %p10_p4 = scmp.ge.s32.totalorder %s13_s12, 4  }
 0x293   :  { %12 = sbr.rel (!%p10_p4) target bundleno = 1 (0x1), region = 68 }

// kernel: vae_encoder_forward.47
= control target key start
LH: loop header
LB: loop body
LE: loop exit
PB: predicated region body
PF: predicated region fallthrough
CT: control target
= control target key end

     0   :  { %s692_s1 = inlined_call_operand.vmem [shape: bf16[128,128], index: 1, kind: input, shape index: {}]   ;;  %s693_s0 = inlined_call_operand.vmem [shape: bf16[128,128], index: 0, kind: input, shape index: {}]   ;;  %s694_s2 = inlined_call_operand.vmem [shape: f32[1,128], index: 2, kind: input, shape index: {}]   ;;  %s695_s3 = inlined_call_operand.vmem [shape: f32[128,128], index: 3, kind: input, shape index: {}]   ;;  %s696_s4 = inlined_call_operand.vmem [shape: f32[128,128], index: 4, kind: output, shape index: {}]  }
   0x1   :  { %v486_v0 = vld [vmem:[%s692_s1] sm:$0xff]   ;;  %v487_v1 = vld [vmem:[%s692_s1 + $0x8] sm:$0xff]   ;;  %v488_v2 = vld [vmem:[%s692_s1 + $0x10] sm:$0xff]  }
   0x2   :  { %438 = vmatprep.subr.bf16.mxu0 %v486_v0  ;;  %470 = vmatprep.subr.bf16.mxu1 %v486_v0  ;;  %v489_v3 = vld [vmem:[%s692_s1 + $0x18] sm:$0xff]   ;;  %v494_v4 = vld [vmem:[%s693_s0] sm:$0xff]   ;;  %v491_v7 = vld [vmem:[%s692_s1 + $0x28] sm:$0xff]  }
   0x3   :  { %439 = vmatpush3.bf16.msra.mxu0 %v486_v0  ;;  %478 = vmatpush3.bf16.msra.mxu1 %v486_v0  ;;  %v495_v5 = vld [vmem:[%s693_s0 + $0x20] sm:$0xff]   ;;  %v492_v8 = vld [vmem:[%s692_s1 + $0x30] sm:$0xff]   ;;  %v493_v9 = vld [vmem:[%s692_s1 + $0x38] sm:$0xff]  }
   0x4   :  { %440 = vmatprep.subr.bf16.mxu0 %v487_v1  ;;  %471 = vmatprep.subr.bf16.mxu1 %v487_v1  ;;  %v490_v6 = vld [vmem:[%s692_s1 + $0x20] sm:$0xff]   ;;  %v496_v10 = vld [vmem:[%s693_s0 + $0x8] sm:$0xff]   ;;  %v498_v12 = vld [vmem:[%s693_s0 + $0x10] sm:$0xff]  }
   0x5   :  { %454 = vmatprep.mubr.bf16.mxu0 %v494_v4  ;;  %462 = vmatprep.mubr.bf16.mxu1 %v495_v5  ;;  %v497_v11 = vld [vmem:[%s693_s0 + $0x28] sm:$0xff]   ;;  %v499_v13 = vld [vmem:[%s693_s0 + $0x30] sm:$0xff]   ;;  %v500_v14 = vld [vmem:[%s693_s0 + $0x18] sm:$0xff]  }
   0x6   :  { %v501_v15 = vld [vmem:[%s693_s0 + $0x38] sm:$0xff]   ;;  %v578_v16 = vld [vmem:[%s694_s2] ss:$0 sm:$0xff]  ;;  %v355_v18 = vld [vmem:[%s695_s3 + $0x10] sm:$0xff] }
   0x7   :  { %441 = vmatpush3.bf16.msra.mxu0 %v487_v1  ;;  %479 = vmatpush3.bf16.msra.mxu1 %v487_v1  ;;  %v363_v20 = vld [vmem:[%s695_s3 + $0x50] sm:$0xff]  ;;  %v353_v24 = vld [vmem:[%s695_s3] sm:$0xff]  ;;  %v356_v30 = vld [vmem:[%s695_s3 + $0x18] sm:$0xff] }
   0x8   :  { %442 = vmatprep.subr.bf16.mxu0 %v488_v2  ;;  %472 = vmatprep.subr.bf16.mxu1 %v488_v2  ;;  %v361_v26 = vld [vmem:[%s695_s3 + $0x40] sm:$0xff]  ;;  %v364_v32 = vld [vmem:[%s695_s3 + $0x58] sm:$0xff]  ;;  %v354_v38 = vld [vmem:[%s695_s3 + $0x8] sm:$0xff] }
   0x9   :  { %v362_v40 = vld [vmem:[%s695_s3 + $0x48] sm:$0xff]  ;;  %v359_v50 = vld [vmem:[%s695_s3 + $0x30] sm:$0xff]  ;;  %v357_v56 = vld [vmem:[%s695_s3 + $0x20] sm:$0xff] }
   0xa   :  { %v367_v52 = vld [vmem:[%s695_s3 + $0x70] sm:$0xff]  ;;  %v365_v58 = vld [vmem:[%s695_s3 + $0x60] sm:$0xff]  ;;  %v360_v62 = vld [vmem:[%s695_s3 + $0x38] sm:$0xff] }
   0xb   :  { %443 = vmatpush3.bf16.msra.mxu0 %v488_v2  ;;  %480 = vmatpush3.bf16.msra.mxu1 %v488_v2  ;;  %v368_v0 = vld [vmem:[%s695_s3 + $0x78] sm:$0xff] }
   0xc   :  { %444 = vmatprep.subr.bf16.mxu0 %v489_v3  ;;  %473 = vmatprep.subr.bf16.mxu1 %v489_v3 }
   0xf   :  { %445 = vmatpush3.bf16.msra.mxu0 %v489_v3  ;;  %481 = vmatpush3.bf16.msra.mxu1 %v489_v3 }
  0x10   :  { %446 = vmatprep.subr.bf16.mxu0 %v490_v6  ;;  %474 = vmatprep.subr.bf16.mxu1 %v490_v6 }
  0x13   :  { %447 = vmatpush3.bf16.msra.mxu0 %v490_v6  ;;  %482 = vmatpush3.bf16.msra.mxu1 %v490_v6  ;;  %v358_v6 = vld [vmem:[%s695_s3 + $0x28] sm:$0xff] }
  0x14   :  { %448 = vmatprep.subr.bf16.mxu0 %v491_v7  ;;  %475 = vmatprep.subr.bf16.mxu1 %v491_v7 }
  0x17   :  { %449 = vmatpush3.bf16.msra.mxu0 %v491_v7  ;;  %483 = vmatpush3.bf16.msra.mxu1 %v491_v7 }
  0x18   :  { %450 = vmatprep.subr.bf16.mxu0 %v492_v8  ;;  %476 = vmatprep.subr.bf16.mxu1 %v492_v8 }
  0x1b   :  { %451 = vmatpush3.bf16.msra.mxu0 %v492_v8  ;;  %484 = vmatpush3.bf16.msra.mxu1 %v492_v8  ;;  %v366_v8 = vld [vmem:[%s695_s3 + $0x68] sm:$0xff] }
  0x1c   :  { %452 = vmatprep.subr.bf16.mxu0 %v493_v9  ;;  %477 = vmatprep.subr.bf16.mxu1 %v493_v9 }
  0x1f   :  { %453 = vmatpush3.bf16.msra.mxu0 %v493_v9  ;;  %485 = vmatpush3.bf16.msra.mxu1 %v493_v9 }
  0x22   :  { %455 = vmatmul.mubr.bf16.vlgmr.msra.gmra.mrb[0].mxu0 %v496_v10  ;;  %463 = vmatmul.mubr.bf16.vlgmr.msra.gmra.mrb[0].mxu1 %v497_v11 }
  0x23   :  { %458 = vmatprep.mubr.bf16.mxu0 %v498_v12  ;;  %466 = vmatprep.mubr.bf16.mxu1 %v499_v13 }
  0x2a   :  { %459 = vmatmul.mubr.bf16.gmra.mrb[4].mxu0 %v500_v14  ;;  %467 = vmatmul.mubr.bf16.gmra.mrb[4].mxu1 %v501_v15 }
  0xf5   :  { %v456_v17 = vpop.f32.mrb[0].mxu0  ;;  %v464_v19 = vpop.f32.mrb[0].mxu1 }
  0xf6   :  { %v339_v21 = vadd.f32 %v456_v17, %v578_v16  ;;  %v347_v22 = vadd.f32 %v464_v19, %v578_v16  ;;  %v216_v23 = vpop.f32.mrb[1].mxu0  ;;  %v248_v25 = vpop.f32.mrb[1].mxu1 }
  0xf7   :  { %v337_v27 = vadd.f32 %v578_v16, %v216_v23  ;;  %v345_v28 = vadd.f32 %v578_v16, %v248_v25  ;;  %v457_v29 = vpop.f32.mrb[2].mxu0  ;;  %v465_v31 = vpop.f32.mrb[2].mxu1 }
  0xf8   :  { %v371_v33 = vadd.f32 %v355_v18, %v339_v21  ;;  %v379_v34 = vadd.f32 %v363_v20, %v347_v22  ;;  %v340_v35 = vadd.f32 %v457_v29, %v578_v16  ;;  %v348_v36 = vadd.f32 %v465_v31, %v578_v16  ;;  %v219_v37 = vpop.f32.mrb[3].mxu0  ;;  %v251_v39 = vpop.f32.mrb[3].mxu1 }
  0xf9   :  { %v369_v41 = vadd.f32 %v353_v24, %v337_v27  ;;  %v377_v42 = vadd.f32 %v361_v26, %v345_v28  ;;  %v338_v43 = vadd.f32 %v578_v16, %v219_v37  ;;  %v346_v44 = vadd.f32 %v578_v16, %v251_v39 }
  0xfa   :  { %387 = vst [vmem:[%s696_s4 + $0x10] sm:$0xff] %v371_v33  ;;  %395 = vst [vmem:[%s696_s4 + $0x50] sm:$0xff] %v379_v34  ;;  %v372_v45 = vadd.f32 %v356_v30, %v340_v35  ;;  %v380_v46 = vadd.f32 %v364_v32, %v348_v36 }
  0xfb   :  { %385 = vst [vmem:[%s696_s4] sm:$0xff] %v369_v41  ;;  %393 = vst [vmem:[%s696_s4 + $0x40] sm:$0xff] %v377_v42  ;;  %v370_v47 = vadd.f32 %v354_v38, %v338_v43  ;;  %v378_v48 = vadd.f32 %v362_v40, %v346_v44 }
  0xfc   :  { %388 = vst [vmem:[%s696_s4 + $0x18] sm:$0xff] %v372_v45  ;;  %396 = vst [vmem:[%s696_s4 + $0x58] sm:$0xff] %v380_v46 }
  0xfd   :  { %386 = vst [vmem:[%s696_s4 + $0x8] sm:$0xff] %v370_v47  ;;  %394 = vst [vmem:[%s696_s4 + $0x48] sm:$0xff] %v378_v48  ;;  %v460_v49 = vpop.f32.mrb[4].mxu0  ;;  %v468_v51 = vpop.f32.mrb[4].mxu1 }
  0xfe   :  { %v343_v53 = vadd.f32 %v460_v49, %v578_v16  ;;  %v351_v54 = vadd.f32 %v468_v51, %v578_v16  ;;  %v232_v55 = vpop.f32.mrb[5].mxu0  ;;  %v264_v57 = vpop.f32.mrb[5].mxu1 }
  0xff   :  { %v341_v59 = vadd.f32 %v578_v16, %v232_v55  ;;  %v349_v60 = vadd.f32 %v578_v16, %v264_v57  ;;  %v461_v61 = vpop.f32.mrb[6].mxu0  ;;  %v469_v63 = vpop.f32.mrb[6].mxu1 }
 0x100   :  { %v375_v1 = vadd.f32 %v359_v50, %v343_v53  ;;  %v383_v2 = vadd.f32 %v367_v52, %v351_v54  ;;  %v344_v3 = vadd.f32 %v461_v61, %v578_v16  ;;  %v352_v4 = vadd.f32 %v469_v63, %v578_v16  ;;  %v235_v5 = vpop.f32.mrb[7].mxu0  ;;  %v267_v7 = vpop.f32.mrb[7].mxu1 }
 0x101   :  { %v373_v9 = vadd.f32 %v357_v56, %v341_v59  ;;  %v381_v10 = vadd.f32 %v365_v58, %v349_v60  ;;  %v342_v11 = vadd.f32 %v578_v16, %v235_v5  ;;  %v350_v12 = vadd.f32 %v578_v16, %v267_v7 }
 0x102   :  { %391 = vst [vmem:[%s696_s4 + $0x30] sm:$0xff] %v375_v1  ;;  %399 = vst [vmem:[%s696_s4 + $0x70] sm:$0xff] %v383_v2  ;;  %v376_v13 = vadd.f32 %v360_v62, %v344_v3  ;;  %v384_v14 = vadd.f32 %v368_v0, %v352_v4 }
 0x103   :  { %389 = vst [vmem:[%s696_s4 + $0x20] sm:$0xff] %v373_v9  ;;  %397 = vst [vmem:[%s696_s4 + $0x60] sm:$0xff] %v381_v10  ;;  %v374_v15 = vadd.f32 %v358_v6, %v342_v11  ;;  %v382_v16 = vadd.f32 %v366_v8, %v350_v12 }
 0x104   :  { %392 = vst [vmem:[%s696_s4 + $0x38] sm:$0xff] %v376_v13  ;;  %400 = vst [vmem:[%s696_s4 + $0x78] sm:$0xff] %v384_v14 }
 0x105   :  { %390 = vst [vmem:[%s696_s4 + $0x28] sm:$0xff] %v374_v15  ;;  %398 = vst [vmem:[%s696_s4 + $0x68] sm:$0xff] %v382_v16 }

</bundles_post_ra>
